<compile_context>
chip_gen: v7x
topology: tpu7x:2x2x1
jax: 0.10.0
libtpu: 0.0.40
codegen_flags: <defaults>
</compile_context>

<pallas_src>
import functools
from collections import namedtuple

import numpy as np
import jax
import jax.numpy as jnp
from jax.experimental import pallas as pl
from jax.experimental.pallas import tpu as pltpu

_SELU_ALPHA = 1.6732632423543772
_SELU_SCALE = 1.0507009873554805


def _round_up(x, m):
    return (x + m - 1) // m * m


# ----------------------------- Pallas kernel ------------------------------- #

def _matmul_act_kernel(a_ref, w_ref, o_ref, *, activation):
    # bf16 operands -> native MXU rate; f32 accumulate; f32 epilogue; cast on store.
    x = jnp.dot(a_ref[...], w_ref[...], preferred_element_type=jnp.float32)
    if activation == "selu":
        # exp(min(x,0)) - 1 instead of expm1: lowering-safe, and the cancellation
        # error (~1e-7) is far below the bf16 output rounding (~2e-3).
        neg = _SELU_ALPHA * (jnp.exp(jnp.minimum(x, 0.0)) - 1.0)
        x = _SELU_SCALE * jnp.where(x > 0, x, neg)
    elif activation == "tanh":
        # TODO(synk): if EUP binds after the byte reduction, use a VPU polynomial tanh.
        x = jnp.tanh(x)
    o_ref[...] = x.astype(o_ref.dtype)


def _choose_tiles(M, K, N, out_itemsize):
    """Pick (tm, Mp, tn, Np) under a ~40 MiB double-buffer budget (v7x-safe)."""
    if N >= 128:
        Np = _round_up(N, 128)
        # Fill the 256-wide MXU (v6e/v7x) on the compute-heavy large-K layers;
        # tn=128 elsewhere (and always fine on v5e's 128-wide MXU).
        tn = 256 if (K >= 1024 and Np % 256 == 0) else 128
    else:
        Np = _round_up(N, 8)      # narrow output (e.g. final Cout=3): pad to 8, not 128
        tn = Np
    budget = 40 * 1024 * 1024     # double-buffered estimate; v7x has 64 MiB / TC
    tm = 2048 if K <= 512 else (1024 if K <= 2048 else 512)
    while tm > 128 and 2 * (tm * K * 2 + K * tn * 2 + tm * tn * out_itemsize) > budget:
        tm //= 2
    Mp = _round_up(M, 16)
    if Mp <= tm:
        tm = Mp                   # single M tile: at most 15 padded rows
    else:
        Mp = _round_up(M, tm)
    return tm, Mp, tn, Np


def _pallas_matmul_act(a, w, activation, out_dtype):
    """act(A[p] @ W[p]) for every phase p.

    a: (P, M, K) bf16, w: (P, K, N) bf16 -> (P, M, N) out_dtype."""
    P, M, K = a.shape
    N = w.shape[-1]
    out_itemsize = np.dtype(out_dtype).itemsize
    tm, Mp, tn, Np = _choose_tiles(M, K, N, out_itemsize)
    a_p = a if Mp == M else jnp.pad(a, ((0, 0), (0, Mp - M), (0, 0)))
    w_p = w if Np == N else jnp.pad(w, ((0, 0), (0, 0), (0, Np - N)))
    out = pl.pallas_call(
        functools.partial(_matmul_act_kernel, activation=activation),
        out_shape=jax.ShapeDtypeStruct((P, Mp, Np), out_dtype),
        grid=(P, Mp // tm, Np // tn),
        in_specs=[
            pl.BlockSpec((None, tm, K), lambda p, i, j: (p, i, 0)),   # patch rows
            pl.BlockSpec((None, K, tn), lambda p, i, j: (p, 0, j)),   # weights (Cout on lanes)
        ],
        out_specs=pl.BlockSpec((None, tm, tn), lambda p, i, j: (p, i, j)),
        compiler_params=pltpu.CompilerParams(
            dimension_semantics=("parallel", "parallel", "parallel"),
            vmem_limit_bytes=48 * 1024 * 1024,
        ),
    )(a_p, w_p)
    return out[:, :M, :N]


# ----------------------- ConvTranspose2d (phase-split) ---------------------- #

_Phase = namedtuple("_Phase", ["o0", "M", "taps", "d", "pad_lo", "pad_hi"])


def _phase_plan(H, Ho, k, s, p):
    """Group ConvTranspose output rows by stride phase.

    Phase r: output rows oh with (oh + p) % s == r use only taps ki with
    ki % s == r; the m-th such row reads input row m + d(ki) (zero if OOB)."""
    plans = []
    for r in range(s):
        taps = list(range(r, k, s))
        o0 = (r - p) % s
        if not taps or o0 >= Ho:
            continue                      # those output rows are structurally 0
        M = (Ho - o0 + s - 1) // s
        d = [(o0 + p - ki) // s for ki in taps]
        pad_lo = max(0, -min(d))
        pad_hi = max(0, (M - 1) + max(d) - (H - 1))
        plans.append(_Phase(o0, M, taps, d, pad_lo, pad_hi))
    return plans


def _pad_for_phases(x, wrap_w, pad_h, pad_w):
    """Circular wrap (width) + phase zero-pad, in one concat (W) + one pad (H)."""
    B, H, W, C = x.shape
    wlo, whi = pad_w
    parts = []
    if wlo:
        parts.append(jnp.zeros((B, H, wlo, C), x.dtype))
    if wrap_w:
        parts.append(x[:, :, W - wrap_w:, :])
    parts.append(x)
    if wrap_w:
        parts.append(x[:, :, :wrap_w, :])
    if whi:
        parts.append(jnp.zeros((B, H, whi, C), x.dtype))
    xw = jnp.concatenate(parts, axis=2) if len(parts) > 1 else x
    hlo, hhi = pad_h
    if hlo or hhi:
        xw = jnp.pad(xw, ((0, 0), (hlo, hhi), (0, 0), (0, 0)))
    return xw


def _deconv2d_nhwc(x, w, stride, conv_padding, wrap_w, activation, out_dtype):
    """ConvTranspose2d(bias=False) + fused activation, channels-last.

    x: (B, H, W, Cin);  w: (Cin, Cout, kh, kw) (PyTorch layout).
    wrap_w: circular padding along width applied before the conv (round_deconv2d)."""
    B, H, Wi, Cin = x.shape
    _, Cout, kh, kw = w.shape
    sh, sw = stride
    ph, pw = conv_padding
    Wi_eff = Wi + 2 * wrap_w
    Ho = (H - 1) * sh - 2 * ph + kh
    Wo = (Wi_eff - 1) * sw - 2 * pw + kw

    plans_h = _phase_plan(H, Ho, kh, sh, ph)
    plans_w = _phase_plan(Wi_eff, Wo, kw, sw, pw)
    if not plans_h or not plans_w:
        return jnp.zeros((B, Ho, Wo, Cout), out_dtype)

    xb = x if x.dtype == jnp.bfloat16 else x.astype(jnp.bfloat16)
    plh = max(fp.pad_lo for fp in plans_h)
    phi = max(fp.pad_hi for fp in plans_h)
    plw = max(fp.pad_lo for fp in plans_w)
    pwi = max(fp.pad_hi for fp in plans_w)
    xp = _pad_for_phases(xb, wrap_w, (plh, phi), (plw, pwi))

    # (kh, kw, Cin, Cout) bf16 -- Cout ends up on the lane axis in the kernel.
    wt = jnp.transpose(w, (2, 3, 0, 1)).astype(jnp.bfloat16)

    def phase_patches(fh, fw):
        cols = []
        for dh in fh.d:
            r0 = dh + plh
            for dw in fw.d:
                c0 = dw + plw
                cols.append(xp[:, r0:r0 + fh.M, c0:c0 + fw.M, :])
        a = jnp.concatenate(cols, axis=-1) if len(cols) > 1 else cols[0]
        return a.reshape(B * fh.M * fw.M, len(cols) * Cin)

    def phase_weight(fh, fw):
        # taps of a phase are exactly ki % s == r -> static strided slice, no gather.
        w_sel = wt[fh.taps[0]::sh, fw.taps[0]::sw]
        return w_sel.reshape(len(fh.taps) * len(fw.taps) * Cin, Cout)

    plans_h = sorted(plans_h, key=lambda fp: fp.o0)
    plans_w = sorted(plans_w, key=lambda fp: fp.o0)
    Mh, Mw = plans_h[0].M, plans_w[0].M
    th, tw = len(plans_h[0].taps), len(plans_w[0].taps)
    uniform = (
        len(plans_h) == sh and len(plans_w) == sw
        and [fp.o0 for fp in plans_h] == list(range(sh))
        and [fp.o0 for fp in plans_w] == list(range(sw))
        and all(fp.M == Mh and len(fp.taps) == th for fp in plans_h)
        and all(fp.M == Mw and len(fp.taps) == tw for fp in plans_w)
        and sh * Mh == Ho and sw * Mw == Wo
    )

    if uniform:
        # One pallas_call for all sh*sw phases (leading "parallel" grid axis),
        # then one transpose/reshape interleave instead of strided scatters.
        a_all = jnp.stack([phase_patches(fh, fw) for fh in plans_h for fw in plans_w])
        w_all = jnp.stack([phase_weight(fh, fw) for fh in plans_h for fw in plans_w])
        out = _pallas_matmul_act(a_all, w_all, activation, out_dtype)
        out = out.reshape(sh, sw, B, Mh, Mw, Cout)
        # y[b, sh*mh + o0h, sw*mw + o0w, c] = out[o0h, o0w, b, mh, mw, c]
        return jnp.transpose(out, (2, 3, 0, 4, 1, 5)).reshape(B, Ho, Wo, Cout)

    # Ragged phases (layer 2 of netG, kernel (3,4)): per-phase matmul + scatter.
    y = jnp.zeros((B, Ho, Wo, Cout), out_dtype)
    for fh in plans_h:
        for fw in plans_w:
            a = phase_patches(fh, fw)[None]
            wm = phase_weight(fh, fw)[None]
            yp = _pallas_matmul_act(a, wm, activation, out_dtype)[0]
            y = y.at[:, fh.o0::sh, fw.o0::sw, :].set(
                yp.reshape(B, fh.M, fw.M, Cout))
    return y


# --------------------------------- netG ------------------------------------ #

class Args:
    use_round_conv = True
    use_spectral_norm = False
    use_selu = True


# (stride, padding (ph, pw)) for the 5 deconv layers, matching netG.__init__
_LAYER_CFG = [
    ((1, 1), (0, 0)),
    ((2, 2), (0, 1)),
    ((2, 2), (1, 1)),
    ((2, 2), (1, 1)),
    ((2, 2), (1, 1)),
]


def init_netG_params(key, nz=100, ngf=64, nc=3, ff=(2, 16)):
    """Deterministic weights, PyTorch ConvTranspose2d layout (Cin, Cout, kh, kw)."""
    shapes = [
        (nz, ngf * 8) + tuple(ff),
        (ngf * 8, ngf * 4, 3, 4),
        (ngf * 4, ngf * 2, 4, 4),
        (ngf * 2, ngf * 1, 4, 4),
        (ngf, nc, 4, 4),
    ]
    keys = jax.random.split(key, len(shapes))
    return [0.02 * jax.random.normal(k, s, jnp.float32) for k, s in zip(keys, shapes)]


def netG_forward(params, x, args):
    # TODO(synk): use_selu=False (BatchNorm2d+ReLU) and spectral_norm not implemented.
    if x.ndim == 2:
        x = x[:, :, None, None]
    x = jnp.transpose(x, (0, 2, 3, 1))          # NCHW -> NHWC (persistent)
    n = len(params)
    for li, (w, (stride, padding)) in enumerate(zip(params, _LAYER_CFG)):
        last = li == n - 1
        act = "tanh" if last else "selu"
        out_dtype = jnp.float32 if last else jnp.bfloat16   # bf16 intermediates
        ph, pw = padding
        if args.use_round_conv:
            x = _deconv2d_nhwc(x, w, stride, (ph, 0), pw, act, out_dtype)
        else:
            x = _deconv2d_nhwc(x, w, stride, (ph, pw), 0, act, out_dtype)
    return jnp.transpose(x, (0, 3, 1, 2))       # NHWC -> NCHW at API boundary


# ------------------------ pure-JAX reference (check) ------------------------ #

def _round_wrap_nchw(x, pw):
    if pw <= 0:
        return x
    return jnp.concatenate([x[:, :, :, -pw:], x, x[:, :, :, :pw]], axis=-1)


def _ref_conv_transpose(x, w, stride, padding):
    _, _, kh, kw = w.shape
    ph, pw = padding
    wf = jnp.transpose(w[:, :, ::-1, ::-1], (1, 0, 2, 3))    # (Cout, Cin, kh, kw)
    return jax.lax.conv_general_dilated(
        x, wf, window_strides=(1, 1),
        padding=[(kh - 1 - ph, kh - 1 - ph), (kw - 1 - pw, kw - 1 - pw)],
        lhs_dilation=stride,
        dimension_numbers=("NCHW", "OIHW", "NCHW"),
        precision=jax.lax.Precision.HIGHEST,
    )


def netG_ref(params, x, args):
    if x.ndim == 2:
        x = x[:, :, None, None]
    n = len(params)
    for li, (w, (stride, padding)) in enumerate(zip(params, _LAYER_CFG)):
        ph, pw = padding
        if args.use_round_conv:
            x = _round_wrap_nchw(x, pw)
            conv_pad = (ph, 0)
        else:
            conv_pad = (ph, pw)
        x = _ref_conv_transpose(x, w, stride, conv_pad)
        x = jnp.tanh(x) if li == n - 1 else jax.nn.selu(x)
    return x


# ---------------------------------- main ------------------------------------ #

if __name__ == "__main__":
    args = Args()
    # small config consistent with the module's constructor signature
    B, nz, ngf, nc = 2, 16, 8, 3
    key = jax.random.PRNGKey(0)
    kp, kx = jax.random.split(key)
    params = init_netG_params(kp, nz=nz, ngf=ngf, nc=nc, ff=(2, 16))
    z = jax.random.normal(kx, (B, nz), jnp.float32)   # 2-D input -> unsqueezed inside

    fwd = jax.jit(functools.partial(netG_forward, args=args))
    out = jax.block_until_ready(fwd(params, z))
    ref = jax.block_until_ready(netG_ref(params, z, args))

    assert out.shape == ref.shape, (out.shape, ref.shape)
    err = float(jnp.max(jnp.abs(out - ref)))
    assert err < 5e-3, f"max abs err {err}"
    print("KERNEL_OK")
</pallas_src>

<mosaic_0001>
module attributes {stable_mosaic.version = 11 : i64} {
  func.func @_matmul_act_kernel(%arg0: i32, %arg1: i32, %arg2: i32, %arg3: memref<1x64x512xbf16, #tpu.memory_space<vmem>>, %arg4: memref<1x512x64xbf16, #tpu.memory_space<vmem>>, %arg5: memref<1x64x64xbf16, #tpu.memory_space<vmem>>) attributes {dimension_semantics = [#tpu.dimension_semantics<parallel>, #tpu.dimension_semantics<parallel>, #tpu.dimension_semantics<parallel>], iteration_bounds = array<i64: 1, 1, 1>, scalar_prefetch = 0 : i64, scratch_operands = 0 : i64, tpu.core_type = #tpu.core_type<tc>, window_params = [{transform_indices = @transform_0, window_bounds = array<i64: 1, 64, 512>}, {transform_indices = @transform_1, window_bounds = array<i64: 1, 512, 64>}, {transform_indices = @transform_2, window_bounds = array<i64: 1, 64, 64>}]} {
    %c0 = arith.constant 0 : index
    %c0_0 = arith.constant 0 : index
    %c0_1 = arith.constant 0 : index
    %0 = vector.load %arg3[%c0, %c0_0, %c0_1] : memref<1x64x512xbf16, #tpu.memory_space<vmem>>, vector<1x64x512xbf16>
    %1 = vector.shape_cast %0 : vector<1x64x512xbf16> to vector<64x512xbf16>
    %c0_2 = arith.constant 0 : index
    %c0_3 = arith.constant 0 : index
    %c0_4 = arith.constant 0 : index
    %2 = vector.load %arg4[%c0_2, %c0_3, %c0_4] : memref<1x512x64xbf16, #tpu.memory_space<vmem>>, vector<1x512x64xbf16>
    %3 = vector.shape_cast %2 : vector<1x512x64xbf16> to vector<512x64xbf16>
    %cst = arith.constant dense<0.000000e+00> : vector<64x64xf32>
    %4 = tpu.matmul %1, %3, %cst {dimension_numbers = #tpu.dot_dimension_numbers<[1], [0], [0], [1], [0, 0, 1, 1], [], []>} : vector<64x512xbf16>, vector<512x64xbf16>, vector<64x64xf32> -> vector<64x64xf32>
    %cst_5 = arith.constant 0.000000e+00 : f32
    %5 = vector.broadcast %cst_5 : f32 to vector<64x64xf32>
    %6 = arith.minimumf %4, %5 : vector<64x64xf32>
    %7 = math.exp %6 : vector<64x64xf32>
    %cst_6 = arith.constant 1.000000e+00 : f32
    %8 = vector.broadcast %cst_6 : f32 to vector<64x64xf32>
    %9 = arith.subf %7, %8 : vector<64x64xf32>
    %cst_7 = arith.constant 1.67326319 : f32
    %10 = vector.broadcast %cst_7 : f32 to vector<64x64xf32>
    %11 = arith.mulf %10, %9 : vector<64x64xf32>
    %cst_8 = arith.constant 0.000000e+00 : f32
    %12 = vector.broadcast %cst_8 : f32 to vector<64x64xf32>
    %13 = arith.cmpf ogt, %4, %12 : vector<64x64xf32>
    %14 = arith.select %13, %4, %11 : vector<64x64xi1>, vector<64x64xf32>
    %cst_9 = arith.constant 1.05070102 : f32
    %15 = vector.broadcast %cst_9 : f32 to vector<64x64xf32>
    %16 = arith.mulf %15, %14 : vector<64x64xf32>
    %17 = arith.truncf %16 : vector<64x64xf32> to vector<64x64xbf16>
    %c0_10 = arith.constant 0 : index
    %c0_11 = arith.constant 0 : index
    %c0_12 = arith.constant 0 : index
    %18 = vector.load %arg5[%c0_10, %c0_11, %c0_12] : memref<1x64x64xbf16, #tpu.memory_space<vmem>>, vector<1x64x64xbf16>
    %19 = vector.shape_cast %18 : vector<1x64x64xbf16> to vector<64x64xbf16>
    %20 = vector.shape_cast %17 : vector<64x64xbf16> to vector<1x64x64xbf16>
    tpu.vector_store %arg5[%c0_10, %c0_11, %c0_12], %20 {strides = array<i32>} : memref<1x64x64xbf16, #tpu.memory_space<vmem>>, vector<1x64x64xbf16>,
    return
  }
  func.func @transform_0(%arg0: i32, %arg1: i32, %arg2: i32) -> (i32, i32, i32) {
    %c0_i32 = arith.constant 0 : i32
    %c0_i32_0 = arith.constant 0 : i32
    return %arg0, %arg1, %c0_i32 : i32, i32, i32
  }
  func.func @transform_1(%arg0: i32, %arg1: i32, %arg2: i32) -> (i32, i32, i32) {
    %c0_i32 = arith.constant 0 : i32
    %c0_i32_0 = arith.constant 0 : i32
    return %arg0, %c0_i32, %arg2 : i32, i32, i32
  }
  func.func @transform_2(%arg0: i32, %arg1: i32, %arg2: i32) -> (i32, i32, i32) {
    %c0_i32 = arith.constant 0 : i32
    return %arg0, %arg1, %arg2 : i32, i32, i32
  }
}

module attributes {stable_mosaic.version = 11 : i64} {
  func.func @_matmul_act_kernel(%arg0: i32, %arg1: i32, %arg2: i32, %arg3: memref<1x80x128xbf16, #tpu.memory_space<vmem>>, %arg4: memref<1x128x32xbf16, #tpu.memory_space<vmem>>, %arg5: memref<1x80x32xbf16, #tpu.memory_space<vmem>>) attributes {dimension_semantics = [#tpu.dimension_semantics<parallel>, #tpu.dimension_semantics<parallel>, #tpu.dimension_semantics<parallel>], iteration_bounds = array<i64: 1, 1, 1>, scalar_prefetch = 0 : i64, scratch_operands = 0 : i64, tpu.core_type = #tpu.core_type<tc>, window_params = [{transform_indices = @transform_0, window_bounds = array<i64: 1, 80, 128>}, {transform_indices = @transform_1, window_bounds = array<i64: 1, 128, 32>}, {transform_indices = @transform_2, window_bounds = array<i64: 1, 80, 32>}]} {
    %c0 = arith.constant 0 : index
    %c0_0 = arith.constant 0 : index
    %c0_1 = arith.constant 0 : index
    %0 = vector.load %arg3[%c0, %c0_0, %c0_1] : memref<1x80x128xbf16, #tpu.memory_space<vmem>>, vector<1x80x128xbf16>
    %1 = vector.shape_cast %0 : vector<1x80x128xbf16> to vector<80x128xbf16>
    %c0_2 = arith.constant 0 : index
    %c0_3 = arith.constant 0 : index
    %c0_4 = arith.constant 0 : index
    %2 = vector.load %arg4[%c0_2, %c0_3, %c0_4] : memref<1x128x32xbf16, #tpu.memory_space<vmem>>, vector<1x128x32xbf16>
    %3 = vector.shape_cast %2 : vector<1x128x32xbf16> to vector<128x32xbf16>
    %cst = arith.constant dense<0.000000e+00> : vector<80x32xf32>
    %4 = tpu.matmul %1, %3, %cst {dimension_numbers = #tpu.dot_dimension_numbers<[1], [0], [0], [1], [0, 0, 1, 1], [], []>} : vector<80x128xbf16>, vector<128x32xbf16>, vector<80x32xf32> -> vector<80x32xf32>
    %cst_5 = arith.constant 0.000000e+00 : f32
    %5 = vector.broadcast %cst_5 : f32 to vector<80x32xf32>
    %6 = arith.minimumf %4, %5 : vector<80x32xf32>
    %7 = math.exp %6 : vector<80x32xf32>
    %cst_6 = arith.constant 1.000000e+00 : f32
    %8 = vector.broadcast %cst_6 : f32 to vector<80x32xf32>
    %9 = arith.subf %7, %8 : vector<80x32xf32>
    %cst_7 = arith.constant 1.67326319 : f32
    %10 = vector.broadcast %cst_7 : f32 to vector<80x32xf32>
    %11 = arith.mulf %10, %9 : vector<80x32xf32>
    %cst_8 = arith.constant 0.000000e+00 : f32
    %12 = vector.broadcast %cst_8 : f32 to vector<80x32xf32>
    %13 = arith.cmpf ogt, %4, %12 : vector<80x32xf32>
    %14 = arith.select %13, %4, %11 : vector<80x32xi1>, vector<80x32xf32>
    %cst_9 = arith.constant 1.05070102 : f32
    %15 = vector.broadcast %cst_9 : f32 to vector<80x32xf32>
    %16 = arith.mulf %15, %14 : vector<80x32xf32>
    %17 = arith.truncf %16 : vector<80x32xf32> to vector<80x32xbf16>
    %c0_10 = arith.constant 0 : index
    %c0_11 = arith.constant 0 : index
    %c0_12 = arith.constant 0 : index
    %18 = vector.load %arg5[%c0_10, %c0_11, %c0_12] : memref<1x80x32xbf16, #tpu.memory_space<vmem>>, vector<1x80x32xbf16>
    %19 = vector.shape_cast %18 : vector<1x80x32xbf16> to vector<80x32xbf16>
    %20 = vector.shape_cast %17 : vector<80x32xbf16> to vector<1x80x32xbf16>
    tpu.vector_store %arg5[%c0_10, %c0_11, %c0_12], %20 {strides = array<i32>} : memref<1x80x32xbf16, #tpu.memory_space<vmem>>, vector<1x80x32xbf16>,
    return
  }
  func.func @transform_0(%arg0: i32, %arg1: i32, %arg2: i32) -> (i32, i32, i32) {
    %c0_i32 = arith.constant 0 : i32
    %c0_i32_0 = arith.constant 0 : i32
    return %arg0, %arg1, %c0_i32 : i32, i32, i32
  }
  func.func @transform_1(%arg0: i32, %arg1: i32, %arg2: i32) -> (i32, i32, i32) {
    %c0_i32 = arith.constant 0 : i32
    %c0_i32_0 = arith.constant 0 : i32
    return %arg0, %c0_i32, %arg2 : i32, i32, i32
  }
  func.func @transform_2(%arg0: i32, %arg1: i32, %arg2: i32) -> (i32, i32, i32) {
    %c0_i32 = arith.constant 0 : i32
    return %arg0, %arg1, %arg2 : i32, i32, i32
  }
}

module attributes {stable_mosaic.version = 11 : i64} {
  func.func @_matmul_act_kernel(%arg0: i32, %arg1: i32, %arg2: i32, %arg3: memref<1x128x256xbf16, #tpu.memory_space<vmem>>, %arg4: memref<1x256x32xbf16, #tpu.memory_space<vmem>>, %arg5: memref<1x128x32xbf16, #tpu.memory_space<vmem>>) attributes {dimension_semantics = [#tpu.dimension_semantics<parallel>, #tpu.dimension_semantics<parallel>, #tpu.dimension_semantics<parallel>], iteration_bounds = array<i64: 1, 1, 1>, scalar_prefetch = 0 : i64, scratch_operands = 0 : i64, tpu.core_type = #tpu.core_type<tc>, window_params = [{transform_indices = @transform_0, window_bounds = array<i64: 1, 128, 256>}, {transform_indices = @transform_1, window_bounds = array<i64: 1, 256, 32>}, {transform_indices = @transform_2, window_bounds = array<i64: 1, 128, 32>}]} {
    %c0 = arith.constant 0 : index
    %c0_0 = arith.constant 0 : index
    %c0_1 = arith.constant 0 : index
    %0 = vector.load %arg3[%c0, %c0_0, %c0_1] : memref<1x128x256xbf16, #tpu.memory_space<vmem>>, vector<1x128x256xbf16>
    %1 = vector.shape_cast %0 : vector<1x128x256xbf16> to vector<128x256xbf16>
    %c0_2 = arith.constant 0 : index
    %c0_3 = arith.constant 0 : index
    %c0_4 = arith.constant 0 : index
    %2 = vector.load %arg4[%c0_2, %c0_3, %c0_4] : memref<1x256x32xbf16, #tpu.memory_space<vmem>>, vector<1x256x32xbf16>
    %3 = vector.shape_cast %2 : vector<1x256x32xbf16> to vector<256x32xbf16>
    %cst = arith.constant dense<0.000000e+00> : vector<128x32xf32>
    %4 = tpu.matmul %1, %3, %cst {dimension_numbers = #tpu.dot_dimension_numbers<[1], [0], [0], [1], [0, 0, 1, 1], [], []>} : vector<128x256xbf16>, vector<256x32xbf16>, vector<128x32xf32> -> vector<128x32xf32>
    %cst_5 = arith.constant 0.000000e+00 : f32
    %5 = vector.broadcast %cst_5 : f32 to vector<128x32xf32>
    %6 = arith.minimumf %4, %5 : vector<128x32xf32>
    %7 = math.exp %6 : vector<128x32xf32>
    %cst_6 = arith.constant 1.000000e+00 : f32
    %8 = vector.broadcast %cst_6 : f32 to vector<128x32xf32>
    %9 = arith.subf %7, %8 : vector<128x32xf32>
    %cst_7 = arith.constant 1.67326319 : f32
    %10 = vector.broadcast %cst_7 : f32 to vector<128x32xf32>
    %11 = arith.mulf %10, %9 : vector<128x32xf32>
    %cst_8 = arith.constant 0.000000e+00 : f32
    %12 = vector.broadcast %cst_8 : f32 to vector<128x32xf32>
    %13 = arith.cmpf ogt, %4, %12 : vector<128x32xf32>
    %14 = arith.select %13, %4, %11 : vector<128x32xi1>, vector<128x32xf32>
    %cst_9 = arith.constant 1.05070102 : f32
    %15 = vector.broadcast %cst_9 : f32 to vector<128x32xf32>
    %16 = arith.mulf %15, %14 : vector<128x32xf32>
    %17 = arith.truncf %16 : vector<128x32xf32> to vector<128x32xbf16>
    %c0_10 = arith.constant 0 : index
    %c0_11 = arith.constant 0 : index
    %c0_12 = arith.constant 0 : index
    %18 = vector.load %arg5[%c0_10, %c0_11, %c0_12] : memref<1x128x32xbf16, #tpu.memory_space<vmem>>, vector<1x128x32xbf16>
    %19 = vector.shape_cast %18 : vector<1x128x32xbf16> to vector<128x32xbf16>
    %20 = vector.shape_cast %17 : vector<128x32xbf16> to vector<1x128x32xbf16>
    tpu.vector_store %arg5[%c0_10, %c0_11, %c0_12], %20 {strides = array<i32>} : memref<1x128x32xbf16, #tpu.memory_space<vmem>>, vector<1x128x32xbf16>,
    return
  }
  func.func @transform_0(%arg0: i32, %arg1: i32, %arg2: i32) -> (i32, i32, i32) {
    %c0_i32 = arith.constant 0 : i32
    %c0_i32_0 = arith.constant 0 : i32
    return %arg0, %arg1, %c0_i32 : i32, i32, i32
  }
  func.func @transform_1(%arg0: i32, %arg1: i32, %arg2: i32) -> (i32, i32, i32) {
    %c0_i32 = arith.constant 0 : i32
    %c0_i32_0 = arith.constant 0 : i32
    return %arg0, %c0_i32, %arg2 : i32, i32, i32
  }
  func.func @transform_2(%arg0: i32, %arg1: i32, %arg2: i32) -> (i32, i32, i32) {
    %c0_i32 = arith.constant 0 : i32
    return %arg0, %arg1, %arg2 : i32, i32, i32
  }
}

module attributes {stable_mosaic.version = 11 : i64} {
  func.func @_matmul_act_kernel(%arg0: i32, %arg1: i32, %arg2: i32, %arg3: memref<1x416x128xbf16, #tpu.memory_space<vmem>>, %arg4: memref<1x128x16xbf16, #tpu.memory_space<vmem>>, %arg5: memref<1x416x16xbf16, #tpu.memory_space<vmem>>) attributes {dimension_semantics = [#tpu.dimension_semantics<parallel>, #tpu.dimension_semantics<parallel>, #tpu.dimension_semantics<parallel>], iteration_bounds = array<i64: 4, 1, 1>, scalar_prefetch = 0 : i64, scratch_operands = 0 : i64, tpu.core_type = #tpu.core_type<tc>, window_params = [{transform_indices = @transform_0, window_bounds = array<i64: 1, 416, 128>}, {transform_indices = @transform_1, window_bounds = array<i64: 1, 128, 16>}, {transform_indices = @transform_2, window_bounds = array<i64: 1, 416, 16>}]} {
    %c0 = arith.constant 0 : index
    %c0_0 = arith.constant 0 : index
    %c0_1 = arith.constant 0 : index
    %0 = vector.load %arg3[%c0, %c0_0, %c0_1] : memref<1x416x128xbf16, #tpu.memory_space<vmem>>, vector<1x416x128xbf16>
    %1 = vector.shape_cast %0 : vector<1x416x128xbf16> to vector<416x128xbf16>
    %c0_2 = arith.constant 0 : index
    %c0_3 = arith.constant 0 : index
    %c0_4 = arith.constant 0 : index
    %2 = vector.load %arg4[%c0_2, %c0_3, %c0_4] : memref<1x128x16xbf16, #tpu.memory_space<vmem>>, vector<1x128x16xbf16>
    %3 = vector.shape_cast %2 : vector<1x128x16xbf16> to vector<128x16xbf16>
    %cst = arith.constant dense<0.000000e+00> : vector<416x16xf32>
    %4 = tpu.matmul %1, %3, %cst {dimension_numbers = #tpu.dot_dimension_numbers<[1], [0], [0], [1], [0, 0, 1, 1], [], []>} : vector<416x128xbf16>, vector<128x16xbf16>, vector<416x16xf32> -> vector<416x16xf32>
    %cst_5 = arith.constant 0.000000e+00 : f32
    %5 = vector.broadcast %cst_5 : f32 to vector<416x16xf32>
    %6 = arith.minimumf %4, %5 : vector<416x16xf32>
    %7 = math.exp %6 : vector<416x16xf32>
    %cst_6 = arith.constant 1.000000e+00 : f32
    %8 = vector.broadcast %cst_6 : f32 to vector<416x16xf32>
    %9 = arith.subf %7, %8 : vector<416x16xf32>
    %cst_7 = arith.constant 1.67326319 : f32
    %10 = vector.broadcast %cst_7 : f32 to vector<416x16xf32>
    %11 = arith.mulf %10, %9 : vector<416x16xf32>
    %cst_8 = arith.constant 0.000000e+00 : f32
    %12 = vector.broadcast %cst_8 : f32 to vector<416x16xf32>
    %13 = arith.cmpf ogt, %4, %12 : vector<416x16xf32>
    %14 = arith.select %13, %4, %11 : vector<416x16xi1>, vector<416x16xf32>
    %cst_9 = arith.constant 1.05070102 : f32
    %15 = vector.broadcast %cst_9 : f32 to vector<416x16xf32>
    %16 = arith.mulf %15, %14 : vector<416x16xf32>
    %17 = arith.truncf %16 : vector<416x16xf32> to vector<416x16xbf16>
    %c0_10 = arith.constant 0 : index
    %c0_11 = arith.constant 0 : index
    %c0_12 = arith.constant 0 : index
    %18 = vector.load %arg5[%c0_10, %c0_11, %c0_12] : memref<1x416x16xbf16, #tpu.memory_space<vmem>>, vector<1x416x16xbf16>
    %19 = vector.shape_cast %18 : vector<1x416x16xbf16> to vector<416x16xbf16>
    %20 = vector.shape_cast %17 : vector<416x16xbf16> to vector<1x416x16xbf16>
    tpu.vector_store %arg5[%c0_10, %c0_11, %c0_12], %20 {strides = array<i32>} : memref<1x416x16xbf16, #tpu.memory_space<vmem>>, vector<1x416x16xbf16>,
    return
  }
  func.func @transform_0(%arg0: i32, %arg1: i32, %arg2: i32) -> (i32, i32, i32) {
    %c0_i32 = arith.constant 0 : i32
    %c0_i32_0 = arith.constant 0 : i32
    return %arg0, %arg1, %c0_i32 : i32, i32, i32
  }
  func.func @transform_1(%arg0: i32, %arg1: i32, %arg2: i32) -> (i32, i32, i32) {
    %c0_i32 = arith.constant 0 : i32
    %c0_i32_0 = arith.constant 0 : i32
    return %arg0, %c0_i32, %arg2 : i32, i32, i32
  }
  func.func @transform_2(%arg0: i32, %arg1: i32, %arg2: i32) -> (i32, i32, i32) {
    %c0_i32 = arith.constant 0 : i32
    return %arg0, %arg1, %arg2 : i32, i32, i32
  }
}

module attributes {stable_mosaic.version = 11 : i64} {
  func.func @_matmul_act_kernel(%arg0: i32, %arg1: i32, %arg2: i32, %arg3: memref<1x1712x64xbf16, #tpu.memory_space<vmem>>, %arg4: memref<1x64x8xbf16, #tpu.memory_space<vmem>>, %arg5: memref<1x1712x8xbf16, #tpu.memory_space<vmem>>) attributes {dimension_semantics = [#tpu.dimension_semantics<parallel>, #tpu.dimension_semantics<parallel>, #tpu.dimension_semantics<parallel>], iteration_bounds = array<i64: 4, 1, 1>, scalar_prefetch = 0 : i64, scratch_operands = 0 : i64, tpu.core_type = #tpu.core_type<tc>, window_params = [{transform_indices = @transform_0, window_bounds = array<i64: 1, 1712, 64>}, {transform_indices = @transform_1, window_bounds = array<i64: 1, 64, 8>}, {transform_indices = @transform_2, window_bounds = array<i64: 1, 1712, 8>}]} {
    %c0 = arith.constant 0 : index
    %c0_0 = arith.constant 0 : index
    %c0_1 = arith.constant 0 : index
    %0 = vector.load %arg3[%c0, %c0_0, %c0_1] : memref<1x1712x64xbf16, #tpu.memory_space<vmem>>, vector<1x1712x64xbf16>
    %1 = vector.shape_cast %0 : vector<1x1712x64xbf16> to vector<1712x64xbf16>
    %c0_2 = arith.constant 0 : index
    %c0_3 = arith.constant 0 : index
    %c0_4 = arith.constant 0 : index
    %2 = vector.load %arg4[%c0_2, %c0_3, %c0_4] : memref<1x64x8xbf16, #tpu.memory_space<vmem>>, vector<1x64x8xbf16>
    %3 = vector.shape_cast %2 : vector<1x64x8xbf16> to vector<64x8xbf16>
    %cst = arith.constant dense<0.000000e+00> : vector<1712x8xf32>
    %4 = tpu.matmul %1, %3, %cst {dimension_numbers = #tpu.dot_dimension_numbers<[1], [0], [0], [1], [0, 0, 1, 1], [], []>} : vector<1712x64xbf16>, vector<64x8xbf16>, vector<1712x8xf32> -> vector<1712x8xf32>
    %cst_5 = arith.constant 0.000000e+00 : f32
    %5 = vector.broadcast %cst_5 : f32 to vector<1712x8xf32>
    %6 = arith.minimumf %4, %5 : vector<1712x8xf32>
    %7 = math.exp %6 : vector<1712x8xf32>
    %cst_6 = arith.constant 1.000000e+00 : f32
    %8 = vector.broadcast %cst_6 : f32 to vector<1712x8xf32>
    %9 = arith.subf %7, %8 : vector<1712x8xf32>
    %cst_7 = arith.constant 1.67326319 : f32
    %10 = vector.broadcast %cst_7 : f32 to vector<1712x8xf32>
    %11 = arith.mulf %10, %9 : vector<1712x8xf32>
    %cst_8 = arith.constant 0.000000e+00 : f32
    %12 = vector.broadcast %cst_8 : f32 to vector<1712x8xf32>
    %13 = arith.cmpf ogt, %4, %12 : vector<1712x8xf32>
    %14 = arith.select %13, %4, %11 : vector<1712x8xi1>, vector<1712x8xf32>
    %cst_9 = arith.constant 1.05070102 : f32
    %15 = vector.broadcast %cst_9 : f32 to vector<1712x8xf32>
    %16 = arith.mulf %15, %14 : vector<1712x8xf32>
    %17 = arith.truncf %16 : vector<1712x8xf32> to vector<1712x8xbf16>
    %c0_10 = arith.constant 0 : index
    %c0_11 = arith.constant 0 : index
    %c0_12 = arith.constant 0 : index
    %18 = vector.load %arg5[%c0_10, %c0_11, %c0_12] : memref<1x1712x8xbf16, #tpu.memory_space<vmem>>, vector<1x1712x8xbf16>
    %19 = vector.shape_cast %18 : vector<1x1712x8xbf16> to vector<1712x8xbf16>
    %20 = vector.shape_cast %17 : vector<1712x8xbf16> to vector<1x1712x8xbf16>
    tpu.vector_store %arg5[%c0_10, %c0_11, %c0_12], %20 {strides = array<i32>} : memref<1x1712x8xbf16, #tpu.memory_space<vmem>>, vector<1x1712x8xbf16>,
    return
  }
  func.func @transform_0(%arg0: i32, %arg1: i32, %arg2: i32) -> (i32, i32, i32) {
    %c0_i32 = arith.constant 0 : i32
    %c0_i32_0 = arith.constant 0 : i32
    return %arg0, %arg1, %c0_i32 : i32, i32, i32
  }
  func.func @transform_1(%arg0: i32, %arg1: i32, %arg2: i32) -> (i32, i32, i32) {
    %c0_i32 = arith.constant 0 : i32
    %c0_i32_0 = arith.constant 0 : i32
    return %arg0, %c0_i32, %arg2 : i32, i32, i32
  }
  func.func @transform_2(%arg0: i32, %arg1: i32, %arg2: i32) -> (i32, i32, i32) {
    %c0_i32 = arith.constant 0 : i32
    return %arg0, %arg1, %arg2 : i32, i32, i32
  }
}

module attributes {stable_mosaic.version = 11 : i64} {
  func.func @_matmul_act_kernel(%arg0: i32, %arg1: i32, %arg2: i32, %arg3: memref<1x2048x32xbf16, #tpu.memory_space<vmem>>, %arg4: memref<1x32x8xbf16, #tpu.memory_space<vmem>>, %arg5: memref<1x2048x8xf32, #tpu.memory_space<vmem>>) attributes {dimension_semantics = [#tpu.dimension_semantics<parallel>, #tpu.dimension_semantics<parallel>, #tpu.dimension_semantics<parallel>], iteration_bounds = array<i64: 4, 4, 1>, scalar_prefetch = 0 : i64, scratch_operands = 0 : i64, tpu.core_type = #tpu.core_type<tc>, window_params = [{transform_indices = @transform_0, window_bounds = array<i64: 1, 2048, 32>}, {transform_indices = @transform_1, window_bounds = array<i64: 1, 32, 8>}, {transform_indices = @transform_2, window_bounds = array<i64: 1, 2048, 8>}]} {
    %c0 = arith.constant 0 : index
    %c0_0 = arith.constant 0 : index
    %c0_1 = arith.constant 0 : index
    %0 = vector.load %arg3[%c0, %c0_0, %c0_1] : memref<1x2048x32xbf16, #tpu.memory_space<vmem>>, vector<1x2048x32xbf16>
    %1 = vector.shape_cast %0 : vector<1x2048x32xbf16> to vector<2048x32xbf16>
    %c0_2 = arith.constant 0 : index
    %c0_3 = arith.constant 0 : index
    %c0_4 = arith.constant 0 : index
    %2 = vector.load %arg4[%c0_2, %c0_3, %c0_4] : memref<1x32x8xbf16, #tpu.memory_space<vmem>>, vector<1x32x8xbf16>
    %3 = vector.shape_cast %2 : vector<1x32x8xbf16> to vector<32x8xbf16>
    %cst = arith.constant dense<0.000000e+00> : vector<2048x8xf32>
    %4 = tpu.matmul %1, %3, %cst {dimension_numbers = #tpu.dot_dimension_numbers<[1], [0], [0], [1], [0, 0, 1, 1], [], []>} : vector<2048x32xbf16>, vector<32x8xbf16>, vector<2048x8xf32> -> vector<2048x8xf32>
    %5 = math.tanh %4 : vector<2048x8xf32>
    %c0_5 = arith.constant 0 : index
    %c0_6 = arith.constant 0 : index
    %c0_7 = arith.constant 0 : index
    %6 = vector.load %arg5[%c0_5, %c0_6, %c0_7] : memref<1x2048x8xf32, #tpu.memory_space<vmem>>, vector<1x2048x8xf32>
    %7 = vector.shape_cast %6 : vector<1x2048x8xf32> to vector<2048x8xf32>
    %8 = vector.shape_cast %5 : vector<2048x8xf32> to vector<1x2048x8xf32>
    tpu.vector_store %arg5[%c0_5, %c0_6, %c0_7], %8 {strides = array<i32>} : memref<1x2048x8xf32, #tpu.memory_space<vmem>>, vector<1x2048x8xf32>,
    return
  }
  func.func @transform_0(%arg0: i32, %arg1: i32, %arg2: i32) -> (i32, i32, i32) {
    %c0_i32 = arith.constant 0 : i32
    %c0_i32_0 = arith.constant 0 : i32
    return %arg0, %arg1, %c0_i32 : i32, i32, i32
  }
  func.func @transform_1(%arg0: i32, %arg1: i32, %arg2: i32) -> (i32, i32, i32) {
    %c0_i32 = arith.constant 0 : i32
    %c0_i32_0 = arith.constant 0 : i32
    return %arg0, %c0_i32, %arg2 : i32, i32, i32
  }
  func.func @transform_2(%arg0: i32, %arg1: i32, %arg2: i32) -> (i32, i32, i32) {
    %c0_i32 = arith.constant 0 : i32
    return %arg0, %arg1, %arg2 : i32, i32, i32
  }
}

</mosaic_0001>

<bundles_post_ra>
// kernel: squeeze.7
= control target key start
LH: loop header
LB: loop body
LE: loop exit
PB: predicated region body
PF: predicated region fallthrough
CT: control target
= control target key end

     0   :  { %vm66_vm0 = vcmask 154624   ;;  %s879_s10 = smov 109   ;;  %s880_s11 = smov 71   ;;  %v881_v29 = vmov 0.0   ;;  %s1218_s0 = inlined_call_operand.vmem [shape: bf16[1,76,32], index: 0, kind: input, shape index: {}]   ;;  %s1219_s1 = inlined_call_operand.vmem [shape: bf16[2,2,19,32], index: 1, kind: output, shape index: {}]  }
   0x1   :  { %v840_v0 = vld [vmem:[%s1218_s0] sm:$0xff]   ;;  %v843_v1 = vld [vmem:[%s1218_s0 + $0x8] sm:$0xff]   ;;  %s878_s0 = smov 90  }
   0x2   :  { %v841_v2 = vunpack.c.l.bf16 %v840_v0  ;;  %v842_v3 = vunpack.c.h.bf16 %v840_v0  ;;  %v837_v4 = vunpack.c.l.bf16 %v843_v1  ;;  %v838_v5 = vunpack.c.h.bf16 %v843_v1 }
   0x4   :  { %v858_v6 = vpack.i.bf16 %v842_v3, %v841_v2  ;;  %67 = vst.msk [vmem:[#allocation0] ss:$16 sm:$0x3] %vm66_vm0, %v841_v2   ;;  %68 = vst.msk [vmem:[#allocation0] ss:$16 sm:$0xc] %vm66_vm0, %v841_v2   ;;  %v863_v7 = vpack.i.bf16 %v838_v5, %v837_v4 }
   0x5   :  { %69 = vst.msk [vmem:[#allocation0] ss:$16 sm:$0x30] %vm66_vm0, %v841_v2   ;;  %70 = vst.msk [vmem:[#allocation0] ss:$16 sm:$0xc0] %vm66_vm0, %v841_v2  }
   0x6   :  { %75 = vst.msk [vmem:[#allocation0 + $0x80] ss:$16 sm:$0x3] %vm66_vm0, %v842_v3   ;;  %77 = vst.msk [vmem:[#allocation0 + $0x80] ss:$16 sm:$0xc] %vm66_vm0, %v842_v3   ;;  %859 = vrot.lane.b32.xlu1 %v858_v6, %s878_s0  ;;  %849 = vrot.lane.b32.xlu0 %v858_v6, %s879_s10 }
   0x7   :  { %79 = vst.msk [vmem:[#allocation0 + $0x80] ss:$16 sm:$0x30] %vm66_vm0, %v842_v3   ;;  %81 = vst.msk [vmem:[#allocation0 + $0x80] ss:$16 sm:$0xc0] %vm66_vm0, %v842_v3  }
   0x8   :  { %86 = vst.msk [vmem:[#allocation0 + $0x100] ss:$16 sm:$0x3] %vm66_vm0, %v837_v4   ;;  %88 = vst.msk [vmem:[#allocation0 + $0x100] ss:$16 sm:$0xc] %vm66_vm0, %v837_v4  }
   0x9   :  { %90 = vst.msk [vmem:[#allocation0 + $0x100] ss:$16 sm:$0x30] %vm66_vm0, %v837_v4   ;;  %92 = vst.msk [vmem:[#allocation0 + $0x100] ss:$16 sm:$0xc0] %vm66_vm0, %v837_v4  }
   0xa   :  { %97 = vst.msk [vmem:[#allocation0 + $0x180] ss:$16 sm:$0x3] %vm66_vm0, %v838_v5   ;;  %99 = vst.msk [vmem:[#allocation0 + $0x180] ss:$16 sm:$0xc] %vm66_vm0, %v838_v5   ;;  %864 = vrot.lane.b32.xlu1 %v863_v7, %s878_s0  ;;  %854 = vrot.lane.b32.xlu0 %v863_v7, %s879_s10 }
   0xb   :  { %101 = vst.msk [vmem:[#allocation0 + $0x180] ss:$16 sm:$0x30] %vm66_vm0, %v838_v5   ;;  %103 = vst.msk [vmem:[#allocation0 + $0x180] ss:$16 sm:$0xc0] %vm66_vm0, %v838_v5  }
   0xe   :  { %874 = vrot.lane.b32.xlu1 %v863_v7, %s880_s11  ;;  %869 = vrot.lane.b32.xlu0 %v858_v6, %s880_s11 }
  0x78   :  { %v860_v8 = vpop.permute.xlu1 %859  ;;  %v850_v9 = vpop.permute.xlu0 %849 }
  0x79   :  { %v862_v10 = vunpack.i.h.bf16 %v860_v8  ;;  %v861_v11 = vunpack.i.l.bf16 %v860_v8  ;;  %v852_v12 = vunpack.i.h.bf16 %v850_v9  ;;  %v851_v13 = vunpack.i.l.bf16 %v850_v9 }
  0x7b   :  { %173 = vst.msk [vmem:[#allocation0 + $0x88] ss:$16 sm:$0x3] %vm66_vm0, %v862_v10   ;;  %175 = vst.msk [vmem:[#allocation0 + $0x88] ss:$16 sm:$0xc] %vm66_vm0, %v862_v10  }
  0x7c   :  { %177 = vst.msk [vmem:[#allocation0 + $0x88] ss:$16 sm:$0x30] %vm66_vm0, %v862_v10   ;;  %179 = vst.msk [vmem:[#allocation0 + $0x88] ss:$16 sm:$0xc0] %vm66_vm0, %v862_v10   ;;  %v865_v14 = vpop.permute.xlu1 %864  ;;  %v855_v15 = vpop.permute.xlu0 %854 }
  0x7d   :  { %160 = vst.msk [vmem:[#allocation0 + $0x8] ss:$16 sm:$0x3] %vm66_vm0, %v861_v11   ;;  %162 = vst.msk [vmem:[#allocation0 + $0x8] ss:$16 sm:$0xc] %vm66_vm0, %v861_v11   ;;  %v867_v16 = vunpack.i.h.bf16 %v865_v14  ;;  %v866_v17 = vunpack.i.l.bf16 %v865_v14  ;;  %v857_v18 = vunpack.i.h.bf16 %v855_v15  ;;  %v856_v19 = vunpack.i.l.bf16 %v855_v15 }
  0x7e   :  { %164 = vst.msk [vmem:[#allocation0 + $0x8] ss:$16 sm:$0x30] %vm66_vm0, %v861_v11   ;;  %166 = vst.msk [vmem:[#allocation0 + $0x8] ss:$16 sm:$0xc0] %vm66_vm0, %v861_v11  }
  0x7f   :  { %122 = vst.msk [vmem:[#allocation0 + $0x81] ss:$16 sm:$0x3] %vm66_vm0, %v852_v12   ;;  %124 = vst.msk [vmem:[#allocation0 + $0x81] ss:$16 sm:$0xc] %vm66_vm0, %v852_v12  }
  0x80   :  { %126 = vst.msk [vmem:[#allocation0 + $0x81] ss:$16 sm:$0x30] %vm66_vm0, %v852_v12   ;;  %128 = vst.msk [vmem:[#allocation0 + $0x81] ss:$16 sm:$0xc0] %vm66_vm0, %v852_v12   ;;  %v875_v20 = vpop.permute.xlu1 %874  ;;  %v870_v21 = vpop.permute.xlu0 %869 }
  0x81   :  { %109 = vst.msk [vmem:[#allocation0 + $0x1] ss:$16 sm:$0x3] %vm66_vm0, %v851_v13   ;;  %111 = vst.msk [vmem:[#allocation0 + $0x1] ss:$16 sm:$0xc] %vm66_vm0, %v851_v13   ;;  %v877_v22 = vunpack.i.h.bf16 %v875_v20  ;;  %v876_v23 = vunpack.i.l.bf16 %v875_v20  ;;  %v872_v24 = vunpack.i.h.bf16 %v870_v21  ;;  %v871_v25 = vunpack.i.l.bf16 %v870_v21 }
  0x82   :  { %113 = vst.msk [vmem:[#allocation0 + $0x1] ss:$16 sm:$0x30] %vm66_vm0, %v851_v13   ;;  %115 = vst.msk [vmem:[#allocation0 + $0x1] ss:$16 sm:$0xc0] %vm66_vm0, %v851_v13  }
  0x83   :  { %199 = vst.msk [vmem:[#allocation0 + $0x188] ss:$16 sm:$0x3] %vm66_vm0, %v867_v16   ;;  %201 = vst.msk [vmem:[#allocation0 + $0x188] ss:$16 sm:$0xc] %vm66_vm0, %v867_v16  }
  0x84   :  { %203 = vst.msk [vmem:[#allocation0 + $0x188] ss:$16 sm:$0x30] %vm66_vm0, %v867_v16   ;;  %205 = vst.msk [vmem:[#allocation0 + $0x188] ss:$16 sm:$0xc0] %vm66_vm0, %v867_v16  }
  0x85   :  { %186 = vst.msk [vmem:[#allocation0 + $0x108] ss:$16 sm:$0x3] %vm66_vm0, %v866_v17   ;;  %188 = vst.msk [vmem:[#allocation0 + $0x108] ss:$16 sm:$0xc] %vm66_vm0, %v866_v17  }
  0x86   :  { %190 = vst.msk [vmem:[#allocation0 + $0x108] ss:$16 sm:$0x30] %vm66_vm0, %v866_v17   ;;  %192 = vst.msk [vmem:[#allocation0 + $0x108] ss:$16 sm:$0xc0] %vm66_vm0, %v866_v17  }
  0x87   :  { %148 = vst.msk [vmem:[#allocation0 + $0x181] ss:$16 sm:$0x3] %vm66_vm0, %v857_v18   ;;  %150 = vst.msk [vmem:[#allocation0 + $0x181] ss:$16 sm:$0xc] %vm66_vm0, %v857_v18  }
  0x88   :  { %152 = vst.msk [vmem:[#allocation0 + $0x181] ss:$16 sm:$0x30] %vm66_vm0, %v857_v18   ;;  %154 = vst.msk [vmem:[#allocation0 + $0x181] ss:$16 sm:$0xc0] %vm66_vm0, %v857_v18  }
  0x89   :  { %135 = vst.msk [vmem:[#allocation0 + $0x101] ss:$16 sm:$0x3] %vm66_vm0, %v856_v19   ;;  %137 = vst.msk [vmem:[#allocation0 + $0x101] ss:$16 sm:$0xc] %vm66_vm0, %v856_v19  }
  0x8a   :  { %139 = vst.msk [vmem:[#allocation0 + $0x101] ss:$16 sm:$0x30] %vm66_vm0, %v856_v19   ;;  %141 = vst.msk [vmem:[#allocation0 + $0x101] ss:$16 sm:$0xc0] %vm66_vm0, %v856_v19  }
  0x8b   :  { %v370_v26 = vld [vmem:[#allocation0 + $0x80] sm:$0x3]  ;;  %v384_v27 = vld [vmem:[#allocation0 + $0x90] sm:$0x3] }
  0x8c   :  { %v398_v28 = vld [vmem:[#allocation0 + $0xa0] sm:$0x3]  ;;  %v371_v30 = vpack.c.bf16 %v881_v29, %v370_v26  ;;  %v385_v31 = vpack.c.bf16 %v881_v29, %v384_v27  ;;  %v412_v33 = vld [vmem:[#allocation0 + $0xb0] sm:$0x3] }
  0x8d   :  { %v399_v32 = vpack.c.bf16 %v881_v29, %v398_v28  ;;  %v426_v34 = vld [vmem:[#allocation0 + $0xc0] sm:$0x3]  ;;  %v440_v35 = vld [vmem:[#allocation0 + $0xd0] sm:$0x3]  ;;  %v413_v36 = vpack.c.bf16 %v881_v29, %v412_v33 }
  0x8e   :  { %250 = vst.msk [vmem:[#allocation0 + $0x189] ss:$16 sm:$0x3] %vm66_vm0, %v877_v22   ;;  %252 = vst.msk [vmem:[#allocation0 + $0x189] ss:$16 sm:$0xc] %vm66_vm0, %v877_v22   ;;  %v427_v37 = vpack.c.bf16 %v881_v29, %v426_v34  ;;  %v441_v38 = vpack.c.bf16 %v881_v29, %v440_v35 }
  0x8f   :  { %254 = vst.msk [vmem:[#allocation0 + $0x189] ss:$16 sm:$0x30] %vm66_vm0, %v877_v22   ;;  %256 = vst.msk [vmem:[#allocation0 + $0x189] ss:$16 sm:$0xc0] %vm66_vm0, %v877_v22  }
  0x90   :  { %237 = vst.msk [vmem:[#allocation0 + $0x109] ss:$16 sm:$0x3] %vm66_vm0, %v876_v23   ;;  %239 = vst.msk [vmem:[#allocation0 + $0x109] ss:$16 sm:$0xc] %vm66_vm0, %v876_v23  }
  0x91   :  { %241 = vst.msk [vmem:[#allocation0 + $0x109] ss:$16 sm:$0x30] %vm66_vm0, %v876_v23   ;;  %243 = vst.msk [vmem:[#allocation0 + $0x109] ss:$16 sm:$0xc0] %vm66_vm0, %v876_v23  }
  0x92   :  { %224 = vst.msk [vmem:[#allocation0 + $0x89] ss:$16 sm:$0x3] %vm66_vm0, %v872_v24   ;;  %226 = vst.msk [vmem:[#allocation0 + $0x89] ss:$16 sm:$0xc] %vm66_vm0, %v872_v24  }
  0x93   :  { %228 = vst.msk [vmem:[#allocation0 + $0x89] ss:$16 sm:$0x30] %vm66_vm0, %v872_v24   ;;  %230 = vst.msk [vmem:[#allocation0 + $0x89] ss:$16 sm:$0xc0] %vm66_vm0, %v872_v24  }
  0x94   :  { %211 = vst.msk [vmem:[#allocation0 + $0x9] ss:$16 sm:$0x3] %vm66_vm0, %v871_v25   ;;  %213 = vst.msk [vmem:[#allocation0 + $0x9] ss:$16 sm:$0xc] %vm66_vm0, %v871_v25  }
  0x95   :  { %215 = vst.msk [vmem:[#allocation0 + $0x9] ss:$16 sm:$0x30] %vm66_vm0, %v871_v25   ;;  %217 = vst.msk [vmem:[#allocation0 + $0x9] ss:$16 sm:$0xc0] %vm66_vm0, %v871_v25  }
  0x96   :  { %v454_v39 = vld [vmem:[#allocation0 + $0xe0] sm:$0x3]  ;;  %v468_v40 = vld [vmem:[#allocation0 + $0xf0] sm:$0x3]  ;;  %787 = vst [vmem:[%s1219_s1 + $0x10] sm:$0x1] %v371_v30 }
  0x97   :  { %v261_v41 = vld [vmem:[#allocation0] sm:$0x3]  ;;  %789 = vst [vmem:[%s1219_s1 + $0x12] sm:$0x1] %v385_v31  ;;  %791 = vst [vmem:[%s1219_s1 + $0x14] sm:$0x1] %v399_v32  ;;  %v455_v42 = vpack.c.bf16 %v881_v29, %v454_v39  ;;  %v469_v43 = vpack.c.bf16 %v881_v29, %v468_v40 }
  0x98   :  { %v262_v44 = vpack.c.bf16 %v881_v29, %v261_v41  ;;  %v272_v45 = vld [vmem:[#allocation0 + $0x10] sm:$0x3]  ;;  %v286_v46 = vld [vmem:[#allocation0 + $0x20] sm:$0x3]  ;;  %793 = vst [vmem:[%s1219_s1 + $0x16] sm:$0x1] %v413_v36 }
  0x99   :  { %v300_v47 = vld [vmem:[#allocation0 + $0x30] sm:$0x3]  ;;  %795 = vst [vmem:[%s1219_s1 + $0x18] sm:$0x1] %v427_v37  ;;  %797 = vst [vmem:[%s1219_s1 + $0x1a] sm:$0x1] %v441_v38  ;;  %v273_v48 = vpack.c.bf16 %v881_v29, %v272_v45  ;;  %v287_v49 = vpack.c.bf16 %v881_v29, %v286_v46 }
  0x9a   :  { %v301_v50 = vpack.c.bf16 %v881_v29, %v300_v47  ;;  %v314_v51 = vld [vmem:[#allocation0 + $0x40] sm:$0x3]  ;;  %v328_v52 = vld [vmem:[#allocation0 + $0x50] sm:$0x3]  ;;  %799 = vst [vmem:[%s1219_s1 + $0x1c] sm:$0x1] %v455_v42 }
  0x9b   :  { %v342_v53 = vld [vmem:[#allocation0 + $0x60] sm:$0x3]  ;;  %801 = vst [vmem:[%s1219_s1 + $0x1e] sm:$0x1] %v469_v43  ;;  %264 = vst [vmem:[%s1219_s1] sm:$0x1] %v262_v44  ;;  %v315_v54 = vpack.c.bf16 %v881_v29, %v314_v51  ;;  %v329_v55 = vpack.c.bf16 %v881_v29, %v328_v52 }
  0x9c   :  { %v343_v56 = vpack.c.bf16 %v881_v29, %v342_v53  ;;  %v356_v57 = vld [vmem:[#allocation0 + $0x70] sm:$0x3]  ;;  %v594_v58 = vld [vmem:[#allocation0 + $0x180] sm:$0x3]  ;;  %773 = vst [vmem:[%s1219_s1 + $0x2] sm:$0x1] %v273_v48 }
  0x9d   :  { %v608_v59 = vld [vmem:[#allocation0 + $0x190] sm:$0x3]  ;;  %775 = vst [vmem:[%s1219_s1 + $0x4] sm:$0x1] %v287_v49  ;;  %777 = vst [vmem:[%s1219_s1 + $0x6] sm:$0x1] %v301_v50  ;;  %v357_v60 = vpack.c.bf16 %v881_v29, %v356_v57  ;;  %v595_v61 = vpack.c.bf16 %v881_v29, %v594_v58 }
  0x9e   :  { %v609_v62 = vpack.c.bf16 %v881_v29, %v608_v59  ;;  %v622_v63 = vld [vmem:[#allocation0 + $0x1a0] sm:$0x3]  ;;  %v636_v0 = vld [vmem:[#allocation0 + $0x1b0] sm:$0x3]  ;;  %779 = vst [vmem:[%s1219_s1 + $0x8] sm:$0x1] %v315_v54 }
  0x9f   :  { %v650_v1 = vld [vmem:[#allocation0 + $0x1c0] sm:$0x3]  ;;  %781 = vst [vmem:[%s1219_s1 + $0xa] sm:$0x1] %v329_v55  ;;  %783 = vst [vmem:[%s1219_s1 + $0xc] sm:$0x1] %v343_v56  ;;  %v623_v2 = vpack.c.bf16 %v881_v29, %v622_v63  ;;  %v637_v3 = vpack.c.bf16 %v881_v29, %v636_v0 }
  0xa0   :  { %v651_v4 = vpack.c.bf16 %v881_v29, %v650_v1  ;;  %v664_v5 = vld [vmem:[#allocation0 + $0x1d0] sm:$0x3]  ;;  %v678_v6 = vld [vmem:[#allocation0 + $0x1e0] sm:$0x3]  ;;  %785 = vst [vmem:[%s1219_s1 + $0xe] sm:$0x1] %v357_v60 }
  0xa1   :  { %v692_v7 = vld [vmem:[#allocation0 + $0x1f0] sm:$0x3]  ;;  %819 = vst [vmem:[%s1219_s1 + $0x30] sm:$0x1] %v595_v61  ;;  %821 = vst [vmem:[%s1219_s1 + $0x32] sm:$0x1] %v609_v62  ;;  %v665_v8 = vpack.c.bf16 %v881_v29, %v664_v5  ;;  %v679_v9 = vpack.c.bf16 %v881_v29, %v678_v6 }
  0xa2   :  { %v693_v10 = vpack.c.bf16 %v881_v29, %v692_v7  ;;  %v482_v11 = vld [vmem:[#allocation0 + $0x100] sm:$0x3]  ;;  %v496_v12 = vld [vmem:[#allocation0 + $0x110] sm:$0x3]  ;;  %823 = vst [vmem:[%s1219_s1 + $0x34] sm:$0x1] %v623_v2 }
  0xa3   :  { %v510_v13 = vld [vmem:[#allocation0 + $0x120] sm:$0x3]  ;;  %825 = vst [vmem:[%s1219_s1 + $0x36] sm:$0x1] %v637_v3  ;;  %827 = vst [vmem:[%s1219_s1 + $0x38] sm:$0x1] %v651_v4  ;;  %v483_v14 = vpack.c.bf16 %v881_v29, %v482_v11  ;;  %v497_v15 = vpack.c.bf16 %v881_v29, %v496_v12 }
  0xa4   :  { %v511_v16 = vpack.c.bf16 %v881_v29, %v510_v13  ;;  %v524_v17 = vld [vmem:[#allocation0 + $0x130] sm:$0x3]  ;;  %v538_v18 = vld [vmem:[#allocation0 + $0x140] sm:$0x3]  ;;  %829 = vst [vmem:[%s1219_s1 + $0x3a] sm:$0x1] %v665_v8 }
  0xa5   :  { %v552_v19 = vld [vmem:[#allocation0 + $0x150] sm:$0x3]  ;;  %831 = vst [vmem:[%s1219_s1 + $0x3c] sm:$0x1] %v679_v9  ;;  %833 = vst [vmem:[%s1219_s1 + $0x3e] sm:$0x1] %v693_v10  ;;  %v525_v20 = vpack.c.bf16 %v881_v29, %v524_v17  ;;  %v539_v21 = vpack.c.bf16 %v881_v29, %v538_v18 }
  0xa6   :  { %v553_v22 = vpack.c.bf16 %v881_v29, %v552_v19  ;;  %v566_v23 = vld [vmem:[#allocation0 + $0x160] sm:$0x3]  ;;  %v580_v24 = vld [vmem:[#allocation0 + $0x170] sm:$0x3]  ;;  %v489_v25 = vld [vmem:[#allocation0 + $0x108] sm:$0x3] }
  0xa7   :  { %803 = vst [vmem:[%s1219_s1 + $0x20] sm:$0x1] %v483_v14  ;;  %805 = vst [vmem:[%s1219_s1 + $0x22] sm:$0x1] %v497_v15  ;;  %v567_v26 = vpack.c.bf16 %v881_v29, %v566_v23  ;;  %v581_v27 = vpack.c.bf16 %v881_v29, %v580_v24  ;;  %v490_v28 = vpack.c.bf16 %v881_v29, %v489_v25  ;;  %v503_v30 = vld [vmem:[#allocation0 + $0x118] sm:$0x3] }
  0xa8   :  { %807 = vst [vmem:[%s1219_s1 + $0x24] sm:$0x1] %v511_v16  ;;  %v517_v31 = vld [vmem:[#allocation0 + $0x128] sm:$0x3]  ;;  %v531_v32 = vld [vmem:[#allocation0 + $0x138] sm:$0x3]  ;;  %v504_v33 = vpack.c.bf16 %v881_v29, %v503_v30 }
  0xa9   :  { %809 = vst [vmem:[%s1219_s1 + $0x26] sm:$0x1] %v525_v20  ;;  %811 = vst [vmem:[%s1219_s1 + $0x28] sm:$0x1] %v539_v21  ;;  %v518_v34 = vpack.c.bf16 %v881_v29, %v517_v31  ;;  %v532_v35 = vpack.c.bf16 %v881_v29, %v531_v32  ;;  %v545_v36 = vld [vmem:[#allocation0 + $0x148] sm:$0x3] }
  0xaa   :  { %813 = vst [vmem:[%s1219_s1 + $0x2a] sm:$0x1] %v553_v22  ;;  %v559_v37 = vld [vmem:[#allocation0 + $0x158] sm:$0x3]  ;;  %v573_v38 = vld [vmem:[#allocation0 + $0x168] sm:$0x3]  ;;  %v546_v39 = vpack.c.bf16 %v881_v29, %v545_v36 }
  0xab   :  { %815 = vst [vmem:[%s1219_s1 + $0x2c] sm:$0x1] %v567_v26  ;;  %817 = vst [vmem:[%s1219_s1 + $0x2e] sm:$0x1] %v581_v27  ;;  %v560_v40 = vpack.c.bf16 %v881_v29, %v559_v37  ;;  %v574_v41 = vpack.c.bf16 %v881_v29, %v573_v38  ;;  %v587_v42 = vld [vmem:[#allocation0 + $0x178] sm:$0x3] }
  0xac   :  { %804 = vst [vmem:[%s1219_s1 + $0x21] sm:$0x1] %v490_v28  ;;  %v601_v43 = vld [vmem:[#allocation0 + $0x188] sm:$0x3]  ;;  %v615_v44 = vld [vmem:[#allocation0 + $0x198] sm:$0x3]  ;;  %v588_v45 = vpack.c.bf16 %v881_v29, %v587_v42 }
  0xad   :  { %806 = vst [vmem:[%s1219_s1 + $0x23] sm:$0x1] %v504_v33  ;;  %808 = vst [vmem:[%s1219_s1 + $0x25] sm:$0x1] %v518_v34  ;;  %v602_v46 = vpack.c.bf16 %v881_v29, %v601_v43  ;;  %v616_v47 = vpack.c.bf16 %v881_v29, %v615_v44  ;;  %v629_v48 = vld [vmem:[#allocation0 + $0x1a8] sm:$0x3] }
  0xae   :  { %810 = vst [vmem:[%s1219_s1 + $0x27] sm:$0x1] %v532_v35  ;;  %v643_v49 = vld [vmem:[#allocation0 + $0x1b8] sm:$0x3]  ;;  %v657_v50 = vld [vmem:[#allocation0 + $0x1c8] sm:$0x3]  ;;  %v630_v51 = vpack.c.bf16 %v881_v29, %v629_v48 }
  0xaf   :  { %812 = vst [vmem:[%s1219_s1 + $0x29] sm:$0x1] %v546_v39  ;;  %814 = vst [vmem:[%s1219_s1 + $0x2b] sm:$0x1] %v560_v40  ;;  %v644_v52 = vpack.c.bf16 %v881_v29, %v643_v49  ;;  %v658_v53 = vpack.c.bf16 %v881_v29, %v657_v50  ;;  %v671_v54 = vld [vmem:[#allocation0 + $0x1d8] sm:$0x3] }
  0xb0   :  { %816 = vst [vmem:[%s1219_s1 + $0x2d] sm:$0x1] %v574_v41  ;;  %v685_v55 = vld [vmem:[#allocation0 + $0x1e8] sm:$0x3]  ;;  %v699_v56 = vld [vmem:[#allocation0 + $0x1f8] sm:$0x3]  ;;  %v672_v57 = vpack.c.bf16 %v881_v29, %v671_v54 }
  0xb1   :  { %818 = vst [vmem:[%s1219_s1 + $0x2f] sm:$0x1] %v588_v45  ;;  %820 = vst [vmem:[%s1219_s1 + $0x31] sm:$0x1] %v602_v46  ;;  %v686_v58 = vpack.c.bf16 %v881_v29, %v685_v55  ;;  %v700_v59 = vpack.c.bf16 %v881_v29, %v699_v56  ;;  %v377_v60 = vld [vmem:[#allocation0 + $0x88] sm:$0x3] }
  0xb2   :  { %822 = vst [vmem:[%s1219_s1 + $0x33] sm:$0x1] %v616_v47  ;;  %v391_v61 = vld [vmem:[#allocation0 + $0x98] sm:$0x3]  ;;  %v405_v62 = vld [vmem:[#allocation0 + $0xa8] sm:$0x3]  ;;  %v378_v63 = vpack.c.bf16 %v881_v29, %v377_v60 }
  0xb3   :  { %824 = vst [vmem:[%s1219_s1 + $0x35] sm:$0x1] %v630_v51  ;;  %826 = vst [vmem:[%s1219_s1 + $0x37] sm:$0x1] %v644_v52  ;;  %v392_v0 = vpack.c.bf16 %v881_v29, %v391_v61  ;;  %v406_v1 = vpack.c.bf16 %v881_v29, %v405_v62  ;;  %v419_v2 = vld [vmem:[#allocation0 + $0xb8] sm:$0x3] }
  0xb4   :  { %828 = vst [vmem:[%s1219_s1 + $0x39] sm:$0x1] %v658_v53  ;;  %v433_v3 = vld [vmem:[#allocation0 + $0xc8] sm:$0x3]  ;;  %v447_v4 = vld [vmem:[#allocation0 + $0xd8] sm:$0x3]  ;;  %v420_v5 = vpack.c.bf16 %v881_v29, %v419_v2 }
  0xb5   :  { %830 = vst [vmem:[%s1219_s1 + $0x3b] sm:$0x1] %v672_v57  ;;  %832 = vst [vmem:[%s1219_s1 + $0x3d] sm:$0x1] %v686_v58  ;;  %v434_v6 = vpack.c.bf16 %v881_v29, %v433_v3  ;;  %v448_v7 = vpack.c.bf16 %v881_v29, %v447_v4  ;;  %v461_v8 = vld [vmem:[#allocation0 + $0xe8] sm:$0x3] }
  0xb6   :  { %834 = vst [vmem:[%s1219_s1 + $0x3f] sm:$0x1] %v700_v59  ;;  %v475_v9 = vld [vmem:[#allocation0 + $0xf8] sm:$0x3]  ;;  %v266_v10 = vld [vmem:[#allocation0 + $0x8] sm:$0x3]  ;;  %v462_v11 = vpack.c.bf16 %v881_v29, %v461_v8 }
  0xb7   :  { %788 = vst [vmem:[%s1219_s1 + $0x11] sm:$0x1] %v378_v63  ;;  %790 = vst [vmem:[%s1219_s1 + $0x13] sm:$0x1] %v392_v0  ;;  %v476_v12 = vpack.c.bf16 %v881_v29, %v475_v9  ;;  %v267_v13 = vpack.c.bf16 %v881_v29, %v266_v10  ;;  %v279_v14 = vld [vmem:[#allocation0 + $0x18] sm:$0x3] }
  0xb8   :  { %792 = vst [vmem:[%s1219_s1 + $0x15] sm:$0x1] %v406_v1  ;;  %v293_v15 = vld [vmem:[#allocation0 + $0x28] sm:$0x3]  ;;  %v307_v16 = vld [vmem:[#allocation0 + $0x38] sm:$0x3]  ;;  %v280_v17 = vpack.c.bf16 %v881_v29, %v279_v14 }
  0xb9   :  { %794 = vst [vmem:[%s1219_s1 + $0x17] sm:$0x1] %v420_v5  ;;  %796 = vst [vmem:[%s1219_s1 + $0x19] sm:$0x1] %v434_v6  ;;  %v294_v18 = vpack.c.bf16 %v881_v29, %v293_v15  ;;  %v308_v19 = vpack.c.bf16 %v881_v29, %v307_v16  ;;  %v321_v20 = vld [vmem:[#allocation0 + $0x48] sm:$0x3] }
  0xba   :  { %798 = vst [vmem:[%s1219_s1 + $0x1b] sm:$0x1] %v448_v7  ;;  %v335_v21 = vld [vmem:[#allocation0 + $0x58] sm:$0x3]  ;;  %v349_v22 = vld [vmem:[#allocation0 + $0x68] sm:$0x3]  ;;  %v322_v23 = vpack.c.bf16 %v881_v29, %v321_v20 }
  0xbb   :  { %800 = vst [vmem:[%s1219_s1 + $0x1d] sm:$0x1] %v462_v11  ;;  %802 = vst [vmem:[%s1219_s1 + $0x1f] sm:$0x1] %v476_v12  ;;  %v336_v24 = vpack.c.bf16 %v881_v29, %v335_v21  ;;  %v350_v25 = vpack.c.bf16 %v881_v29, %v349_v22  ;;  %v363_v26 = vld [vmem:[#allocation0 + $0x78] sm:$0x3] }
  0xbc   :  { %772 = vst [vmem:[%s1219_s1 + $0x1] sm:$0x1] %v267_v13  ;;  %774 = vst [vmem:[%s1219_s1 + $0x3] sm:$0x1] %v280_v17  ;;  %v364_v29 = vpack.c.bf16 %v881_v29, %v363_v26 }
  0xbd   :  { %776 = vst [vmem:[%s1219_s1 + $0x5] sm:$0x1] %v294_v18  ;;  %778 = vst [vmem:[%s1219_s1 + $0x7] sm:$0x1] %v308_v19 }
  0xbe   :  { %780 = vst [vmem:[%s1219_s1 + $0x9] sm:$0x1] %v322_v23  ;;  %782 = vst [vmem:[%s1219_s1 + $0xb] sm:$0x1] %v336_v24 }
  0xbf   :  { %784 = vst [vmem:[%s1219_s1 + $0xd] sm:$0x1] %v350_v25  ;;  %786 = vst [vmem:[%s1219_s1 + $0xf] sm:$0x1] %v364_v29 }

// kernel: netG_forward.8
= control target key start
LH: loop header
LB: loop body
LE: loop exit
PB: predicated region body
PF: predicated region fallthrough
CT: control target
= control target key end

     0   :  { %vm590_vm2 = vcmask 519168   ;;  %s1043_s1 = inlined_call_operand.vmem [shape: bf16[1,512,64], index: 1, kind: input, shape index: {}]   ;;  %s1044_s0 = inlined_call_operand.vmem [shape: bf16[1,64,512], index: 0, kind: input, shape index: {}]   ;;  %s1045_s2 = inlined_call_operand.vmem [shape: bf16[1,64,64], index: 2, kind: output, shape index: {}]  }
   0x1   :  { %v755_v0 = vld [vmem:[%s1043_s1 + $0x40] sm:$0xff]   ;;  %v759_v4 = vld [vmem:[%s1043_s1 + $0x48] sm:$0xff]   ;;  %v763_v8 = vld [vmem:[%s1043_s1 + $0x50] sm:$0xff]  }
   0x2   :  { %v756_v1 = vld [vmem:[%s1043_s1 + $0xc0] sm:$0xff]   ;;  %675 = vmatprep.subr.bf16.mxu0 %v755_v0  ;;  %v760_v5 = vld [vmem:[%s1043_s1 + $0xc8] sm:$0xff]   ;;  %v764_v9 = vld [vmem:[%s1043_s1 + $0xd0] sm:$0xff]  }
   0x3   :  { %v757_v2 = vld [vmem:[%s1043_s1] sm:$0xff]   ;;  %715 = vmatprep.subr.bf16.mxu1 %v756_v1  ;;  %v761_v6 = vld [vmem:[%s1043_s1 + $0x8] sm:$0xff]   ;;  %v765_v10 = vld [vmem:[%s1043_s1 + $0x10] sm:$0xff]  }
   0x4   :  { %v758_v3 = vld [vmem:[%s1043_s1 + $0x80] sm:$0xff]   ;;  %676 = vmatpush3.bf16.msra.mxu0 %v757_v2  ;;  %v762_v7 = vld [vmem:[%s1043_s1 + $0x88] sm:$0xff]   ;;  %v766_v11 = vld [vmem:[%s1043_s1 + $0x90] sm:$0xff]  }
   0x5   :  { %716 = vmatpush3.bf16.msra.mxu1 %v758_v3  ;;  %677 = vmatprep.subr.bf16.mxu0 %v759_v4  ;;  %v767_v12 = vld [vmem:[%s1043_s1 + $0x58] sm:$0xff]   ;;  %v771_v16 = vld [vmem:[%s1043_s1 + $0x60] sm:$0xff]   ;;  %v775_v20 = vld [vmem:[%s1043_s1 + $0x68] sm:$0xff]  }
   0x6   :  { %717 = vmatprep.subr.bf16.mxu1 %v760_v5  ;;  %v768_v13 = vld [vmem:[%s1043_s1 + $0xd8] sm:$0xff]   ;;  %v772_v17 = vld [vmem:[%s1043_s1 + $0xe0] sm:$0xff]   ;;  %v776_v21 = vld [vmem:[%s1043_s1 + $0xe8] sm:$0xff]  }
   0x7   :  { %v769_v14 = vld [vmem:[%s1043_s1 + $0x18] sm:$0xff]   ;;  %v773_v18 = vld [vmem:[%s1043_s1 + $0x20] sm:$0xff]   ;;  %v777_v22 = vld [vmem:[%s1043_s1 + $0x28] sm:$0xff]  }
   0x8   :  { %678 = vmatpush3.bf16.msra.mxu0 %v761_v6  ;;  %v770_v15 = vld [vmem:[%s1043_s1 + $0x98] sm:$0xff]   ;;  %v774_v19 = vld [vmem:[%s1043_s1 + $0xa0] sm:$0xff]   ;;  %v778_v23 = vld [vmem:[%s1043_s1 + $0xa8] sm:$0xff]  }
   0x9   :  { %718 = vmatpush3.bf16.msra.mxu1 %v762_v7  ;;  %679 = vmatprep.subr.bf16.mxu0 %v763_v8  ;;  %v779_v24 = vld [vmem:[%s1043_s1 + $0x70] sm:$0xff]   ;;  %v783_v28 = vld [vmem:[%s1043_s1 + $0x78] sm:$0xff]  }
   0xa   :  { %719 = vmatprep.subr.bf16.mxu1 %v764_v9  ;;  %v780_v25 = vld [vmem:[%s1043_s1 + $0xf0] sm:$0xff]   ;;  %v784_v29 = vld [vmem:[%s1043_s1 + $0xf8] sm:$0xff]  }
   0xb   :  { %v781_v26 = vld [vmem:[%s1043_s1 + $0x30] sm:$0xff]   ;;  %v785_v30 = vld [vmem:[%s1043_s1 + $0x38] sm:$0xff]  }
   0xc   :  { %680 = vmatpush3.bf16.msra.mxu0 %v765_v10  ;;  %v782_v27 = vld [vmem:[%s1043_s1 + $0xb0] sm:$0xff]   ;;  %v786_v31 = vld [vmem:[%s1043_s1 + $0xb8] sm:$0xff]  }
   0xd   :  { %720 = vmatpush3.bf16.msra.mxu1 %v766_v11  ;;  %681 = vmatprep.subr.bf16.mxu0 %v767_v12  ;;  %v787_v32 = vld [vmem:[%s1044_s0] ss:$16 sps:$4 sm:$0xff]   ;;  %v789_v33 = vld [vmem:[%s1044_s0 + $0x4] ss:$16 sps:$4 sm:$0xff]   ;;  %v790_v34 = vld [vmem:[%s1044_s0 + $0x8] ss:$16 sps:$4 sm:$0xff]  }
   0xe   :  { %721 = vmatprep.subr.bf16.mxu1 %v768_v13  ;;  %v792_v35 = vld [vmem:[%s1044_s0 + $0xc] ss:$16 sps:$4 sm:$0xff]   ;;  %396 = vmatprep.mubr.bf16.mxu0 %v789_v33  ;;  %v793_v36 = vld [vmem:[%s1044_s0 + $0x24] ss:$16 sps:$4 sm:$0xff]   ;;  %v797_v38 = vld [vmem:[%s1044_s0 + $0x20] ss:$16 sps:$4 sm:$0xff]  }
   0xf   :  { %461 = vmatprep.mubr.bf16.mxu1 %v792_v35  ;;  %v795_v37 = vld [vmem:[%s1044_s0 + $0x2c] ss:$16 sps:$4 sm:$0xff]   ;;  %v798_v39 = vld [vmem:[%s1044_s0 + $0x28] ss:$16 sps:$4 sm:$0xff]   ;;  %v799_v40 = vld [vmem:[%s1044_s0 + $0x44] ss:$16 sps:$4 sm:$0xff]  }
  0x10   :  { %682 = vmatpush3.bf16.msra.mxu0 %v769_v14  ;;  %v801_v41 = vld [vmem:[%s1044_s0 + $0x4c] ss:$16 sps:$4 sm:$0xff]   ;;  %v803_v42 = vld [vmem:[%s1044_s0 + $0x40] ss:$16 sps:$4 sm:$0xff]   ;;  %v804_v43 = vld [vmem:[%s1044_s0 + $0x48] ss:$16 sps:$4 sm:$0xff]  }
  0x11   :  { %722 = vmatpush3.bf16.msra.mxu1 %v770_v15  ;;  %683 = vmatprep.subr.bf16.mxu0 %v771_v16  ;;  %v805_v44 = vld [vmem:[%s1044_s0 + $0x64] ss:$16 sps:$4 sm:$0xff]   ;;  %v807_v45 = vld [vmem:[%s1044_s0 + $0x6c] ss:$16 sps:$4 sm:$0xff]   ;;  %v809_v46 = vld [vmem:[%s1044_s0 + $0x60] ss:$16 sps:$4 sm:$0xff]  }
  0x12   :  { %723 = vmatprep.subr.bf16.mxu1 %v772_v17  ;;  %v810_v47 = vld [vmem:[%s1044_s0 + $0x68] ss:$16 sps:$4 sm:$0xff]  }
  0x14   :  { %684 = vmatpush3.bf16.msra.mxu0 %v773_v18 }
  0x15   :  { %724 = vmatpush3.bf16.msra.mxu1 %v774_v19  ;;  %685 = vmatprep.subr.bf16.mxu0 %v775_v20 }
  0x16   :  { %725 = vmatprep.subr.bf16.mxu1 %v776_v21 }
  0x18   :  { %686 = vmatpush3.bf16.msra.mxu0 %v777_v22 }
  0x19   :  { %726 = vmatpush3.bf16.msra.mxu1 %v778_v23  ;;  %687 = vmatprep.subr.bf16.mxu0 %v779_v24 }
  0x1a   :  { %727 = vmatprep.subr.bf16.mxu1 %v780_v25 }
  0x1c   :  { %688 = vmatpush3.bf16.msra.mxu0 %v781_v26 }
  0x1d   :  { %728 = vmatpush3.bf16.msra.mxu1 %v782_v27  ;;  %689 = vmatprep.subr.bf16.mxu0 %v783_v28 }
  0x1e   :  { %729 = vmatprep.subr.bf16.mxu1 %v784_v29 }
  0x20   :  { %690 = vmatpush3.bf16.msra.mxu0 %v785_v30 }
  0x21   :  { %730 = vmatpush3.bf16.msra.mxu1 %v786_v31 }
  0x23   :  { %397 = vmatmul.mubr.bf16.vlgmr.msra.gmra.mrb[0].mxu0 %v787_v32 }
  0x24   :  { %462 = vmatmul.mubr.bf16.vlgmr.msra.gmra.mrb[0].mxu1 %v790_v34  ;;  %404 = vmatprep.mubr.bf16.mxu0 %v793_v36 }
  0x25   :  { %469 = vmatprep.mubr.bf16.mxu1 %v795_v37 }
  0x2b   :  { %405 = vmatmul.mubr.bf16.gmra.mrb[4].mxu0 %v797_v38 }
  0x2c   :  { %470 = vmatmul.mubr.bf16.gmra.mrb[4].mxu1 %v798_v39  ;;  %412 = vmatprep.mubr.bf16.mxu0 %v799_v40 }
  0x2d   :  { %477 = vmatprep.mubr.bf16.mxu1 %v801_v41 }
  0x33   :  { %413 = vmatmul.mubr.bf16.gmra.mrb[8].mxu0 %v803_v42 }
  0x34   :  { %478 = vmatmul.mubr.bf16.gmra.mrb[8].mxu1 %v804_v43  ;;  %420 = vmatprep.mubr.bf16.mxu0 %v805_v44 }
  0x35   :  { %485 = vmatprep.mubr.bf16.mxu1 %v807_v45 }
  0x3b   :  { %421 = vmatmul.mubr.bf16.gmra.mrb[12].mxu0 %v809_v46 }
  0x3c   :  { %486 = vmatmul.mubr.bf16.gmra.mrb[12].mxu1 %v810_v47 }
  0xf6   :  { %v691_v48 = vpop.f32.mrb[0].mxu0 }
  0xf7   :  { %v731_v49 = vpop.f32.mrb[0].mxu1  ;;  %v692_v50 = vpop.f32.mrb[1].mxu0 }
  0xf8   :  { %v693_v51 = vadd.f32 %v692_v50, %v691_v48  ;;  %v732_v52 = vpop.f32.mrb[1].mxu1  ;;  %v694_v53 = vpop.f32.mrb[2].mxu0 }
  0xf9   :  { %v733_v54 = vadd.f32 %v732_v52, %v731_v49  ;;  %v734_v55 = vpop.f32.mrb[2].mxu1  ;;  %v695_v56 = vpop.f32.mrb[3].mxu0 }
  0xfa   :  { %v696_v57 = vadd.f32 %v695_v56, %v694_v53  ;;  %v735_v58 = vpop.f32.mrb[3].mxu1 }
  0xfb   :  { %v464_v59 = vadd.f32 %v733_v54, %v693_v51  ;;  %v736_v60 = vadd.f32 %v735_v58, %v734_v55 }
  0xfd   :  { %v494_v61 = vmin.f32 %v464_v59, 0.0  ;;  %v986_v62 = vadd.f32 %v736_v60, %v696_v57  ;;  %vm534_vm0 = vcmp.gt.f32.partialorder %v464_v59, 0.0 }
  0xfe   :  { %v697_v63 = vpop.f32.mrb[4].mxu0 }
  0xff   :  { %v502_v0 = vmul.f32 1.442695, %v494_v61  ;;  %v495_v1 = vmin.f32 %v986_v62, 0.0  ;;  %v737_v2 = vpop.f32.mrb[4].mxu1  ;;  %v698_v3 = vpop.f32.mrb[5].mxu0  ;;  %vm535_vm1 = vcmp.gt.f32.partialorder %v986_v62, 0.0 }
 0x100   :  { %v699_v4 = vadd.f32 %v698_v3, %v697_v63  ;;  %v738_v5 = vpop.f32.mrb[5].mxu1  ;;  %v700_v6 = vpop.f32.mrb[6].mxu0 }
 0x101   :  { %811 = vpow2.f32 %v502_v0  ;;  %v504_v7 = vmul.f32 1.442695, %v495_v1  ;;  %v739_v8 = vadd.f32 %v738_v5, %v737_v2  ;;  %v740_v9 = vpop.f32.mrb[6].mxu1  ;;  %v701_v10 = vpop.f32.mrb[7].mxu0 }
 0x102   :  { %v702_v11 = vadd.f32 %v701_v10, %v700_v6  ;;  %v741_v12 = vpop.f32.mrb[7].mxu1 }
 0x103   :  { %813 = vpow2.f32 %v504_v7  ;;  %v989_v13 = vadd.f32 %v739_v8, %v699_v4  ;;  %v742_v14 = vadd.f32 %v741_v12, %v740_v9 }
 0x105   :  { %v496_v15 = vmin.f32 %v989_v13, 0.0  ;;  %v992_v16 = vadd.f32 %v742_v14, %v702_v11  ;;  %vm536_vm3 = vcmp.gt.f32.partialorder %v989_v13, 0.0 }
 0x106   :  { %v703_v17 = vpop.f32.mrb[8].mxu0 }
 0x107   :  { %v506_v18 = vmul.f32 1.442695, %v496_v15  ;;  %v497_v19 = vmin.f32 %v992_v16, 0.0  ;;  %v743_v20 = vpop.f32.mrb[8].mxu1  ;;  %v704_v21 = vpop.f32.mrb[9].mxu0  ;;  %vm537_vm4 = vcmp.gt.f32.partialorder %v992_v16, 0.0 }
 0x108   :  { %v705_v22 = vadd.f32 %v704_v21, %v703_v17  ;;  %v744_v23 = vpop.f32.mrb[9].mxu1  ;;  %v706_v24 = vpop.f32.mrb[10].mxu0 }
 0x109   :  { %815 = vpow2.f32 %v506_v18  ;;  %v508_v25 = vmul.f32 1.442695, %v497_v19  ;;  %v745_v26 = vadd.f32 %v744_v23, %v743_v20  ;;  %v746_v27 = vpop.f32.mrb[10].mxu1  ;;  %v707_v28 = vpop.f32.mrb[11].mxu0 }
 0x10a   :  { %v708_v29 = vadd.f32 %v707_v28, %v706_v24  ;;  %v747_v30 = vpop.f32.mrb[11].mxu1 }
 0x10b   :  { %v812_v31 = vpop.eup %811  ;;  %817 = vpow2.f32 %v508_v25  ;;  %v995_v32 = vadd.f32 %v745_v26, %v705_v22  ;;  %v748_v33 = vadd.f32 %v747_v30, %v746_v27 }
 0x10c   :  { %v651_v34 = vadd.f32 -1.0, %v812_v31 }
 0x10d   :  { %v814_v35 = vpop.eup %813  ;;  %v498_v36 = vmin.f32 %v995_v32, 0.0  ;;  %v998_v37 = vadd.f32 %v748_v33, %v708_v29  ;;  %vm538_vm5 = vcmp.gt.f32.partialorder %v995_v32, 0.0 }
 0x10e   :  { %v526_v38 = vmul.f32 1.6732632, %v651_v34  ;;  %v652_v39 = vadd.f32 -1.0, %v814_v35  ;;  %v709_v40 = vpop.f32.mrb[12].mxu0 }
 0x10f   :  { %v510_v41 = vmul.f32 1.442695, %v498_v36  ;;  %v499_v42 = vmin.f32 %v998_v37, 0.0  ;;  %v749_v43 = vpop.f32.mrb[12].mxu1  ;;  %v710_v44 = vpop.f32.mrb[13].mxu0  ;;  %vm539_vm6 = vcmp.gt.f32.partialorder %v998_v37, 0.0 }
 0x110   :  { %v542_v45 = vsel %vm534_vm0, %v464_v59, %v526_v38  ;;  %v527_v46 = vmul.f32 1.6732632, %v652_v39  ;;  %v711_v47 = vadd.f32 %v710_v44, %v709_v40  ;;  %v750_v48 = vpop.f32.mrb[13].mxu1  ;;  %v712_v49 = vpop.f32.mrb[14].mxu0 }
 0x111   :  { %v550_v50 = vmul.f32 1.050701, %v542_v45  ;;  %819 = vpow2.f32 %v510_v41  ;;  %v512_v51 = vmul.f32 1.442695, %v499_v42  ;;  %v751_v52 = vadd.f32 %v750_v48, %v749_v43  ;;  %v752_v53 = vpop.f32.mrb[14].mxu1  ;;  %v713_v54 = vpop.f32.mrb[15].mxu0 }
 0x112   :  { %v543_v55 = vsel %vm535_vm1, %v986_v62, %v527_v46  ;;  %v714_v56 = vadd.f32 %v713_v54, %v712_v49  ;;  %v753_v57 = vpop.f32.mrb[15].mxu1 }
 0x113   :  { %v816_v58 = vpop.eup %815  ;;  %v667_v60 = vpack.c.bf16 %v550_v50, %v550_v50  ;;  %v551_v59 = vmul.f32 1.050701, %v543_v55  ;;  %821 = vpow2.f32 %v512_v51  ;;  %v488_v61 = vadd.f32 %v751_v52, %v711_v47 }
 0x114   :  { %v653_v63 = vadd.f32 -1.0, %v816_v58  ;;  %v754_v0 = vadd.f32 %v753_v57, %v752_v53 }
 0x115   :  { %v818_v1 = vpop.eup %817  ;;  %591 = vst.msk [vmem:[%s1045_s2] sm:$0xf] %vm590_vm2, %v667_v60  ;;  %v668_v2 = vpack.c.bf16 %v551_v59, %v551_v59  ;;  %v500_v3 = vmin.f32 %v488_v61, 0.0  ;;  %vm540_vm7 = vcmp.gt.f32.partialorder %v488_v61, 0.0 }
 0x116   :  { %v528_v4 = vmul.f32 1.6732632, %v653_v63  ;;  %v654_v5 = vadd.f32 -1.0, %v818_v1  ;;  %v491_v62 = vadd.f32 %v754_v0, %v714_v56 }
 0x117   :  { %592 = vst.msk [vmem:[%s1045_s2 + $0x4] sm:$0xf] %vm590_vm2, %v668_v2  ;;  %v514_v6 = vmul.f32 1.442695, %v500_v3 }
 0x118   :  { %v544_v7 = vsel %vm536_vm3, %v989_v13, %v528_v4  ;;  %v529_v8 = vmul.f32 1.6732632, %v654_v5  ;;  %v501_v9 = vmin.f32 %v491_v62, 0.0  ;;  %vm541_vm8 = vcmp.gt.f32.partialorder %v491_v62, 0.0 }
 0x119   :  { %v552_v10 = vmul.f32 1.050701, %v544_v7  ;;  %823 = vpow2.f32 %v514_v6 }
 0x11a   :  { %v545_v11 = vsel %vm537_vm4, %v992_v16, %v529_v8  ;;  %v516_v12 = vmul.f32 1.442695, %v501_v9 }
 0x11b   :  { %v820_v14 = vpop.eup %819  ;;  %v669_v15 = vpack.c.bf16 %v552_v10, %v552_v10  ;;  %v553_v17 = vmul.f32 1.050701, %v545_v11 }
 0x11c   :  { %v655_v18 = vadd.f32 -1.0, %v820_v14  ;;  %825 = vpow2.f32 %v516_v12 }
 0x11d   :  { %v822_v19 = vpop.eup %821  ;;  %593 = vst.msk [vmem:[%s1045_s2 + $0x8] sm:$0xf] %vm590_vm2, %v669_v15  ;;  %v670_v13 = vpack.c.bf16 %v553_v17, %v553_v17 }
 0x11e   :  { %v530_v20 = vmul.f32 1.6732632, %v655_v18  ;;  %v656_v21 = vadd.f32 -1.0, %v822_v19 }
 0x11f   :  { %594 = vst.msk [vmem:[%s1045_s2 + $0xc] sm:$0xf] %vm590_vm2, %v670_v13 }
 0x120   :  { %v546_v16 = vsel %vm538_vm5, %v995_v32, %v530_v20  ;;  %v531_v22 = vmul.f32 1.6732632, %v656_v21 }
 0x121   :  { %v554_v23 = vmul.f32 1.050701, %v546_v16 }
 0x122   :  { %v547_v24 = vsel %vm539_vm6, %v998_v37, %v531_v22 }
 0x123   :  { %v824_v25 = vpop.eup %823  ;;  %v671_v26 = vpack.c.bf16 %v554_v23, %v554_v23  ;;  %v555_v27 = vmul.f32 1.050701, %v547_v24 }
 0x124   :  { %v657_v28 = vadd.f32 -1.0, %v824_v25 }
 0x125   :  { %595 = vst.msk [vmem:[%s1045_s2 + $0x10] sm:$0xf] %vm590_vm2, %v671_v26  ;;  %v672_v29 = vpack.c.bf16 %v555_v27, %v555_v27 }
 0x126   :  { %v826_v30 = vpop.eup %825  ;;  %v532_v31 = vmul.f32 1.6732632, %v657_v28 }
 0x127   :  { %596 = vst.msk [vmem:[%s1045_s2 + $0x14] sm:$0xf] %vm590_vm2, %v672_v29  ;;  %v658_v32 = vadd.f32 -1.0, %v826_v30 }
 0x128   :  { %v548_v33 = vsel %vm540_vm7, %v488_v61, %v532_v31 }
 0x129   :  { %v556_v34 = vmul.f32 1.050701, %v548_v33  ;;  %v533_v35 = vmul.f32 1.6732632, %v658_v32 }
 0x12b   :  { %v673_v36 = vpack.c.bf16 %v556_v34, %v556_v34  ;;  %v549_v37 = vsel %vm541_vm8, %v491_v62, %v533_v35 }
 0x12c   :  { %v557_v38 = vmul.f32 1.050701, %v549_v37 }
 0x12d   :  { %597 = vst.msk [vmem:[%s1045_s2 + $0x18] sm:$0xf] %vm590_vm2, %v673_v36 }
 0x12e   :  { %v674_v39 = vpack.c.bf16 %v557_v38, %v557_v38 }
 0x130   :  { %598 = vst.msk [vmem:[%s1045_s2 + $0x1c] sm:$0xf] %vm590_vm2, %v674_v39 }

// kernel: netG_forward.12
= control target key start
LH: loop header
LB: loop body
LE: loop exit
PB: predicated region body
PF: predicated region fallthrough
CT: control target
= control target key end

     0   :  { %v467_v0 = vmov 0.0   ;;  %vm468_vm0 = vmmov 0   ;;  %vm309_vm2 = vcmask 257024   ;;  %s613_s1 = inlined_call_operand.vmem [shape: bf16[1,128,32], index: 1, kind: input, shape index: {}]   ;;  %s614_s0 = inlined_call_operand.vmem [shape: bf16[1,80,128], index: 0, kind: input, shape index: {}]   ;;  %s615_s2 = inlined_call_operand.vmem [shape: bf16[1,80,32], index: 2, kind: output, shape index: {}]  }
   0x1   :  { %380 = vmatprep.subr.bf16.mxu0 %v467_v0  ;;  %416 = vmatprep.subr.bf16.mxu1 %v467_v0  ;;  %v434_v1 = vld [vmem:[%s613_s1] sm:$0xff]   ;;  %v435_v2 = vld [vmem:[%s613_s1 + $0x8] sm:$0xff]   ;;  %v436_v3 = vld [vmem:[%s613_s1 + $0x10] sm:$0xff]  }
   0x2   :  { %396 = vmatprep.mubr.msk.bf16.mxu0 %vm468_vm0, %v467_v0  ;;  %408 = vmatprep.mubr.msk.bf16.mxu1 %vm468_vm0, %v467_v0  ;;  %v437_v4 = vld [vmem:[%s613_s1 + $0x18] sm:$0xff]   ;;  %v438_v5 = vld [vmem:[%s613_s1 + $0x20] sm:$0xff]   ;;  %v439_v6 = vld [vmem:[%s613_s1 + $0x28] sm:$0xff]  }
   0x3   :  { %381 = vmatpush3.bf16.msra.mxu0 %v434_v1  ;;  %424 = vmatpush3.bf16.msra.mxu1 %v434_v1  ;;  %v440_v7 = vld [vmem:[%s613_s1 + $0x30] sm:$0xff]   ;;  %v441_v8 = vld [vmem:[%s613_s1 + $0x38] sm:$0xff]   ;;  %v442_v9 = vld [vmem:[%s614_s0] sm:$0xff]  }
   0x4   :  { %382 = vmatprep.subr.bf16.mxu0 %v467_v0  ;;  %417 = vmatprep.subr.bf16.mxu1 %v467_v0  ;;  %v443_v10 = vld [vmem:[%s614_s0 + $0x18] sm:$0xff]   ;;  %v444_v11 = vld [vmem:[%s614_s0 + $0x8] sm:$0xff]   ;;  %v445_v12 = vld [vmem:[%s614_s0 + $0x20] sm:$0xff]  }
   0x5   :  { %v446_v13 = vld [vmem:[%s614_s0 + $0x10] sm:$0xff]  }
   0x7   :  { %383 = vmatpush3.bf16.msra.mxu0 %v435_v2  ;;  %425 = vmatpush3.bf16.msra.mxu1 %v435_v2 }
   0x8   :  { %384 = vmatprep.subr.bf16.mxu0 %v467_v0  ;;  %418 = vmatprep.subr.bf16.mxu1 %v467_v0 }
   0xb   :  { %385 = vmatpush3.bf16.msra.mxu0 %v436_v3  ;;  %426 = vmatpush3.bf16.msra.mxu1 %v436_v3 }
   0xc   :  { %386 = vmatprep.subr.bf16.mxu0 %v467_v0  ;;  %419 = vmatprep.subr.bf16.mxu1 %v467_v0 }
   0xf   :  { %387 = vmatpush3.bf16.msra.mxu0 %v437_v4  ;;  %427 = vmatpush3.bf16.msra.mxu1 %v437_v4 }
  0x10   :  { %388 = vmatprep.subr.bf16.mxu0 %v467_v0  ;;  %420 = vmatprep.subr.bf16.mxu1 %v467_v0 }
  0x13   :  { %389 = vmatpush3.bf16.msra.mxu0 %v438_v5  ;;  %428 = vmatpush3.bf16.msra.mxu1 %v438_v5 }
  0x14   :  { %390 = vmatprep.subr.bf16.mxu0 %v467_v0  ;;  %421 = vmatprep.subr.bf16.mxu1 %v467_v0 }
  0x17   :  { %391 = vmatpush3.bf16.msra.mxu0 %v439_v6  ;;  %429 = vmatpush3.bf16.msra.mxu1 %v439_v6 }
  0x18   :  { %392 = vmatprep.subr.bf16.mxu0 %v467_v0  ;;  %422 = vmatprep.subr.bf16.mxu1 %v467_v0 }
  0x1b   :  { %393 = vmatpush3.bf16.msra.mxu0 %v440_v7  ;;  %430 = vmatpush3.bf16.msra.mxu1 %v440_v7 }
  0x1c   :  { %394 = vmatprep.subr.bf16.mxu0 %v467_v0  ;;  %423 = vmatprep.subr.bf16.mxu1 %v467_v0 }
  0x1f   :  { %395 = vmatpush3.bf16.msra.mxu0 %v441_v8  ;;  %431 = vmatpush3.bf16.msra.mxu1 %v441_v8 }
  0x22   :  { %397 = vmatmul.mubr.bf16.vlgmr.msra.gmra.mrb[0].mxu0 %v442_v9  ;;  %409 = vmatmul.mubr.bf16.vlgmr.msra.gmra.mrb[0].mxu1 %v443_v10 }
  0x23   :  { %400 = vmatprep.mubr.msk.bf16.mxu0 %vm468_vm0, %v467_v0  ;;  %412 = vmatprep.mubr.msk.bf16.mxu1 %vm468_vm0, %v467_v0 }
  0x2a   :  { %401 = vmatmul.mubr.bf16.gmra.mrb[4].mxu0 %v444_v11  ;;  %413 = vmatmul.mubr.bf16.gmra.mrb[4].mxu1 %v445_v12 }
  0x2b   :  { %404 = vmatprep.mubr.msk.bf16.mxu0 %vm468_vm0, %v467_v0 }
  0x32   :  { %405 = vmatmul.mubr.bf16.gmra.mrb[8].mxu0 %v446_v13 }
  0xf5   :  { %v150_v14 = vpop.f32.mrb[0].mxu0  ;;  %v528_v15 = vpop.f32.mrb[0].mxu1 }
  0xf6   :  { %v189_v16 = vmin.f32 %v150_v14, 0.0  ;;  %v195_v17 = vmin.f32 %v528_v15, 0.0  ;;  %v398_v18 = vpop.f32.mrb[1].mxu0  ;;  %v410_v19 = vpop.f32.mrb[1].mxu1  ;;  %vm239_vm1 = vcmp.gt.f32.partialorder %v150_v14, 0.0  ;;  %vm245_vm3 = vcmp.gt.f32.partialorder %v528_v15, 0.0 }
  0xf7   :  { %v531_v20 = vpop.f32.mrb[2].mxu0  ;;  %v533_v21 = vpop.f32.mrb[2].mxu1 }
  0xf8   :  { %v199_v22 = vmul.f32 1.442695, %v189_v16  ;;  %v211_v23 = vmul.f32 1.442695, %v195_v17  ;;  %v190_v24 = vmin.f32 %v531_v20, 0.0  ;;  %v196_v25 = vmin.f32 %v533_v21, 0.0 }
  0xf9   :  { %v399_v26 = vpop.f32.mrb[3].mxu0  ;;  %v411_v27 = vpop.f32.mrb[3].mxu1  ;;  %vm240_vm4 = vcmp.gt.f32.partialorder %v531_v20, 0.0  ;;  %vm246_vm5 = vcmp.gt.f32.partialorder %v533_v21, 0.0 }
  0xfa   :  { %447 = vpow2.f32 %v199_v22  ;;  %v201_v28 = vmul.f32 1.442695, %v190_v24  ;;  %v213_v29 = vmul.f32 1.442695, %v196_v25 }
  0xfb   :  { %449 = vpow2.f32 %v211_v23 }
  0xfc   :  { %451 = vpow2.f32 %v201_v28 }
  0xfd   :  { %453 = vpow2.f32 %v213_v29  ;;  %v537_v30 = vpop.f32.mrb[4].mxu0  ;;  %v539_v31 = vpop.f32.mrb[4].mxu1 }
  0xfe   :  { %v191_v32 = vmin.f32 %v537_v30, 0.0  ;;  %v197_v33 = vmin.f32 %v539_v31, 0.0  ;;  %v402_v34 = vpop.f32.mrb[5].mxu0  ;;  %v414_v35 = vpop.f32.mrb[5].mxu1  ;;  %vm241_vm6 = vcmp.gt.f32.partialorder %v537_v30, 0.0  ;;  %vm247_vm7 = vcmp.gt.f32.partialorder %v539_v31, 0.0 }
  0xff   :  { %v543_v36 = vpop.f32.mrb[6].mxu0  ;;  %v545_v37 = vpop.f32.mrb[6].mxu1 }
 0x100   :  { %v203_v38 = vmul.f32 1.442695, %v191_v32  ;;  %v215_v39 = vmul.f32 1.442695, %v197_v33  ;;  %v192_v40 = vmin.f32 %v543_v36, 0.0  ;;  %v198_v41 = vmin.f32 %v545_v37, 0.0 }
 0x101   :  { %v403_v42 = vpop.f32.mrb[7].mxu0  ;;  %v415_v43 = vpop.f32.mrb[7].mxu1  ;;  %vm242_vm8 = vcmp.gt.f32.partialorder %v543_v36, 0.0  ;;  %vm248_vm9 = vcmp.gt.f32.partialorder %v545_v37, 0.0 }
 0x102   :  { %455 = vpow2.f32 %v203_v38  ;;  %v205_v44 = vmul.f32 1.442695, %v192_v40  ;;  %v217_v45 = vmul.f32 1.442695, %v198_v41 }
 0x103   :  { %457 = vpow2.f32 %v215_v39 }
 0x104   :  { %v448_v46 = vpop.eup %447  ;;  %459 = vpow2.f32 %v205_v44 }
 0x105   :  { %v450_v47 = vpop.eup %449  ;;  %v337_v48 = vadd.f32 -1.0, %v448_v46  ;;  %461 = vpow2.f32 %v217_v45  ;;  %v549_v49 = vpop.f32.mrb[8].mxu0 }
 0x106   :  { %v452_v50 = vpop.eup %451  ;;  %v343_v51 = vadd.f32 -1.0, %v450_v47  ;;  %v193_v52 = vmin.f32 %v549_v49, 0.0  ;;  %v406_v53 = vpop.f32.mrb[9].mxu0  ;;  %vm243_vm10 = vcmp.gt.f32.partialorder %v549_v49, 0.0 }
 0x107   :  { %v454_v54 = vpop.eup %453  ;;  %v229_v55 = vmul.f32 1.6732632, %v337_v48  ;;  %v338_v56 = vadd.f32 -1.0, %v452_v50  ;;  %v552_v57 = vpop.f32.mrb[10].mxu0 }
 0x108   :  { %v235_v58 = vmul.f32 1.6732632, %v343_v51  ;;  %v344_v59 = vadd.f32 -1.0, %v454_v54  ;;  %v207_v60 = vmul.f32 1.442695, %v193_v52  ;;  %v194_v61 = vmin.f32 %v552_v57, 0.0 }
 0x109   :  { %v249_v62 = vsel %vm239_vm1, %v150_v14, %v229_v55  ;;  %v230_v63 = vmul.f32 1.6732632, %v338_v56  ;;  %v407_v0 = vpop.f32.mrb[11].mxu0  ;;  %vm244_vm11 = vcmp.gt.f32.partialorder %v552_v57, 0.0 }
 0x10a   :  { %v259_v1 = vmul.f32 1.050701, %v249_v62  ;;  %v255_v2 = vsel %vm245_vm3, %v528_v15, %v235_v58  ;;  %v236_v3 = vmul.f32 1.6732632, %v344_v59  ;;  %463 = vpow2.f32 %v207_v60 }
 0x10b   :  { %v265_v4 = vmul.f32 1.050701, %v255_v2  ;;  %v250_v5 = vsel %vm240_vm4, %v531_v20, %v230_v63  ;;  %v209_v6 = vmul.f32 1.442695, %v194_v61 }
 0x10c   :  { %v456_v7 = vpop.eup %455  ;;  %v357_v8 = vpack.c.bf16 %v259_v1, %v259_v1  ;;  %v260_v9 = vmul.f32 1.050701, %v250_v5  ;;  %v256_v10 = vsel %vm246_vm5, %v533_v21, %v236_v3 }
 0x10d   :  { %v458_v11 = vpop.eup %457  ;;  %v363_v12 = vpack.c.bf16 %v265_v4, %v265_v4  ;;  %v266_v13 = vmul.f32 1.050701, %v256_v10  ;;  %v339_v14 = vadd.f32 -1.0, %v456_v7  ;;  %465 = vpow2.f32 %v209_v6 }
 0x10e   :  { %v460_v16 = vpop.eup %459  ;;  %310 = vst.msk [vmem:[%s615_s2] sm:$0xf] %vm309_vm2, %v357_v8  ;;  %v358_v15 = vpack.c.bf16 %v260_v9, %v260_v9  ;;  %v345_v17 = vadd.f32 -1.0, %v458_v11 }
 0x10f   :  { %v462_v18 = vpop.eup %461  ;;  %316 = vst.msk [vmem:[%s615_s2 + $0x18] sm:$0xf] %vm309_vm2, %v363_v12  ;;  %v364_v19 = vpack.c.bf16 %v266_v13, %v266_v13  ;;  %v231_v20 = vmul.f32 1.6732632, %v339_v14  ;;  %v340_v21 = vadd.f32 -1.0, %v460_v16 }
 0x110   :  { %311 = vst.msk [vmem:[%s615_s2 + $0x4] sm:$0xf] %vm309_vm2, %v358_v15  ;;  %v237_v22 = vmul.f32 1.6732632, %v345_v17  ;;  %v346_v23 = vadd.f32 -1.0, %v462_v18 }
 0x111   :  { %317 = vst.msk [vmem:[%s615_s2 + $0x1c] sm:$0xf] %vm309_vm2, %v364_v19  ;;  %v251_v24 = vsel %vm241_vm6, %v537_v30, %v231_v20  ;;  %v232_v25 = vmul.f32 1.6732632, %v340_v21 }
 0x112   :  { %v261_v26 = vmul.f32 1.050701, %v251_v24  ;;  %v257_v27 = vsel %vm247_vm7, %v539_v31, %v237_v22  ;;  %v238_v28 = vmul.f32 1.6732632, %v346_v23 }
 0x113   :  { %v267_v29 = vmul.f32 1.050701, %v257_v27  ;;  %v252_v32 = vsel %vm242_vm8, %v543_v36, %v232_v25 }
 0x114   :  { %v464_v33 = vpop.eup %463  ;;  %v359_v34 = vpack.c.bf16 %v261_v26, %v261_v26  ;;  %v262_v35 = vmul.f32 1.050701, %v252_v32  ;;  %v258_v38 = vsel %vm248_vm9, %v545_v37, %v238_v28 }
 0x115   :  { %v365_v30 = vpack.c.bf16 %v267_v29, %v267_v29  ;;  %v268_v39 = vmul.f32 1.050701, %v258_v38  ;;  %v341_v40 = vadd.f32 -1.0, %v464_v33 }
 0x116   :  { %312 = vst.msk [vmem:[%s615_s2 + $0x8] sm:$0xf] %vm309_vm2, %v359_v34  ;;  %v360_v31 = vpack.c.bf16 %v262_v35, %v262_v35 }
 0x117   :  { %v466_v41 = vpop.eup %465  ;;  %318 = vst.msk [vmem:[%s615_s2 + $0x20] sm:$0xf] %vm309_vm2, %v365_v30  ;;  %v366_v36 = vpack.c.bf16 %v268_v39, %v268_v39  ;;  %v233_v42 = vmul.f32 1.6732632, %v341_v40 }
 0x118   :  { %313 = vst.msk [vmem:[%s615_s2 + $0xc] sm:$0xf] %vm309_vm2, %v360_v31  ;;  %v342_v37 = vadd.f32 -1.0, %v466_v41 }
 0x119   :  { %319 = vst.msk [vmem:[%s615_s2 + $0x24] sm:$0xf] %vm309_vm2, %v366_v36  ;;  %v253_v43 = vsel %vm243_vm10, %v549_v49, %v233_v42 }
 0x11a   :  { %v263_v44 = vmul.f32 1.050701, %v253_v43  ;;  %v234_v45 = vmul.f32 1.6732632, %v342_v37 }
 0x11c   :  { %v361_v46 = vpack.c.bf16 %v263_v44, %v263_v44  ;;  %v254_v47 = vsel %vm244_vm11, %v552_v57, %v234_v45 }
 0x11d   :  { %v264_v48 = vmul.f32 1.050701, %v254_v47 }
 0x11e   :  { %314 = vst.msk [vmem:[%s615_s2 + $0x10] sm:$0xf] %vm309_vm2, %v361_v46 }
 0x11f   :  { %v362_v50 = vpack.c.bf16 %v264_v48, %v264_v48 }
 0x121   :  { %315 = vst.msk [vmem:[%s615_s2 + $0x14] sm:$0xf] %vm309_vm2, %v362_v50 }

// kernel: squeeze.5
= control target key start
LH: loop header
LB: loop body
LE: loop exit
PB: predicated region body
PF: predicated region fallthrough
CT: control target
= control target key end

     0   :  { %vm242_vm0 = vcmask 261120   ;;  %s678_s0 = inlined_call_operand.vmem [shape: bf16[1,114,32], index: 0, kind: input, shape index: {}]   ;;  %s679_s1 = inlined_call_operand.vmem [shape: bf16[2,3,19,32], index: 1, kind: output, shape index: {}]  }
   0x1   :  { %v479_v0 = vld [vmem:[%s678_s0 + $0x38] sm:$0xf]  ;;  %v583_v1 = vld [vmem:[%s678_s0 + $0x30] sm:$0xff]   ;;  %v584_v2 = vld [vmem:[%s678_s0 + $0x28] sm:$0xff]  }
   0x2   :  { %v17_v3 = vunpack.c.l.bf16 %v479_v0  ;;  %v512_v4 = vunpack.c.l.bf16 %v583_v1  ;;  %v513_v5 = vunpack.c.h.bf16 %v583_v1  ;;  %v516_v6 = vunpack.c.l.bf16 %v584_v2  ;;  %v585_v7 = vld [vmem:[%s678_s0 + $0x20] sm:$0xff]   ;;  %v586_v8 = vld [vmem:[%s678_s0 + $0x18] sm:$0xff]   ;;  %v587_v9 = vld [vmem:[%s678_s0 + $0x10] sm:$0xff]  }
   0x3   :  { %v517_v10 = vunpack.c.h.bf16 %v584_v2  ;;  %v520_v11 = vunpack.c.l.bf16 %v585_v7  ;;  %v521_v12 = vunpack.c.h.bf16 %v585_v7  ;;  %v524_v13 = vunpack.c.l.bf16 %v586_v8  ;;  %v588_v14 = vld [vmem:[%s678_s0 + $0x8] sm:$0xff]   ;;  %v535_v15 = vld [vmem:[%s678_s0] sm:$0xff]  }
   0x4   :  { %20 = vst [vmem:[#allocation1 + $0x70] sm:$0xff] %v17_v3  ;;  %v525_v16 = vunpack.c.h.bf16 %v586_v8  ;;  %v528_v17 = vunpack.c.l.bf16 %v587_v9  ;;  %v529_v18 = vunpack.c.h.bf16 %v587_v9  ;;  %v532_v19 = vunpack.c.l.bf16 %v588_v14  ;;  %301 = vst.msk [vmem:[#allocation0 + $0x64] sm:$0xff] %vm242_vm0, %v516_v6  }
   0x5   :  { %313 = vst.msk [vmem:[#allocation0 + $0x79] sm:$0xff] %vm242_vm0, %v512_v4   ;;  %318 = vst.msk [vmem:[#allocation0 + $0x81] sm:$0xff] %vm242_vm0, %v513_v5   ;;  %v533_v20 = vunpack.c.h.bf16 %v588_v14  ;;  %v536_v21 = vunpack.c.l.bf16 %v535_v15  ;;  %v537_v22 = vunpack.c.h.bf16 %v535_v15 }
   0x6   :  { %277 = vst.msk [vmem:[#allocation0 + $0x3a] sm:$0xff] %vm242_vm0, %v524_v13   ;;  %289 = vst.msk [vmem:[#allocation0 + $0x4f] sm:$0xff] %vm242_vm0, %v520_v11  }
   0x7   :  { %294 = vst.msk [vmem:[#allocation0 + $0x57] sm:$0xf] %vm242_vm0, %v521_v12   ;;  %296 = vst.msk [vmem:[#allocation0 + $0x5c] sm:$0xf0] %vm242_vm0, %v521_v12  }
   0x8   :  { %306 = vst.msk [vmem:[#allocation0 + $0x6c] sm:$0x7f] %vm242_vm0, %v517_v10   ;;  %308 = vst.msk [vmem:[#allocation0 + $0x71] sm:$0x80] %vm242_vm0, %v517_v10  }
   0x9   :  { %253 = vst.msk [vmem:[#allocation0 + $0x10] sm:$0x7] %vm242_vm0, %v532_v19   ;;  %255 = vst.msk [vmem:[#allocation0 + $0x15] sm:$0xf8] %vm242_vm0, %v532_v19  }
   0xa   :  { %265 = vst.msk [vmem:[#allocation0 + $0x25] sm:$0x3f] %vm242_vm0, %v528_v17   ;;  %267 = vst.msk [vmem:[#allocation0 + $0x2a] sm:$0xc0] %vm242_vm0, %v528_v17  }
   0xb   :  { %272 = vst.msk [vmem:[#allocation0 + $0x32] sm:$0xff] %vm242_vm0, %v529_v18   ;;  %282 = vst.msk [vmem:[#allocation0 + $0x42] ss:$6 sm:$0x3] %vm242_vm0, %v525_v16   ;;  %v320_v23 = vld [vmem:[#allocation1 + $0x70] sm:$0x3]  }
   0xc   :  { %284 = vst.msk [vmem:[#allocation0 + $0x47] sm:$0xfc] %vm242_vm0, %v525_v16   ;;  %243 = vst.msk [vmem:[#allocation0] sm:$0xff] %vm242_vm0, %v536_v21   ;;  %v437_v47 = vld [vmem:[#allocation0 + $0x80] sm:$0xff] }
   0xd   :  { %248 = vst.msk [vmem:[#allocation0 + $0x8] sm:$0xff] %vm242_vm0, %v537_v22   ;;  %260 = vst.msk [vmem:[#allocation0 + $0x1d] sm:$0xff] %vm242_vm0, %v533_v20  }
   0xe   :  { %323 = vst.msk [vmem:[#allocation0 + $0x89] sm:$0x3] %vm242_vm0, %v320_v23   ;;  %v395_v24 = vld [vmem:[#allocation0 + $0x50] sm:$0xff]  ;;  %v402_v25 = vld [vmem:[#allocation0 + $0x58] sm:$0xff]  ;;  %v409_v26 = vld [vmem:[#allocation0 + $0x60] sm:$0xff] }
   0xf   :  { %v566_v30 = vpack.c.bf16 %v402_v25, %v395_v24  ;;  %v416_v42 = vld [vmem:[#allocation0 + $0x68] sm:$0xff]  ;;  %v423_v43 = vld [vmem:[#allocation0 + $0x70] sm:$0xff]  ;;  %v430_v46 = vld [vmem:[#allocation0 + $0x78] sm:$0xff] }
  0x10   :  { %v339_v27 = vld [vmem:[#allocation0 + $0x10] sm:$0xff]  ;;  %v571_v45 = vpack.c.bf16 %v416_v42, %v409_v26  ;;  %v576_v48 = vpack.c.bf16 %v430_v46, %v423_v43 }
  0x11   :  { %v360_v28 = vld [vmem:[#allocation0 + $0x28] sm:$0xff]  ;;  %593 = vst [vmem:[%s679_s1 + $0x28] sm:$0xff] %v566_v30  }
  0x12   :  { %v367_v29 = vld [vmem:[#allocation0 + $0x30] sm:$0xff]  ;;  %v374_v37 = vld [vmem:[#allocation0 + $0x38] sm:$0xff]  ;;  %v381_v38 = vld [vmem:[#allocation0 + $0x40] sm:$0xff]  ;;  %594 = vst [vmem:[%s679_s1 + $0x30] sm:$0xff] %v571_v45  }
  0x13   :  { %v328_v31 = vld [vmem:[#allocation0] sm:$0xff]  ;;  %v556_v40 = vpack.c.bf16 %v374_v37, %v367_v29  ;;  %v388_v41 = vld [vmem:[#allocation0 + $0x48] sm:$0xff]  ;;  %595 = vst [vmem:[%s679_s1 + $0x38] sm:$0xff] %v576_v48  }
  0x14   :  { %v333_v32 = vld [vmem:[#allocation0 + $0x8] sm:$0xff]  ;;  %v346_v33 = vld [vmem:[#allocation0 + $0x18] sm:$0xff]  ;;  %v353_v36 = vld [vmem:[#allocation0 + $0x20] sm:$0xff]  ;;  %v561_v44 = vpack.c.bf16 %v388_v41, %v381_v38 }
  0x15   :  { %v541_v34 = vpack.c.bf16 %v333_v32, %v328_v31  ;;  %v546_v35 = vpack.c.bf16 %v346_v33, %v339_v27  ;;  %v551_v39 = vpack.c.bf16 %v360_v28, %v353_v36  ;;  %591 = vst [vmem:[%s679_s1 + $0x18] sm:$0xff] %v556_v40   ;;  %v444_v49 = vld [vmem:[#allocation0 + $0x88] sm:$0xff] }
  0x16   :  { %592 = vst [vmem:[%s679_s1 + $0x20] sm:$0xff] %v561_v44   ;;  %v581_v50 = vpack.c.bf16 %v444_v49, %v437_v47 }
  0x17   :  { %542 = vst [vmem:[%s679_s1] sm:$0xff] %v541_v34   ;;  %589 = vst [vmem:[%s679_s1 + $0x8] sm:$0xff] %v546_v35  }
  0x18   :  { %590 = vst [vmem:[%s679_s1 + $0x10] sm:$0xff] %v551_v39   ;;  %596 = vst [vmem:[%s679_s1 + $0x40] sm:$0xff] %v581_v50  }

// kernel: netG_forward.10
= control target key start
LH: loop header
LB: loop body
LE: loop exit
PB: predicated region body
PF: predicated region fallthrough
CT: control target
= control target key end

     0   :  { %vm525_vm0 = vcmask 257024   ;;  %s1038_s1 = inlined_call_operand.vmem [shape: bf16[1,256,32], index: 1, kind: input, shape index: {}]   ;;  %s1039_s0 = inlined_call_operand.vmem [shape: bf16[1,128,256], index: 0, kind: input, shape index: {}]   ;;  %s1040_s2 = inlined_call_operand.vmem [shape: bf16[1,128,32], index: 2, kind: output, shape index: {}]  }
   0x1   :  { %v706_v0 = vld [vmem:[%s1038_s1 + $0x40] sm:$0xff]   ;;  %v708_v2 = vld [vmem:[%s1038_s1 + $0x48] sm:$0xff]   ;;  %v710_v4 = vld [vmem:[%s1038_s1 + $0x50] sm:$0xff]  }
   0x2   :  { %v707_v1 = vld [vmem:[%s1038_s1] sm:$0xff]   ;;  %626 = vmatprep.subr.bf16.mxu0 %v706_v0  ;;  %690 = vmatprep.subr.bf16.mxu1 %v706_v0  ;;  %v709_v3 = vld [vmem:[%s1038_s1 + $0x8] sm:$0xff]   ;;  %v711_v5 = vld [vmem:[%s1038_s1 + $0x10] sm:$0xff]  }
   0x3   :  { %627 = vmatpush3.bf16.msra.mxu0 %v707_v1  ;;  %698 = vmatpush3.bf16.msra.mxu1 %v707_v1  ;;  %v712_v6 = vld [vmem:[%s1038_s1 + $0x58] sm:$0xff]   ;;  %v714_v8 = vld [vmem:[%s1038_s1 + $0x60] sm:$0xff]   ;;  %v716_v10 = vld [vmem:[%s1038_s1 + $0x68] sm:$0xff]  }
   0x4   :  { %628 = vmatprep.subr.bf16.mxu0 %v708_v2  ;;  %691 = vmatprep.subr.bf16.mxu1 %v708_v2  ;;  %v713_v7 = vld [vmem:[%s1038_s1 + $0x18] sm:$0xff]   ;;  %v715_v9 = vld [vmem:[%s1038_s1 + $0x20] sm:$0xff]   ;;  %v717_v13 = vld [vmem:[%s1038_s1 + $0x28] sm:$0xff]  }
   0x5   :  { %v724_v11 = vld [vmem:[%s1039_s0 + $0x4] ss:$8 sps:$4 sm:$0xff]   ;;  %v718_v14 = vld [vmem:[%s1038_s1 + $0x70] sm:$0xff]   ;;  %v720_v16 = vld [vmem:[%s1038_s1 + $0x78] sm:$0xff]  }
   0x6   :  { %v727_v12 = vld [vmem:[%s1039_s0 + $0x44] ss:$8 sps:$4 sm:$0xff]   ;;  %268 = vmatprep.mubr.bf16.mxu0 %v724_v11  ;;  %v719_v15 = vld [vmem:[%s1038_s1 + $0x30] sm:$0xff]   ;;  %v721_v17 = vld [vmem:[%s1038_s1 + $0x38] sm:$0xff]  }
   0x7   :  { %629 = vmatpush3.bf16.msra.mxu0 %v709_v3  ;;  %699 = vmatpush3.bf16.msra.mxu1 %v709_v3  ;;  %v722_v18 = vld [vmem:[%s1039_s0] ss:$8 sps:$4 sm:$0xff]   ;;  %v728_v20 = vld [vmem:[%s1039_s0 + $0x14] ss:$8 sps:$4 sm:$0xff]   ;;  %v732_v22 = vld [vmem:[%s1039_s0 + $0x10] ss:$8 sps:$4 sm:$0xff]  }
   0x8   :  { %630 = vmatprep.subr.bf16.mxu0 %v710_v4  ;;  %692 = vmatprep.subr.bf16.mxu1 %v710_v4  ;;  %v725_v19 = vld [vmem:[%s1039_s0 + $0x40] ss:$8 sps:$4 sm:$0xff]   ;;  %v730_v21 = vld [vmem:[%s1039_s0 + $0x54] ss:$8 sps:$4 sm:$0xff]   ;;  %v733_v23 = vld [vmem:[%s1039_s0 + $0x50] ss:$8 sps:$4 sm:$0xff]  }
   0x9   :  { %300 = vmatprep.mubr.bf16.mxu1 %v727_v12  ;;  %v734_v24 = vld [vmem:[%s1039_s0 + $0x24] ss:$8 sps:$4 sm:$0xff]   ;;  %v738_v26 = vld [vmem:[%s1039_s0 + $0x20] ss:$8 sps:$4 sm:$0xff]   ;;  %v740_v28 = vld [vmem:[%s1039_s0 + $0x34] ss:$8 sps:$4 sm:$0xff]  }
   0xa   :  { %v736_v25 = vld [vmem:[%s1039_s0 + $0x64] ss:$8 sps:$4 sm:$0xff]   ;;  %v739_v27 = vld [vmem:[%s1039_s0 + $0x60] ss:$8 sps:$4 sm:$0xff]   ;;  %v742_v29 = vld [vmem:[%s1039_s0 + $0x74] ss:$8 sps:$4 sm:$0xff]  }
   0xb   :  { %631 = vmatpush3.bf16.msra.mxu0 %v711_v5  ;;  %700 = vmatpush3.bf16.msra.mxu1 %v711_v5  ;;  %v744_v30 = vld [vmem:[%s1039_s0 + $0x30] ss:$8 sps:$4 sm:$0xff]  }
   0xc   :  { %632 = vmatprep.subr.bf16.mxu0 %v712_v6  ;;  %693 = vmatprep.subr.bf16.mxu1 %v712_v6  ;;  %v745_v31 = vld [vmem:[%s1039_s0 + $0x70] ss:$8 sps:$4 sm:$0xff]  }
   0xf   :  { %633 = vmatpush3.bf16.msra.mxu0 %v713_v7  ;;  %701 = vmatpush3.bf16.msra.mxu1 %v713_v7 }
  0x10   :  { %634 = vmatprep.subr.bf16.mxu0 %v714_v8  ;;  %694 = vmatprep.subr.bf16.mxu1 %v714_v8 }
  0x13   :  { %635 = vmatpush3.bf16.msra.mxu0 %v715_v9  ;;  %702 = vmatpush3.bf16.msra.mxu1 %v715_v9 }
  0x14   :  { %636 = vmatprep.subr.bf16.mxu0 %v716_v10  ;;  %695 = vmatprep.subr.bf16.mxu1 %v716_v10 }
  0x17   :  { %637 = vmatpush3.bf16.msra.mxu0 %v717_v13  ;;  %703 = vmatpush3.bf16.msra.mxu1 %v717_v13 }
  0x18   :  { %638 = vmatprep.subr.bf16.mxu0 %v718_v14  ;;  %696 = vmatprep.subr.bf16.mxu1 %v718_v14 }
  0x1b   :  { %639 = vmatpush3.bf16.msra.mxu0 %v719_v15  ;;  %704 = vmatpush3.bf16.msra.mxu1 %v719_v15 }
  0x1c   :  { %640 = vmatprep.subr.bf16.mxu0 %v720_v16  ;;  %697 = vmatprep.subr.bf16.mxu1 %v720_v16 }
  0x1f   :  { %641 = vmatpush3.bf16.msra.mxu0 %v721_v17  ;;  %705 = vmatpush3.bf16.msra.mxu1 %v721_v17 }
  0x22   :  { %269 = vmatmul.mubr.bf16.vlgmr.msra.gmra.mrb[0].mxu0 %v722_v18  ;;  %301 = vmatmul.mubr.bf16.vlgmr.msra.gmra.mrb[0].mxu1 %v725_v19 }
  0x23   :  { %276 = vmatprep.mubr.bf16.mxu0 %v728_v20  ;;  %308 = vmatprep.mubr.bf16.mxu1 %v730_v21 }
  0x2a   :  { %277 = vmatmul.mubr.bf16.gmra.mrb[4].mxu0 %v732_v22  ;;  %309 = vmatmul.mubr.bf16.gmra.mrb[4].mxu1 %v733_v23 }
  0x2b   :  { %284 = vmatprep.mubr.bf16.mxu0 %v734_v24  ;;  %316 = vmatprep.mubr.bf16.mxu1 %v736_v25 }
  0x32   :  { %285 = vmatmul.mubr.bf16.gmra.mrb[8].mxu0 %v738_v26  ;;  %317 = vmatmul.mubr.bf16.gmra.mrb[8].mxu1 %v739_v27 }
  0x33   :  { %292 = vmatprep.mubr.bf16.mxu0 %v740_v28  ;;  %324 = vmatprep.mubr.bf16.mxu1 %v742_v29 }
  0x3a   :  { %293 = vmatmul.mubr.bf16.gmra.mrb[12].mxu0 %v744_v30  ;;  %325 = vmatmul.mubr.bf16.gmra.mrb[12].mxu1 %v745_v31 }
  0xf5   :  { %v642_v32 = vpop.f32.mrb[0].mxu0  ;;  %v666_v33 = vpop.f32.mrb[0].mxu1 }
  0xf6   :  { %v643_v34 = vpop.f32.mrb[1].mxu0  ;;  %v667_v35 = vpop.f32.mrb[1].mxu1 }
  0xf7   :  { %v889_v36 = vadd.f32 %v643_v34, %v642_v32  ;;  %v891_v37 = vadd.f32 %v667_v35, %v666_v33  ;;  %v645_v38 = vpop.f32.mrb[2].mxu0  ;;  %v669_v39 = vpop.f32.mrb[2].mxu1 }
  0xf8   :  { %v646_v40 = vpop.f32.mrb[3].mxu0  ;;  %v670_v41 = vpop.f32.mrb[3].mxu1 }
  0xf9   :  { %v333_v42 = vmin.f32 %v889_v36, 0.0  ;;  %v341_v43 = vmin.f32 %v891_v37, 0.0  ;;  %v895_v44 = vadd.f32 %v646_v40, %v645_v38  ;;  %v897_v45 = vadd.f32 %v670_v41, %v669_v39 }
  0xfa   :  { %vm413_vm1 = vcmp.gt.f32.partialorder %v889_v36, 0.0  ;;  %vm421_vm2 = vcmp.gt.f32.partialorder %v891_v37, 0.0 }
  0xfb   :  { %v349_v46 = vmul.f32 1.442695, %v333_v42  ;;  %v365_v47 = vmul.f32 1.442695, %v341_v43  ;;  %v334_v48 = vmin.f32 %v895_v44, 0.0  ;;  %v342_v49 = vmin.f32 %v897_v45, 0.0 }
  0xfc   :  { %vm414_vm3 = vcmp.gt.f32.partialorder %v895_v44, 0.0  ;;  %vm422_vm4 = vcmp.gt.f32.partialorder %v897_v45, 0.0 }
  0xfd   :  { %746 = vpow2.f32 %v349_v46  ;;  %v648_v50 = vpop.f32.mrb[4].mxu0  ;;  %v672_v51 = vpop.f32.mrb[4].mxu1  ;;  %v351_v52 = vmul.f32 1.442695, %v334_v48  ;;  %v367_v53 = vmul.f32 1.442695, %v342_v49 }
  0xfe   :  { %748 = vpow2.f32 %v365_v47  ;;  %v649_v54 = vpop.f32.mrb[5].mxu0  ;;  %v673_v55 = vpop.f32.mrb[5].mxu1 }
  0xff   :  { %v901_v56 = vadd.f32 %v649_v54, %v648_v50  ;;  %v903_v57 = vadd.f32 %v673_v55, %v672_v51  ;;  %v651_v58 = vpop.f32.mrb[6].mxu0  ;;  %v675_v59 = vpop.f32.mrb[6].mxu1  ;;  %750 = vpow2.f32 %v351_v52 }
 0x100   :  { %v652_v60 = vpop.f32.mrb[7].mxu0  ;;  %v676_v61 = vpop.f32.mrb[7].mxu1  ;;  %752 = vpow2.f32 %v367_v53 }
 0x101   :  { %v335_v62 = vmin.f32 %v901_v56, 0.0  ;;  %v343_v63 = vmin.f32 %v903_v57, 0.0  ;;  %v907_v0 = vadd.f32 %v652_v60, %v651_v58  ;;  %v909_v1 = vadd.f32 %v676_v61, %v675_v59 }
 0x102   :  { %vm415_vm5 = vcmp.gt.f32.partialorder %v901_v56, 0.0  ;;  %vm423_vm6 = vcmp.gt.f32.partialorder %v903_v57, 0.0 }
 0x103   :  { %v353_v2 = vmul.f32 1.442695, %v335_v62  ;;  %v369_v3 = vmul.f32 1.442695, %v343_v63  ;;  %v336_v4 = vmin.f32 %v907_v0, 0.0  ;;  %v344_v5 = vmin.f32 %v909_v1, 0.0 }
 0x104   :  { %vm416_vm7 = vcmp.gt.f32.partialorder %v907_v0, 0.0  ;;  %vm424_vm8 = vcmp.gt.f32.partialorder %v909_v1, 0.0 }
 0x105   :  { %754 = vpow2.f32 %v353_v2  ;;  %v654_v6 = vpop.f32.mrb[8].mxu0  ;;  %v678_v7 = vpop.f32.mrb[8].mxu1  ;;  %v355_v8 = vmul.f32 1.442695, %v336_v4  ;;  %v371_v9 = vmul.f32 1.442695, %v344_v5 }
 0x106   :  { %756 = vpow2.f32 %v369_v3  ;;  %v655_v10 = vpop.f32.mrb[9].mxu0  ;;  %v679_v11 = vpop.f32.mrb[9].mxu1 }
 0x107   :  { %v747_v12 = vpop.eup %746  ;;  %v913_v13 = vadd.f32 %v655_v10, %v654_v6  ;;  %v915_v14 = vadd.f32 %v679_v11, %v678_v7  ;;  %v657_v15 = vpop.f32.mrb[10].mxu0  ;;  %758 = vpow2.f32 %v355_v8 }
 0x108   :  { %v681_v16 = vpop.f32.mrb[10].mxu1  ;;  %v749_v17 = vpop.eup %748  ;;  %v578_v18 = vadd.f32 -1.0, %v747_v12  ;;  %760 = vpow2.f32 %v371_v9 }
 0x109   :  { %v658_v19 = vpop.f32.mrb[11].mxu0  ;;  %v682_v20 = vpop.f32.mrb[11].mxu1  ;;  %v586_v21 = vadd.f32 -1.0, %v749_v17  ;;  %v337_v22 = vmin.f32 %v913_v13, 0.0  ;;  %v345_v25 = vmin.f32 %v915_v14, 0.0  ;;  %vm417_vm9 = vcmp.gt.f32.partialorder %v913_v13, 0.0 }
 0x10a   :  { %v751_v23 = vpop.eup %750  ;;  %v397_v24 = vmul.f32 1.6732632, %v578_v18  ;;  %v923_v26 = vadd.f32 %v658_v19, %v657_v15  ;;  %v925_v31 = vadd.f32 %v682_v20, %v681_v16  ;;  %vm425_vm10 = vcmp.gt.f32.partialorder %v915_v14, 0.0 }
 0x10b   :  { %v753_v27 = vpop.eup %752  ;;  %v405_v28 = vmul.f32 1.6732632, %v586_v21  ;;  %v579_v29 = vadd.f32 -1.0, %v751_v23  ;;  %v357_v30 = vmul.f32 1.442695, %v337_v22 }
 0x10c   :  { %v429_v32 = vsel %vm413_vm1, %v889_v36, %v397_v24  ;;  %v587_v33 = vadd.f32 -1.0, %v753_v27  ;;  %v373_v34 = vmul.f32 1.442695, %v345_v25  ;;  %v338_v35 = vmin.f32 %v923_v26, 0.0 }
 0x10d   :  { %v445_v38 = vmul.f32 1.050701, %v429_v32  ;;  %v437_v39 = vsel %vm421_vm2, %v891_v37, %v405_v28  ;;  %v398_v40 = vmul.f32 1.6732632, %v579_v29  ;;  %762 = vpow2.f32 %v357_v30  ;;  %v660_v41 = vpop.f32.mrb[12].mxu0  ;;  %v684_v42 = vpop.f32.mrb[12].mxu1 }
 0x10e   :  { %v453_v43 = vmul.f32 1.050701, %v437_v39  ;;  %v406_v46 = vmul.f32 1.6732632, %v587_v33  ;;  %764 = vpow2.f32 %v373_v34  ;;  %v359_v47 = vmul.f32 1.442695, %v338_v35 }
 0x10f   :  { %v755_v48 = vpop.eup %754  ;;  %v610_v49 = vpack.c.bf16 %v445_v38, %v445_v38  ;;  %v430_v36 = vsel %vm414_vm3, %v895_v44, %v398_v40  ;;  %v346_v50 = vmin.f32 %v925_v31, 0.0  ;;  %v661_v51 = vpop.f32.mrb[13].mxu0  ;;  %vm418_vm11 = vcmp.gt.f32.partialorder %v923_v26, 0.0 }
 0x110   :  { %v685_v37 = vpop.f32.mrb[13].mxu1  ;;  %v757_v52 = vpop.eup %756  ;;  %v618_v53 = vpack.c.bf16 %v453_v43, %v453_v43  ;;  %v446_v54 = vmul.f32 1.050701, %v430_v36  ;;  %v438_v55 = vsel %vm422_vm4, %v897_v45, %v406_v46  ;;  %v580_v58 = vadd.f32 -1.0, %v755_v48 }
 0x111   :  { %v663_v59 = vpop.f32.mrb[14].mxu0  ;;  %v687_v60 = vpop.f32.mrb[14].mxu1  ;;  %526 = vst.msk [vmem:[%s1040_s2] sm:$0xf] %vm525_vm0, %v610_v49  ;;  %v454_v44 = vmul.f32 1.050701, %v438_v55  ;;  %766 = vpow2.f32 %v359_v47  ;;  %v951_v4 = vadd.f32 %v661_v51, %v660_v41  ;;  %v967_v18 = vadd.f32 %v685_v37, %v684_v42 }
 0x112   :  { %v588_v61 = vadd.f32 -1.0, %v757_v52  ;;  %v375_v62 = vmul.f32 1.442695, %v346_v50  ;;  %v664_v63 = vpop.f32.mrb[15].mxu0  ;;  %v759_v2 = vpop.eup %758  ;;  %534 = vst.msk [vmem:[%s1040_s2 + $0x20] sm:$0xf] %vm525_vm0, %v618_v53  ;;  %v611_v45 = vpack.c.bf16 %v446_v54, %v446_v54 }
 0x113   :  { %v399_v3 = vmul.f32 1.6732632, %v580_v58  ;;  %v688_v5 = vpop.f32.mrb[15].mxu1  ;;  %v761_v6 = vpop.eup %760  ;;  %v619_v7 = vpack.c.bf16 %v454_v44, %v454_v44  ;;  %v581_v9 = vadd.f32 -1.0, %v759_v2  ;;  %v339_v12 = vmin.f32 %v951_v4, 0.0 }
 0x114   :  { %v407_v8 = vmul.f32 1.6732632, %v588_v61  ;;  %768 = vpow2.f32 %v375_v62  ;;  %527 = vst.msk [vmem:[%s1040_s2 + $0x4] sm:$0xf] %vm525_vm0, %v611_v45  ;;  %v589_v11 = vadd.f32 -1.0, %v761_v6  ;;  %v347_v25 = vmin.f32 %v967_v18, 0.0 }
 0x115   :  { %v431_v10 = vsel %vm415_vm5, %v901_v56, %v399_v3  ;;  %535 = vst.msk [vmem:[%s1040_s2 + $0x24] sm:$0xf] %vm525_vm0, %v619_v7  ;;  %v400_v17 = vmul.f32 1.6732632, %v581_v9  ;;  %v361_v21 = vmul.f32 1.442695, %v339_v12  ;;  %v969_v56 = vadd.f32 %v664_v63, %v663_v59 }
 0x116   :  { %v447_v15 = vmul.f32 1.050701, %v431_v10  ;;  %v439_v16 = vsel %vm423_vm6, %v903_v57, %v407_v8  ;;  %v408_v20 = vmul.f32 1.6732632, %v589_v11  ;;  %v377_v34 = vmul.f32 1.442695, %v347_v25 }
 0x117   :  { %v455_v19 = vmul.f32 1.050701, %v439_v16  ;;  %v763_v22 = vpop.eup %762  ;;  %v432_v24 = vsel %vm416_vm7, %v907_v0, %v400_v17  ;;  %770 = vpow2.f32 %v361_v21  ;;  %v689_v41 = vadd.f32 %v688_v5, %v687_v60 }
 0x118   :  { %v612_v23 = vpack.c.bf16 %v447_v15, %v447_v15  ;;  %v765_v27 = vpop.eup %764  ;;  %v448_v29 = vmul.f32 1.050701, %v432_v24  ;;  %v440_v57 = vsel %vm424_vm8, %v909_v1, %v408_v20  ;;  %v582_v30 = vadd.f32 -1.0, %v763_v22 }
 0x119   :  { %v620_v28 = vpack.c.bf16 %v455_v19, %v455_v19  ;;  %v456_v32 = vmul.f32 1.050701, %v440_v57  ;;  %v590_v33 = vadd.f32 -1.0, %v765_v27  ;;  %v340_v1 = vmin.f32 %v969_v56, 0.0 }
 0x11a   :  { %528 = vst.msk [vmem:[%s1040_s2 + $0x8] sm:$0xf] %vm525_vm0, %v612_v23  ;;  %v613_v0 = vpack.c.bf16 %v448_v29, %v448_v29  ;;  %v401_v35 = vmul.f32 1.6732632, %v582_v30  ;;  %772 = vpow2.f32 %v377_v34  ;;  %v348_v36 = vmin.f32 %v689_v41, 0.0 }
 0x11b   :  { %536 = vst.msk [vmem:[%s1040_s2 + $0x28] sm:$0xf] %vm525_vm0, %v620_v28  ;;  %v767_v38 = vpop.eup %766  ;;  %v621_v39 = vpack.c.bf16 %v456_v32, %v456_v32  ;;  %v409_v40 = vmul.f32 1.6732632, %v590_v33  ;;  %v363_v46 = vmul.f32 1.442695, %v340_v1 }
 0x11c   :  { %529 = vst.msk [vmem:[%s1040_s2 + $0xc] sm:$0xf] %vm525_vm0, %v613_v0  ;;  %v433_v42 = vsel %vm417_vm9, %v913_v13, %v401_v35  ;;  %v583_v43 = vadd.f32 -1.0, %v767_v38  ;;  %v379_v13 = vmul.f32 1.442695, %v348_v36  ;;  %vm426_vm12 = vcmp.gt.f32.partialorder %v925_v31, 0.0 }
 0x11d   :  { %537 = vst.msk [vmem:[%s1040_s2 + $0x2c] sm:$0xf] %vm525_vm0, %v621_v39  ;;  %v449_v48 = vmul.f32 1.050701, %v433_v42  ;;  %v441_v49 = vsel %vm425_vm10, %v915_v14, %v409_v40  ;;  %774 = vpow2.f32 %v363_v46  ;;  %vm419_vm13 = vcmp.gt.f32.partialorder %v951_v4, 0.0 }
 0x11e   :  { %v769_v47 = vpop.eup %768  ;;  %v457_v50 = vmul.f32 1.050701, %v441_v49  ;;  %v402_v51 = vmul.f32 1.6732632, %v583_v43  ;;  %776 = vpow2.f32 %v379_v13  ;;  %vm427_vm14 = vcmp.gt.f32.partialorder %v967_v18, 0.0 }
 0x11f   :  { %v591_v37 = vadd.f32 -1.0, %v769_v47  ;;  %v614_v52 = vpack.c.bf16 %v449_v48, %v449_v48  ;;  %vm420_vm15 = vcmp.gt.f32.partialorder %v969_v56, 0.0  ;;  %vm428_vm1 = vcmp.gt.f32.partialorder %v689_v41, 0.0 }
 0x120   :  { %v622_v53 = vpack.c.bf16 %v457_v50, %v457_v50  ;;  %v434_v54 = vsel %vm418_vm11, %v923_v26, %v402_v51 }
 0x121   :  { %v410_v55 = vmul.f32 1.6732632, %v591_v37  ;;  %530 = vst.msk [vmem:[%s1040_s2 + $0x10] sm:$0xf] %vm525_vm0, %v614_v52  ;;  %v450_v58 = vmul.f32 1.050701, %v434_v54  ;;  %v771_v59 = vpop.eup %770 }
 0x122   :  { %538 = vst.msk [vmem:[%s1040_s2 + $0x30] sm:$0xf] %vm525_vm0, %v622_v53  ;;  %v584_v44 = vadd.f32 -1.0, %v771_v59 }
 0x123   :  { %v442_v14 = vsel %vm426_vm12, %v925_v31, %v410_v55  ;;  %v615_v60 = vpack.c.bf16 %v450_v58, %v450_v58 }
 0x124   :  { %v458_v26 = vmul.f32 1.050701, %v442_v14  ;;  %v773_v61 = vpop.eup %772  ;;  %v403_v63 = vmul.f32 1.6732632, %v584_v44 }
 0x125   :  { %531 = vst.msk [vmem:[%s1040_s2 + $0x14] sm:$0xf] %vm525_vm0, %v615_v60  ;;  %v592_v2 = vadd.f32 -1.0, %v773_v61 }
 0x126   :  { %v623_v62 = vpack.c.bf16 %v458_v26, %v458_v26  ;;  %v435_v45 = vsel %vm419_vm13, %v951_v4, %v403_v63 }
 0x127   :  { %v775_v31 = vpop.eup %774  ;;  %v411_v3 = vmul.f32 1.6732632, %v592_v2  ;;  %v451_v5 = vmul.f32 1.050701, %v435_v45 }
 0x128   :  { %539 = vst.msk [vmem:[%s1040_s2 + $0x34] sm:$0xf] %vm525_vm0, %v623_v62  ;;  %v585_v6 = vadd.f32 -1.0, %v775_v31  ;;  %v777_v8 = vpop.eup %776 }
 0x129   :  { %v443_v7 = vsel %vm427_vm14, %v967_v18, %v411_v3  ;;  %v616_v9 = vpack.c.bf16 %v451_v5, %v451_v5  ;;  %v593_v12 = vadd.f32 -1.0, %v777_v8 }
 0x12a   :  { %v459_v10 = vmul.f32 1.050701, %v443_v7  ;;  %v404_v11 = vmul.f32 1.6732632, %v585_v6 }
 0x12b   :  { %532 = vst.msk [vmem:[%s1040_s2 + $0x18] sm:$0xf] %vm525_vm0, %v616_v9  ;;  %v412_v17 = vmul.f32 1.6732632, %v593_v12 }
 0x12c   :  { %v624_v4 = vpack.c.bf16 %v459_v10, %v459_v10  ;;  %v436_v15 = vsel %vm420_vm15, %v969_v56, %v404_v11 }
 0x12d   :  { %v452_v16 = vmul.f32 1.050701, %v436_v15  ;;  %v444_v19 = vsel %vm428_vm1, %v689_v41, %v412_v17 }
 0x12e   :  { %540 = vst.msk [vmem:[%s1040_s2 + $0x38] sm:$0xf] %vm525_vm0, %v624_v4  ;;  %v460_v20 = vmul.f32 1.050701, %v444_v19 }
 0x12f   :  { %v617_v18 = vpack.c.bf16 %v452_v16, %v452_v16 }
 0x130   :  { %v625_v21 = vpack.c.bf16 %v460_v20, %v460_v20 }
 0x131   :  { %533 = vst.msk [vmem:[%s1040_s2 + $0x1c] sm:$0xf] %vm525_vm0, %v617_v18 }
 0x132   :  { %541 = vst.msk [vmem:[%s1040_s2 + $0x3c] sm:$0xf] %vm525_vm0, %v625_v21 }

// kernel: netG_forward.13
= control target key start
LH: loop header
LB: loop body
LE: loop exit
PB: predicated region body
PF: predicated region fallthrough
CT: control target
= control target key end

     0   :  { %s2060_s9 = smov 0   ;;  %s2062_s10 = smov 0   ;;  %s2597_s0 = inlined_call_operand.vmem [shape: bf16[4,416,128], index: 0, kind: input, shape index: {}]   ;;  %s2598_s1 = inlined_call_operand.vmem [shape: bf16[4,128,16], index: 1, kind: input, shape index: {}]   ;;  %s2599_s2 = inlined_call_operand.vmem [shape: bf16[4,416,16], index: 2, kind: output, shape index: {}]  }
   0x1   :  { %s2064_s11 = smov 0  }
   0x2 LB: > { %s31_s12 = sadd.s32 1, %s2039_s10  ;;  %p1542_p0 = scmp.ge.s32.totalorder %s2043_s11, 1  ;;  %s2043_s11 = sphi %s2064_s11, %s12_s11   ;;  %s2039_s10 = sphi %s2062_s10, %s2601_s10   ;;  %s2035_s9 = sphi %s2060_s9, %s2600_s9  }
   0x3   : > { %p33_p1 = scmp.ge.s32.totalorder %s31_s12, 4  ;;  %p157_p2 = scmp.lt.s32.totalorder %s2043_s11, 5 }
   0x5   : > { %s2603_s12 = smov (%p33_p1, %s31_s12), 0  ;;  %p158_p3 = pnand %p1542_p0, %p157_p2 }
   0x6   : > { %p199_p4 = scmp.lt.s32.totalorder (!%p158_p3), %s2035_s9, 3  ;;  %vm1367_vm3 = vcmask (!%p158_p3), 125952  }
   0x7   : > { %161 = sbr.rel (%p158_p3) target bundleno = 402 (0x192), region = 28 }
   0xe   : > { %s2605_s9 = smov (!%p199_p4, %s2035_s9), 3 }
   0xf   : > { %s1687_s13 = sshll.u32 %s2605_s9, 6  ;;  %s1858_s17 = smul.u32 208, %s2605_s9 }
  0x10   : > { %s2084_s16 = scalar_lea.vmem %s2598_s1, %s1687_s13 }
  0x11   : > { %v1883_v0 = vld [vmem:[%s2084_s16] sm:$0xff]   ;;  %v1884_v1 = vld [vmem:[%s2084_s16 + $0x8] sm:$0xff]   ;;  %v1885_v2 = vld [vmem:[%s2084_s16 + $0x10] sm:$0xff]   ;;  %s2095_s20 = scalar_lea.vmem %s2597_s0, %s1858_s17  ;;  %s2213_s23 = scalar_lea.vmem %s2599_s2, %s1858_s17 }
  0x12   : > { %1774 = vmatprep.subr.bf16.mxu0 %v1883_v0  ;;  %1842 = vmatprep.subr.bf16.mxu1 %v1883_v0  ;;  %v1886_v3 = vld [vmem:[%s2084_s16 + $0x18] sm:$0xff]   ;;  %v1891_v4 = vld [vmem:[%s2095_s20] sm:$0xff]   ;;  %v1892_v5 = vld [vmem:[%s2095_s20 + $0x70] sm:$0xff]  }
  0x13   : > { %1775 = vmatpush3.bf16.msra.mxu0 %v1883_v0  ;;  %1850 = vmatpush3.bf16.msra.mxu1 %v1883_v0  ;;  %v1887_v6 = vld [vmem:[%s2084_s16 + $0x20] sm:$0xff]   ;;  %v1888_v7 = vld [vmem:[%s2084_s16 + $0x28] sm:$0xff]   ;;  %v1889_v8 = vld [vmem:[%s2084_s16 + $0x30] sm:$0xff]  }
  0x14   : > { %1776 = vmatprep.subr.bf16.mxu0 %v1884_v1  ;;  %1843 = vmatprep.subr.bf16.mxu1 %v1884_v1  ;;  %v1890_v9 = vld [vmem:[%s2084_s16 + $0x38] sm:$0xff]   ;;  %v1893_v10 = vld [vmem:[%s2095_s20 + $0x8] sm:$0xff]   ;;  %v1895_v12 = vld [vmem:[%s2095_s20 + $0x10] sm:$0xff]  }
  0x15   : > { %1790 = vmatprep.mubr.bf16.mxu0 %v1891_v4  ;;  %1818 = vmatprep.mubr.bf16.mxu1 %v1892_v5  ;;  %v1894_v11 = vld [vmem:[%s2095_s20 + $0x78] sm:$0xff]   ;;  %v1896_v13 = vld [vmem:[%s2095_s20 + $0x80] sm:$0xff]   ;;  %v1898_v15 = vld [vmem:[%s2095_s20 + $0x88] sm:$0xff]  }
  0x16   : > { %v1897_v14 = vld [vmem:[%s2095_s20 + $0x18] sm:$0xff]   ;;  %v1899_v16 = vld [vmem:[%s2095_s20 + $0x20] sm:$0xff]   ;;  %v1900_v17 = vld [vmem:[%s2095_s20 + $0x90] sm:$0xff]  }
  0x17   : > { %1777 = vmatpush3.bf16.msra.mxu0 %v1884_v1  ;;  %1851 = vmatpush3.bf16.msra.mxu1 %v1884_v1  ;;  %v1901_v18 = vld [vmem:[%s2095_s20 + $0x28] sm:$0xff]   ;;  %v1902_v19 = vld [vmem:[%s2095_s20 + $0x98] sm:$0xff]   ;;  %v1903_v20 = vld [vmem:[%s2095_s20 + $0x30] sm:$0xff]  }
  0x18   : > { %1778 = vmatprep.subr.bf16.mxu0 %v1885_v2  ;;  %1844 = vmatprep.subr.bf16.mxu1 %v1885_v2  ;;  %v1904_v21 = vld [vmem:[%s2095_s20 + $0xa0] sm:$0xff]   ;;  %v1905_v22 = vld [vmem:[%s2095_s20 + $0x38] sm:$0xff]   ;;  %v1906_v23 = vld [vmem:[%s2095_s20 + $0xa8] sm:$0xff]  }
  0x19   : > { %v1907_v24 = vld [vmem:[%s2095_s20 + $0x40] sm:$0xff]   ;;  %v1908_v25 = vld [vmem:[%s2095_s20 + $0xb0] sm:$0xff]   ;;  %v1909_v26 = vld [vmem:[%s2095_s20 + $0x48] sm:$0xff]  }
  0x1a   : > { %v1910_v27 = vld [vmem:[%s2095_s20 + $0xb8] sm:$0xff]   ;;  %v1911_v28 = vld [vmem:[%s2095_s20 + $0x50] sm:$0xff]   ;;  %v1912_v29 = vld [vmem:[%s2095_s20 + $0xc0] sm:$0xff]  }
  0x1b   : > { %1779 = vmatpush3.bf16.msra.mxu0 %v1885_v2  ;;  %1852 = vmatpush3.bf16.msra.mxu1 %v1885_v2  ;;  %v1913_v30 = vld [vmem:[%s2095_s20 + $0x58] sm:$0xff]   ;;  %v1914_v31 = vld [vmem:[%s2095_s20 + $0xc8] sm:$0xff]   ;;  %v1915_v32 = vld [vmem:[%s2095_s20 + $0x60] sm:$0xff]  }
  0x1c   : > { %1780 = vmatprep.subr.bf16.mxu0 %v1886_v3  ;;  %1845 = vmatprep.subr.bf16.mxu1 %v1886_v3  ;;  %v1916_v33 = vld [vmem:[%s2095_s20 + $0x68] sm:$0xff]  }
  0x1f   : > { %1781 = vmatpush3.bf16.msra.mxu0 %v1886_v3  ;;  %1853 = vmatpush3.bf16.msra.mxu1 %v1886_v3 }
  0x20   : > { %1782 = vmatprep.subr.bf16.mxu0 %v1887_v6  ;;  %1846 = vmatprep.subr.bf16.mxu1 %v1887_v6 }
  0x23   : > { %1783 = vmatpush3.bf16.msra.mxu0 %v1887_v6  ;;  %1854 = vmatpush3.bf16.msra.mxu1 %v1887_v6 }
  0x24   : > { %1784 = vmatprep.subr.bf16.mxu0 %v1888_v7  ;;  %1847 = vmatprep.subr.bf16.mxu1 %v1888_v7 }
  0x27   : > { %1785 = vmatpush3.bf16.msra.mxu0 %v1888_v7  ;;  %1855 = vmatpush3.bf16.msra.mxu1 %v1888_v7 }
  0x28   : > { %1786 = vmatprep.subr.bf16.mxu0 %v1889_v8  ;;  %1848 = vmatprep.subr.bf16.mxu1 %v1889_v8 }
  0x2b   : > { %1787 = vmatpush3.bf16.msra.mxu0 %v1889_v8  ;;  %1856 = vmatpush3.bf16.msra.mxu1 %v1889_v8 }
  0x2c   : > { %1788 = vmatprep.subr.bf16.mxu0 %v1890_v9  ;;  %1849 = vmatprep.subr.bf16.mxu1 %v1890_v9 }
  0x2f   : > { %1789 = vmatpush3.bf16.msra.mxu0 %v1890_v9  ;;  %1857 = vmatpush3.bf16.msra.mxu1 %v1890_v9 }
  0x32   : > { %1791 = vmatmul.mubr.bf16.vlgmr.msra.gmra.mrb[0].mxu0 %v1893_v10  ;;  %1819 = vmatmul.mubr.bf16.vlgmr.msra.gmra.mrb[0].mxu1 %v1894_v11 }
  0x33   : > { %1794 = vmatprep.mubr.bf16.mxu0 %v1895_v12  ;;  %1822 = vmatprep.mubr.bf16.mxu1 %v1896_v13 }
  0x3a   : > { %1795 = vmatmul.mubr.bf16.gmra.mrb[4].mxu0 %v1897_v14  ;;  %1823 = vmatmul.mubr.bf16.gmra.mrb[4].mxu1 %v1898_v15 }
  0x3b   : > { %1798 = vmatprep.mubr.bf16.mxu0 %v1899_v16  ;;  %1826 = vmatprep.mubr.bf16.mxu1 %v1900_v17 }
  0x42   : > { %1799 = vmatmul.mubr.bf16.gmra.mrb[8].mxu0 %v1901_v18  ;;  %1827 = vmatmul.mubr.bf16.gmra.mrb[8].mxu1 %v1902_v19 }
  0x43   : > { %1802 = vmatprep.mubr.bf16.mxu0 %v1903_v20  ;;  %1830 = vmatprep.mubr.bf16.mxu1 %v1904_v21 }
  0x4a   : > { %1803 = vmatmul.mubr.bf16.gmra.mrb[12].mxu0 %v1905_v22  ;;  %1831 = vmatmul.mubr.bf16.gmra.mrb[12].mxu1 %v1906_v23 }
  0x4b   : > { %1806 = vmatprep.mubr.bf16.mxu0 %v1907_v24  ;;  %1834 = vmatprep.mubr.bf16.mxu1 %v1908_v25 }
  0x52   : > { %1807 = vmatmul.mubr.bf16.gmra.mrb[16].mxu0 %v1909_v26  ;;  %1835 = vmatmul.mubr.bf16.gmra.mrb[16].mxu1 %v1910_v27 }
  0x53   : > { %1810 = vmatprep.mubr.bf16.mxu0 %v1911_v28  ;;  %1838 = vmatprep.mubr.bf16.mxu1 %v1912_v29 }
  0x5a   : > { %1811 = vmatmul.mubr.bf16.gmra.mrb[20].mxu0 %v1913_v30  ;;  %1839 = vmatmul.mubr.bf16.gmra.mrb[20].mxu1 %v1914_v31 }
  0x5b   : > { %1814 = vmatprep.mubr.bf16.mxu0 %v1915_v32 }
  0x62   : > { %1815 = vmatmul.mubr.bf16.gmra.mrb[24].mxu0 %v1916_v33 }
 0x105   : > { %v2128_v34 = vpop.f32.mrb[0].mxu0  ;;  %v2130_v35 = vpop.f32.mrb[0].mxu1 }
 0x106   : > { %v745_v36 = vmin.f32 %v2128_v34, 0.0  ;;  %v773_v37 = vmin.f32 %v2130_v35, 0.0  ;;  %v2134_v38 = vpop.f32.mrb[1].mxu0  ;;  %v2136_v39 = vpop.f32.mrb[1].mxu1  ;;  %vm1005_vm0 = vcmp.gt.f32.partialorder %v2128_v34, 0.0  ;;  %vm1033_vm1 = vcmp.gt.f32.partialorder %v2130_v35, 0.0 }
 0x107   : > { %v743_v40 = vmin.f32 %v2134_v38, 0.0  ;;  %v771_v41 = vmin.f32 %v2136_v39, 0.0  ;;  %v2140_v42 = vpop.f32.mrb[2].mxu0  ;;  %v2142_v43 = vpop.f32.mrb[2].mxu1  ;;  %vm1003_vm2 = vcmp.gt.f32.partialorder %v2134_v38, 0.0  ;;  %vm1031_vm4 = vcmp.gt.f32.partialorder %v2136_v39, 0.0 }
 0x108   : > { %v799_v44 = vmul.f32 1.442695, %v745_v36  ;;  %v855_v45 = vmul.f32 1.442695, %v773_v37  ;;  %v746_v46 = vmin.f32 %v2140_v42, 0.0  ;;  %v774_v49 = vmin.f32 %v2142_v43, 0.0 }
 0x109   : > { %v795_v47 = vmul.f32 1.442695, %v743_v40  ;;  %v851_v48 = vmul.f32 1.442695, %v771_v41  ;;  %v2146_v51 = vpop.f32.mrb[3].mxu0  ;;  %v2148_v52 = vpop.f32.mrb[3].mxu1 }
 0x10a   : > { %1917 = vpow2.f32 %v799_v44  ;;  %v801_v50 = vmul.f32 1.442695, %v746_v46  ;;  %v857_v53 = vmul.f32 1.442695, %v774_v49  ;;  %v744_v54 = vmin.f32 %v2146_v51, 0.0 }
 0x10b   : > { %1919 = vpow2.f32 %v855_v45  ;;  %v772_v55 = vmin.f32 %v2148_v52, 0.0  ;;  %vm1006_vm5 = vcmp.gt.f32.partialorder %v2140_v42, 0.0  ;;  %vm1034_vm6 = vcmp.gt.f32.partialorder %v2142_v43, 0.0 }
 0x10c   : > { %1921 = vpow2.f32 %v795_v47  ;;  %v797_v56 = vmul.f32 1.442695, %v744_v54  ;;  %vm1004_vm7 = vcmp.gt.f32.partialorder %v2146_v51, 0.0  ;;  %vm1032_vm8 = vcmp.gt.f32.partialorder %v2148_v52, 0.0 }
 0x10d   : > { %1923 = vpow2.f32 %v851_v48  ;;  %v2152_v57 = vpop.f32.mrb[4].mxu0  ;;  %v2154_v58 = vpop.f32.mrb[4].mxu1  ;;  %v853_v59 = vmul.f32 1.442695, %v772_v55 }
 0x10e   : > { %1925 = vpow2.f32 %v801_v50  ;;  %v749_v60 = vmin.f32 %v2152_v57, 0.0  ;;  %v2157_v61 = vpop.f32.mrb[5].mxu0  ;;  %v2159_v62 = vpop.f32.mrb[5].mxu1  ;;  %v777_v63 = vmin.f32 %v2154_v58, 0.0  ;;  %vm1009_vm9 = vcmp.gt.f32.partialorder %v2152_v57, 0.0 }
 0x10f   : > { %1927 = vpow2.f32 %v857_v53  ;;  %v747_v0 = vmin.f32 %v2157_v61, 0.0  ;;  %v2163_v1 = vpop.f32.mrb[6].mxu0  ;;  %v2165_v2 = vpop.f32.mrb[6].mxu1  ;;  %v775_v4 = vmin.f32 %v2159_v62, 0.0  ;;  %vm1037_vm10 = vcmp.gt.f32.partialorder %v2154_v58, 0.0 }
 0x110   : > { %1929 = vpow2.f32 %v797_v56  ;;  %v807_v3 = vmul.f32 1.442695, %v749_v60  ;;  %v2169_v5 = vpop.f32.mrb[7].mxu0  ;;  %v2171_v6 = vpop.f32.mrb[7].mxu1  ;;  %v863_v7 = vmul.f32 1.442695, %v777_v63 }
 0x111   : > { %1931 = vpow2.f32 %v853_v59  ;;  %v803_v8 = vmul.f32 1.442695, %v747_v0  ;;  %v859_v9 = vmul.f32 1.442695, %v775_v4  ;;  %v750_v10 = vmin.f32 %v2163_v1, 0.0 }
 0x112   : > { %1933 = vpow2.f32 %v807_v3  ;;  %v778_v11 = vmin.f32 %v2165_v2, 0.0  ;;  %v748_v12 = vmin.f32 %v2169_v5, 0.0  ;;  %v776_v15 = vmin.f32 %v2171_v6, 0.0 }
 0x113   : > { %1935 = vpow2.f32 %v863_v7  ;;  %v809_v14 = vmul.f32 1.442695, %v750_v10  ;;  %vm1007_vm11 = vcmp.gt.f32.partialorder %v2157_v61, 0.0  ;;  %vm1035_vm12 = vcmp.gt.f32.partialorder %v2159_v62, 0.0 }
 0x114   : > { %v1918_v13 = vpop.eup %1917  ;;  %1937 = vpow2.f32 %v803_v8  ;;  %v865_v18 = vmul.f32 1.442695, %v778_v11  ;;  %v805_v19 = vmul.f32 1.442695, %v748_v12  ;;  %v861_v23 = vmul.f32 1.442695, %v776_v15 }
 0x115   : > { %v1920_v16 = vpop.eup %1919  ;;  %v1583_v17 = vadd.f32 -1.0, %v1918_v13  ;;  %1939 = vpow2.f32 %v859_v9  ;;  %v2181_v20 = vpop.f32.mrb[8].mxu0  ;;  %vm1010_vm13 = vcmp.gt.f32.partialorder %v2163_v1, 0.0  ;;  %vm1038_vm14 = vcmp.gt.f32.partialorder %v2165_v2, 0.0 }
 0x116   : > { %v1922_v21 = vpop.eup %1921  ;;  %v1611_v22 = vadd.f32 -1.0, %v1920_v16  ;;  %1941 = vpow2.f32 %v809_v14  ;;  %v2184_v24 = vpop.f32.mrb[8].mxu1  ;;  %v753_v36 = vmin.f32 %v2181_v20, 0.0  ;;  %vm1008_vm15 = vcmp.gt.f32.partialorder %v2169_v5, 0.0 }
 0x117   : > { %v2186_v25 = vpop.f32.mrb[9].mxu0  ;;  %v1924_v26 = vpop.eup %1923  ;;  %v953_v27 = vmul.f32 1.6732632, %v1583_v17  ;;  %v1581_v28 = vadd.f32 -1.0, %v1922_v21  ;;  %1943 = vpow2.f32 %v865_v18 }
 0x118   : > { %v2189_v29 = vpop.f32.mrb[9].mxu1  ;;  %v2191_v30 = vpop.f32.mrb[10].mxu0  ;;  %v981_v32 = vmul.f32 1.6732632, %v1611_v22  ;;  %v1609_v33 = vadd.f32 -1.0, %v1924_v26  ;;  %1945 = vpow2.f32 %v805_v19 }
 0x119   : > { %v1926_v31 = vpop.eup %1925  ;;  %v2194_v37 = vpop.f32.mrb[10].mxu1  ;;  %v1057_v44 = vsel %vm1005_vm0, %v2128_v34, %v953_v27  ;;  %v951_v45 = vmul.f32 1.6732632, %v1581_v28  ;;  %1947 = vpow2.f32 %v861_v23  ;;  %vm1036_vm0 = vcmp.gt.f32.partialorder %v2171_v6, 0.0 }
 0x11a   : > { %v2196_v40 = vpop.f32.mrb[11].mxu0  ;;  %v1928_v41 = vpop.eup %1927  ;;  %v1584_v46 = vadd.f32 -1.0, %v1926_v31  ;;  %v1109_v49 = vmul.f32 1.050701, %v1057_v44  ;;  %v1085_v50 = vsel %vm1033_vm1, %v2130_v35, %v981_v32  ;;  %v979_v53 = vmul.f32 1.6732632, %v1609_v33 }
 0x11b   : > { %v2202_v47 = vpop.f32.mrb[11].mxu1  ;;  %v1930_v48 = vpop.eup %1929  ;;  %v1612_v54 = vadd.f32 -1.0, %v1928_v41  ;;  %v1137_v34 = vmul.f32 1.050701, %v1085_v50  ;;  %v1055_v56 = vsel %vm1003_vm2, %v2134_v38, %v951_v45  ;;  %vm1013_vm1 = vcmp.gt.f32.partialorder %v2181_v20, 0.0 }
 0x11c   : > { %v1932_v55 = vpop.eup %1931  ;;  %v954_v59 = vmul.f32 1.6732632, %v1584_v46  ;;  %v1582_v60 = vadd.f32 -1.0, %v1930_v48  ;;  %v1690_v63 = vpack.c.bf16 %v1109_v49, %v1109_v49  ;;  %v1107_v0 = vmul.f32 1.050701, %v1055_v56 }
 0x11d   : > { %v1934_v35 = vpop.eup %1933  ;;  %v1083_v3 = vsel %vm1031_vm4, %v2136_v39, %v979_v53  ;;  %v982_v4 = vmul.f32 1.6732632, %v1612_v54  ;;  %v1718_v8 = vpack.c.bf16 %v1137_v34, %v1137_v34  ;;  %v2228_v11 = vpop.f32.mrb[12].mxu0  ;;  %v1610_v16 = vadd.f32 -1.0, %v1932_v55 }
 0x11e   : > { %v1936_v7 = vpop.eup %1935  ;;  %v1135_v38 = vmul.f32 1.050701, %v1083_v3  ;;  %v1058_v9 = vsel %vm1006_vm5, %v2140_v42, %v954_v59  ;;  %v952_v10 = vmul.f32 1.6732632, %v1582_v60  ;;  %v2230_v12 = vpop.f32.mrb[12].mxu1  ;;  %v1688_v13 = vpack.c.bf16 %v1107_v0, %v1107_v0 }
 0x11f   : > { %v1938_v39 = vpop.eup %1937  ;;  %1370 = vst.msk [vmem:[%s2213_s23 + $0x8] sm:$0xf] %vm1367_vm3, %v1690_v63  ;;  %v1110_v14 = vmul.f32 1.050701, %v1058_v9  ;;  %v1086_v15 = vsel %vm1034_vm6, %v2142_v43, %v982_v4  ;;  %v2237_v17 = vpop.f32.mrb[13].mxu0  ;;  %v1587_v23 = vadd.f32 -1.0, %v1934_v35 }
 0x120   : > { %v2239_v42 = vpop.f32.mrb[13].mxu1  ;;  %v1940_v18 = vpop.eup %1939  ;;  %1398 = vst.msk [vmem:[%s2213_s23 + $0x78] sm:$0xf] %vm1367_vm3, %v1718_v8  ;;  %v1716_v19 = vpack.c.bf16 %v1135_v38, %v1135_v38  ;;  %v1138_v21 = vmul.f32 1.050701, %v1086_v15  ;;  %v1056_v22 = vsel %vm1004_vm7, %v2146_v51, %v952_v10  ;;  %v1615_v33 = vadd.f32 -1.0, %v1936_v7 }
 0x121   : > { %v2246_v26 = vpop.f32.mrb[14].mxu0  ;;  %v2248_v27 = vpop.f32.mrb[14].mxu1  ;;  %1368 = vst.msk [vmem:[%s2213_s23] sm:$0xf] %vm1367_vm3, %v1688_v13  ;;  %v1691_v28 = vpack.c.bf16 %v1110_v14, %v1110_v14  ;;  %v1108_v31 = vmul.f32 1.050701, %v1056_v22 }
 0x122   : > { %v1942_v43 = vpop.eup %1941  ;;  %v980_v32 = vmul.f32 1.6732632, %v1610_v16  ;;  %v2253_v41 = vpop.f32.mrb[15].mxu0  ;;  %1396 = vst.msk [vmem:[%s2213_s23 + $0x70] sm:$0xf] %vm1367_vm3, %v1716_v19  ;;  %v1719_v51 = vpack.c.bf16 %v1138_v21, %v1138_v21  ;;  %v1585_v46 = vadd.f32 -1.0, %v1938_v39 }
 0x123   : > { %v1944_v44 = vpop.eup %1943  ;;  %v957_v45 = vmul.f32 1.6732632, %v1587_v23  ;;  %v1613_v48 = vadd.f32 -1.0, %v1940_v18  ;;  %v2257_v49 = vpop.f32.mrb[15].mxu1  ;;  %1371 = vst.msk [vmem:[%s2213_s23 + $0xc] sm:$0xf] %vm1367_vm3, %v1691_v28  ;;  %v1689_v53 = vpack.c.bf16 %v1108_v31, %v1108_v31 }
 0x124   : > { %v1946_v50 = vpop.eup %1945  ;;  %v1084_v54 = vsel %vm1032_vm8, %v2148_v52, %v980_v32  ;;  %v985_v55 = vmul.f32 1.6732632, %v1615_v33  ;;  %v1588_v34 = vadd.f32 -1.0, %v1942_v43  ;;  %1399 = vst.msk [vmem:[%s2213_s23 + $0x7c] sm:$0xf] %vm1367_vm3, %v1719_v51  ;;  %v1616_v4 = vadd.f32 -1.0, %v1944_v44 }
 0x125   : > { %v1948_v56 = vpop.eup %1947  ;;  %v1136_v59 = vmul.f32 1.050701, %v1084_v54  ;;  %v1061_v60 = vsel %vm1009_vm9, %v2152_v57, %v957_v45  ;;  %v955_v35 = vmul.f32 1.6732632, %v1585_v46  ;;  %v983_v63 = vmul.f32 1.6732632, %v1613_v48 }
 0x126   : > { %1369 = vst.msk [vmem:[%s2213_s23 + $0x4] sm:$0xf] %vm1367_vm3, %v1689_v53  ;;  %v1113_v0 = vmul.f32 1.050701, %v1061_v60  ;;  %v1089_v52 = vsel %vm1037_vm10, %v2154_v58, %v985_v55  ;;  %v958_v3 = vmul.f32 1.6732632, %v1588_v34 }
 0x127   : > { %v1717_v7 = vpack.c.bf16 %v1136_v59, %v1136_v59  ;;  %v1141_v8 = vmul.f32 1.050701, %v1089_v52  ;;  %v1059_v38 = vsel %vm1007_vm11, %v2157_v61, %v955_v35  ;;  %v1087_v57 = vsel %vm1035_vm12, %v2159_v62, %v983_v63  ;;  %v2280_v9 = vpop.f32.mrb[16].mxu0  ;;  %v2282_v10 = vpop.f32.mrb[16].mxu1 }
 0x128   : > { %v1694_v39 = vpack.c.bf16 %v1113_v0, %v1113_v0  ;;  %v1111_v13 = vmul.f32 1.050701, %v1059_v38  ;;  %v1139_v58 = vmul.f32 1.050701, %v1087_v57  ;;  %v1062_v14 = vsel %vm1010_vm13, %v2163_v1, %v958_v3  ;;  %v2287_v15 = vpop.f32.mrb[17].mxu0  ;;  %v2289_v61 = vpop.f32.mrb[17].mxu1 }
 0x129   : > { %1397 = vst.msk [vmem:[%s2213_s23 + $0x74] sm:$0xf] %vm1367_vm3, %v1717_v7  ;;  %v1722_v16 = vpack.c.bf16 %v1141_v8, %v1141_v8  ;;  %v1114_v62 = vmul.f32 1.050701, %v1062_v14  ;;  %v986_v18 = vmul.f32 1.6732632, %v1616_v4 }
 0x12a   : > { %v1586_v19 = vadd.f32 -1.0, %v1946_v50  ;;  %v2293_v21 = vpop.f32.mrb[18].mxu0  ;;  %1374 = vst.msk [vmem:[%s2213_s23 + $0x18] sm:$0xf] %vm1367_vm3, %v1694_v39  ;;  %v1692_v22 = vpack.c.bf16 %v1111_v13, %v1111_v13  ;;  %v1720_v23 = vpack.c.bf16 %v1139_v58, %v1139_v58  ;;  %v1614_v1 = vadd.f32 -1.0, %v1948_v56  ;;  %v2299_v28 = vpop.f32.mrb[18].mxu1 }
 0x12b   : > { %v815_v43 = vmul.f32 1.442695, %v753_v36  ;;  %v2301_v31 = vpop.f32.mrb[19].mxu0  ;;  %1402 = vst.msk [vmem:[%s2213_s23 + $0x88] sm:$0xf] %vm1367_vm3, %v1722_v16  ;;  %v1695_v32 = vpack.c.bf16 %v1114_v62, %v1114_v62  ;;  %v1090_v33 = vsel %vm1038_vm14, %v2165_v2, %v986_v18  ;;  %v781_v51 = vmin.f32 %v2184_v24, 0.0 }
 0x12c   : > { %v956_v44 = vmul.f32 1.6732632, %v1586_v19  ;;  %v2309_v45 = vpop.f32.mrb[19].mxu1  ;;  %1372 = vst.msk [vmem:[%s2213_s23 + $0x10] sm:$0xf] %vm1367_vm3, %v1692_v22  ;;  %v751_v50 = vmin.f32 %v2186_v25, 0.0 }
 0x12d   : > { %1400 = vst.msk [vmem:[%s2213_s23 + $0x80] sm:$0xf] %vm1367_vm3, %v1720_v23  ;;  %v1142_v36 = vmul.f32 1.050701, %v1090_v33  ;;  %v984_v46 = vmul.f32 1.6732632, %v1614_v1  ;;  %1949 = vpow2.f32 %v815_v43 }
 0x12e   : > { %1375 = vst.msk [vmem:[%s2213_s23 + $0x1c] sm:$0xf] %vm1367_vm3, %v1695_v32  ;;  %v1060_v48 = vsel %vm1008_vm15, %v2169_v5, %v956_v44  ;;  %v871_v2 = vmul.f32 1.442695, %v781_v51  ;;  %v779_v34 = vmin.f32 %v2189_v29, 0.0  ;;  %v2323_v60 = vpop.f32.mrb[20].mxu0 }
 0x12f   : > { %v1723_v53 = vpack.c.bf16 %v1142_v36, %v1142_v36  ;;  %v1112_v54 = vmul.f32 1.050701, %v1060_v48  ;;  %v1088_v55 = vsel %vm1036_vm0, %v2171_v6, %v984_v46  ;;  %v811_v59 = vmul.f32 1.442695, %v751_v50  ;;  %v2328_v0 = vpop.f32.mrb[20].mxu1  ;;  %v2330_v52 = vpop.f32.mrb[21].mxu0 }
 0x130   : > { %v1140_v56 = vmul.f32 1.050701, %v1088_v55  ;;  %1951 = vpow2.f32 %v871_v2  ;;  %v867_v35 = vmul.f32 1.442695, %v779_v34  ;;  %v754_v63 = vmin.f32 %v2191_v30, 0.0  ;;  %v2333_v4 = vpop.f32.mrb[21].mxu1 }
 0x131   : > { %1403 = vst.msk [vmem:[%s2213_s23 + $0x8c] sm:$0xf] %vm1367_vm3, %v1723_v53  ;;  %v1693_v5 = vpack.c.bf16 %v1112_v54, %v1112_v54  ;;  %1953 = vpow2.f32 %v811_v59  ;;  %v782_v3 = vmin.f32 %v2194_v37, 0.0  ;;  %v2335_v7 = vpop.f32.mrb[22].mxu0  ;;  %v752_v38 = vmin.f32 %v2196_v40, 0.0  ;;  %v2340_v57 = vpop.f32.mrb[22].mxu1 }
 0x132   : > { %v1721_v6 = vpack.c.bf16 %v1140_v56, %v1140_v56  ;;  %1955 = vpow2.f32 %v867_v35  ;;  %v817_v8 = vmul.f32 1.442695, %v754_v63  ;;  %v2342_v39 = vpop.f32.mrb[23].mxu0  ;;  %v780_v58 = vmin.f32 %v2202_v47, 0.0  ;;  %v2348_v16 = vpop.f32.mrb[23].mxu1 }
 0x133   : > { %1373 = vst.msk [vmem:[%s2213_s23 + $0x14] sm:$0xf] %vm1367_vm3, %v1693_v5  ;;  %v873_v13 = vmul.f32 1.442695, %v782_v3  ;;  %v757_v14 = vmin.f32 %v2228_v11, 0.0  ;;  %v785_v18 = vmin.f32 %v2230_v12, 0.0 }
 0x134   : > { %1401 = vst.msk [vmem:[%s2213_s23 + $0x84] sm:$0xf] %vm1367_vm3, %v1721_v6  ;;  %1957 = vpow2.f32 %v817_v8  ;;  %v813_v62 = vmul.f32 1.442695, %v752_v38  ;;  %v869_v19 = vmul.f32 1.442695, %v780_v58 }
 0x135   : > { %1959 = vpow2.f32 %v873_v13  ;;  %v823_v22 = vmul.f32 1.442695, %v757_v14  ;;  %vm1041_vm2 = vcmp.gt.f32.partialorder %v2184_v24, 0.0  ;;  %v879_v1 = vmul.f32 1.442695, %v785_v18  ;;  %v2356_v44 = vpop.f32.mrb[24].mxu0 }
 0x136   : > { %1961 = vpow2.f32 %v813_v62  ;;  %v755_v43 = vmin.f32 %v2237_v17, 0.0  ;;  %vm1011_vm4 = vcmp.gt.f32.partialorder %v2186_v25, 0.0  ;;  %v783_v33 = vmin.f32 %v2239_v42, 0.0  ;;  %v2360_v46 = vpop.f32.mrb[25].mxu0 }
 0x137   : > { %v1950_v23 = vpop.eup %1949  ;;  %1963 = vpow2.f32 %v869_v19  ;;  %vm1039_vm5 = vcmp.gt.f32.partialorder %v2189_v29, 0.0  ;;  %v758_v36 = vmin.f32 %v2246_v26, 0.0  ;;  %v786_v53 = vmin.f32 %v2248_v27, 0.0  ;;  %v2363_v54 = vpop.f32.mrb[26].mxu0 }
 0x138   : > { %v1591_v32 = vadd.f32 -1.0, %v1950_v23  ;;  %1965 = vpow2.f32 %v823_v22  ;;  %v819_v51 = vmul.f32 1.442695, %v755_v43  ;;  %v875_v50 = vmul.f32 1.442695, %v783_v33  ;;  %v2366_v56 = vpop.f32.mrb[27].mxu0 }
 0x139   : > { %1967 = vpow2.f32 %v879_v1  ;;  %vm1014_vm6 = vcmp.gt.f32.partialorder %v2191_v30, 0.0  ;;  %v825_v34 = vmul.f32 1.442695, %v758_v36  ;;  %vm1042_vm7 = vcmp.gt.f32.partialorder %v2194_v37, 0.0 }
 0x13a   : > { %v1952_v48 = vpop.eup %1951  ;;  %v961_v2 = vmul.f32 1.6732632, %v1591_v32  ;;  %1969 = vpow2.f32 %v819_v51  ;;  %v881_v35 = vmul.f32 1.442695, %v786_v53  ;;  %v756_v63 = vmin.f32 %v2253_v41, 0.0 }
 0x13b   : > { %v1619_v55 = vadd.f32 -1.0, %v1952_v48  ;;  %v1954_v59 = vpop.eup %1953  ;;  %1971 = vpow2.f32 %v875_v50  ;;  %vm1012_vm8 = vcmp.gt.f32.partialorder %v2196_v40, 0.0  ;;  %vm1040_vm9 = vcmp.gt.f32.partialorder %v2202_v47, 0.0 }
 0x13c   : > { %v1065_v5 = vsel %vm1013_vm1, %v2181_v20, %v961_v2  ;;  %v1956_v6 = vpop.eup %1955  ;;  %v1589_v38 = vadd.f32 -1.0, %v1954_v59  ;;  %1973 = vpow2.f32 %v825_v34  ;;  %v821_v58 = vmul.f32 1.442695, %v756_v63 }
 0x13d   : > { %v1117_v3 = vmul.f32 1.050701, %v1065_v5  ;;  %v989_v8 = vmul.f32 1.6732632, %v1619_v55  ;;  %v1617_v13 = vadd.f32 -1.0, %v1956_v6  ;;  %1975 = vpow2.f32 %v881_v35 }
 0x13e   : > { %v1958_v14 = vpop.eup %1957  ;;  %v959_v18 = vmul.f32 1.6732632, %v1589_v38  ;;  %v784_v19 = vmin.f32 %v2257_v49, 0.0  ;;  %1977 = vpow2.f32 %v821_v58  ;;  %vm1017_vm10 = vcmp.gt.f32.partialorder %v2228_v11, 0.0 }
 0x13f   : > { %v1698_v62 = vpack.c.bf16 %v1117_v3, %v1117_v3  ;;  %v1093_v20 = vsel %vm1041_vm2, %v2184_v24, %v989_v8  ;;  %v1960_v22 = vpop.eup %1959  ;;  %v987_v1 = vmul.f32 1.6732632, %v1617_v13  ;;  %v1592_v43 = vadd.f32 -1.0, %v1958_v14 }
 0x140   : > { %v1145_v23 = vmul.f32 1.050701, %v1093_v20  ;;  %v1962_v32 = vpop.eup %1961  ;;  %v1063_v33 = vsel %vm1011_vm4, %v2186_v25, %v959_v18  ;;  %v1620_v51 = vadd.f32 -1.0, %v1960_v22  ;;  %v877_v24 = vmul.f32 1.442695, %v784_v19 }
 0x141   : > { %1378 = vst.msk [vmem:[%s2213_s23 + $0x28] sm:$0xf] %vm1367_vm3, %v1698_v62  ;;  %v1964_v36 = vpop.eup %1963  ;;  %v1115_v2 = vmul.f32 1.050701, %v1063_v33  ;;  %v1091_v50 = vsel %vm1039_vm5, %v2189_v29, %v987_v1  ;;  %v962_v53 = vmul.f32 1.6732632, %v1592_v43 }
 0x142   : > { %v1726_v48 = vpack.c.bf16 %v1145_v23, %v1145_v23  ;;  %vm1045_vm11 = vcmp.gt.f32.partialorder %v2230_v12, 0.0  ;;  %v1966_v55 = vpop.eup %1965  ;;  %v1143_v34 = vmul.f32 1.050701, %v1091_v50  ;;  %v990_v59 = vmul.f32 1.6732632, %v1620_v51 }
 0x143   : > { %v1590_v5 = vadd.f32 -1.0, %v1962_v32  ;;  %v1618_v25 = vadd.f32 -1.0, %v1964_v36  ;;  %vm1015_vm12 = vcmp.gt.f32.partialorder %v2237_v17, 0.0  ;;  %v1968_v35 = vpop.eup %1967  ;;  %v1696_v63 = vpack.c.bf16 %v1115_v2, %v1115_v2 }
 0x144   : > { %1406 = vst.msk [vmem:[%s2213_s23 + $0x98] sm:$0xf] %vm1367_vm3, %v1726_v48  ;;  %v1066_v6 = vsel %vm1014_vm6, %v2191_v30, %v962_v53  ;;  %v1595_v29 = vadd.f32 -1.0, %v1966_v55  ;;  %1979 = vpow2.f32 %v877_v24  ;;  %v1970_v3 = vpop.eup %1969  ;;  %v1724_v8 = vpack.c.bf16 %v1143_v34, %v1143_v34 }
 0x145   : > { %v1118_v38 = vmul.f32 1.050701, %v1066_v6  ;;  %v1094_v13 = vsel %vm1042_vm7, %v2194_v37, %v990_v59  ;;  %v960_v58 = vmul.f32 1.6732632, %v1590_v5  ;;  %vm1043_vm13 = vcmp.gt.f32.partialorder %v2239_v42, 0.0  ;;  %v1972_v14 = vpop.eup %1971 }
 0x146   : > { %vm1018_vm14 = vcmp.gt.f32.partialorder %v2246_v26, 0.0  ;;  %1376 = vst.msk [vmem:[%s2213_s23 + $0x20] sm:$0xf] %vm1367_vm3, %v1696_v63  ;;  %v1146_v30 = vmul.f32 1.050701, %v1094_v13  ;;  %v1974_v18 = vpop.eup %1973  ;;  %v1623_v22 = vadd.f32 -1.0, %v1968_v35 }
 0x147   : > { %v988_v62 = vmul.f32 1.6732632, %v1618_v25  ;;  %v965_v20 = vmul.f32 1.6732632, %v1595_v29  ;;  %1404 = vst.msk [vmem:[%s2213_s23 + $0x90] sm:$0xf] %vm1367_vm3, %v1724_v8  ;;  %v1699_v19 = vpack.c.bf16 %v1118_v38, %v1118_v38  ;;  %v1064_v37 = vsel %vm1012_vm8, %v2196_v40, %v960_v58  ;;  %v1976_v1 = vpop.eup %1975 }
 0x148   : > { %v1593_v23 = vadd.f32 -1.0, %v1970_v3  ;;  %v1727_v43 = vpack.c.bf16 %v1146_v30, %v1146_v30  ;;  %v1116_v32 = vmul.f32 1.050701, %v1064_v37  ;;  %v993_v48 = vmul.f32 1.6732632, %v1623_v22  ;;  %v1978_v40 = vpop.eup %1977 }
 0x149   : > { %v1092_v33 = vsel %vm1040_vm9, %v2202_v47, %v988_v62  ;;  %v1069_v51 = vsel %vm1017_vm10, %v2228_v11, %v965_v20  ;;  %1379 = vst.msk [vmem:[%s2213_s23 + $0x2c] sm:$0xf] %vm1367_vm3, %v1699_v19  ;;  %v1621_v53 = vadd.f32 -1.0, %v1972_v14  ;;  %v1596_v55 = vadd.f32 -1.0, %v1974_v18 }
 0x14a   : > { %v1144_v24 = vmul.f32 1.050701, %v1092_v33  ;;  %v1121_v36 = vmul.f32 1.050701, %v1069_v51  ;;  %1407 = vst.msk [vmem:[%s2213_s23 + $0x9c] sm:$0xf] %vm1367_vm3, %v1727_v43  ;;  %v1697_v2 = vpack.c.bf16 %v1116_v32, %v1116_v32  ;;  %v1097_v11 = vsel %vm1045_vm11, %v2230_v12, %v993_v48 }
 0x14b   : > { %v963_v50 = vmul.f32 1.6732632, %v1593_v23  ;;  %v1624_v59 = vadd.f32 -1.0, %v1976_v1  ;;  %v1149_v5 = vmul.f32 1.050701, %v1097_v11  ;;  %v1594_v3 = vadd.f32 -1.0, %v1978_v40 }
 0x14c   : > { %v1725_v47 = vpack.c.bf16 %v1144_v24, %v1144_v24  ;;  %v1702_v34 = vpack.c.bf16 %v1121_v36, %v1121_v36  ;;  %1377 = vst.msk [vmem:[%s2213_s23 + $0x24] sm:$0xf] %vm1367_vm3, %v1697_v2  ;;  %v991_v35 = vmul.f32 1.6732632, %v1621_v53  ;;  %v966_v63 = vmul.f32 1.6732632, %v1596_v55 }
 0x14d   : > { %v1067_v25 = vsel %vm1015_vm12, %v2237_v17, %v963_v50  ;;  %v994_v29 = vmul.f32 1.6732632, %v1624_v59  ;;  %v761_v12 = vmin.f32 %v2280_v9, 0.0  ;;  %v1730_v38 = vpack.c.bf16 %v1149_v5, %v1149_v5 }
 0x14e   : > { %1405 = vst.msk [vmem:[%s2213_s23 + $0x94] sm:$0xf] %vm1367_vm3, %v1725_v47  ;;  %1382 = vst.msk [vmem:[%s2213_s23 + $0x38] sm:$0xf] %vm1367_vm3, %v1702_v34  ;;  %v1119_v6 = vmul.f32 1.050701, %v1067_v25  ;;  %v1980_v8 = vpop.eup %1979  ;;  %v1095_v13 = vsel %vm1043_vm13, %v2239_v42, %v991_v35  ;;  %v1070_v17 = vsel %vm1018_vm14, %v2246_v26, %v966_v63 }
 0x14f   : > { %vm1046_vm15 = vcmp.gt.f32.partialorder %v2248_v27, 0.0  ;;  %v1147_v14 = vmul.f32 1.050701, %v1095_v13  ;;  %v1122_v30 = vmul.f32 1.050701, %v1070_v17  ;;  %v1622_v19 = vadd.f32 -1.0, %v1980_v8 }
 0x150   : > { %v1700_v58 = vpack.c.bf16 %v1119_v6, %v1119_v6  ;;  %v1098_v62 = vsel %vm1046_vm15, %v2248_v27, %v994_v29  ;;  %1410 = vst.msk [vmem:[%s2213_s23 + $0xa8] sm:$0xf] %vm1367_vm3, %v1730_v38  ;;  %v964_v18 = vmul.f32 1.6732632, %v1594_v3  ;;  %v789_v42 = vmin.f32 %v2282_v10, 0.0 }
 0x151   : > { %v1150_v20 = vmul.f32 1.050701, %v1098_v62  ;;  %v1728_v26 = vpack.c.bf16 %v1147_v14, %v1147_v14  ;;  %v1703_v37 = vpack.c.bf16 %v1122_v30, %v1122_v30  ;;  %vm1016_vm0 = vcmp.gt.f32.partialorder %v2253_v41, 0.0 }
 0x152   : > { %1380 = vst.msk [vmem:[%s2213_s23 + $0x30] sm:$0xf] %vm1367_vm3, %v1700_v58  ;;  %v831_v22 = vmul.f32 1.442695, %v761_v12  ;;  %v1068_v1 = vsel %vm1016_vm0, %v2253_v41, %v964_v18  ;;  %v992_v27 = vmul.f32 1.6732632, %v1622_v19 }
 0x153   : > { %v1731_v23 = vpack.c.bf16 %v1150_v20, %v1150_v20  ;;  %v887_v43 = vmul.f32 1.442695, %v789_v42  ;;  %1408 = vst.msk [vmem:[%s2213_s23 + $0xa0] sm:$0xf] %vm1367_vm3, %v1728_v26  ;;  %1383 = vst.msk [vmem:[%s2213_s23 + $0x3c] sm:$0xf] %vm1367_vm3, %v1703_v37 }
 0x154   : > { %v1120_v32 = vmul.f32 1.050701, %v1068_v1  ;;  %vm1044_vm1 = vcmp.gt.f32.partialorder %v2257_v49, 0.0  ;;  %1981 = vpow2.f32 %v831_v22  ;;  %v759_v33 = vmin.f32 %v2287_v15, 0.0 }
 0x155   : > { %1411 = vst.msk [vmem:[%s2213_s23 + $0xac] sm:$0xf] %vm1367_vm3, %v1731_v23  ;;  %v1096_v51 = vsel %vm1044_vm1, %v2257_v49, %v992_v27  ;;  %1983 = vpow2.f32 %v887_v43  ;;  %v787_v41 = vmin.f32 %v2289_v61, 0.0  ;;  %v762_v40 = vmin.f32 %v2293_v21, 0.0 }
 0x156   : > { %v1701_v24 = vpack.c.bf16 %v1120_v32, %v1120_v32  ;;  %v1148_v36 = vmul.f32 1.050701, %v1096_v51  ;;  %v827_v48 = vmul.f32 1.442695, %v759_v33  ;;  %v790_v50 = vmin.f32 %v2299_v28, 0.0 }
 0x157   : > { %v883_v2 = vmul.f32 1.442695, %v787_v41  ;;  %v833_v55 = vmul.f32 1.442695, %v762_v40  ;;  %v760_v47 = vmin.f32 %v2301_v31, 0.0  ;;  %v788_v34 = vmin.f32 %v2309_v45, 0.0 }
 0x158   : > { %1381 = vst.msk [vmem:[%s2213_s23 + $0x34] sm:$0xf] %vm1367_vm3, %v1701_v24  ;;  %v1729_v53 = vpack.c.bf16 %v1148_v36, %v1148_v36  ;;  %1985 = vpow2.f32 %v827_v48  ;;  %v889_v49 = vmul.f32 1.442695, %v790_v50  ;;  %v765_v59 = vmin.f32 %v2323_v60, 0.0 }
 0x159   : > { %1987 = vpow2.f32 %v883_v2  ;;  %v829_v11 = vmul.f32 1.442695, %v760_v47  ;;  %v885_v5 = vmul.f32 1.442695, %v788_v34  ;;  %v793_v25 = vmin.f32 %v2328_v0, 0.0 }
 0x15a   : > { %1409 = vst.msk [vmem:[%s2213_s23 + $0xa4] sm:$0xf] %vm1367_vm3, %v1729_v53  ;;  %1989 = vpow2.f32 %v833_v55  ;;  %vm1021_vm2 = vcmp.gt.f32.partialorder %v2280_v9, 0.0  ;;  %v839_v35 = vmul.f32 1.442695, %v765_v59  ;;  %v763_v63 = vmin.f32 %v2330_v52, 0.0 }
 0x15b   : > { %1991 = vpow2.f32 %v889_v49  ;;  %vm1049_vm4 = vcmp.gt.f32.partialorder %v2282_v10, 0.0  ;;  %v895_v6 = vmul.f32 1.442695, %v793_v25  ;;  %v791_v29 = vmin.f32 %v2333_v4, 0.0 }
 0x15c   : > { %1993 = vpow2.f32 %v829_v11  ;;  %vm1019_vm5 = vcmp.gt.f32.partialorder %v2287_v15, 0.0  ;;  %v835_v12 = vmul.f32 1.442695, %v763_v63  ;;  %v766_v8 = vmin.f32 %v2335_v7, 0.0 }
 0x15d   : > { %1995 = vpow2.f32 %v885_v5  ;;  %vm1047_vm6 = vcmp.gt.f32.partialorder %v2289_v61, 0.0  ;;  %v891_v17 = vmul.f32 1.442695, %v791_v29  ;;  %vm1022_vm7 = vcmp.gt.f32.partialorder %v2293_v21, 0.0 }
 0x15e   : > { %v1982_v3 = vpop.eup %1981  ;;  %1997 = vpow2.f32 %v839_v35  ;;  %v841_v14 = vmul.f32 1.442695, %v766_v8  ;;  %v794_v30 = vmin.f32 %v2340_v57, 0.0  ;;  %vm1050_vm8 = vcmp.gt.f32.partialorder %v2299_v28, 0.0 }
 0x15f   : > { %v1984_v38 = vpop.eup %1983  ;;  %v1599_v13 = vadd.f32 -1.0, %v1982_v3  ;;  %1999 = vpow2.f32 %v895_v6  ;;  %v764_v20 = vmin.f32 %v2342_v39, 0.0  ;;  %vm1020_vm9 = vcmp.gt.f32.partialorder %v2301_v31, 0.0 }
 0x160   : > { %v1627_v58 = vadd.f32 -1.0, %v1984_v38  ;;  %2001 = vpow2.f32 %v835_v12  ;;  %v897_v42 = vmul.f32 1.442695, %v794_v30  ;;  %vm1048_vm10 = vcmp.gt.f32.partialorder %v2309_v45, 0.0 }
 0x161   : > { %v969_v62 = vmul.f32 1.6732632, %v1599_v13  ;;  %2003 = vpow2.f32 %v891_v17  ;;  %v837_v23 = vmul.f32 1.442695, %v764_v20  ;;  %v792_v1 = vmin.f32 %v2348_v16, 0.0 }
 0x162   : > { %v1986_v18 = vpop.eup %1985  ;;  %v997_v19 = vmul.f32 1.6732632, %v1627_v58  ;;  %2005 = vpow2.f32 %v841_v14  ;;  %vm1025_vm11 = vcmp.gt.f32.partialorder %v2323_v60, 0.0  ;;  %vm1053_vm12 = vcmp.gt.f32.partialorder %v2328_v0, 0.0 }
 0x163   : > { %v1988_v26 = vpop.eup %1987  ;;  %v1073_v37 = vsel %vm1021_vm2, %v2280_v9, %v969_v62  ;;  %v1597_v22 = vadd.f32 -1.0, %v1986_v18  ;;  %2007 = vpow2.f32 %v897_v42  ;;  %v2486_v50 = vmul.f32 1.442695, %v792_v1 }
 0x164   : > { %v1990_v27 = vpop.eup %1989  ;;  %v1125_v43 = vmul.f32 1.050701, %v1073_v37  ;;  %v1101_v32 = vsel %vm1049_vm4, %v2282_v10, %v997_v19  ;;  %v1625_v33 = vadd.f32 -1.0, %v1988_v26  ;;  %2009 = vpow2.f32 %v837_v23 }
 0x165   : > { %v1992_v51 = vpop.eup %1991  ;;  %v1153_v41 = vmul.f32 1.050701, %v1101_v32  ;;  %v967_v9 = vmul.f32 1.6732632, %v1597_v22  ;;  %v1600_v24 = vadd.f32 -1.0, %v1990_v27  ;;  %vm1023_vm13 = vcmp.gt.f32.partialorder %v2330_v52, 0.0 }
 0x166   : > { %v1994_v36 = vpop.eup %1993  ;;  %v1706_v48 = vpack.c.bf16 %v1125_v43, %v1125_v43  ;;  %v995_v40 = vmul.f32 1.6732632, %v1625_v33  ;;  %v1628_v2 = vadd.f32 -1.0, %v1992_v51  ;;  %vm1051_vm14 = vcmp.gt.f32.partialorder %v2333_v4, 0.0 }
 0x167   : > { %v1996_v53 = vpop.eup %1995  ;;  %v1734_v55 = vpack.c.bf16 %v1153_v41, %v1153_v41  ;;  %v1071_v10 = vsel %vm1019_vm5, %v2287_v15, %v967_v9  ;;  %v970_v47 = vmul.f32 1.6732632, %v1600_v24  ;;  %v1598_v49 = vadd.f32 -1.0, %v1994_v36 }
 0x168   : > { %v1998_v34 = vpop.eup %1997  ;;  %1386 = vst.msk [vmem:[%s2213_s23 + $0x48] sm:$0xf] %vm1367_vm3, %v1706_v48  ;;  %v1123_v11 = vmul.f32 1.050701, %v1071_v10  ;;  %v1099_v59 = vsel %vm1047_vm6, %v2289_v61, %v995_v40  ;;  %v998_v5 = vmul.f32 1.6732632, %v1628_v2  ;;  %2011 = vpow2.f32 %v2486_v50 }
 0x169   : > { %v1626_v25 = vadd.f32 -1.0, %v1996_v53  ;;  %v2000_v35 = vpop.eup %1999  ;;  %1414 = vst.msk [vmem:[%s2213_s23 + $0xb8] sm:$0xf] %vm1367_vm3, %v1734_v55  ;;  %v1151_v15 = vmul.f32 1.050701, %v1099_v59  ;;  %v1074_v63 = vsel %vm1022_vm7, %v2293_v21, %v970_v47  ;;  %v1603_v29 = vadd.f32 -1.0, %v1998_v34 }
 0x16a   : > { %v968_v6 = vmul.f32 1.6732632, %v1598_v49  ;;  %v2002_v3 = vpop.eup %2001  ;;  %v1704_v12 = vpack.c.bf16 %v1123_v11, %v1123_v11  ;;  %v1126_v61 = vmul.f32 1.050701, %v1074_v63  ;;  %v1102_v8 = vsel %vm1050_vm8, %v2299_v28, %v998_v5 }
 0x16b   : > { %v996_v38 = vmul.f32 1.6732632, %v1626_v25  ;;  %vm1026_vm15 = vcmp.gt.f32.partialorder %v2335_v7, 0.0  ;;  %vm1054_vm0 = vcmp.gt.f32.partialorder %v2340_v57, 0.0  ;;  %v2004_v13 = vpop.eup %2003  ;;  %v1732_v21 = vpack.c.bf16 %v1151_v15, %v1151_v15 }
 0x16c   : > { %v1154_v17 = vmul.f32 1.050701, %v1102_v8  ;;  %v1072_v58 = vsel %vm1020_vm9, %v2301_v31, %v968_v6  ;;  %v973_v14 = vmul.f32 1.6732632, %v1603_v29  ;;  %vm1024_vm1 = vcmp.gt.f32.partialorder %v2342_v39, 0.0  ;;  %v2006_v30 = vpop.eup %2005 }
 0x16d   : > { %1384 = vst.msk [vmem:[%s2213_s23 + $0x40] sm:$0xf] %vm1367_vm3, %v1704_v12  ;;  %v1707_v28 = vpack.c.bf16 %v1126_v61, %v1126_v61  ;;  %v1124_v62 = vmul.f32 1.050701, %v1072_v58  ;;  %v1100_v20 = vsel %vm1048_vm10, %v2309_v45, %v996_v38  ;;  %v1631_v18 = vadd.f32 -1.0, %v2000_v35  ;;  %v2008_v37 = vpop.eup %2007 }
 0x16e   : > { %1412 = vst.msk [vmem:[%s2213_s23 + $0xb0] sm:$0xf] %vm1367_vm3, %v1732_v21  ;;  %v1735_v19 = vpack.c.bf16 %v1154_v17, %v1154_v17  ;;  %v1152_v42 = vmul.f32 1.050701, %v1100_v20  ;;  %v1077_v31 = vsel %vm1025_vm11, %v2323_v60, %v973_v14  ;;  %v1601_v26 = vadd.f32 -1.0, %v2002_v3  ;;  %v2010_v45 = vpop.eup %2009 }
 0x16f   : > { %1387 = vst.msk [vmem:[%s2213_s23 + $0x4c] sm:$0xf] %vm1367_vm3, %v1707_v28  ;;  %v1705_v22 = vpack.c.bf16 %v1124_v62, %v1124_v62  ;;  %v1129_v23 = vmul.f32 1.050701, %v1077_v31  ;;  %v1001_v1 = vmul.f32 1.6732632, %v1631_v18 }
 0x170   : > { %v1629_v27 = vadd.f32 -1.0, %v2004_v13  ;;  %1415 = vst.msk [vmem:[%s2213_s23 + $0xbc] sm:$0xf] %vm1367_vm3, %v1735_v19  ;;  %v1733_v43 = vpack.c.bf16 %v1152_v42, %v1152_v42  ;;  %v971_v32 = vmul.f32 1.6732632, %v1601_v26  ;;  %v1604_v33 = vadd.f32 -1.0, %v2006_v30 }
 0x171   : > { %v1632_v51 = vadd.f32 -1.0, %v2008_v37  ;;  %1385 = vst.msk [vmem:[%s2213_s23 + $0x44] sm:$0xf] %vm1367_vm3, %v1705_v22  ;;  %v1710_v60 = vpack.c.bf16 %v1129_v23, %v1129_v23  ;;  %v1105_v41 = vsel %vm1053_vm12, %v2328_v0, %v1001_v1  ;;  %v1602_v24 = vadd.f32 -1.0, %v2010_v45 }
 0x172   : > { %v999_v9 = vmul.f32 1.6732632, %v1629_v27  ;;  %1413 = vst.msk [vmem:[%s2213_s23 + $0xb4] sm:$0xf] %vm1367_vm3, %v1733_v43  ;;  %v1157_v36 = vmul.f32 1.050701, %v1105_v41  ;;  %v1075_v48 = vsel %vm1023_vm13, %v2330_v52, %v971_v32  ;;  %v2012_v61 = vpop.eup %2011 }
 0x173   : > { %v974_v40 = vmul.f32 1.6732632, %v1604_v33  ;;  %v1002_v2 = vmul.f32 1.6732632, %v1632_v51  ;;  %1390 = vst.msk [vmem:[%s2213_s23 + $0x58] sm:$0xf] %vm1367_vm3, %v1710_v60 }
 0x174   : > { %v1127_v53 = vmul.f32 1.050701, %v1075_v48  ;;  %v1103_v0 = vsel %vm1051_vm14, %v2333_v4, %v999_v9  ;;  %v972_v55 = vmul.f32 1.6732632, %v1602_v24  ;;  %v1738_v10 = vpack.c.bf16 %v1157_v36, %v1157_v36 }
 0x175   : > { %v1155_v47 = vmul.f32 1.050701, %v1103_v0  ;;  %v1078_v52 = vsel %vm1026_vm15, %v2335_v7, %v974_v40  ;;  %v1106_v49 = vsel %vm1054_vm0, %v2340_v57, %v1002_v2  ;;  %v769_v7 = vmin.f32 %v2356_v44, 0.0 }
 0x176   : > { %v1708_v34 = vpack.c.bf16 %v1127_v53, %v1127_v53  ;;  %v1130_v11 = vmul.f32 1.050701, %v1078_v52  ;;  %v1158_v59 = vmul.f32 1.050701, %v1106_v49  ;;  %v1076_v4 = vsel %vm1024_vm1, %v2342_v39, %v972_v55  ;;  %1418 = vst.msk [vmem:[%s2213_s23 + $0xc8] sm:$0xf] %vm1367_vm3, %v1738_v10 }
 0x177   : > { %v1736_v50 = vpack.c.bf16 %v1155_v47, %v1155_v47  ;;  %v1128_v5 = vmul.f32 1.050701, %v1076_v4  ;;  %v767_v35 = vmin.f32 %v2360_v46, 0.0  ;;  %v847_v63 = vmul.f32 1.442695, %v769_v7 }
 0x178   : > { %1388 = vst.msk [vmem:[%s2213_s23 + $0x50] sm:$0xf] %vm1367_vm3, %v1708_v34  ;;  %v1711_v25 = vpack.c.bf16 %v1130_v11, %v1130_v11  ;;  %v1739_v57 = vpack.c.bf16 %v1158_v59, %v1158_v59  ;;  %v770_v6 = vmin.f32 %v2363_v54, 0.0  ;;  %v768_v29 = vmin.f32 %v2366_v56, 0.0 }
 0x179   : > { %1416 = vst.msk [vmem:[%s2213_s23 + $0xc0] sm:$0xf] %vm1367_vm3, %v1736_v50  ;;  %v1709_v15 = vpack.c.bf16 %v1128_v5, %v1128_v5  ;;  %v843_v39 = vmul.f32 1.442695, %v767_v35  ;;  %2013 = vpow2.f32 %v847_v63  ;;  %v1630_v8 = vadd.f32 -1.0, %v2012_v61 }
 0x17a   : > { %1391 = vst.msk [vmem:[%s2213_s23 + $0x5c] sm:$0xf] %vm1367_vm3, %v1711_v25  ;;  %1419 = vst.msk [vmem:[%s2213_s23 + $0xcc] sm:$0xf] %vm1367_vm3, %v1739_v57  ;;  %v849_v3 = vmul.f32 1.442695, %v770_v6 }
 0x17b   : > { %1389 = vst.msk [vmem:[%s2213_s23 + $0x54] sm:$0xf] %vm1367_vm3, %v1709_v15  ;;  %2015 = vpow2.f32 %v843_v39  ;;  %v845_v12 = vmul.f32 1.442695, %v768_v29  ;;  %v1000_v38 = vmul.f32 1.6732632, %v1630_v8 }
 0x17c   : > { %2017 = vpow2.f32 %v849_v3  ;;  %vm1052_vm2 = vcmp.gt.f32.partialorder %v2348_v16, 0.0  ;;  %vm1029_vm4 = vcmp.gt.f32.partialorder %v2356_v44, 0.0  ;;  %vm1027_vm5 = vcmp.gt.f32.partialorder %v2360_v46, 0.0 }
 0x17d   : > { %2019 = vpow2.f32 %v845_v12  ;;  %v1104_v13 = vsel %vm1052_vm2, %v2348_v16, %v1000_v38  ;;  %vm1030_vm6 = vcmp.gt.f32.partialorder %v2363_v54, 0.0  ;;  %vm1028_vm7 = vcmp.gt.f32.partialorder %v2366_v56, 0.0 }
 0x17e   : > { %v1156_v21 = vmul.f32 1.050701, %v1104_v13 }
 0x180   : > { %v1737_v14 = vpack.c.bf16 %v1156_v21, %v1156_v21 }
 0x182   : > { %1417 = vst.msk [vmem:[%s2213_s23 + $0xc4] sm:$0xf] %vm1367_vm3, %v1737_v14 }
 0x183   : > { %v2014_v17 = vpop.eup %2013 }
 0x184   : > { %v1607_v30 = vadd.f32 -1.0, %v2014_v17 }
 0x185   : > { %v2016_v58 = vpop.eup %2015 }
 0x186   : > { %v2018_v28 = vpop.eup %2017  ;;  %v1605_v62 = vadd.f32 -1.0, %v2016_v58  ;;  %v977_v18 = vmul.f32 1.6732632, %v1607_v30 }
 0x187   : > { %v2020_v20 = vpop.eup %2019  ;;  %v1608_v19 = vadd.f32 -1.0, %v2018_v28 }
 0x188   : > { %v975_v42 = vmul.f32 1.6732632, %v1605_v62  ;;  %v1606_v31 = vadd.f32 -1.0, %v2020_v20  ;;  %v1081_v26 = vsel %vm1029_vm4, %v2356_v44, %v977_v18 }
 0x189   : > { %v978_v16 = vmul.f32 1.6732632, %v1608_v19  ;;  %v1133_v37 = vmul.f32 1.050701, %v1081_v26 }
 0x18a   : > { %v1079_v22 = vsel %vm1027_vm5, %v2360_v46, %v975_v42  ;;  %v976_v23 = vmul.f32 1.6732632, %v1606_v31 }
 0x18b   : > { %v1131_v1 = vmul.f32 1.050701, %v1079_v22  ;;  %v1082_v27 = vsel %vm1030_vm6, %v2363_v54, %v978_v16  ;;  %v1714_v45 = vpack.c.bf16 %v1133_v37, %v1133_v37 }
 0x18c   : > { %v1134_v43 = vmul.f32 1.050701, %v1082_v27  ;;  %v1080_v44 = vsel %vm1028_vm7, %v2366_v56, %v976_v23 }
 0x18d   : > { %v1712_v32 = vpack.c.bf16 %v1131_v1, %v1131_v1  ;;  %v1132_v33 = vmul.f32 1.050701, %v1080_v44  ;;  %1394 = vst.msk [vmem:[%s2213_s23 + $0x68] sm:$0xf] %vm1367_vm3, %v1714_v45 }
 0x18e   : > { %v1715_v51 = vpack.c.bf16 %v1134_v43, %v1134_v43 }
 0x18f   : > { %1392 = vst.msk [vmem:[%s2213_s23 + $0x60] sm:$0xf] %vm1367_vm3, %v1712_v32  ;;  %v1713_v46 = vpack.c.bf16 %v1132_v33, %v1132_v33 }
 0x190   : > { %1395 = vst.msk [vmem:[%s2213_s23 + $0x6c] sm:$0xf] %vm1367_vm3, %v1715_v51 }
 0x191   : > { %1393 = vst.msk [vmem:[%s2213_s23 + $0x64] sm:$0xf] %vm1367_vm3, %v1713_v46 }
 0x192 PF: > { %s12_s11 = sadd.s32 1, %s2043_s11   ;;  %s2600_s9 = smov %s2039_s10 }
 0x193   : > { %p9_p5 = scmp.ge.s32.totalorder %s12_s11, 6   ;;  %s2601_s10 = smov %s2603_s12 }
 0x195   :  { %11 = sbr.rel (!%p9_p5) target bundleno = 2 (0x2), region = 61 }

// kernel: netG_forward.14
= control target key start
LH: loop header
LB: loop body
LE: loop exit
PB: predicated region body
PF: predicated region fallthrough
CT: control target
= control target key end

     0   :  { %s7157_s9 = smov 0   ;;  %s7159_s10 = smov 0   ;;  %s9504_s0 = inlined_call_operand.vmem [shape: bf16[4,1712,64], index: 0, kind: input, shape index: {}]   ;;  %s9505_s1 = inlined_call_operand.vmem [shape: bf16[4,64,8], index: 1, kind: input, shape index: {}]   ;;  %s9506_s2 = inlined_call_operand.vmem [shape: bf16[4,1712,8], index: 2, kind: output, shape index: {}]  }
   0x1   :  { %s7161_s11 = smov 0  }
   0x2 LB: > { %s31_s12 = sadd.s32 1, %s7134_s10  ;;  %p5127_p0 = scmp.ge.s32.totalorder %s7138_s11, 1  ;;  %s7138_s11 = sphi %s7161_s11, %s12_s11   ;;  %s7134_s10 = sphi %s7159_s10, %s9508_s10   ;;  %s7130_s9 = sphi %s7157_s9, %s9507_s9  }
   0x3   : > { %p33_p1 = scmp.ge.s32.totalorder %s31_s12, 4  ;;  %p157_p2 = scmp.lt.s32.totalorder %s7138_s11, 5 }
   0x5   : > { %s9510_s12 = smov (%p33_p1, %s31_s12), 0  ;;  %p158_p3 = pnand %p5127_p0, %p157_p2 }
   0x6   : > { %p199_p4 = scmp.lt.s32.totalorder (!%p158_p3), %s7130_s9, 3  ;;  %v7140_v0 = vmov (!%p158_p3), 0.0   ;;  %vm7141_vm0 = vmmov (!%p158_p3), 0   ;;  %vm1011_vm1 = vcmask (!%p158_p3), 523264   ;;  %vm4790_vm2 = vcmask (!%p158_p3), 60416  }
   0x7   : > { %161 = sbr.rel (%p158_p3) target bundleno = 782 (0x30e), region = 28  ;;  %6106 = vmatprep.subr.bf16.mxu0 (!%p158_p3), %v7140_v0  ;;  %6542 = vmatprep.subr.bf16.mxu1 (!%p158_p3), %v7140_v0 }
   0x8   : > { %6114 = vmatprep.mubr.msk.bf16.mxu0 (!%p158_p3), %vm7141_vm0, %v7140_v0  ;;  %6330 = vmatprep.mubr.msk.bf16.mxu1 (!%p158_p3), %vm7141_vm0, %v7140_v0 }
   0xe   : > { %s9512_s9 = smov (!%p199_p4, %s7130_s9), 3 }
   0xf   : > { %s5780_s13 = sshll.u32 %s9512_s9, 5  ;;  %s6550_s14 = smul.u32 856, %s9512_s9 }
  0x10   : > { %s215_s17 = scalar_lea.vmem %s9505_s1, %s5780_s13 }
  0x11   : > { %v6577_v1 = vld [vmem:[%s215_s17] sm:$0xff]   ;;  %v6578_v2 = vld [vmem:[%s215_s17 + $0x8] sm:$0xff]   ;;  %s7195_s20 = scalar_lea.vmem %s9504_s0, %s6550_s14  ;;  %v6579_v3 = vld [vmem:[%s215_s17 + $0x10] sm:$0xff]   ;;  %s7488_s23 = scalar_lea.vmem %s9506_s2, %s6550_s14 }
  0x12   : > { %6107 = vmatpush3.bf16.msra.mxu0 %v6577_v1  ;;  %6546 = vmatpush3.bf16.msra.mxu1 %v6577_v1  ;;  %v6580_v4 = vld [vmem:[%s215_s17 + $0x18] sm:$0xff]   ;;  %v6581_v5 = vld [vmem:[%s7195_s20] sm:$0xff]   ;;  %v6582_v6 = vld [vmem:[%s7195_s20 + $0x1b0] sm:$0xff]  }
  0x13   : > { %6108 = vmatprep.subr.bf16.mxu0 %v7140_v0  ;;  %6543 = vmatprep.subr.bf16.mxu1 %v7140_v0  ;;  %v6583_v7 = vld [vmem:[%s7195_s20 + $0x8] sm:$0xff]   ;;  %v6584_v8 = vld [vmem:[%s7195_s20 + $0x1b8] sm:$0xff]   ;;  %v6585_v9 = vld [vmem:[%s7195_s20 + $0x10] sm:$0xff]  }
  0x14   : > { %v6586_v10 = vld [vmem:[%s7195_s20 + $0x1c0] sm:$0xff]   ;;  %v6587_v11 = vld [vmem:[%s7195_s20 + $0x18] sm:$0xff]   ;;  %v6588_v12 = vld [vmem:[%s7195_s20 + $0x1c8] sm:$0xff]  }
  0x15   : > { %v6589_v13 = vld [vmem:[%s7195_s20 + $0x20] sm:$0xff]   ;;  %v6590_v14 = vld [vmem:[%s7195_s20 + $0x1d0] sm:$0xff]   ;;  %v6591_v15 = vld [vmem:[%s7195_s20 + $0x28] sm:$0xff]  }
  0x16   : > { %6109 = vmatpush3.bf16.msra.mxu0 %v6578_v2  ;;  %6547 = vmatpush3.bf16.msra.mxu1 %v6578_v2  ;;  %v6592_v16 = vld [vmem:[%s7195_s20 + $0x1d8] sm:$0xff]   ;;  %v6593_v17 = vld [vmem:[%s7195_s20 + $0x30] sm:$0xff]   ;;  %v6594_v18 = vld [vmem:[%s7195_s20 + $0x1e0] sm:$0xff]  }
  0x17   : > { %6110 = vmatprep.subr.bf16.mxu0 %v7140_v0  ;;  %6544 = vmatprep.subr.bf16.mxu1 %v7140_v0  ;;  %v6595_v19 = vld [vmem:[%s7195_s20 + $0x38] sm:$0xff]   ;;  %v6596_v20 = vld [vmem:[%s7195_s20 + $0x1e8] sm:$0xff]   ;;  %v6597_v21 = vld [vmem:[%s7195_s20 + $0x40] sm:$0xff]  }
  0x18   : > { %v6598_v22 = vld [vmem:[%s7195_s20 + $0x1f0] sm:$0xff]   ;;  %v6599_v23 = vld [vmem:[%s7195_s20 + $0x48] sm:$0xff]   ;;  %v6600_v24 = vld [vmem:[%s7195_s20 + $0x1f8] sm:$0xff]  }
  0x19   : > { %v6601_v25 = vld [vmem:[%s7195_s20 + $0x50] sm:$0xff]   ;;  %v6602_v26 = vld [vmem:[%s7195_s20 + $0x200] sm:$0xff]   ;;  %v6603_v27 = vld [vmem:[%s7195_s20 + $0x58] sm:$0xff]  }
  0x1a   : > { %6111 = vmatpush3.bf16.msra.mxu0 %v6579_v3  ;;  %6548 = vmatpush3.bf16.msra.mxu1 %v6579_v3  ;;  %v6604_v28 = vld [vmem:[%s7195_s20 + $0x208] sm:$0xff]   ;;  %v6605_v29 = vld [vmem:[%s7195_s20 + $0x60] sm:$0xff]   ;;  %v6606_v30 = vld [vmem:[%s7195_s20 + $0x210] sm:$0xff]  }
  0x1b   : > { %6112 = vmatprep.subr.bf16.mxu0 %v7140_v0  ;;  %6545 = vmatprep.subr.bf16.mxu1 %v7140_v0  ;;  %v6607_v31 = vld [vmem:[%s7195_s20 + $0x68] sm:$0xff]   ;;  %v6608_v32 = vld [vmem:[%s7195_s20 + $0x218] sm:$0xff]   ;;  %v6609_v33 = vld [vmem:[%s7195_s20 + $0x70] sm:$0xff]  }
  0x1c   : > { %v6610_v34 = vld [vmem:[%s7195_s20 + $0x220] sm:$0xff]   ;;  %v6611_v35 = vld [vmem:[%s7195_s20 + $0x78] sm:$0xff]   ;;  %v6612_v36 = vld [vmem:[%s7195_s20 + $0x228] sm:$0xff]  }
  0x1d   : > { %v6613_v37 = vld [vmem:[%s7195_s20 + $0x80] sm:$0xff]   ;;  %v6614_v38 = vld [vmem:[%s7195_s20 + $0x230] sm:$0xff]   ;;  %v6615_v39 = vld [vmem:[%s7195_s20 + $0x88] sm:$0xff]  }
  0x1e   : > { %6113 = vmatpush3.bf16.msra.mxu0 %v6580_v4  ;;  %6549 = vmatpush3.bf16.msra.mxu1 %v6580_v4  ;;  %v6616_v40 = vld [vmem:[%s7195_s20 + $0x238] sm:$0xff]   ;;  %v6617_v41 = vld [vmem:[%s7195_s20 + $0x90] sm:$0xff]   ;;  %v6618_v42 = vld [vmem:[%s7195_s20 + $0x240] sm:$0xff]  }
  0x1f   : > { %v6619_v43 = vld [vmem:[%s7195_s20 + $0x98] sm:$0xff]   ;;  %v6620_v44 = vld [vmem:[%s7195_s20 + $0x248] sm:$0xff]   ;;  %v6621_v45 = vld [vmem:[%s7195_s20 + $0xa0] sm:$0xff]  }
  0x20   : > { %v6622_v46 = vld [vmem:[%s7195_s20 + $0x250] sm:$0xff]   ;;  %v6623_v47 = vld [vmem:[%s7195_s20 + $0xa8] sm:$0xff]   ;;  %v6624_v48 = vld [vmem:[%s7195_s20 + $0x258] sm:$0xff]  }
  0x21   : > { %6115 = vmatmul.mubr.msk.bf16.vlgmr.msra.gmra.mrb[0].mxu0 %vm1011_vm1, %v6581_v5  ;;  %6331 = vmatmul.mubr.msk.bf16.vlgmr.msra.gmra.mrb[0].mxu1 %vm1011_vm1, %v6582_v6  ;;  %v6625_v49 = vld [vmem:[%s7195_s20 + $0xb0] sm:$0xff]   ;;  %v6626_v50 = vld [vmem:[%s7195_s20 + $0x260] sm:$0xff]   ;;  %v6627_v51 = vld [vmem:[%s7195_s20 + $0xb8] sm:$0xff]  }
  0x22   : > { %6118 = vmatprep.mubr.msk.bf16.mxu0 %vm7141_vm0, %v7140_v0  ;;  %6334 = vmatprep.mubr.msk.bf16.mxu1 %vm7141_vm0, %v7140_v0  ;;  %v6628_v52 = vld [vmem:[%s7195_s20 + $0x268] sm:$0xff]   ;;  %v6629_v53 = vld [vmem:[%s7195_s20 + $0xc0] sm:$0xff]   ;;  %v6630_v54 = vld [vmem:[%s7195_s20 + $0x270] sm:$0xff]  }
  0x23   : > { %v6631_v55 = vld [vmem:[%s7195_s20 + $0xc8] sm:$0xff]   ;;  %v6632_v56 = vld [vmem:[%s7195_s20 + $0x278] sm:$0xff]   ;;  %v6633_v57 = vld [vmem:[%s7195_s20 + $0xd0] sm:$0xff]  }
  0x24   : > { %v6634_v58 = vld [vmem:[%s7195_s20 + $0x280] sm:$0xff]   ;;  %v6635_v2 = vld [vmem:[%s7195_s20 + $0xd8] sm:$0xff]   ;;  %v6636_v3 = vld [vmem:[%s7195_s20 + $0x288] sm:$0xff]  }
  0x29   : > { %6119 = vmatmul.mubr.msk.bf16.gmra.mrb[4].mxu0 %vm1011_vm1, %v6583_v7  ;;  %6335 = vmatmul.mubr.msk.bf16.gmra.mrb[4].mxu1 %vm1011_vm1, %v6584_v8 }
  0x2a   : > { %6122 = vmatprep.mubr.msk.bf16.mxu0 %vm7141_vm0, %v7140_v0  ;;  %6338 = vmatprep.mubr.msk.bf16.mxu1 %vm7141_vm0, %v7140_v0 }
  0x31   : > { %6123 = vmatmul.mubr.msk.bf16.gmra.mrb[8].mxu0 %vm1011_vm1, %v6585_v9  ;;  %6339 = vmatmul.mubr.msk.bf16.gmra.mrb[8].mxu1 %vm1011_vm1, %v6586_v10 }
  0x32   : > { %6126 = vmatprep.mubr.msk.bf16.mxu0 %vm7141_vm0, %v7140_v0  ;;  %6342 = vmatprep.mubr.msk.bf16.mxu1 %vm7141_vm0, %v7140_v0 }
  0x39   : > { %6127 = vmatmul.mubr.msk.bf16.gmra.mrb[12].mxu0 %vm1011_vm1, %v6587_v11  ;;  %6343 = vmatmul.mubr.msk.bf16.gmra.mrb[12].mxu1 %vm1011_vm1, %v6588_v12 }
  0x3a   : > { %6130 = vmatprep.mubr.msk.bf16.mxu0 %vm7141_vm0, %v7140_v0  ;;  %6346 = vmatprep.mubr.msk.bf16.mxu1 %vm7141_vm0, %v7140_v0 }
  0x41   : > { %6131 = vmatmul.mubr.msk.bf16.gmra.mrb[16].mxu0 %vm1011_vm1, %v6589_v13  ;;  %6347 = vmatmul.mubr.msk.bf16.gmra.mrb[16].mxu1 %vm1011_vm1, %v6590_v14 }
  0x42   : > { %6134 = vmatprep.mubr.msk.bf16.mxu0 %vm7141_vm0, %v7140_v0  ;;  %6350 = vmatprep.mubr.msk.bf16.mxu1 %vm7141_vm0, %v7140_v0 }
  0x49   : > { %6135 = vmatmul.mubr.msk.bf16.gmra.mrb[20].mxu0 %vm1011_vm1, %v6591_v15  ;;  %6351 = vmatmul.mubr.msk.bf16.gmra.mrb[20].mxu1 %vm1011_vm1, %v6592_v16 }
  0x4a   : > { %6138 = vmatprep.mubr.msk.bf16.mxu0 %vm7141_vm0, %v7140_v0  ;;  %6354 = vmatprep.mubr.msk.bf16.mxu1 %vm7141_vm0, %v7140_v0 }
  0x51   : > { %6139 = vmatmul.mubr.msk.bf16.gmra.mrb[24].mxu0 %vm1011_vm1, %v6593_v17  ;;  %6355 = vmatmul.mubr.msk.bf16.gmra.mrb[24].mxu1 %vm1011_vm1, %v6594_v18 }
  0x52   : > { %6142 = vmatprep.mubr.msk.bf16.mxu0 %vm7141_vm0, %v7140_v0  ;;  %6358 = vmatprep.mubr.msk.bf16.mxu1 %vm7141_vm0, %v7140_v0 }
  0x59   : > { %6143 = vmatmul.mubr.msk.bf16.gmra.mrb[28].mxu0 %vm1011_vm1, %v6595_v19  ;;  %6359 = vmatmul.mubr.msk.bf16.gmra.mrb[28].mxu1 %vm1011_vm1, %v6596_v20  ;;  %v6637_v20 = vld [vmem:[%s7195_s20 + $0xe0] sm:$0xff]  }
  0x5a   : > { %6146 = vmatprep.mubr.msk.bf16.mxu0 %vm7141_vm0, %v7140_v0  ;;  %6362 = vmatprep.mubr.msk.bf16.mxu1 %vm7141_vm0, %v7140_v0 }
  0x61   : > { %6147 = vmatmul.mubr.msk.bf16.gmra.mrb[32].mxu0 %vm1011_vm1, %v6597_v21  ;;  %6363 = vmatmul.mubr.msk.bf16.gmra.mrb[32].mxu1 %vm1011_vm1, %v6598_v22  ;;  %v6638_v21 = vld [vmem:[%s7195_s20 + $0x290] sm:$0xff]  }
  0x62   : > { %6150 = vmatprep.mubr.msk.bf16.mxu0 %vm7141_vm0, %v7140_v0  ;;  %6366 = vmatprep.mubr.msk.bf16.mxu1 %vm7141_vm0, %v7140_v0 }
  0x69   : > { %6151 = vmatmul.mubr.msk.bf16.gmra.mrb[36].mxu0 %vm1011_vm1, %v6599_v23  ;;  %6367 = vmatmul.mubr.msk.bf16.gmra.mrb[36].mxu1 %vm1011_vm1, %v6600_v24 }
  0x6a   : > { %6154 = vmatprep.mubr.msk.bf16.mxu0 %vm7141_vm0, %v7140_v0  ;;  %6370 = vmatprep.mubr.msk.bf16.mxu1 %vm7141_vm0, %v7140_v0 }
  0x71   : > { %6155 = vmatmul.mubr.msk.bf16.gmra.mrb[40].mxu0 %vm1011_vm1, %v6601_v25  ;;  %6371 = vmatmul.mubr.msk.bf16.gmra.mrb[40].mxu1 %vm1011_vm1, %v6602_v26 }
  0x72   : > { %6158 = vmatprep.mubr.msk.bf16.mxu0 %vm7141_vm0, %v7140_v0  ;;  %6374 = vmatprep.mubr.msk.bf16.mxu1 %vm7141_vm0, %v7140_v0 }
  0x79   : > { %6159 = vmatmul.mubr.msk.bf16.gmra.mrb[44].mxu0 %vm1011_vm1, %v6603_v27  ;;  %6375 = vmatmul.mubr.msk.bf16.gmra.mrb[44].mxu1 %vm1011_vm1, %v6604_v28 }
  0x7a   : > { %6162 = vmatprep.mubr.msk.bf16.mxu0 %vm7141_vm0, %v7140_v0  ;;  %6378 = vmatprep.mubr.msk.bf16.mxu1 %vm7141_vm0, %v7140_v0 }
  0x81   : > { %6163 = vmatmul.mubr.msk.bf16.gmra.mrb[48].mxu0 %vm1011_vm1, %v6605_v29  ;;  %6379 = vmatmul.mubr.msk.bf16.gmra.mrb[48].mxu1 %vm1011_vm1, %v6606_v30 }
  0x82   : > { %6166 = vmatprep.mubr.msk.bf16.mxu0 %vm7141_vm0, %v7140_v0  ;;  %6382 = vmatprep.mubr.msk.bf16.mxu1 %vm7141_vm0, %v7140_v0 }
  0x89   : > { %6167 = vmatmul.mubr.msk.bf16.gmra.mrb[52].mxu0 %vm1011_vm1, %v6607_v31  ;;  %6383 = vmatmul.mubr.msk.bf16.gmra.mrb[52].mxu1 %vm1011_vm1, %v6608_v32 }
  0x8a   : > { %6170 = vmatprep.mubr.msk.bf16.mxu0 %vm7141_vm0, %v7140_v0  ;;  %6386 = vmatprep.mubr.msk.bf16.mxu1 %vm7141_vm0, %v7140_v0 }
  0x91   : > { %6171 = vmatmul.mubr.msk.bf16.gmra.mrb[56].mxu0 %vm1011_vm1, %v6609_v33  ;;  %6387 = vmatmul.mubr.msk.bf16.gmra.mrb[56].mxu1 %vm1011_vm1, %v6610_v34  ;;  %v6639_v33 = vld [vmem:[%s7195_s20 + $0xe8] sm:$0xff]  }
  0x92   : > { %6174 = vmatprep.mubr.msk.bf16.mxu0 %vm7141_vm0, %v7140_v0  ;;  %6390 = vmatprep.mubr.msk.bf16.mxu1 %vm7141_vm0, %v7140_v0 }
  0x99   : > { %6175 = vmatmul.mubr.msk.bf16.gmra.mrb[60].mxu0 %vm1011_vm1, %v6611_v35  ;;  %6391 = vmatmul.mubr.msk.bf16.gmra.mrb[60].mxu1 %vm1011_vm1, %v6612_v36 }
  0x9a   : > { %6178 = vmatprep.mubr.msk.bf16.mxu0 %vm7141_vm0, %v7140_v0  ;;  %6394 = vmatprep.mubr.msk.bf16.mxu1 %vm7141_vm0, %v7140_v0 }
  0xa1   : > { %6179 = vmatmul.mubr.msk.bf16.gmra.mrb[64].mxu0 %vm1011_vm1, %v6613_v37  ;;  %6395 = vmatmul.mubr.msk.bf16.gmra.mrb[64].mxu1 %vm1011_vm1, %v6614_v38  ;;  %v6640_v38 = vld [vmem:[%s7195_s20 + $0x298] sm:$0xff]  }
  0xa2   : > { %6182 = vmatprep.mubr.msk.bf16.mxu0 %vm7141_vm0, %v7140_v0  ;;  %6398 = vmatprep.mubr.msk.bf16.mxu1 %vm7141_vm0, %v7140_v0 }
  0xa9   : > { %6183 = vmatmul.mubr.msk.bf16.gmra.mrb[68].mxu0 %vm1011_vm1, %v6615_v39  ;;  %6399 = vmatmul.mubr.msk.bf16.gmra.mrb[68].mxu1 %vm1011_vm1, %v6616_v40 }
  0xaa   : > { %6186 = vmatprep.mubr.msk.bf16.mxu0 %vm7141_vm0, %v7140_v0  ;;  %6402 = vmatprep.mubr.msk.bf16.mxu1 %vm7141_vm0, %v7140_v0 }
  0xb1   : > { %6187 = vmatmul.mubr.msk.bf16.gmra.mrb[72].mxu0 %vm1011_vm1, %v6617_v41  ;;  %6403 = vmatmul.mubr.msk.bf16.gmra.mrb[72].mxu1 %vm1011_vm1, %v6618_v42 }
  0xb2   : > { %6190 = vmatprep.mubr.msk.bf16.mxu0 %vm7141_vm0, %v7140_v0  ;;  %6406 = vmatprep.mubr.msk.bf16.mxu1 %vm7141_vm0, %v7140_v0 }
  0xb9   : > { %6191 = vmatmul.mubr.msk.bf16.gmra.mrb[76].mxu0 %vm1011_vm1, %v6619_v43  ;;  %6407 = vmatmul.mubr.msk.bf16.gmra.mrb[76].mxu1 %vm1011_vm1, %v6620_v44 }
  0xba   : > { %6194 = vmatprep.mubr.msk.bf16.mxu0 %vm7141_vm0, %v7140_v0  ;;  %6410 = vmatprep.mubr.msk.bf16.mxu1 %vm7141_vm0, %v7140_v0 }
  0xc1   : > { %6195 = vmatmul.mubr.msk.bf16.gmra.mrb[80].mxu0 %vm1011_vm1, %v6621_v45  ;;  %6411 = vmatmul.mubr.msk.bf16.gmra.mrb[80].mxu1 %vm1011_vm1, %v6622_v46 }
  0xc2   : > { %6198 = vmatprep.mubr.msk.bf16.mxu0 %vm7141_vm0, %v7140_v0  ;;  %6414 = vmatprep.mubr.msk.bf16.mxu1 %vm7141_vm0, %v7140_v0 }
  0xc9   : > { %6199 = vmatmul.mubr.msk.bf16.gmra.mrb[84].mxu0 %vm1011_vm1, %v6623_v47  ;;  %6415 = vmatmul.mubr.msk.bf16.gmra.mrb[84].mxu1 %vm1011_vm1, %v6624_v48 }
  0xca   : > { %6202 = vmatprep.mubr.msk.bf16.mxu0 %vm7141_vm0, %v7140_v0  ;;  %6418 = vmatprep.mubr.msk.bf16.mxu1 %vm7141_vm0, %v7140_v0 }
  0xd1   : > { %6203 = vmatmul.mubr.msk.bf16.gmra.mrb[88].mxu0 %vm1011_vm1, %v6625_v49  ;;  %6419 = vmatmul.mubr.msk.bf16.gmra.mrb[88].mxu1 %vm1011_vm1, %v6626_v50 }
  0xd2   : > { %6206 = vmatprep.mubr.msk.bf16.mxu0 %vm7141_vm0, %v7140_v0  ;;  %6422 = vmatprep.mubr.msk.bf16.mxu1 %vm7141_vm0, %v7140_v0 }
  0xd9   : > { %6207 = vmatmul.mubr.msk.bf16.gmra.mrb[92].mxu0 %vm1011_vm1, %v6627_v51  ;;  %6423 = vmatmul.mubr.msk.bf16.gmra.mrb[92].mxu1 %vm1011_vm1, %v6628_v52 }
  0xda   : > { %6210 = vmatprep.mubr.msk.bf16.mxu0 %vm7141_vm0, %v7140_v0  ;;  %6426 = vmatprep.mubr.msk.bf16.mxu1 %vm7141_vm0, %v7140_v0 }
  0xe1   : > { %6211 = vmatmul.mubr.msk.bf16.gmra.mrb[96].mxu0 %vm1011_vm1, %v6629_v53  ;;  %6427 = vmatmul.mubr.msk.bf16.gmra.mrb[96].mxu1 %vm1011_vm1, %v6630_v54 }
  0xe2   : > { %6214 = vmatprep.mubr.msk.bf16.mxu0 %vm7141_vm0, %v7140_v0  ;;  %6430 = vmatprep.mubr.msk.bf16.mxu1 %vm7141_vm0, %v7140_v0 }
  0xe9   : > { %6215 = vmatmul.mubr.msk.bf16.gmra.mrb[100].mxu0 %vm1011_vm1, %v6631_v55  ;;  %6431 = vmatmul.mubr.msk.bf16.gmra.mrb[100].mxu1 %vm1011_vm1, %v6632_v56 }
  0xea   : > { %6218 = vmatprep.mubr.msk.bf16.mxu0 %vm7141_vm0, %v7140_v0  ;;  %6434 = vmatprep.mubr.msk.bf16.mxu1 %vm7141_vm0, %v7140_v0 }
  0xf1   : > { %6219 = vmatmul.mubr.msk.bf16.gmra.mrb[104].mxu0 %vm1011_vm1, %v6633_v57  ;;  %6435 = vmatmul.mubr.msk.bf16.gmra.mrb[104].mxu1 %vm1011_vm1, %v6634_v58 }
  0xf2   : > { %6222 = vmatprep.mubr.msk.bf16.mxu0 %vm7141_vm0, %v7140_v0  ;;  %6438 = vmatprep.mubr.msk.bf16.mxu1 %vm7141_vm0, %v7140_v0 }
  0xf4   : > { %v7417_v59 = vpop.f32.mrb[0].mxu0  ;;  %v7419_v60 = vpop.f32.mrb[0].mxu1 }
  0xf5   : > { %v2222_v61 = vmin.f32 %v7417_v59, 0.0  ;;  %v2330_v62 = vmin.f32 %v7419_v60, 0.0  ;;  %v6116_v63 = vpop.f32.mrb[1].mxu0  ;;  %v6332_v1 = vpop.f32.mrb[1].mxu1  ;;  %vm3292_vm3 = vcmp.gt.f32.partialorder %v7417_v59, 0.0  ;;  %vm3400_vm4 = vcmp.gt.f32.partialorder %v7419_v60, 0.0 }
  0xf6   : > { %v7425_v4 = vpop.f32.mrb[2].mxu0  ;;  %v7427_v5 = vpop.f32.mrb[2].mxu1 }
  0xf7   : > { %v2436_v6 = vmul.f32 1.442695, %v2222_v61  ;;  %v2652_v7 = vmul.f32 1.442695, %v2330_v62  ;;  %v2223_v8 = vmin.f32 %v7425_v4, 0.0  ;;  %v2331_v9 = vmin.f32 %v7427_v5, 0.0 }
  0xf8   : > { %v6117_v10 = vpop.f32.mrb[3].mxu0  ;;  %v6333_v11 = vpop.f32.mrb[3].mxu1  ;;  %vm3293_vm5 = vcmp.gt.f32.partialorder %v7425_v4, 0.0  ;;  %vm3401_vm6 = vcmp.gt.f32.partialorder %v7427_v5, 0.0 }
  0xf9   : > { %6688 = vpow2.f32 %v2436_v6  ;;  %v2438_v12 = vmul.f32 1.442695, %v2223_v8  ;;  %6223 = vmatmul.mubr.msk.bf16.gmra.mrb[108].mxu0 %vm1011_vm1, %v6635_v2  ;;  %6439 = vmatmul.mubr.msk.bf16.gmra.mrb[108].mxu1 %vm1011_vm1, %v6636_v3  ;;  %v2654_v13 = vmul.f32 1.442695, %v2331_v9 }
  0xfa   : > { %6690 = vpow2.f32 %v2652_v7  ;;  %6226 = vmatprep.mubr.msk.bf16.mxu0 %vm7141_vm0, %v7140_v0  ;;  %6442 = vmatprep.mubr.msk.bf16.mxu1 %vm7141_vm0, %v7140_v0 }
  0xfb   : > { %6692 = vpow2.f32 %v2438_v12 }
  0xfc   : > { %6694 = vpow2.f32 %v2654_v13  ;;  %v7437_v14 = vpop.f32.mrb[4].mxu0  ;;  %v7439_v15 = vpop.f32.mrb[4].mxu1 }
  0xfd   : > { %v2224_v16 = vmin.f32 %v7437_v14, 0.0  ;;  %v2332_v17 = vmin.f32 %v7439_v15, 0.0  ;;  %v6120_v18 = vpop.f32.mrb[5].mxu0  ;;  %v6336_v19 = vpop.f32.mrb[5].mxu1  ;;  %vm3294_vm7 = vcmp.gt.f32.partialorder %v7437_v14, 0.0  ;;  %vm3402_vm8 = vcmp.gt.f32.partialorder %v7439_v15, 0.0 }
  0xfe   : > { %v7445_v22 = vpop.f32.mrb[6].mxu0  ;;  %v7447_v23 = vpop.f32.mrb[6].mxu1 }
  0xff   : > { %v2440_v24 = vmul.f32 1.442695, %v2224_v16  ;;  %v2656_v25 = vmul.f32 1.442695, %v2332_v17  ;;  %v2225_v26 = vmin.f32 %v7445_v22, 0.0  ;;  %v2333_v27 = vmin.f32 %v7447_v23, 0.0 }
 0x100   : > { %v6121_v28 = vpop.f32.mrb[7].mxu0  ;;  %v6337_v29 = vpop.f32.mrb[7].mxu1  ;;  %v6642_v17 = vld [vmem:[%s7195_s20 + $0x2a0] sm:$0xff]   ;;  %vm3295_vm9 = vcmp.gt.f32.partialorder %v7445_v22, 0.0  ;;  %vm3403_vm10 = vcmp.gt.f32.partialorder %v7447_v23, 0.0 }
 0x101   : > { %6696 = vpow2.f32 %v2440_v24  ;;  %v2442_v30 = vmul.f32 1.442695, %v2225_v26  ;;  %6227 = vmatmul.mubr.msk.bf16.gmra.mrb[112].mxu0 %vm1011_vm1, %v6637_v20  ;;  %6443 = vmatmul.mubr.msk.bf16.gmra.mrb[112].mxu1 %vm1011_vm1, %v6638_v21  ;;  %v2658_v31 = vmul.f32 1.442695, %v2333_v27 }
 0x102   : > { %6698 = vpow2.f32 %v2656_v25  ;;  %6230 = vmatprep.mubr.msk.bf16.mxu0 %vm7141_vm0, %v7140_v0  ;;  %6446 = vmatprep.mubr.msk.bf16.mxu1 %vm7141_vm0, %v7140_v0 }
 0x103   : > { %v6689_v32 = vpop.eup %6688  ;;  %6700 = vpow2.f32 %v2442_v30 }
 0x104   : > { %v6691_v34 = vpop.eup %6690  ;;  %v5350_v35 = vadd.f32 -1.0, %v6689_v32  ;;  %6702 = vpow2.f32 %v2658_v31  ;;  %v7460_v36 = vpop.f32.mrb[8].mxu0 }
 0x105   : > { %v7462_v37 = vpop.f32.mrb[8].mxu1  ;;  %v6693_v39 = vpop.eup %6692  ;;  %v5458_v40 = vadd.f32 -1.0, %v6691_v34  ;;  %v2226_v41 = vmin.f32 %v7460_v36, 0.0  ;;  %vm3296_vm11 = vcmp.gt.f32.partialorder %v7460_v36, 0.0 }
 0x106   : > { %v2334_v42 = vmin.f32 %v7462_v37, 0.0  ;;  %v6124_v43 = vpop.f32.mrb[9].mxu0  ;;  %v6340_v44 = vpop.f32.mrb[9].mxu1  ;;  %v3078_v46 = vmul.f32 1.6732632, %v5350_v35  ;;  %v5351_v47 = vadd.f32 -1.0, %v6693_v39 }
 0x107   : > { %v6695_v45 = vpop.eup %6694  ;;  %v7469_v48 = vpop.f32.mrb[10].mxu0  ;;  %v3186_v50 = vmul.f32 1.6732632, %v5458_v40  ;;  %v2444_v52 = vmul.f32 1.442695, %v2226_v41  ;;  %vm3404_vm12 = vcmp.gt.f32.partialorder %v7462_v37, 0.0 }
 0x108   : > { %v7471_v49 = vpop.f32.mrb[10].mxu1  ;;  %v5459_v51 = vadd.f32 -1.0, %v6695_v45  ;;  %v2227_v53 = vmin.f32 %v7469_v48, 0.0  ;;  %v3506_v54 = vsel %vm3292_vm3, %v7417_v59, %v3078_v46  ;;  %v3079_v55 = vmul.f32 1.6732632, %v5351_v47  ;;  %v6125_v57 = vpop.f32.mrb[11].mxu0 }
 0x109   : > { %v2660_v56 = vmul.f32 1.442695, %v2334_v42  ;;  %v3720_v58 = vmul.f32 1.050701, %v3506_v54  ;;  %v3614_v61 = vsel %vm3400_vm4, %v7419_v60, %v3186_v50  ;;  %6704 = vpow2.f32 %v2444_v52  ;;  %6231 = vmatmul.mubr.msk.bf16.gmra.mrb[116].mxu0 %vm1011_vm1, %v6639_v33  ;;  %6447 = vmatmul.mubr.msk.bf16.gmra.mrb[116].mxu1 %vm1011_vm1, %v6640_v38  ;;  %v6341_v63 = vpop.f32.mrb[11].mxu1 }
 0x10a   : > { %v3187_v62 = vmul.f32 1.6732632, %v5459_v51  ;;  %v3828_v59 = vmul.f32 1.050701, %v3614_v61  ;;  %v3507_v1 = vsel %vm3293_vm5, %v7425_v4, %v3079_v55  ;;  %v2446_v60 = vmul.f32 1.442695, %v2227_v53  ;;  %6234 = vmatprep.mubr.msk.bf16.mxu0 %vm7141_vm0, %v7140_v0  ;;  %6450 = vmatprep.mubr.msk.bf16.mxu1 %vm7141_vm0, %v7140_v0 }
 0x10b   : > { %6706 = vpow2.f32 %v2660_v56  ;;  %v6697_v2 = vpop.eup %6696  ;;  %v5781_v3 = vpack.c.bf16 %v3720_v58, %v3720_v58  ;;  %v3721_v6 = vmul.f32 1.050701, %v3507_v1  ;;  %v2335_v8 = vmin.f32 %v7471_v49, 0.0  ;;  %v6641_v4 = vld [vmem:[%s7195_s20 + $0xf0] sm:$0xff]   ;;  %v6643_v53 = vld [vmem:[%s7195_s20 + $0xf8] sm:$0xff]   ;;  %v6644_v61 = vld [vmem:[%s7195_s20 + $0x2a8] sm:$0xff]  }
 0x10c   : > { %v3615_v7 = vsel %vm3401_vm6, %v7427_v5, %v3187_v62  ;;  %v6699_v9 = vpop.eup %6698  ;;  %v5889_v10 = vpack.c.bf16 %v3828_v59, %v3828_v59  ;;  %v5352_v12 = vadd.f32 -1.0, %v6697_v2  ;;  %6708 = vpow2.f32 %v2446_v60  ;;  %v7502_v13 = vpop.f32.mrb[12].mxu0 }
 0x10d   : > { %v3829_v11 = vmul.f32 1.050701, %v3615_v7  ;;  %v7504_v16 = vpop.f32.mrb[12].mxu1  ;;  %v6701_v18 = vpop.eup %6700  ;;  %4791 = vst.msk [vmem:[%s7488_s23] sm:$0xf] %vm4790_vm2, %v5781_v3  ;;  %v5782_v19 = vpack.c.bf16 %v3721_v6, %v3721_v6  ;;  %v5460_v5 = vadd.f32 -1.0, %v6699_v9 }
 0x10e   : > { %v2662_v20 = vmul.f32 1.442695, %v2335_v8  ;;  %v6128_v21 = vpop.f32.mrb[13].mxu0  ;;  %v6344_v24 = vpop.f32.mrb[13].mxu1  ;;  %4899 = vst.msk [vmem:[%s7488_s23 + $0x1b0] sm:$0xf] %vm4790_vm2, %v5889_v10 }
 0x10f   : > { %v6703_v25 = vpop.eup %6702  ;;  %v5890_v26 = vpack.c.bf16 %v3829_v11, %v3829_v11  ;;  %v3080_v27 = vmul.f32 1.6732632, %v5352_v12  ;;  %v5353_v28 = vadd.f32 -1.0, %v6701_v18  ;;  %v2228_v29 = vmin.f32 %v7502_v13, 0.0  ;;  %v7513_v30 = vpop.f32.mrb[14].mxu0 }
 0x110   : > { %v7515_v31 = vpop.f32.mrb[14].mxu1  ;;  %4792 = vst.msk [vmem:[%s7488_s23 + $0x4] sm:$0xf] %vm4790_vm2, %v5782_v19  ;;  %v3188_v32 = vmul.f32 1.6732632, %v5460_v5  ;;  %v5461_v33 = vadd.f32 -1.0, %v6703_v25  ;;  %6710 = vpow2.f32 %v2662_v20 }
 0x111   : > { %v6129_v34 = vpop.f32.mrb[15].mxu0  ;;  %v6345_v35 = vpop.f32.mrb[15].mxu1  ;;  %4900 = vst.msk [vmem:[%s7488_s23 + $0x1b4] sm:$0xf] %vm4790_vm2, %v5890_v26  ;;  %v3508_v38 = vsel %vm3294_vm7, %v7437_v14, %v3080_v27  ;;  %v3081_v39 = vmul.f32 1.6732632, %v5353_v28  ;;  %6235 = vmatmul.mubr.msk.bf16.gmra.mrb[120].mxu0 %vm1011_vm1, %v6641_v4  ;;  %6451 = vmatmul.mubr.msk.bf16.gmra.mrb[120].mxu1 %vm1011_vm1, %v6642_v17 }
 0x112   : > { %v2448_v40 = vmul.f32 1.442695, %v2228_v29  ;;  %v2336_v41 = vmin.f32 %v7504_v16, 0.0  ;;  %v3722_v42 = vmul.f32 1.050701, %v3508_v38  ;;  %v3616_v43 = vsel %vm3402_vm8, %v7439_v15, %v3188_v32  ;;  %6238 = vmatprep.mubr.msk.bf16.mxu0 %vm7141_vm0, %v7140_v0  ;;  %6454 = vmatprep.mubr.msk.bf16.mxu1 %vm7141_vm0, %v7140_v0  ;;  %v6645_v29 = vld [vmem:[%s7195_s20 + $0x100] sm:$0xff]  }
 0x113   : > { %v3189_v44 = vmul.f32 1.6732632, %v5461_v33  ;;  %v3830_v45 = vmul.f32 1.050701, %v3616_v43  ;;  %v3509_v14 = vsel %vm3295_vm9, %v7445_v22, %v3081_v39  ;;  %v6705_v15 = vpop.eup %6704  ;;  %v2229_v52 = vmin.f32 %v7513_v30, 0.0  ;;  %v6646_v32 = vld [vmem:[%s7195_s20 + $0x2b0] sm:$0xff]  }
 0x114   : > { %6712 = vpow2.f32 %v2448_v40  ;;  %v2664_v46 = vmul.f32 1.442695, %v2336_v41  ;;  %v5783_v47 = vpack.c.bf16 %v3722_v42, %v3722_v42  ;;  %v3723_v50 = vmul.f32 1.050701, %v3509_v14  ;;  %v7542_v57 = vpop.f32.mrb[16].mxu0  ;;  %v7544_v58 = vpop.f32.mrb[16].mxu1 }
 0x115   : > { %v3617_v51 = vsel %vm3403_vm10, %v7447_v23, %v3189_v44  ;;  %v6707_v54 = vpop.eup %6706  ;;  %v5891_v22 = vpack.c.bf16 %v3830_v45, %v3830_v45  ;;  %v5354_v56 = vadd.f32 -1.0, %v6705_v15  ;;  %v2450_v63 = vmul.f32 1.442695, %v2229_v52  ;;  %v6132_v59 = vpop.f32.mrb[17].mxu0 }
 0x116   : > { %v3831_v55 = vmul.f32 1.050701, %v3617_v51  ;;  %6714 = vpow2.f32 %v2664_v46  ;;  %4793 = vst.msk [vmem:[%s7488_s23 + $0x8] sm:$0xf] %vm4790_vm2, %v5783_v47  ;;  %v5784_v62 = vpack.c.bf16 %v3723_v50, %v3723_v50  ;;  %v5462_v23 = vadd.f32 -1.0, %v6707_v54  ;;  %v6348_v1 = vpop.f32.mrb[17].mxu1  ;;  %v6709_v60 = vpop.eup %6708 }
 0x117   : > { %4901 = vst.msk [vmem:[%s7488_s23 + $0x1b8] sm:$0xf] %vm4790_vm2, %v5891_v22  ;;  %v3082_v3 = vmul.f32 1.6732632, %v5354_v56  ;;  %v2337_v6 = vmin.f32 %v7515_v31, 0.0  ;;  %v7554_v7 = vpop.f32.mrb[18].mxu0  ;;  %6716 = vpow2.f32 %v2450_v63 }
 0x118   : > { %v5892_v2 = vpack.c.bf16 %v3831_v55, %v3831_v55  ;;  %v7556_v8 = vpop.f32.mrb[18].mxu1  ;;  %4794 = vst.msk [vmem:[%s7488_s23 + $0xc] sm:$0xf] %vm4790_vm2, %v5784_v62  ;;  %v3190_v4 = vmul.f32 1.6732632, %v5462_v23  ;;  %v5355_v9 = vadd.f32 -1.0, %v6709_v60 }
 0x119   : > { %v2230_v10 = vmin.f32 %v7542_v57, 0.0  ;;  %v6133_v11 = vpop.f32.mrb[19].mxu0  ;;  %v6349_v12 = vpop.f32.mrb[19].mxu1  ;;  %v3510_v17 = vsel %vm3296_vm11, %v7460_v36, %v3082_v3  ;;  %vm3297_vm13 = vcmp.gt.f32.partialorder %v7469_v48, 0.0  ;;  %v2666_v18 = vmul.f32 1.442695, %v2337_v6  ;;  %6239 = vmatmul.mubr.msk.bf16.gmra.mrb[124].mxu0 %vm1011_vm1, %v6643_v53  ;;  %6455 = vmatmul.mubr.msk.bf16.gmra.mrb[124].mxu1 %vm1011_vm1, %v6644_v61 }
 0x11a   : > { %4902 = vst.msk [vmem:[%s7488_s23 + $0x1bc] sm:$0xf] %vm4790_vm2, %v5892_v2  ;;  %v2338_v19 = vmin.f32 %v7544_v58, 0.0  ;;  %v6711_v5 = vpop.eup %6710  ;;  %v3724_v20 = vmul.f32 1.050701, %v3510_v17  ;;  %v3618_v21 = vsel %vm3404_vm12, %v7462_v37, %v3190_v4  ;;  %6242 = vmatprep.mubr.msk.bf16.mxu0 %vm7141_vm0, %v7140_v0  ;;  %6458 = vmatprep.mubr.msk.bf16.mxu1 %vm7141_vm0, %v7140_v0  ;;  %vm3405_vm14 = vcmp.gt.f32.partialorder %v7471_v49, 0.0 }
 0x11b   : > { %v3083_v24 = vmul.f32 1.6732632, %v5355_v9  ;;  %v2452_v25 = vmul.f32 1.442695, %v2230_v10  ;;  %v3832_v36 = vmul.f32 1.050701, %v3618_v21  ;;  %6718 = vpow2.f32 %v2666_v18 }
 0x11c   : > { %v5463_v26 = vadd.f32 -1.0, %v6711_v5  ;;  %v2668_v27 = vmul.f32 1.442695, %v2338_v19  ;;  %v5785_v28 = vpack.c.bf16 %v3724_v20, %v3724_v20  ;;  %v7583_v39 = vpop.f32.mrb[20].mxu0  ;;  %v7585_v40 = vpop.f32.mrb[20].mxu1  ;;  %vm3298_vm15 = vcmp.gt.f32.partialorder %v7502_v13, 0.0 }
 0x11d   : > { %v3511_v37 = vsel %vm3297_vm13, %v7469_v48, %v3083_v24  ;;  %6720 = vpow2.f32 %v2452_v25  ;;  %v5893_v34 = vpack.c.bf16 %v3832_v36, %v3832_v36  ;;  %v2231_v48 = vmin.f32 %v7554_v7, 0.0  ;;  %v6136_v43 = vpop.f32.mrb[21].mxu0  ;;  %v6352_v44 = vpop.f32.mrb[21].mxu1  ;;  %v6647_v6 = vld [vmem:[%s7195_s20 + $0x108] sm:$0xff]   ;;  %v6648_v4 = vld [vmem:[%s7195_s20 + $0x2b8] sm:$0xff]  }
 0x11e   : > { %v6713_v33 = vpop.eup %6712  ;;  %v3725_v35 = vmul.f32 1.050701, %v3511_v37  ;;  %v3191_v38 = vmul.f32 1.6732632, %v5463_v26  ;;  %6722 = vpow2.f32 %v2668_v27  ;;  %4795 = vst.msk [vmem:[%s7488_s23 + $0x10] sm:$0xf] %vm4790_vm2, %v5785_v28 }
 0x11f   : > { %v5356_v41 = vadd.f32 -1.0, %v6713_v33  ;;  %v2339_v42 = vmin.f32 %v7556_v8, 0.0  ;;  %4903 = vst.msk [vmem:[%s7488_s23 + $0x1c0] sm:$0xf] %vm4790_vm2, %v5893_v34  ;;  %vm3406_vm3 = vcmp.gt.f32.partialorder %v7504_v16, 0.0  ;;  %v2232_v15 = vmin.f32 %v7583_v39, 0.0 }
 0x120   : > { %v6715_v45 = vpop.eup %6714  ;;  %v5786_v14 = vpack.c.bf16 %v3725_v35, %v3725_v35  ;;  %v3619_v46 = vsel %vm3405_vm14, %v7471_v49, %v3191_v38  ;;  %v7599_v47 = vpop.f32.mrb[22].mxu0  ;;  %vm3299_vm4 = vcmp.gt.f32.partialorder %v7513_v30, 0.0  ;;  %v2454_v54 = vmul.f32 1.442695, %v2231_v48 }
 0x121   : > { %v7601_v50 = vpop.f32.mrb[22].mxu1  ;;  %v3833_v51 = vmul.f32 1.050701, %v3619_v46  ;;  %v3084_v52 = vmul.f32 1.6732632, %v5356_v41  ;;  %v5464_v53 = vadd.f32 -1.0, %v6715_v45  ;;  %v6717_v49 = vpop.eup %6716  ;;  %6243 = vmatmul.mubr.msk.bf16.gmra.mrb[128].mxu0 %vm1011_vm1, %v6645_v29  ;;  %6459 = vmatmul.mubr.msk.bf16.gmra.mrb[128].mxu1 %vm1011_vm1, %v6646_v32 }
 0x122   : > { %4796 = vst.msk [vmem:[%s7488_s23 + $0x14] sm:$0xf] %vm4790_vm2, %v5786_v14  ;;  %v2670_v22 = vmul.f32 1.442695, %v2339_v42  ;;  %v2456_v55 = vmul.f32 1.442695, %v2232_v15  ;;  %6724 = vpow2.f32 %v2454_v54  ;;  %6246 = vmatprep.mubr.msk.bf16.mxu0 %vm7141_vm0, %v7140_v0  ;;  %6462 = vmatprep.mubr.msk.bf16.mxu1 %vm7141_vm0, %v7140_v0 }
 0x123   : > { %v5894_v56 = vpack.c.bf16 %v3833_v51, %v3833_v51  ;;  %v3512_v61 = vsel %vm3298_vm15, %v7502_v13, %v3084_v52  ;;  %v3192_v62 = vmul.f32 1.6732632, %v5464_v53  ;;  %v2340_v23 = vmin.f32 %v7585_v40, 0.0  ;;  %v6137_v63 = vpop.f32.mrb[23].mxu0  ;;  %v6353_v59 = vpop.f32.mrb[23].mxu1  ;;  %v6649_v15 = vld [vmem:[%s7195_s20 + $0x110] sm:$0xff]  }
 0x124   : > { %v3726_v1 = vmul.f32 1.050701, %v3512_v61  ;;  %v5357_v60 = vadd.f32 -1.0, %v6717_v49  ;;  %vm3407_vm5 = vcmp.gt.f32.partialorder %v7515_v31, 0.0  ;;  %6726 = vpow2.f32 %v2670_v22  ;;  %v7625_v17 = vpop.f32.mrb[24].mxu0  ;;  %v7627_v18 = vpop.f32.mrb[24].mxu1 }
 0x125   : > { %4904 = vst.msk [vmem:[%s7488_s23 + $0x1c4] sm:$0xf] %vm4790_vm2, %v5894_v56  ;;  %v3620_v13 = vsel %vm3406_vm3, %v7504_v16, %v3192_v62  ;;  %v2672_v2 = vmul.f32 1.442695, %v2340_v23  ;;  %v2233_v3 = vmin.f32 %v7599_v47, 0.0  ;;  %v6719_v9 = vpop.eup %6718  ;;  %6728 = vpow2.f32 %v2456_v55  ;;  %v6140_v20 = vpop.f32.mrb[25].mxu0 }
 0x126   : > { %v5787_v10 = vpack.c.bf16 %v3726_v1, %v3726_v1  ;;  %v3834_v11 = vmul.f32 1.050701, %v3620_v13  ;;  %v3085_v12 = vmul.f32 1.6732632, %v5357_v60  ;;  %v5465_v5 = vadd.f32 -1.0, %v6719_v9  ;;  %v6356_v21 = vpop.f32.mrb[25].mxu1 }
 0x127   : > { %v6721_v19 = vpop.eup %6720  ;;  %vm3300_vm6 = vcmp.gt.f32.partialorder %v7542_v57, 0.0  ;;  %6730 = vpow2.f32 %v2672_v2  ;;  %v2458_v16 = vmul.f32 1.442695, %v2233_v3  ;;  %v2341_v27 = vmin.f32 %v7601_v50, 0.0  ;;  %v7636_v28 = vpop.f32.mrb[26].mxu0  ;;  %v6650_v49 = vld [vmem:[%s7195_s20 + $0x2c0] sm:$0xff]  }
 0x128   : > { %v6723_v24 = vpop.eup %6722  ;;  %4797 = vst.msk [vmem:[%s7488_s23 + $0x18] sm:$0xf] %vm4790_vm2, %v5787_v10  ;;  %v5895_v25 = vpack.c.bf16 %v3834_v11, %v3834_v11  ;;  %v3513_v36 = vsel %vm3299_vm4, %v7513_v30, %v3085_v12  ;;  %v5358_v26 = vadd.f32 -1.0, %v6721_v19  ;;  %v7638_v37 = vpop.f32.mrb[26].mxu1  ;;  %v3193_v32 = vmul.f32 1.6732632, %v5465_v5 }
 0x129   : > { %v3727_v29 = vmul.f32 1.050701, %v3513_v36  ;;  %v5466_v33 = vadd.f32 -1.0, %v6723_v24  ;;  %6732 = vpow2.f32 %v2458_v16  ;;  %v6141_v34 = vpop.f32.mrb[27].mxu0  ;;  %vm3408_vm7 = vcmp.gt.f32.partialorder %v7544_v58, 0.0  ;;  %6247 = vmatmul.mubr.msk.bf16.gmra.mrb[132].mxu0 %vm1011_vm1, %v6647_v6  ;;  %6463 = vmatmul.mubr.msk.bf16.gmra.mrb[132].mxu1 %vm1011_vm1, %v6648_v4  ;;  %v6357_v43 = vpop.f32.mrb[27].mxu1 }
 0x12a   : > { %4905 = vst.msk [vmem:[%s7488_s23 + $0x1c8] sm:$0xf] %vm4790_vm2, %v5895_v25  ;;  %v3086_v35 = vmul.f32 1.6732632, %v5358_v26  ;;  %v2674_v38 = vmul.f32 1.442695, %v2341_v27  ;;  %v3621_v48 = vsel %vm3407_vm5, %v7515_v31, %v3193_v32  ;;  %6250 = vmatprep.mubr.msk.bf16.mxu0 %vm7141_vm0, %v7140_v0  ;;  %6466 = vmatprep.mubr.msk.bf16.mxu1 %vm7141_vm0, %v7140_v0 }
 0x12b   : > { %v2234_v30 = vmin.f32 %v7625_v17, 0.0  ;;  %v5788_v41 = vpack.c.bf16 %v3727_v29, %v3727_v29  ;;  %v3194_v42 = vmul.f32 1.6732632, %v5466_v33  ;;  %vm3301_vm8 = vcmp.gt.f32.partialorder %v7554_v7, 0.0  ;;  %v6651_v34 = vld [vmem:[%s7195_s20 + $0x118] sm:$0xff]  }
 0x12c   : > { %v3835_v44 = vmul.f32 1.050701, %v3621_v48  ;;  %v3514_v45 = vsel %vm3300_vm6, %v7542_v57, %v3086_v35  ;;  %6734 = vpow2.f32 %v2674_v38  ;;  %vm3409_vm9 = vcmp.gt.f32.partialorder %v7556_v8, 0.0  ;;  %v6725_v51 = vpop.eup %6724  ;;  %v7666_v22 = vpop.f32.mrb[28].mxu0 }
 0x12d   : > { %v2460_v14 = vmul.f32 1.442695, %v2234_v30  ;;  %4798 = vst.msk [vmem:[%s7488_s23 + $0x1c] sm:$0xf] %vm4790_vm2, %v5788_v41  ;;  %v3728_v31 = vmul.f32 1.050701, %v3514_v45  ;;  %v3622_v46 = vsel %vm3408_vm7, %v7544_v58, %v3194_v42 }
 0x12e   : > { %v2342_v57 = vmin.f32 %v7627_v18, 0.0  ;;  %v5896_v52 = vpack.c.bf16 %v3835_v44, %v3835_v44  ;;  %v3836_v53 = vmul.f32 1.050701, %v3622_v46  ;;  %v2235_v54 = vmin.f32 %v7636_v28, 0.0  ;;  %v7668_v55 = vpop.f32.mrb[28].mxu1  ;;  %v6727_v56 = vpop.eup %6726 }
 0x12f   : > { %6736 = vpow2.f32 %v2460_v14  ;;  %v5789_v58 = vpack.c.bf16 %v3728_v31, %v3728_v31  ;;  %v5359_v61 = vadd.f32 -1.0, %v6725_v51  ;;  %vm3302_vm10 = vcmp.gt.f32.partialorder %v7583_v39, 0.0  ;;  %v6144_v23 = vpop.f32.mrb[29].mxu0  ;;  %v6360_v63 = vpop.f32.mrb[29].mxu1  ;;  %v6652_v31 = vld [vmem:[%s7195_s20 + $0x2c8] sm:$0xff]  }
 0x130   : > { %v2676_v62 = vmul.f32 1.442695, %v2342_v57  ;;  %v6729_v59 = vpop.eup %6728  ;;  %4906 = vst.msk [vmem:[%s7488_s23 + $0x1cc] sm:$0xf] %vm4790_vm2, %v5896_v52  ;;  %v5897_v1 = vpack.c.bf16 %v3836_v53, %v3836_v53  ;;  %v5467_v60 = vadd.f32 -1.0, %v6727_v56  ;;  %v2343_v2 = vmin.f32 %v7638_v37, 0.0 }
 0x131   : > { %v2462_v13 = vmul.f32 1.442695, %v2235_v54  ;;  %v7675_v3 = vpop.f32.mrb[30].mxu0  ;;  %v7677_v6 = vpop.f32.mrb[30].mxu1  ;;  %4799 = vst.msk [vmem:[%s7488_s23 + $0x20] sm:$0xf] %vm4790_vm2, %v5789_v58  ;;  %6251 = vmatmul.mubr.msk.bf16.gmra.mrb[136].mxu0 %vm1011_vm1, %v6649_v15  ;;  %6467 = vmatmul.mubr.msk.bf16.gmra.mrb[136].mxu1 %vm1011_vm1, %v6650_v49 }
 0x132   : > { %v6731_v4 = vpop.eup %6730  ;;  %v3087_v9 = vmul.f32 1.6732632, %v5359_v61  ;;  %v5360_v10 = vadd.f32 -1.0, %v6729_v59  ;;  %vm3410_vm11 = vcmp.gt.f32.partialorder %v7585_v40, 0.0  ;;  %6738 = vpow2.f32 %v2676_v62  ;;  %v6145_v11 = vpop.f32.mrb[31].mxu0  ;;  %6254 = vmatprep.mubr.msk.bf16.mxu0 %vm7141_vm0, %v7140_v0  ;;  %6470 = vmatprep.mubr.msk.bf16.mxu1 %vm7141_vm0, %v7140_v0 }
 0x133   : > { %v6361_v12 = vpop.f32.mrb[31].mxu1  ;;  %4907 = vst.msk [vmem:[%s7488_s23 + $0x1d0] sm:$0xf] %vm4790_vm2, %v5897_v1  ;;  %v3195_v19 = vmul.f32 1.6732632, %v5467_v60  ;;  %v5468_v5 = vadd.f32 -1.0, %v6731_v4  ;;  %6740 = vpow2.f32 %v2462_v13  ;;  %v6733_v20 = vpop.eup %6732 }
 0x134   : > { %v2678_v16 = vmul.f32 1.442695, %v2343_v2  ;;  %v3515_v21 = vsel %vm3301_vm8, %v7554_v7, %v3087_v9  ;;  %v3088_v24 = vmul.f32 1.6732632, %v5360_v10  ;;  %vm3303_vm12 = vcmp.gt.f32.partialorder %v7599_v47, 0.0  ;;  %v7705_v48 = vpop.f32.mrb[32].mxu0 }
 0x135   : > { %v2236_v25 = vmin.f32 %v7666_v22, 0.0  ;;  %v3729_v36 = vmul.f32 1.050701, %v3515_v21  ;;  %v3623_v26 = vsel %vm3409_vm9, %v7556_v8, %v3195_v19  ;;  %v3196_v27 = vmul.f32 1.6732632, %v5468_v5  ;;  %v7707_v42 = vpop.f32.mrb[32].mxu1 }
 0x136   : > { %v5361_v29 = vadd.f32 -1.0, %v6733_v20  ;;  %v3837_v7 = vmul.f32 1.050701, %v3623_v26  ;;  %v3516_v32 = vsel %vm3302_vm10, %v7583_v39, %v3088_v24  ;;  %6742 = vpow2.f32 %v2678_v16  ;;  %v6735_v35 = vpop.eup %6734  ;;  %v6148_v45 = vpop.f32.mrb[33].mxu0  ;;  %v6653_v19 = vld [vmem:[%s7195_s20 + $0x120] sm:$0xff]   ;;  %v6654_v5 = vld [vmem:[%s7195_s20 + $0x2d0] sm:$0xff]  }
 0x137   : > { %v2464_v33 = vmul.f32 1.442695, %v2236_v25  ;;  %v5790_v8 = vpack.c.bf16 %v3729_v36, %v3729_v36  ;;  %v3730_v38 = vmul.f32 1.050701, %v3516_v32  ;;  %v3624_v30 = vsel %vm3410_vm11, %v7585_v40, %v3196_v27  ;;  %v6364_v14 = vpop.f32.mrb[33].mxu1  ;;  %v7717_v51 = vpop.f32.mrb[34].mxu0 }
 0x138   : > { %v3089_v41 = vmul.f32 1.6732632, %v5361_v29  ;;  %v5898_v43 = vpack.c.bf16 %v3837_v7, %v3837_v7  ;;  %v3838_v39 = vmul.f32 1.050701, %v3624_v30  ;;  %v5469_v44 = vadd.f32 -1.0, %v6735_v35  ;;  %v7719_v52 = vpop.f32.mrb[34].mxu1 }
 0x139   : > { %6744 = vpow2.f32 %v2464_v33  ;;  %v6737_v46 = vpop.eup %6736  ;;  %4800 = vst.msk [vmem:[%s7488_s23 + $0x24] sm:$0xf] %vm4790_vm2, %v5790_v8  ;;  %v5791_v57 = vpack.c.bf16 %v3730_v38, %v3730_v38  ;;  %vm3411_vm13 = vcmp.gt.f32.partialorder %v7601_v50, 0.0  ;;  %v2344_v15 = vmin.f32 %v7668_v55, 0.0  ;;  %v6149_v58 = vpop.f32.mrb[35].mxu0  ;;  %6255 = vmatmul.mubr.msk.bf16.gmra.mrb[140].mxu0 %vm1011_vm1, %v6651_v34  ;;  %6471 = vmatmul.mubr.msk.bf16.gmra.mrb[140].mxu1 %vm1011_vm1, %v6652_v31 }
 0x13a   : > { %v3517_v40 = vsel %vm3303_vm12, %v7599_v47, %v3089_v41  ;;  %4908 = vst.msk [vmem:[%s7488_s23 + $0x1d4] sm:$0xf] %vm4790_vm2, %v5898_v43  ;;  %v5899_v53 = vpack.c.bf16 %v3838_v39, %v3838_v39  ;;  %v3197_v49 = vmul.f32 1.6732632, %v5469_v44  ;;  %v5362_v56 = vadd.f32 -1.0, %v6737_v46  ;;  %v6365_v23 = vpop.f32.mrb[35].mxu1  ;;  %6258 = vmatprep.mubr.msk.bf16.mxu0 %vm7141_vm0, %v7140_v0  ;;  %6474 = vmatprep.mubr.msk.bf16.mxu1 %vm7141_vm0, %v7140_v0 }
 0x13b   : > { %v3731_v54 = vmul.f32 1.050701, %v3517_v40  ;;  %4801 = vst.msk [vmem:[%s7488_s23 + $0x28] sm:$0xf] %vm4790_vm2, %v5791_v57  ;;  %vm3304_vm14 = vcmp.gt.f32.partialorder %v7625_v17, 0.0  ;;  %v2237_v61 = vmin.f32 %v7675_v3, 0.0 }
 0x13c   : > { %v2680_v47 = vmul.f32 1.442695, %v2344_v15  ;;  %v2345_v62 = vmin.f32 %v7677_v6, 0.0  ;;  %v6739_v63 = vpop.eup %6738  ;;  %4909 = vst.msk [vmem:[%s7488_s23 + $0x1d8] sm:$0xf] %vm4790_vm2, %v5899_v53  ;;  %v3625_v1 = vsel %vm3411_vm13, %v7601_v50, %v3197_v49  ;;  %vm3412_vm15 = vcmp.gt.f32.partialorder %v7627_v18, 0.0 }
 0x13d   : > { %v5792_v59 = vpack.c.bf16 %v3731_v54, %v3731_v54  ;;  %v3090_v60 = vmul.f32 1.6732632, %v5362_v56  ;;  %v6741_v13 = vpop.eup %6740  ;;  %v3839_v2 = vmul.f32 1.050701, %v3625_v1  ;;  %v5470_v4 = vadd.f32 -1.0, %v6739_v63  ;;  %v7748_v24 = vpop.f32.mrb[36].mxu0 }
 0x13e   : > { %6746 = vpow2.f32 %v2680_v47  ;;  %v2466_v9 = vmul.f32 1.442695, %v2237_v61  ;;  %v5363_v10 = vadd.f32 -1.0, %v6741_v13  ;;  %v2682_v11 = vmul.f32 1.442695, %v2345_v62  ;;  %v7750_v25 = vpop.f32.mrb[36].mxu1 }
 0x13f   : > { %4802 = vst.msk [vmem:[%s7488_s23 + $0x2c] sm:$0xf] %vm4790_vm2, %v5792_v59  ;;  %v3518_v50 = vsel %vm3304_vm14, %v7625_v17, %v3090_v60  ;;  %v2238_v12 = vmin.f32 %v7705_v48, 0.0  ;;  %v5900_v16 = vpack.c.bf16 %v3839_v2, %v3839_v2  ;;  %v3198_v21 = vmul.f32 1.6732632, %v5470_v4  ;;  %v6152_v27 = vpop.f32.mrb[37].mxu0 }
 0x140   : > { %v3732_v20 = vmul.f32 1.050701, %v3518_v50  ;;  %6748 = vpow2.f32 %v2466_v9  ;;  %v6743_v36 = vpop.eup %6742  ;;  %v3091_v26 = vmul.f32 1.6732632, %v5363_v10  ;;  %vm3305_vm3 = vcmp.gt.f32.partialorder %v7636_v28, 0.0  ;;  %v6368_v34 = vpop.f32.mrb[37].mxu1 }
 0x141   : > { %6750 = vpow2.f32 %v2682_v11  ;;  %v2468_v17 = vmul.f32 1.442695, %v2238_v12  ;;  %4910 = vst.msk [vmem:[%s7488_s23 + $0x1dc] sm:$0xf] %vm4790_vm2, %v5900_v16  ;;  %v3626_v7 = vsel %vm3412_vm15, %v7627_v18, %v3198_v21  ;;  %v5471_v32 = vadd.f32 -1.0, %v6743_v36  ;;  %v7759_v35 = vpop.f32.mrb[38].mxu0  ;;  %6259 = vmatmul.mubr.msk.bf16.gmra.mrb[144].mxu0 %vm1011_vm1, %v6653_v19  ;;  %6475 = vmatmul.mubr.msk.bf16.gmra.mrb[144].mxu1 %vm1011_vm1, %v6654_v5 }
 0x142   : > { %v5793_v29 = vpack.c.bf16 %v3732_v20, %v3732_v20  ;;  %v2346_v33 = vmin.f32 %v7707_v42, 0.0  ;;  %v3840_v38 = vmul.f32 1.050701, %v3626_v7  ;;  %v3519_v30 = vsel %vm3305_vm3, %v7636_v28, %v3091_v26  ;;  %v7763_v41 = vpop.f32.mrb[38].mxu1  ;;  %v6153_v43 = vpop.f32.mrb[39].mxu0  ;;  %6262 = vmatprep.mubr.msk.bf16.mxu0 %vm7141_vm0, %v7140_v0  ;;  %6478 = vmatprep.mubr.msk.bf16.mxu1 %vm7141_vm0, %v7140_v0  ;;  %v6655_v62 = vld [vmem:[%s7195_s20 + $0x128] sm:$0xff]  }
 0x143   : > { %v6745_v8 = vpop.eup %6744  ;;  %vm3413_vm4 = vcmp.gt.f32.partialorder %v7638_v37, 0.0  ;;  %6752 = vpow2.f32 %v2468_v17  ;;  %v3733_v39 = vmul.f32 1.050701, %v3519_v30  ;;  %v3199_v18 = vmul.f32 1.6732632, %v5471_v32  ;;  %v6369_v46 = vpop.f32.mrb[39].mxu1 }
 0x144   : > { %4803 = vst.msk [vmem:[%s7488_s23 + $0x30] sm:$0xf] %vm4790_vm2, %v5793_v29  ;;  %v5364_v44 = vadd.f32 -1.0, %v6745_v8  ;;  %v2239_v45 = vmin.f32 %v7717_v51, 0.0  ;;  %v5901_v14 = vpack.c.bf16 %v3840_v38, %v3840_v38  ;;  %vm3306_vm5 = vcmp.gt.f32.partialorder %v7666_v22, 0.0  ;;  %v7789_v47 = vpop.f32.mrb[40].mxu0 }
 0x145   : > { %v2684_v31 = vmul.f32 1.442695, %v2346_v33  ;;  %v2347_v28 = vmin.f32 %v7719_v52, 0.0  ;;  %v5794_v57 = vpack.c.bf16 %v3733_v39, %v3733_v39  ;;  %v3627_v40 = vsel %vm3413_vm4, %v7638_v37, %v3199_v18  ;;  %v7791_v61 = vpop.f32.mrb[40].mxu1  ;;  %v6156_v1 = vpop.f32.mrb[41].mxu0  ;;  %v6656_v13 = vld [vmem:[%s7195_s20 + $0x2d8] sm:$0xff]  }
 0x146   : > { %v3092_v15 = vmul.f32 1.6732632, %v5364_v44  ;;  %v2470_v53 = vmul.f32 1.442695, %v2239_v45  ;;  %4911 = vst.msk [vmem:[%s7488_s23 + $0x1e0] sm:$0xf] %vm4790_vm2, %v5901_v14 }
 0x147   : > { %v3841_v54 = vmul.f32 1.050701, %v3627_v40  ;;  %vm3414_vm6 = vcmp.gt.f32.partialorder %v7668_v55, 0.0  ;;  %6754 = vpow2.f32 %v2684_v31  ;;  %v2686_v49 = vmul.f32 1.442695, %v2347_v28  ;;  %v6372_v60 = vpop.f32.mrb[41].mxu1 }
 0x148   : > { %v6747_v56 = vpop.eup %6746  ;;  %4804 = vst.msk [vmem:[%s7488_s23 + $0x34] sm:$0xf] %vm4790_vm2, %v5794_v57  ;;  %v3520_v37 = vsel %vm3306_vm5, %v7666_v22, %v3092_v15  ;;  %vm3307_vm7 = vcmp.gt.f32.partialorder %v7675_v3, 0.0  ;;  %6756 = vpow2.f32 %v2470_v53  ;;  %v2240_v58 = vmin.f32 %v7748_v24, 0.0  ;;  %v7798_v50 = vpop.f32.mrb[42].mxu0  ;;  %v6657_v30 = vld [vmem:[%s7195_s20 + $0x130] sm:$0xff]  }
 0x149   : > { %v5902_v23 = vpack.c.bf16 %v3841_v54, %v3841_v54  ;;  %v3734_v63 = vmul.f32 1.050701, %v3520_v37  ;;  %v5472_v59 = vadd.f32 -1.0, %v6747_v56  ;;  %6758 = vpow2.f32 %v2686_v49  ;;  %v7803_v5 = vpop.f32.mrb[42].mxu1  ;;  %v6157_v16 = vpop.f32.mrb[43].mxu0  ;;  %6263 = vmatmul.mubr.msk.bf16.gmra.mrb[148].mxu0 %vm1011_vm1, %v6655_v62  ;;  %6479 = vmatmul.mubr.msk.bf16.gmra.mrb[148].mxu1 %vm1011_vm1, %v6656_v13  ;;  %v6658_v43 = vld [vmem:[%s7195_s20 + $0x2e0] sm:$0xff]  }
 0x14a   : > { %v6749_v2 = vpop.eup %6748  ;;  %vm3415_vm8 = vcmp.gt.f32.partialorder %v7677_v6, 0.0  ;;  %v2472_v22 = vmul.f32 1.442695, %v2240_v58  ;;  %v2348_v4 = vmin.f32 %v7750_v25, 0.0  ;;  %v2241_v9 = vmin.f32 %v7759_v35, 0.0  ;;  %v6373_v26 = vpop.f32.mrb[43].mxu1  ;;  %6266 = vmatprep.mubr.msk.bf16.mxu0 %vm7141_vm0, %v7140_v0  ;;  %6482 = vmatprep.mubr.msk.bf16.mxu1 %vm7141_vm0, %v7140_v0 }
 0x14b   : > { %v6751_v10 = vpop.eup %6750  ;;  %4912 = vst.msk [vmem:[%s7488_s23 + $0x1e4] sm:$0xf] %vm4790_vm2, %v5902_v23  ;;  %v5795_v11 = vpack.c.bf16 %v3734_v63, %v3734_v63  ;;  %v3200_v12 = vmul.f32 1.6732632, %v5472_v59  ;;  %v5365_v19 = vadd.f32 -1.0, %v6749_v2  ;;  %vm3308_vm9 = vcmp.gt.f32.partialorder %v7705_v48, 0.0 }
 0x14c   : > { %v5473_v20 = vadd.f32 -1.0, %v6751_v10  ;;  %6760 = vpow2.f32 %v2472_v22  ;;  %v2688_v21 = vmul.f32 1.442695, %v2348_v4  ;;  %v2474_v36 = vmul.f32 1.442695, %v2241_v9  ;;  %v7827_v14 = vpop.f32.mrb[44].mxu0 }
 0x14d   : > { %v6753_v17 = vpop.eup %6752  ;;  %4805 = vst.msk [vmem:[%s7488_s23 + $0x38] sm:$0xf] %vm4790_vm2, %v5795_v11  ;;  %v3628_v27 = vsel %vm3414_vm6, %v7668_v55, %v3200_v12  ;;  %v3093_v29 = vmul.f32 1.6732632, %v5365_v19  ;;  %vm3416_vm10 = vcmp.gt.f32.partialorder %v7707_v42, 0.0  ;;  %v2349_v7 = vmin.f32 %v7763_v41, 0.0 }
 0x14e   : > { %v3842_v32 = vmul.f32 1.050701, %v3628_v27  ;;  %v3201_v33 = vmul.f32 1.6732632, %v5473_v20  ;;  %v5366_v34 = vadd.f32 -1.0, %v6753_v17  ;;  %6762 = vpow2.f32 %v2688_v21  ;;  %v7829_v31 = vpop.f32.mrb[44].mxu1 }
 0x14f   : > { %v3521_v55 = vsel %vm3307_vm7, %v7675_v3, %v3093_v29  ;;  %6764 = vpow2.f32 %v2474_v36  ;;  %v2690_v8 = vmul.f32 1.442695, %v2349_v7  ;;  %v2242_v38 = vmin.f32 %v7789_v47, 0.0  ;;  %v6160_v57 = vpop.f32.mrb[45].mxu0  ;;  %v6376_v49 = vpop.f32.mrb[45].mxu1  ;;  %v6660_v36 = vld [vmem:[%s7195_s20 + $0x2e8] sm:$0xff]  }
 0x150   : > { %v5903_v39 = vpack.c.bf16 %v3842_v32, %v3842_v32  ;;  %v3735_v18 = vmul.f32 1.050701, %v3521_v55  ;;  %v3629_v44 = vsel %vm3415_vm8, %v7677_v6, %v3201_v33  ;;  %v3094_v45 = vmul.f32 1.6732632, %v5366_v34  ;;  %v7838_v56 = vpop.f32.mrb[46].mxu0  ;;  %v7840_v63 = vpop.f32.mrb[46].mxu1 }
 0x151   : > { %v6755_v28 = vpop.eup %6754  ;;  %v3843_v3 = vmul.f32 1.050701, %v3629_v44  ;;  %vm3309_vm11 = vcmp.gt.f32.partialorder %v7717_v51, 0.0  ;;  %6766 = vpow2.f32 %v2690_v8  ;;  %v2476_v46 = vmul.f32 1.442695, %v2242_v38  ;;  %v6161_v59 = vpop.f32.mrb[47].mxu0  ;;  %6267 = vmatmul.mubr.msk.bf16.gmra.mrb[152].mxu0 %vm1011_vm1, %v6657_v30  ;;  %6483 = vmatmul.mubr.msk.bf16.gmra.mrb[152].mxu1 %vm1011_vm1, %v6658_v43 }
 0x152   : > { %v6757_v40 = vpop.eup %6756  ;;  %4913 = vst.msk [vmem:[%s7488_s23 + $0x1e8] sm:$0xf] %vm4790_vm2, %v5903_v39  ;;  %v5796_v15 = vpack.c.bf16 %v3735_v18, %v3735_v18  ;;  %v3522_v6 = vsel %vm3308_vm9, %v7705_v48, %v3094_v45  ;;  %v5474_v53 = vadd.f32 -1.0, %v6755_v28  ;;  %v2350_v54 = vmin.f32 %v7791_v61, 0.0  ;;  %v6377_v4 = vpop.f32.mrb[47].mxu1  ;;  %6270 = vmatprep.mubr.msk.bf16.mxu0 %vm7141_vm0, %v7140_v0  ;;  %6486 = vmatprep.mubr.msk.bf16.mxu1 %vm7141_vm0, %v7140_v0 }
 0x153   : > { %v6759_v37 = vpop.eup %6758  ;;  %v5904_v58 = vpack.c.bf16 %v3843_v3, %v3843_v3  ;;  %v3736_v62 = vmul.f32 1.050701, %v3522_v6  ;;  %v5367_v23 = vadd.f32 -1.0, %v6757_v40  ;;  %6768 = vpow2.f32 %v2476_v46 }
 0x154   : > { %4806 = vst.msk [vmem:[%s7488_s23 + $0x3c] sm:$0xf] %vm4790_vm2, %v5796_v15  ;;  %v3202_v1 = vmul.f32 1.6732632, %v5474_v53  ;;  %v5475_v60 = vadd.f32 -1.0, %v6759_v37  ;;  %vm3417_vm12 = vcmp.gt.f32.partialorder %v7719_v52, 0.0 }
 0x155   : > { %v2692_v48 = vmul.f32 1.442695, %v2350_v54  ;;  %4914 = vst.msk [vmem:[%s7488_s23 + $0x1ec] sm:$0xf] %vm4790_vm2, %v5904_v58  ;;  %v5797_v13 = vpack.c.bf16 %v3736_v62, %v3736_v62  ;;  %v3095_v2 = vmul.f32 1.6732632, %v5367_v23 }
 0x156   : > { %vm3310_vm13 = vcmp.gt.f32.partialorder %v7748_v24, 0.0  ;;  %v2243_v22 = vmin.f32 %v7798_v50, 0.0  ;;  %v6761_v9 = vpop.eup %6760  ;;  %v3630_v10 = vsel %vm3416_vm10, %v7707_v42, %v3202_v1  ;;  %v3203_v11 = vmul.f32 1.6732632, %v5475_v60  ;;  %v6659_v42 = vld [vmem:[%s7195_s20 + $0x138] sm:$0xff]   ;;  %v7870_v7 = vpop.f32.mrb[48].mxu0 }
 0x157   : > { %6770 = vpow2.f32 %v2692_v48  ;;  %v2351_v12 = vmin.f32 %v7803_v5, 0.0  ;;  %4807 = vst.msk [vmem:[%s7488_s23 + $0x40] sm:$0xf] %vm4790_vm2, %v5797_v13  ;;  %v3844_v19 = vmul.f32 1.050701, %v3630_v10  ;;  %v3523_v16 = vsel %vm3309_vm11, %v7717_v51, %v3095_v2  ;;  %v7872_v8 = vpop.f32.mrb[48].mxu1 }
 0x158   : > { %v5368_v20 = vadd.f32 -1.0, %v6761_v9  ;;  %v2478_v21 = vmul.f32 1.442695, %v2243_v22  ;;  %v6763_v26 = vpop.eup %6762  ;;  %v3737_v17 = vmul.f32 1.050701, %v3523_v16  ;;  %v3631_v27 = vsel %vm3417_vm12, %v7719_v52, %v3203_v11  ;;  %v6164_v52 = vpop.f32.mrb[49].mxu0 }
 0x159   : > { %vm3418_vm14 = vcmp.gt.f32.partialorder %v7750_v25, 0.0  ;;  %v2694_v29 = vmul.f32 1.442695, %v2351_v12  ;;  %v6765_v32 = vpop.eup %6764  ;;  %v5905_v33 = vpack.c.bf16 %v3844_v19, %v3844_v19  ;;  %v3845_v34 = vmul.f32 1.050701, %v3631_v27  ;;  %v6380_v39 = vpop.f32.mrb[49].mxu1  ;;  %6271 = vmatmul.mubr.msk.bf16.gmra.mrb[156].mxu0 %vm1011_vm1, %v6659_v42  ;;  %6487 = vmatmul.mubr.msk.bf16.gmra.mrb[156].mxu1 %vm1011_vm1, %v6660_v36 }
 0x15a   : > { %v3096_v51 = vmul.f32 1.6732632, %v5368_v20  ;;  %v5476_v55 = vadd.f32 -1.0, %v6763_v26  ;;  %v5798_v38 = vpack.c.bf16 %v3737_v17, %v3737_v17  ;;  %v5369_v30 = vadd.f32 -1.0, %v6765_v32  ;;  %v7880_v3 = vpop.f32.mrb[50].mxu0  ;;  %v7882_v46 = vpop.f32.mrb[50].mxu1  ;;  %6274 = vmatprep.mubr.msk.bf16.mxu0 %vm7141_vm0, %v7140_v0  ;;  %6490 = vmatprep.mubr.msk.bf16.mxu1 %vm7141_vm0, %v7140_v0 }
 0x15b   : > { %6772 = vpow2.f32 %v2478_v21  ;;  %v2244_v43 = vmin.f32 %v7827_v14, 0.0  ;;  %v6767_v18 = vpop.eup %6766  ;;  %4915 = vst.msk [vmem:[%s7488_s23 + $0x1f0] sm:$0xf] %vm4790_vm2, %v5905_v33  ;;  %v5906_v44 = vpack.c.bf16 %v3845_v34, %v3845_v34  ;;  %vm3311_vm15 = vcmp.gt.f32.partialorder %v7759_v35, 0.0  ;;  %v6165_v49 = vpop.f32.mrb[51].mxu0  ;;  %v6661_v9 = vld [vmem:[%s7195_s20 + $0x140] sm:$0xff]  }
 0x15c   : > { %v3524_v45 = vsel %vm3310_vm13, %v7748_v24, %v3096_v51  ;;  %v3204_v28 = vmul.f32 1.6732632, %v5476_v55  ;;  %6774 = vpow2.f32 %v2694_v29  ;;  %4808 = vst.msk [vmem:[%s7488_s23 + $0x44] sm:$0xf] %vm4790_vm2, %v5798_v38  ;;  %v3097_v40 = vmul.f32 1.6732632, %v5369_v30 }
 0x15d   : > { %v3738_v57 = vmul.f32 1.050701, %v3524_v45  ;;  %v5477_v15 = vadd.f32 -1.0, %v6767_v18  ;;  %v6769_v6 = vpop.eup %6768  ;;  %4916 = vst.msk [vmem:[%s7488_s23 + $0x1f4] sm:$0xf] %vm4790_vm2, %v5906_v44  ;;  %vm3419_vm3 = vcmp.gt.f32.partialorder %v7763_v41, 0.0 }
 0x15e   : > { %v3632_v24 = vsel %vm3418_vm14, %v7750_v25, %v3204_v28  ;;  %v2480_v53 = vmul.f32 1.442695, %v2244_v43  ;;  %v2352_v54 = vmin.f32 %v7829_v31, 0.0  ;;  %v6381_v37 = vpop.f32.mrb[51].mxu1  ;;  %v3525_v23 = vsel %vm3311_vm15, %v7759_v35, %v3097_v40  ;;  %v7908_v22 = vpop.f32.mrb[52].mxu0  ;;  %v6662_v10 = vld [vmem:[%s7195_s20 + $0x2f0] sm:$0xff]  }
 0x15f   : > { %v5799_v58 = vpack.c.bf16 %v3738_v57, %v3738_v57  ;;  %v3846_v62 = vmul.f32 1.050701, %v3632_v24  ;;  %v3205_v59 = vmul.f32 1.6732632, %v5477_v15  ;;  %v3739_v25 = vmul.f32 1.050701, %v3525_v23 }
 0x160   : > { %v5370_v1 = vadd.f32 -1.0, %v6769_v6  ;;  %6776 = vpow2.f32 %v2480_v53  ;;  %v2696_v60 = vmul.f32 1.442695, %v2352_v54  ;;  %vm3312_vm4 = vcmp.gt.f32.partialorder %v7789_v47, 0.0  ;;  %v7910_v4 = vpop.f32.mrb[52].mxu1  ;;  %v6168_v20 = vpop.f32.mrb[53].mxu0 }
 0x161   : > { %v6771_v48 = vpop.eup %6770  ;;  %4809 = vst.msk [vmem:[%s7488_s23 + $0x48] sm:$0xf] %vm4790_vm2, %v5799_v58  ;;  %v5907_v13 = vpack.c.bf16 %v3846_v62, %v3846_v62  ;;  %v3633_v35 = vsel %vm3419_vm3, %v7763_v41, %v3205_v59  ;;  %v2245_v2 = vmin.f32 %v7838_v56, 0.0  ;;  %v5800_v11 = vpack.c.bf16 %v3739_v25, %v3739_v25  ;;  %v6384_v42 = vpop.f32.mrb[53].mxu1  ;;  %6275 = vmatmul.mubr.msk.bf16.gmra.mrb[160].mxu0 %vm1011_vm1, %v6661_v9  ;;  %v6663_v62 = vld [vmem:[%s7195_s20 + $0x148] sm:$0xff]   ;;  %v6664_v23 = vld [vmem:[%s7195_s20 + $0x2f8] sm:$0xff]  }
 0x162   : > { %v3847_v12 = vmul.f32 1.050701, %v3633_v35  ;;  %v3098_v19 = vmul.f32 1.6732632, %v5370_v1  ;;  %v5478_v16 = vadd.f32 -1.0, %v6771_v48  ;;  %vm3420_vm5 = vcmp.gt.f32.partialorder %v7791_v61, 0.0  ;;  %6491 = vmatmul.mubr.msk.bf16.gmra.mrb[160].mxu1 %vm1011_vm1, %v6662_v10  ;;  %6278 = vmatprep.mubr.msk.bf16.mxu0 %vm7141_vm0, %v7140_v0 }
 0x163   : > { %4917 = vst.msk [vmem:[%s7488_s23 + $0x1f8] sm:$0xf] %vm4790_vm2, %v5907_v13  ;;  %6778 = vpow2.f32 %v2696_v60  ;;  %v2482_v41 = vmul.f32 1.442695, %v2245_v2  ;;  %v2353_v21 = vmin.f32 %v7840_v63, 0.0  ;;  %v7918_v36 = vpop.f32.mrb[54].mxu0  ;;  %6494 = vmatprep.mubr.msk.bf16.mxu1 %vm7141_vm0, %v7140_v0 }
 0x164   : > { %4810 = vst.msk [vmem:[%s7488_s23 + $0x4c] sm:$0xf] %vm4790_vm2, %v5800_v11  ;;  %v5908_v26 = vpack.c.bf16 %v3847_v12, %v3847_v12  ;;  %v3526_v17 = vsel %vm3312_vm4, %v7789_v47, %v3098_v19  ;;  %v3206_v27 = vmul.f32 1.6732632, %v5478_v16  ;;  %v2246_v29 = vmin.f32 %v7870_v7, 0.0  ;;  %v7926_v32 = vpop.f32.mrb[54].mxu1 }
 0x165   : > { %v6169_v33 = vpop.f32.mrb[55].mxu0  ;;  %v6773_v34 = vpop.eup %6772  ;;  %v3740_v51 = vmul.f32 1.050701, %v3526_v17  ;;  %vm3313_vm6 = vcmp.gt.f32.partialorder %v7798_v50, 0.0  ;;  %6780 = vpow2.f32 %v2482_v41  ;;  %v2698_v55 = vmul.f32 1.442695, %v2353_v21 }
 0x166   : > { %v6385_v38 = vpop.f32.mrb[55].mxu1  ;;  %v6775_v30 = vpop.eup %6774  ;;  %4918 = vst.msk [vmem:[%s7488_s23 + $0x1fc] sm:$0xf] %vm4790_vm2, %v5908_v26  ;;  %v3634_v47 = vsel %vm3420_vm5, %v7791_v61, %v3206_v27  ;;  %v5371_v43 = vadd.f32 -1.0, %v6773_v34  ;;  %v2484_v52 = vmul.f32 1.442695, %v2246_v29 }
 0x167   : > { %v2354_v39 = vmin.f32 %v7872_v8, 0.0  ;;  %v5801_v18 = vpack.c.bf16 %v3740_v51, %v3740_v51  ;;  %v3848_v44 = vmul.f32 1.050701, %v3634_v47  ;;  %v5479_v45 = vadd.f32 -1.0, %v6775_v30  ;;  %v7946_v6 = vpop.f32.mrb[56].mxu0  ;;  %v7948_v24 = vpop.f32.mrb[56].mxu1 }
 0x168   : > { %6782 = vpow2.f32 %v2698_v55  ;;  %v3099_v61 = vmul.f32 1.6732632, %v5371_v43  ;;  %vm3421_vm7 = vcmp.gt.f32.partialorder %v7803_v5, 0.0  ;;  %vm3314_vm8 = vcmp.gt.f32.partialorder %v7827_v14, 0.0  ;;  %v6172_v37 = vpop.f32.mrb[57].mxu0  ;;  %v6388_v58 = vpop.f32.mrb[57].mxu1 }
 0x169   : > { %6784 = vpow2.f32 %v2484_v52  ;;  %v2700_v28 = vmul.f32 1.442695, %v2354_v39  ;;  %4811 = vst.msk [vmem:[%s7488_s23 + $0x50] sm:$0xf] %vm4790_vm2, %v5801_v18  ;;  %v5909_v57 = vpack.c.bf16 %v3848_v44, %v3848_v44  ;;  %v3207_v40 = vmul.f32 1.6732632, %v5479_v45  ;;  %6279 = vmatmul.mubr.msk.bf16.gmra.mrb[164].mxu0 %vm1011_vm1, %v6663_v62 }
 0x16a   : > { %v2247_v15 = vmin.f32 %v7880_v3, 0.0  ;;  %v6777_v53 = vpop.eup %6776  ;;  %v3527_v54 = vsel %vm3313_vm6, %v7798_v50, %v3099_v61  ;;  %vm3422_vm9 = vcmp.gt.f32.partialorder %v7829_v31, 0.0  ;;  %v2355_v49 = vmin.f32 %v7882_v46, 0.0  ;;  %v7962_v48 = vpop.f32.mrb[58].mxu0  ;;  %6495 = vmatmul.mubr.msk.bf16.gmra.mrb[164].mxu1 %vm1011_vm1, %v6664_v23  ;;  %6282 = vmatprep.mubr.msk.bf16.mxu0 %vm7141_vm0, %v7140_v0  ;;  %v6665_v34 = vld [vmem:[%s7195_s20 + $0x150] sm:$0xff]   ;;  %v6666_v61 = vld [vmem:[%s7195_s20 + $0x300] sm:$0xff]  }
 0x16b   : > { %6786 = vpow2.f32 %v2700_v28  ;;  %4919 = vst.msk [vmem:[%s7488_s23 + $0x200] sm:$0xf] %vm4790_vm2, %v5909_v57  ;;  %v3741_v59 = vmul.f32 1.050701, %v3527_v54  ;;  %v3635_v25 = vsel %vm3421_vm7, %v7803_v5, %v3207_v40  ;;  %v5372_v1 = vadd.f32 -1.0, %v6777_v53  ;;  %v7968_v5 = vpop.f32.mrb[58].mxu1  ;;  %6498 = vmatprep.mubr.msk.bf16.mxu1 %vm7141_vm0, %v7140_v0 }
 0x16c   : > { %v2486_v60 = vmul.f32 1.442695, %v2247_v15  ;;  %v3849_v50 = vmul.f32 1.050701, %v3635_v25  ;;  %vm3315_vm10 = vcmp.gt.f32.partialorder %v7838_v56, 0.0  ;;  %v2248_v35 = vmin.f32 %v7908_v22, 0.0 }
 0x16d   : > { %v2702_v13 = vmul.f32 1.442695, %v2355_v49  ;;  %v6779_v2 = vpop.eup %6778  ;;  %v5802_v9 = vpack.c.bf16 %v3741_v59, %v3741_v59  ;;  %v3100_v10 = vmul.f32 1.6732632, %v5372_v1  ;;  %vm3423_vm11 = vcmp.gt.f32.partialorder %v7840_v63, 0.0  ;;  %v6173_v12 = vpop.f32.mrb[59].mxu0 }
 0x16e   : > { %6788 = vpow2.f32 %v2486_v60  ;;  %v2356_v11 = vmin.f32 %v7910_v4, 0.0  ;;  %v5910_v19 = vpack.c.bf16 %v3849_v50, %v3849_v50  ;;  %v5480_v16 = vadd.f32 -1.0, %v6779_v2  ;;  %v6389_v41 = vpop.f32.mrb[59].mxu1  ;;  %v7988_v38 = vpop.f32.mrb[60].mxu0 }
 0x16f   : > { %6790 = vpow2.f32 %v2702_v13  ;;  %v2488_v20 = vmul.f32 1.442695, %v2248_v35  ;;  %v6781_v21 = vpop.eup %6780  ;;  %4812 = vst.msk [vmem:[%s7488_s23 + $0x54] sm:$0xf] %vm4790_vm2, %v5802_v9  ;;  %v3528_v42 = vsel %vm3314_vm8, %v7827_v14, %v3100_v10  ;;  %vm3316_vm12 = vcmp.gt.f32.partialorder %v7870_v7, 0.0  ;;  %v7990_v30 = vpop.f32.mrb[60].mxu1 }
 0x170   : > { %v2704_v26 = vmul.f32 1.442695, %v2356_v11  ;;  %v2249_v17 = vmin.f32 %v7918_v36, 0.0  ;;  %4920 = vst.msk [vmem:[%s7488_s23 + $0x204] sm:$0xf] %vm4790_vm2, %v5910_v19  ;;  %v5373_v33 = vadd.f32 -1.0, %v6781_v21 }
 0x171   : > { %v3742_v27 = vmul.f32 1.050701, %v3528_v42  ;;  %v3208_v29 = vmul.f32 1.6732632, %v5480_v16  ;;  %6792 = vpow2.f32 %v2488_v20  ;;  %vm3424_vm13 = vcmp.gt.f32.partialorder %v7872_v8, 0.0  ;;  %v6176_v44 = vpop.f32.mrb[61].mxu0  ;;  %6283 = vmatmul.mubr.msk.bf16.gmra.mrb[168].mxu0 %vm1011_vm1, %v6665_v34 }
 0x172   : > { %v6783_v14 = vpop.eup %6782  ;;  %6794 = vpow2.f32 %v2704_v26  ;;  %v2490_v51 = vmul.f32 1.442695, %v2249_v17  ;;  %v2357_v55 = vmin.f32 %v7926_v32, 0.0  ;;  %v3101_v39 = vmul.f32 1.6732632, %v5373_v33  ;;  %v6392_v45 = vpop.f32.mrb[61].mxu1  ;;  %6499 = vmatmul.mubr.msk.bf16.gmra.mrb[168].mxu1 %vm1011_vm1, %v6666_v61  ;;  %6286 = vmatprep.mubr.msk.bf16.mxu0 %vm7141_vm0, %v7140_v0 }
 0x173   : > { %v6785_v47 = vpop.eup %6784  ;;  %v5803_v43 = vpack.c.bf16 %v3742_v27, %v3742_v27  ;;  %v3636_v52 = vsel %vm3422_vm9, %v7829_v31, %v3208_v29  ;;  %v5481_v18 = vadd.f32 -1.0, %v6783_v14  ;;  %v7996_v15 = vpop.f32.mrb[62].mxu0  ;;  %vm3317_vm14 = vcmp.gt.f32.partialorder %v7880_v3, 0.0  ;;  %6502 = vmatprep.mubr.msk.bf16.mxu1 %vm7141_vm0, %v7140_v0  ;;  %v6667_v21 = vld [vmem:[%s7195_s20 + $0x158] sm:$0xff]   ;;  %v6668_v42 = vld [vmem:[%s7195_s20 + $0x308] sm:$0xff]  }
 0x174   : > { %v3850_v28 = vmul.f32 1.050701, %v3636_v52  ;;  %v5374_v57 = vadd.f32 -1.0, %v6785_v47  ;;  %6796 = vpow2.f32 %v2490_v51  ;;  %v2706_v40 = vmul.f32 1.442695, %v2357_v55  ;;  %v8005_v37 = vpop.f32.mrb[62].mxu1 }
 0x175   : > { %v6787_v53 = vpop.eup %6786  ;;  %4813 = vst.msk [vmem:[%s7488_s23 + $0x58] sm:$0xf] %vm4790_vm2, %v5803_v43  ;;  %v3529_v54 = vsel %vm3315_vm10, %v7838_v56, %v3101_v39  ;;  %v3209_v49 = vmul.f32 1.6732632, %v5481_v18  ;;  %v2250_v31 = vmin.f32 %v7946_v6, 0.0  ;;  %v6177_v58 = vpop.f32.mrb[63].mxu0 }
 0x176   : > { %v5911_v62 = vpack.c.bf16 %v3850_v28, %v3850_v28  ;;  %v3743_v23 = vmul.f32 1.050701, %v3529_v54  ;;  %v3102_v59 = vmul.f32 1.6732632, %v5374_v57  ;;  %v5482_v25 = vadd.f32 -1.0, %v6787_v53  ;;  %v6393_v1 = vpop.f32.mrb[63].mxu1 }
 0x177   : > { %v3637_v60 = vsel %vm3423_vm11, %v7840_v63, %v3209_v49  ;;  %vm3425_vm15 = vcmp.gt.f32.partialorder %v7882_v46, 0.0  ;;  %6798 = vpow2.f32 %v2706_v40  ;;  %v2492_v56 = vmul.f32 1.442695, %v2250_v31  ;;  %v8029_v20 = vpop.f32.mrb[64].mxu0  ;;  %v8031_v41 = vpop.f32.mrb[64].mxu1 }
 0x178   : > { %v6789_v50 = vpop.eup %6788  ;;  %4921 = vst.msk [vmem:[%s7488_s23 + $0x208] sm:$0xf] %vm4790_vm2, %v5911_v62  ;;  %v5804_v13 = vpack.c.bf16 %v3743_v23, %v3743_v23  ;;  %v3851_v35 = vmul.f32 1.050701, %v3637_v60  ;;  %v3530_v2 = vsel %vm3316_vm12, %v7870_v7, %v3102_v59  ;;  %v3210_v63 = vmul.f32 1.6732632, %v5482_v25 }
 0x179   : > { %v6791_v9 = vpop.eup %6790  ;;  %v3744_v10 = vmul.f32 1.050701, %v3530_v2  ;;  %v5375_v11 = vadd.f32 -1.0, %v6789_v50  ;;  %6800 = vpow2.f32 %v2492_v56  ;;  %v2358_v12 = vmin.f32 %v7948_v24, 0.0  ;;  %v6180_v55 = vpop.f32.mrb[65].mxu0  ;;  %6287 = vmatmul.mubr.msk.bf16.gmra.mrb[172].mxu0 %vm1011_vm1, %v6667_v21 }
 0x17a   : > { %4814 = vst.msk [vmem:[%s7488_s23 + $0x5c] sm:$0xf] %vm4790_vm2, %v5804_v13  ;;  %v5912_v19 = vpack.c.bf16 %v3851_v35, %v3851_v35  ;;  %v3638_v7 = vsel %vm3424_vm13, %v7872_v8, %v3210_v63  ;;  %v5483_v16 = vadd.f32 -1.0, %v6791_v9  ;;  %vm3318_vm3 = vcmp.gt.f32.partialorder %v7908_v22, 0.0  ;;  %v6396_v39 = vpop.f32.mrb[65].mxu1  ;;  %v8044_v18 = vpop.f32.mrb[66].mxu0  ;;  %6503 = vmatmul.mubr.msk.bf16.gmra.mrb[172].mxu1 %vm1011_vm1, %v6668_v42  ;;  %6290 = vmatprep.mubr.msk.bf16.mxu0 %vm7141_vm0, %v7140_v0 }
 0x17b   : > { %v6793_v26 = vpop.eup %6792  ;;  %v5805_v17 = vpack.c.bf16 %v3744_v10, %v3744_v10  ;;  %v3852_v27 = vmul.f32 1.050701, %v3638_v7  ;;  %v3103_v29 = vmul.f32 1.6732632, %v5375_v11  ;;  %v2708_v33 = vmul.f32 1.442695, %v2358_v12  ;;  %6506 = vmatprep.mubr.msk.bf16.mxu1 %vm7141_vm0, %v7140_v0 }
 0x17c   : > { %v6795_v34 = vpop.eup %6794  ;;  %4922 = vst.msk [vmem:[%s7488_s23 + $0x20c] sm:$0xf] %vm4790_vm2, %v5912_v19  ;;  %v3211_v14 = vmul.f32 1.6732632, %v5483_v16  ;;  %v5376_v8 = vadd.f32 -1.0, %v6793_v26  ;;  %vm3426_vm4 = vcmp.gt.f32.partialorder %v7910_v4, 0.0 }
 0x17d   : > { %v2251_v51 = vmin.f32 %v7962_v48, 0.0  ;;  %4815 = vst.msk [vmem:[%s7488_s23 + $0x60] sm:$0xf] %vm4790_vm2, %v5805_v17  ;;  %v5913_v47 = vpack.c.bf16 %v3852_v27, %v3852_v27  ;;  %v3531_v43 = vsel %vm3317_vm14, %v7880_v3, %v3103_v29  ;;  %v5484_v52 = vadd.f32 -1.0, %v6795_v34  ;;  %v6181_v58 = vpop.f32.mrb[67].mxu0  ;;  %v6669_v11 = vld [vmem:[%s7195_s20 + $0x160] sm:$0xff]  }
 0x17e   : > { %6802 = vpow2.f32 %v2708_v33  ;;  %v6797_v44 = vpop.eup %6796  ;;  %v3745_v45 = vmul.f32 1.050701, %v3531_v43  ;;  %v3639_v61 = vsel %vm3425_vm15, %v7882_v46, %v3211_v14  ;;  %v3104_v28 = vmul.f32 1.6732632, %v5376_v8  ;;  %v8058_v46 = vpop.f32.mrb[66].mxu1  ;;  %v6670_v12 = vld [vmem:[%s7195_s20 + $0x310] sm:$0xff]  }
 0x17f   : > { %v2494_v57 = vmul.f32 1.442695, %v2251_v51  ;;  %4923 = vst.msk [vmem:[%s7488_s23 + $0x210] sm:$0xf] %vm4790_vm2, %v5913_v47  ;;  %v3853_v40 = vmul.f32 1.050701, %v3639_v61 }
 0x180   : > { %v3212_v53 = vmul.f32 1.6732632, %v5484_v52  ;;  %v5377_v54 = vadd.f32 -1.0, %v6797_v44  ;;  %v2359_v3 = vmin.f32 %v7968_v5, 0.0  ;;  %v5806_v49 = vpack.c.bf16 %v3745_v45, %v3745_v45  ;;  %v6397_v1 = vpop.f32.mrb[67].mxu1  ;;  %v8076_v9 = vpop.f32.mrb[68].mxu0 }
 0x181   : > { %v3532_v31 = vsel %vm3318_vm3, %v7908_v22, %v3104_v28  ;;  %vm3319_vm5 = vcmp.gt.f32.partialorder %v7918_v36, 0.0  ;;  %6804 = vpow2.f32 %v2494_v57  ;;  %v6799_v62 = vpop.eup %6798  ;;  %v5914_v23 = vpack.c.bf16 %v3853_v40, %v3853_v40  ;;  %v8078_v10 = vpop.f32.mrb[68].mxu1  ;;  %6291 = vmatmul.mubr.msk.bf16.gmra.mrb[176].mxu0 %vm1011_vm1, %v6669_v11 }
 0x182   : > { %v3746_v59 = vmul.f32 1.050701, %v3532_v31  ;;  %v3640_v22 = vsel %vm3426_vm4, %v7910_v4, %v3212_v53  ;;  %v3105_v25 = vmul.f32 1.6732632, %v5377_v54  ;;  %4816 = vst.msk [vmem:[%s7488_s23 + $0x64] sm:$0xf] %vm4790_vm2, %v5806_v49  ;;  %6507 = vmatmul.mubr.msk.bf16.gmra.mrb[176].mxu1 %vm1011_vm1, %v6670_v12  ;;  %6294 = vmatprep.mubr.msk.bf16.mxu0 %vm7141_vm0, %v7140_v0 }
 0x183   : > { %v3854_v60 = vmul.f32 1.050701, %v3640_v22  ;;  %v5485_v56 = vadd.f32 -1.0, %v6799_v62  ;;  %v2710_v50 = vmul.f32 1.442695, %v2359_v3  ;;  %v2252_v13 = vmin.f32 %v7988_v38, 0.0  ;;  %v6801_v35 = vpop.eup %6800  ;;  %6510 = vmatprep.mubr.msk.bf16.mxu1 %vm7141_vm0, %v7140_v0 }
 0x184   : > { %4924 = vst.msk [vmem:[%s7488_s23 + $0x214] sm:$0xf] %vm4790_vm2, %v5914_v23  ;;  %v5807_v2 = vpack.c.bf16 %v3746_v59, %v3746_v59  ;;  %v3533_v63 = vsel %vm3319_vm5, %v7918_v36, %v3105_v25  ;;  %v2360_v4 = vmin.f32 %v7990_v30, 0.0  ;;  %v5378_v21 = vadd.f32 -1.0, %v6801_v35  ;;  %v6184_v42 = vpop.f32.mrb[69].mxu0  ;;  %v6400_v17 = vpop.f32.mrb[69].mxu1 }
 0x185   : > { %v5915_v19 = vpack.c.bf16 %v3854_v60, %v3854_v60  ;;  %v3747_v7 = vmul.f32 1.050701, %v3533_v63  ;;  %v3213_v16 = vmul.f32 1.6732632, %v5485_v56  ;;  %vm3427_vm6 = vcmp.gt.f32.partialorder %v7926_v32, 0.0  ;;  %v8089_v14 = vpop.f32.mrb[70].mxu0 }
 0x186   : > { %4817 = vst.msk [vmem:[%s7488_s23 + $0x68] sm:$0xf] %vm4790_vm2, %v5807_v2  ;;  %6806 = vpow2.f32 %v2710_v50  ;;  %v2496_v36 = vmul.f32 1.442695, %v2252_v13  ;;  %v2712_v26 = vmul.f32 1.442695, %v2360_v4 }
 0x187   : > { %4925 = vst.msk [vmem:[%s7488_s23 + $0x218] sm:$0xf] %vm4790_vm2, %v5915_v19  ;;  %v5808_v27 = vpack.c.bf16 %v3747_v7, %v3747_v7  ;;  %v3641_v29 = vsel %vm3427_vm6, %v7926_v32, %v3213_v16  ;;  %v3106_v33 = vmul.f32 1.6732632, %v5378_v21  ;;  %v2253_v34 = vmin.f32 %v7996_v15, 0.0  ;;  %v8091_v8 = vpop.f32.mrb[70].mxu1 }
 0x188   : > { %v6803_v51 = vpop.eup %6802  ;;  %v3855_v55 = vmul.f32 1.050701, %v3641_v29  ;;  %vm3320_vm7 = vcmp.gt.f32.partialorder %v7946_v6, 0.0  ;;  %6808 = vpow2.f32 %v2496_v36  ;;  %v2361_v47 = vmin.f32 %v8005_v37, 0.0  ;;  %v6185_v43 = vpop.f32.mrb[71].mxu0  ;;  %v6671_v23 = vld [vmem:[%s7195_s20 + $0x168] sm:$0xff]  }
 0x189   : > { %v6401_v32 = vpop.f32.mrb[71].mxu1  ;;  %4818 = vst.msk [vmem:[%s7488_s23 + $0x6c] sm:$0xf] %vm4790_vm2, %v5808_v27  ;;  %v3534_v52 = vsel %vm3320_vm7, %v7946_v6, %v3106_v33  ;;  %v5486_v39 = vadd.f32 -1.0, %v6803_v51  ;;  %6810 = vpow2.f32 %v2712_v26  ;;  %v2498_v44 = vmul.f32 1.442695, %v2253_v34  ;;  %6295 = vmatmul.mubr.msk.bf16.gmra.mrb[180].mxu0 %vm1011_vm1, %v6671_v23 }
 0x18a   : > { %v5916_v45 = vpack.c.bf16 %v3855_v55, %v3855_v55  ;;  %v3748_v61 = vmul.f32 1.050701, %v3534_v52  ;;  %vm3428_vm8 = vcmp.gt.f32.partialorder %v7948_v24, 0.0  ;;  %v2714_v28 = vmul.f32 1.442695, %v2361_v47  ;;  %v8107_v53 = vpop.f32.mrb[72].mxu0  ;;  %6298 = vmatprep.mubr.msk.bf16.mxu0 %vm7141_vm0, %v7140_v0 }
 0x18b   : > { %v6805_v57 = vpop.eup %6804  ;;  %v3214_v40 = vmul.f32 1.6732632, %v5486_v39  ;;  %vm3321_vm9 = vcmp.gt.f32.partialorder %v7962_v48, 0.0  ;;  %6812 = vpow2.f32 %v2498_v44  ;;  %v2254_v6 = vmin.f32 %v8029_v20, 0.0  ;;  %v8109_v54 = vpop.f32.mrb[72].mxu1  ;;  %v6672_v59 = vld [vmem:[%s7195_s20 + $0x318] sm:$0xff]  }
 0x18c   : > { %4926 = vst.msk [vmem:[%s7488_s23 + $0x21c] sm:$0xf] %vm4790_vm2, %v5916_v45  ;;  %v5809_v3 = vpack.c.bf16 %v3748_v61, %v3748_v61  ;;  %v5379_v49 = vadd.f32 -1.0, %v6805_v57  ;;  %6814 = vpow2.f32 %v2714_v28  ;;  %v2362_v31 = vmin.f32 %v8031_v41, 0.0  ;;  %v6188_v58 = vpop.f32.mrb[73].mxu0  ;;  %v6404_v62 = vpop.f32.mrb[73].mxu1  ;;  %6511 = vmatmul.mubr.msk.bf16.gmra.mrb[180].mxu1 %vm1011_vm1, %v6672_v59 }
 0x18d   : > { %v3642_v22 = vsel %vm3428_vm8, %v7948_v24, %v3214_v40  ;;  %vm3429_vm10 = vcmp.gt.f32.partialorder %v7968_v5, 0.0  ;;  %v2500_v25 = vmul.f32 1.442695, %v2254_v6  ;;  %v2255_v1 = vmin.f32 %v8044_v18, 0.0  ;;  %v8121_v60 = vpop.f32.mrb[74].mxu0  ;;  %v8123_v56 = vpop.f32.mrb[74].mxu1  ;;  %6514 = vmatprep.mubr.msk.bf16.mxu1 %vm7141_vm0, %v7140_v0 }
 0x18e   : > { %4819 = vst.msk [vmem:[%s7488_s23 + $0x70] sm:$0xf] %vm4790_vm2, %v5809_v3  ;;  %v3856_v50 = vmul.f32 1.050701, %v3642_v22  ;;  %v3107_v13 = vmul.f32 1.6732632, %v5379_v49 }
 0x18f   : > { %v2716_v35 = vmul.f32 1.442695, %v2362_v31  ;;  %vm3322_vm11 = vcmp.gt.f32.partialorder %v7988_v38, 0.0  ;;  %6816 = vpow2.f32 %v2500_v25  ;;  %v2502_v2 = vmul.f32 1.442695, %v2255_v1  ;;  %v6189_v63 = vpop.f32.mrb[75].mxu0 }
 0x190   : > { %v2363_v24 = vmin.f32 %v8058_v46, 0.0  ;;  %v6405_v4 = vpop.f32.mrb[75].mxu1  ;;  %v6807_v11 = vpop.eup %6806  ;;  %v5917_v12 = vpack.c.bf16 %v3856_v50, %v3856_v50  ;;  %v3535_v19 = vsel %vm3321_vm9, %v7962_v48, %v3107_v13  ;;  %vm3430_vm12 = vcmp.gt.f32.partialorder %v7990_v30, 0.0  ;;  %v6673_v26 = vld [vmem:[%s7195_s20 + $0x170] sm:$0xff]   ;;  %v6674_v55 = vld [vmem:[%s7195_s20 + $0x320] sm:$0xff]  }
 0x191   : > { %6818 = vpow2.f32 %v2716_v35  ;;  %v3749_v7 = vmul.f32 1.050701, %v3535_v19  ;;  %v5487_v16 = vadd.f32 -1.0, %v6807_v11  ;;  %vm3323_vm13 = vcmp.gt.f32.partialorder %v7996_v15, 0.0  ;;  %v8146_v34 = vpop.f32.mrb[76].mxu0  ;;  %v8148_v51 = vpop.f32.mrb[76].mxu1  ;;  %6299 = vmatmul.mubr.msk.bf16.gmra.mrb[184].mxu0 %vm1011_vm1, %v6673_v26 }
 0x192   : > { %6820 = vpow2.f32 %v2502_v2  ;;  %v2718_v21 = vmul.f32 1.442695, %v2363_v24  ;;  %v6809_v48 = vpop.eup %6808  ;;  %4927 = vst.msk [vmem:[%s7488_s23 + $0x220] sm:$0xf] %vm4790_vm2, %v5917_v12  ;;  %vm3431_vm14 = vcmp.gt.f32.partialorder %v8005_v37, 0.0  ;;  %v2256_v42 = vmin.f32 %v8076_v9, 0.0  ;;  %6302 = vmatprep.mubr.msk.bf16.mxu0 %vm7141_vm0, %v7140_v0 }
 0x193   : > { %v2364_v36 = vmin.f32 %v8078_v10, 0.0  ;;  %v6811_v17 = vpop.eup %6810  ;;  %v5810_v27 = vpack.c.bf16 %v3749_v7, %v3749_v7  ;;  %v3215_v29 = vmul.f32 1.6732632, %v5487_v16  ;;  %v5380_v33 = vadd.f32 -1.0, %v6809_v48  ;;  %v6192_v28 = vpop.f32.mrb[77].mxu0  ;;  %v6675_v12 = vld [vmem:[%s7195_s20 + $0x178] sm:$0xff]  }
 0x194   : > { %6822 = vpow2.f32 %v2718_v21  ;;  %v5488_v47 = vadd.f32 -1.0, %v6811_v17  ;;  %v2504_v43 = vmul.f32 1.442695, %v2256_v42  ;;  %v2257_v52 = vmin.f32 %v8089_v14, 0.0  ;;  %v6408_v57 = vpop.f32.mrb[77].mxu1  ;;  %v8160_v31 = vpop.f32.mrb[78].mxu0  ;;  %6515 = vmatmul.mubr.msk.bf16.gmra.mrb[184].mxu1 %vm1011_vm1, %v6674_v55 }
 0x195   : > { %v2720_v32 = vmul.f32 1.442695, %v2364_v36  ;;  %v6813_v39 = vpop.eup %6812  ;;  %4820 = vst.msk [vmem:[%s7488_s23 + $0x74] sm:$0xf] %vm4790_vm2, %v5810_v27  ;;  %v3643_v44 = vsel %vm3429_vm10, %v7968_v5, %v3215_v29  ;;  %v3108_v45 = vmul.f32 1.6732632, %v5380_v33  ;;  %6518 = vmatprep.mubr.msk.bf16.mxu1 %vm7141_vm0, %v7140_v0 }
 0x196   : > { %vm3324_vm15 = vcmp.gt.f32.partialorder %v8029_v20, 0.0  ;;  %v2365_v61 = vmin.f32 %v8091_v8, 0.0  ;;  %v6815_v40 = vpop.eup %6814  ;;  %v3857_v6 = vmul.f32 1.050701, %v3643_v44  ;;  %v3216_v3 = vmul.f32 1.6732632, %v5488_v47 }
 0x197   : > { %v5381_v49 = vadd.f32 -1.0, %v6813_v39  ;;  %vm3432_vm3 = vcmp.gt.f32.partialorder %v8031_v41, 0.0  ;;  %6824 = vpow2.f32 %v2504_v43  ;;  %v3536_v5 = vsel %vm3322_vm11, %v7988_v38, %v3108_v45  ;;  %v8165_v23 = vpop.f32.mrb[78].mxu1  ;;  %v6193_v59 = vpop.f32.mrb[79].mxu0  ;;  %v6676_v26 = vld [vmem:[%s7195_s20 + $0x328] sm:$0xff]  }
 0x198   : > { %v5489_v58 = vadd.f32 -1.0, %v6815_v40  ;;  %6826 = vpow2.f32 %v2720_v32  ;;  %v2506_v62 = vmul.f32 1.442695, %v2257_v52  ;;  %v5918_v22 = vpack.c.bf16 %v3857_v6, %v3857_v6  ;;  %v6409_v38 = vpop.f32.mrb[79].mxu1  ;;  %v8186_v42 = vpop.f32.mrb[80].mxu0 }
 0x199   : > { %v3750_v25 = vmul.f32 1.050701, %v3536_v5  ;;  %v3644_v1 = vsel %vm3430_vm12, %v7990_v30, %v3216_v3  ;;  %v3109_v50 = vmul.f32 1.6732632, %v5381_v49  ;;  %v6817_v13 = vpop.eup %6816  ;;  %v2722_v24 = vmul.f32 1.442695, %v2365_v61  ;;  %6303 = vmatmul.mubr.msk.bf16.gmra.mrb[188].mxu0 %vm1011_vm1, %v6675_v12 }
 0x19a   : > { %v3858_v35 = vmul.f32 1.050701, %v3644_v1  ;;  %v3217_v2 = vmul.f32 1.6732632, %v5489_v58  ;;  %6828 = vpow2.f32 %v2506_v62  ;;  %4928 = vst.msk [vmem:[%s7488_s23 + $0x224] sm:$0xf] %vm4790_vm2, %v5918_v22  ;;  %6306 = vmatprep.mubr.msk.bf16.mxu0 %vm7141_vm0, %v7140_v0 }
 0x19b   : > { %v6819_v30 = vpop.eup %6818  ;;  %v5811_v63 = vpack.c.bf16 %v3750_v25, %v3750_v25  ;;  %v3537_v4 = vsel %vm3323_vm13, %v7996_v15, %v3109_v50  ;;  %v5382_v11 = vadd.f32 -1.0, %v6817_v13  ;;  %vm3325_vm4 = vcmp.gt.f32.partialorder %v8044_v18, 0.0  ;;  %v8188_v36 = vpop.f32.mrb[80].mxu1  ;;  %v6677_v13 = vld [vmem:[%s7195_s20 + $0x180] sm:$0xff]  }
 0x19c   : > { %v6821_v19 = vpop.eup %6820  ;;  %v5919_v7 = vpack.c.bf16 %v3858_v35, %v3858_v35  ;;  %v3751_v16 = vmul.f32 1.050701, %v3537_v4  ;;  %v3645_v21 = vsel %vm3431_vm14, %v8005_v37, %v3217_v2  ;;  %v5490_v48 = vadd.f32 -1.0, %v6819_v30  ;;  %v6196_v29 = vpop.f32.mrb[81].mxu0  ;;  %6519 = vmatmul.mubr.msk.bf16.gmra.mrb[188].mxu1 %vm1011_vm1, %v6676_v26  ;;  %v6678_v35 = vld [vmem:[%s7195_s20 + $0x330] sm:$0xff]  }
 0x19d   : > { %4821 = vst.msk [vmem:[%s7488_s23 + $0x78] sm:$0xf] %vm4790_vm2, %v5811_v63  ;;  %v3859_v15 = vmul.f32 1.050701, %v3645_v21  ;;  %v3110_v17 = vmul.f32 1.6732632, %v5382_v11  ;;  %6830 = vpow2.f32 %v2722_v24  ;;  %6522 = vmatprep.mubr.msk.bf16.mxu1 %vm7141_vm0, %v7140_v0 }
 0x19e   : > { %v5383_v27 = vadd.f32 -1.0, %v6821_v19  ;;  %v6823_v33 = vpop.eup %6822  ;;  %4929 = vst.msk [vmem:[%s7488_s23 + $0x228] sm:$0xf] %vm4790_vm2, %v5919_v7  ;;  %v5812_v55 = vpack.c.bf16 %v3751_v16, %v3751_v16  ;;  %v3218_v47 = vmul.f32 1.6732632, %v5490_v48  ;;  %vm3433_vm5 = vcmp.gt.f32.partialorder %v8058_v46, 0.0 }
 0x19f   : > { %v2258_v37 = vmin.f32 %v8107_v53, 0.0  ;;  %v6412_v43 = vpop.f32.mrb[81].mxu1  ;;  %v8197_v32 = vpop.f32.mrb[82].mxu0  ;;  %v5920_v52 = vpack.c.bf16 %v3859_v15, %v3859_v15  ;;  %v3538_v39 = vsel %vm3324_vm15, %v8029_v20, %v3110_v17  ;;  %v5491_v45 = vadd.f32 -1.0, %v6823_v33 }
 0x1a0   : > { %v3111_v44 = vmul.f32 1.6732632, %v5383_v27  ;;  %v8202_v61 = vpop.f32.mrb[82].mxu1  ;;  %v6197_v28 = vpop.f32.mrb[83].mxu0  ;;  %4822 = vst.msk [vmem:[%s7488_s23 + $0x7c] sm:$0xf] %vm4790_vm2, %v5812_v55  ;;  %v3646_v40 = vsel %vm3432_vm3, %v8031_v41, %v3218_v47 }
 0x1a1   : > { %v3752_v57 = vmul.f32 1.050701, %v3538_v39  ;;  %v2508_v6 = vmul.f32 1.442695, %v2258_v37  ;;  %v2366_v3 = vmin.f32 %v8109_v54, 0.0  ;;  %v6413_v49 = vpop.f32.mrb[83].mxu1  ;;  %v6825_v5 = vpop.eup %6824  ;;  %6307 = vmatmul.mubr.msk.bf16.gmra.mrb[192].mxu0 %vm1011_vm1, %v6677_v13 }
 0x1a2   : > { %4930 = vst.msk [vmem:[%s7488_s23 + $0x22c] sm:$0xf] %vm4790_vm2, %v5920_v52  ;;  %v3860_v20 = vmul.f32 1.050701, %v3646_v40  ;;  %v3539_v58 = vsel %vm3325_vm4, %v8044_v18, %v3111_v44  ;;  %v3219_v62 = vmul.f32 1.6732632, %v5491_v45  ;;  %v6827_v41 = vpop.eup %6826  ;;  %6310 = vmatprep.mubr.msk.bf16.mxu0 %vm7141_vm0, %v7140_v0 }
 0x1a3   : > { %vm3326_vm6 = vcmp.gt.f32.partialorder %v8076_v9, 0.0  ;;  %v5813_v59 = vpack.c.bf16 %v3752_v57, %v3752_v57  ;;  %v3753_v22 = vmul.f32 1.050701, %v3539_v58  ;;  %v5384_v25 = vadd.f32 -1.0, %v6825_v5  ;;  %v8230_v11 = vpop.f32.mrb[84].mxu0  ;;  %v8235_v19 = vpop.f32.mrb[84].mxu1 }
 0x1a4   : > { %6832 = vpow2.f32 %v2508_v6  ;;  %v5921_v18 = vpack.c.bf16 %v3860_v20, %v3860_v20  ;;  %v3647_v1 = vsel %vm3433_vm5, %v8058_v46, %v3219_v62  ;;  %v5492_v50 = vadd.f32 -1.0, %v6827_v41  ;;  %v6829_v2 = vpop.eup %6828  ;;  %v6200_v7 = vpop.f32.mrb[85].mxu0  ;;  %6523 = vmatmul.mubr.msk.bf16.gmra.mrb[192].mxu1 %vm1011_vm1, %v6678_v35 }
 0x1a5   : > { %v2724_v38 = vmul.f32 1.442695, %v2366_v3  ;;  %4823 = vst.msk [vmem:[%s7488_s23 + $0x80] sm:$0xf] %vm4790_vm2, %v5813_v59  ;;  %v5814_v24 = vpack.c.bf16 %v3753_v22, %v3753_v22  ;;  %v3861_v30 = vmul.f32 1.050701, %v3647_v1  ;;  %6526 = vmatprep.mubr.msk.bf16.mxu1 %vm7141_vm0, %v7140_v0 }
 0x1a6   : > { %v3112_v63 = vmul.f32 1.6732632, %v5384_v25  ;;  %v2259_v4 = vmin.f32 %v8121_v60, 0.0  ;;  %4931 = vst.msk [vmem:[%s7488_s23 + $0x230] sm:$0xf] %vm4790_vm2, %v5921_v18  ;;  %vm3434_vm7 = vcmp.gt.f32.partialorder %v8078_v10, 0.0 }
 0x1a7   : > { %v3220_v12 = vmul.f32 1.6732632, %v5492_v50  ;;  %v5385_v46 = vadd.f32 -1.0, %v6829_v2  ;;  %6834 = vpow2.f32 %v2724_v38  ;;  %4824 = vst.msk [vmem:[%s7488_s23 + $0x84] sm:$0xf] %vm4790_vm2, %v5814_v24  ;;  %v5922_v16 = vpack.c.bf16 %v3861_v30, %v3861_v30  ;;  %v6416_v15 = vpop.f32.mrb[85].mxu1  ;;  %v6831_v27 = vpop.eup %6830 }
 0x1a8   : > { %v3540_v21 = vsel %vm3326_vm6, %v8076_v9, %v3112_v63  ;;  %v2510_v48 = vmul.f32 1.442695, %v2259_v4  ;;  %v2367_v26 = vmin.f32 %v8123_v56, 0.0  ;;  %v8243_v17 = vpop.f32.mrb[86].mxu0  ;;  %vm3327_vm8 = vcmp.gt.f32.partialorder %v8089_v14, 0.0  ;;  %v8247_v47 = vpop.f32.mrb[86].mxu1 }
 0x1a9   : > { %v3754_v29 = vmul.f32 1.050701, %v3540_v21  ;;  %v3648_v33 = vsel %vm3434_vm7, %v8078_v10, %v3220_v12  ;;  %v3113_v55 = vmul.f32 1.6732632, %v5385_v46  ;;  %4932 = vst.msk [vmem:[%s7488_s23 + $0x234] sm:$0xf] %vm4790_vm2, %v5922_v16 }
 0x1aa   : > { %v3862_v37 = vmul.f32 1.050701, %v3648_v33  ;;  %v5493_v43 = vadd.f32 -1.0, %v6831_v27  ;;  %6836 = vpow2.f32 %v2510_v48  ;;  %v2726_v9 = vmul.f32 1.442695, %v2367_v26  ;;  %v6201_v52 = vpop.f32.mrb[87].mxu0 }
 0x1ab   : > { %v5815_v39 = vpack.c.bf16 %v3754_v29, %v3754_v29  ;;  %v3541_v44 = vsel %vm3327_vm8, %v8089_v14, %v3113_v55  ;;  %v2260_v45 = vmin.f32 %v8146_v34, 0.0  ;;  %v6417_v10 = vpop.f32.mrb[87].mxu1  ;;  %vm3435_vm9 = vcmp.gt.f32.partialorder %v8091_v8, 0.0  ;;  %v8268_v62 = vpop.f32.mrb[88].mxu0  ;;  %v6679_v59 = vld [vmem:[%s7195_s20 + $0x188] sm:$0xff]   ;;  %v6680_v22 = vld [vmem:[%s7195_s20 + $0x338] sm:$0xff]  }
 0x1ac   : > { %v5923_v28 = vpack.c.bf16 %v3862_v37, %v3862_v37  ;;  %v3755_v57 = vmul.f32 1.050701, %v3541_v44  ;;  %v3221_v40 = vmul.f32 1.6732632, %v5493_v43  ;;  %6838 = vpow2.f32 %v2726_v9  ;;  %v8270_v41 = vpop.f32.mrb[88].mxu1  ;;  %v6204_v50 = vpop.f32.mrb[89].mxu0  ;;  %6311 = vmatmul.mubr.msk.bf16.gmra.mrb[196].mxu0 %vm1011_vm1, %v6679_v59  ;;  %6527 = vmatmul.mubr.msk.bf16.gmra.mrb[196].mxu1 %vm1011_vm1, %v6680_v22 }
 0x1ad   : > { %4825 = vst.msk [vmem:[%s7488_s23 + $0x88] sm:$0xf] %vm4790_vm2, %v5815_v39  ;;  %v2512_v14 = vmul.f32 1.442695, %v2260_v45  ;;  %v2368_v6 = vmin.f32 %v8148_v51, 0.0  ;;  %v2261_v3 = vmin.f32 %v8160_v31, 0.0  ;;  %6314 = vmatprep.mubr.msk.bf16.mxu0 %vm7141_vm0, %v7140_v0  ;;  %6530 = vmatprep.mubr.msk.bf16.mxu1 %vm7141_vm0, %v7140_v0 }
 0x1ae   : > { %v6833_v49 = vpop.eup %6832  ;;  %4933 = vst.msk [vmem:[%s7488_s23 + $0x238] sm:$0xf] %vm4790_vm2, %v5923_v28  ;;  %v5816_v5 = vpack.c.bf16 %v3755_v57, %v3755_v57  ;;  %v3649_v20 = vsel %vm3435_vm9, %v8091_v8, %v3221_v40  ;;  %v2369_v58 = vmin.f32 %v8165_v23, 0.0  ;;  %vm3328_vm10 = vcmp.gt.f32.partialorder %v8107_v53, 0.0  ;;  %v6420_v30 = vpop.f32.mrb[89].mxu1  ;;  %v6681_v45 = vld [vmem:[%s7195_s20 + $0x190] sm:$0xff]  }
 0x1af   : > { %v3863_v25 = vmul.f32 1.050701, %v3649_v20  ;;  %v5386_v18 = vadd.f32 -1.0, %v6833_v49  ;;  %6840 = vpow2.f32 %v2512_v14  ;;  %v2728_v1 = vmul.f32 1.442695, %v2368_v6  ;;  %v8279_v63 = vpop.f32.mrb[90].mxu0 }
 0x1b0   : > { %4826 = vst.msk [vmem:[%s7488_s23 + $0x8c] sm:$0xf] %vm4790_vm2, %v5816_v5  ;;  %v2514_v38 = vmul.f32 1.442695, %v2261_v3  ;;  %v2730_v8 = vmul.f32 1.442695, %v2369_v58 }
 0x1b1   : > { %v2262_v13 = vmin.f32 %v8186_v42, 0.0  ;;  %v6835_v35 = vpop.eup %6834  ;;  %v5924_v2 = vpack.c.bf16 %v3863_v25, %v3863_v25  ;;  %v3114_v24 = vmul.f32 1.6732632, %v5386_v18  ;;  %vm3436_vm11 = vcmp.gt.f32.partialorder %v8109_v54, 0.0  ;;  %v8282_v7 = vpop.f32.mrb[90].mxu1  ;;  %v6682_v10 = vld [vmem:[%s7195_s20 + $0x340] sm:$0xff]  }
 0x1b2   : > { %6842 = vpow2.f32 %v2728_v1  ;;  %v5494_v4 = vadd.f32 -1.0, %v6835_v35  ;;  %v2370_v46 = vmin.f32 %v8188_v36, 0.0  ;;  %v6205_v16 = vpop.f32.mrb[91].mxu0  ;;  %vm3329_vm12 = vcmp.gt.f32.partialorder %v8121_v60, 0.0  ;;  %v6421_v26 = vpop.f32.mrb[91].mxu1 }
 0x1b3   : > { %6844 = vpow2.f32 %v2514_v38  ;;  %v2516_v12 = vmul.f32 1.442695, %v2262_v13  ;;  %4934 = vst.msk [vmem:[%s7488_s23 + $0x23c] sm:$0xf] %vm4790_vm2, %v5924_v2  ;;  %v3542_v21 = vsel %vm3328_vm10, %v8107_v53, %v3114_v24  ;;  %v2263_v48 = vmin.f32 %v8197_v32, 0.0  ;;  %v8303_v39 = vpop.f32.mrb[92].mxu0 }
 0x1b4   : > { %6846 = vpow2.f32 %v2730_v8  ;;  %v6837_v15 = vpop.eup %6836  ;;  %v3756_v27 = vmul.f32 1.050701, %v3542_v21  ;;  %v3222_v29 = vmul.f32 1.6732632, %v5494_v4  ;;  %v2732_v33 = vmul.f32 1.442695, %v2370_v46  ;;  %6315 = vmatmul.mubr.msk.bf16.gmra.mrb[200].mxu0 %vm1011_vm1, %v6681_v45  ;;  %6531 = vmatmul.mubr.msk.bf16.gmra.mrb[200].mxu1 %vm1011_vm1, %v6682_v10 }
 0x1b5   : > { %6848 = vpow2.f32 %v2516_v12  ;;  %v5387_v53 = vadd.f32 -1.0, %v6837_v15  ;;  %vm3437_vm13 = vcmp.gt.f32.partialorder %v8123_v56, 0.0  ;;  %v2518_v55 = vmul.f32 1.442695, %v2263_v48  ;;  %v8305_v44 = vpop.f32.mrb[92].mxu1  ;;  %v6208_v14 = vpop.f32.mrb[93].mxu0  ;;  %6318 = vmatprep.mubr.msk.bf16.mxu0 %vm7141_vm0, %v7140_v0  ;;  %6534 = vmatprep.mubr.msk.bf16.mxu1 %vm7141_vm0, %v7140_v0 }
 0x1b6   : > { %v2371_v37 = vmin.f32 %v8202_v61, 0.0  ;;  %v6839_v43 = vpop.eup %6838  ;;  %v5817_v9 = vpack.c.bf16 %v3756_v27, %v3756_v27  ;;  %v3650_v52 = vsel %vm3436_vm11, %v8109_v54, %v3222_v29  ;;  %vm3330_vm14 = vcmp.gt.f32.partialorder %v8146_v34, 0.0  ;;  %v6424_v49 = vpop.f32.mrb[93].mxu1  ;;  %v6683_v26 = vld [vmem:[%s7195_s20 + $0x198] sm:$0xff]  }
 0x1b7   : > { %6850 = vpow2.f32 %v2732_v33  ;;  %v3864_v28 = vmul.f32 1.050701, %v3650_v52  ;;  %v3115_v57 = vmul.f32 1.6732632, %v5387_v53  ;;  %v5495_v40 = vadd.f32 -1.0, %v6839_v43  ;;  %v8319_v22 = vpop.f32.mrb[94].mxu0 }
 0x1b8   : > { %vm3438_vm15 = vcmp.gt.f32.partialorder %v8148_v51, 0.0  ;;  %6852 = vpow2.f32 %v2518_v55  ;;  %4827 = vst.msk [vmem:[%s7488_s23 + $0x90] sm:$0xf] %vm4790_vm2, %v5817_v9  ;;  %vm3331_vm3 = vcmp.gt.f32.partialorder %v8160_v31, 0.0  ;;  %v2734_v54 = vmul.f32 1.442695, %v2371_v37 }
 0x1b9   : > { %v2264_v6 = vmin.f32 %v8230_v11, 0.0  ;;  %v2372_v3 = vmin.f32 %v8235_v19, 0.0  ;;  %v6841_v5 = vpop.eup %6840  ;;  %v5925_v20 = vpack.c.bf16 %v3864_v28, %v3864_v28  ;;  %v3543_v58 = vsel %vm3329_vm12, %v8121_v60, %v3115_v57  ;;  %v8321_v25 = vpop.f32.mrb[94].mxu1  ;;  %v6684_v43 = vld [vmem:[%s7195_s20 + $0x348] sm:$0xff]  }
 0x1ba   : > { %v3223_v59 = vmul.f32 1.6732632, %v5495_v40  ;;  %vm3439_vm4 = vcmp.gt.f32.partialorder %v8165_v23, 0.0  ;;  %v3757_v18 = vmul.f32 1.050701, %v3543_v58  ;;  %v5388_v1 = vadd.f32 -1.0, %v6841_v5 }
 0x1bb   : > { %6854 = vpow2.f32 %v2734_v54  ;;  %v2520_v50 = vmul.f32 1.442695, %v2264_v6  ;;  %v6209_v38 = vpop.f32.mrb[95].mxu0  ;;  %4935 = vst.msk [vmem:[%s7488_s23 + $0x240] sm:$0xf] %vm4790_vm2, %v5925_v20  ;;  %vm3332_vm5 = vcmp.gt.f32.partialorder %v8186_v42, 0.0 }
 0x1bc   : > { %v6843_v8 = vpop.eup %6842  ;;  %v3651_v13 = vsel %vm3437_vm13, %v8123_v56, %v3223_v59  ;;  %v2736_v60 = vmul.f32 1.442695, %v2372_v3  ;;  %v2265_v35 = vmin.f32 %v8243_v17, 0.0  ;;  %v6425_v2 = vpop.f32.mrb[95].mxu1  ;;  %v5818_v30 = vpack.c.bf16 %v3757_v18, %v3757_v18  ;;  %6319 = vmatmul.mubr.msk.bf16.gmra.mrb[204].mxu0 %vm1011_vm1, %v6683_v26  ;;  %6535 = vmatmul.mubr.msk.bf16.gmra.mrb[204].mxu1 %vm1011_vm1, %v6684_v43  ;;  %v6686_v26 = vld [vmem:[%s7195_s20 + $0x350] sm:$0xff]  }
 0x1bd   : > { %v6845_v24 = vpop.eup %6844  ;;  %v3865_v4 = vmul.f32 1.050701, %v3651_v13  ;;  %v3116_v12 = vmul.f32 1.6732632, %v5388_v1  ;;  %v5496_v46 = vadd.f32 -1.0, %v6843_v8  ;;  %vm3440_vm6 = vcmp.gt.f32.partialorder %v8188_v36, 0.0  ;;  %6322 = vmatprep.mubr.msk.bf16.mxu0 %vm7141_vm0, %v7140_v0  ;;  %6538 = vmatprep.mubr.msk.bf16.mxu1 %vm7141_vm0, %v7140_v0 }
 0x1be   : > { %v6847_v56 = vpop.eup %6846  ;;  %v5389_v16 = vadd.f32 -1.0, %v6845_v24  ;;  %6856 = vpow2.f32 %v2520_v50  ;;  %v2522_v21 = vmul.f32 1.442695, %v2265_v35  ;;  %v2373_v48 = vmin.f32 %v8247_v47, 0.0  ;;  %4828 = vst.msk [vmem:[%s7488_s23 + $0x94] sm:$0xf] %vm4790_vm2, %v5818_v30 }
 0x1bf   : > { %v6849_v15 = vpop.eup %6848  ;;  %v5926_v27 = vpack.c.bf16 %v3865_v4, %v3865_v4  ;;  %v3544_v29 = vsel %vm3330_vm14, %v8146_v34, %v3116_v12  ;;  %v3224_v33 = vmul.f32 1.6732632, %v5496_v46  ;;  %v5497_v53 = vadd.f32 -1.0, %v6847_v56  ;;  %v8344_v55 = vpop.f32.mrb[96].mxu0 }
 0x1c0   : > { %v8346_v37 = vpop.f32.mrb[96].mxu1  ;;  %v3758_v9 = vmul.f32 1.050701, %v3544_v29  ;;  %v3117_v52 = vmul.f32 1.6732632, %v5389_v16  ;;  %v5390_v45 = vadd.f32 -1.0, %v6849_v15  ;;  %6858 = vpow2.f32 %v2736_v60 }
 0x1c1   : > { %v6212_v10 = vpop.f32.mrb[97].mxu0  ;;  %v6851_v28 = vpop.eup %6850  ;;  %4936 = vst.msk [vmem:[%s7488_s23 + $0x244] sm:$0xf] %vm4790_vm2, %v5926_v27  ;;  %v3652_v57 = vsel %vm3438_vm15, %v8148_v51, %v3224_v33  ;;  %v3225_v34 = vmul.f32 1.6732632, %v5497_v53  ;;  %6860 = vpow2.f32 %v2522_v21  ;;  %vm3333_vm7 = vcmp.gt.f32.partialorder %v8197_v32, 0.0 }
 0x1c2   : > { %v2738_v40 = vmul.f32 1.442695, %v2373_v48  ;;  %v6428_v14 = vpop.f32.mrb[97].mxu1  ;;  %v8354_v54 = vpop.f32.mrb[98].mxu0  ;;  %v5819_v3 = vpack.c.bf16 %v3758_v9, %v3758_v9  ;;  %v3866_v49 = vmul.f32 1.050701, %v3652_v57  ;;  %v3545_v5 = vsel %vm3331_vm3, %v8160_v31, %v3117_v52 }
 0x1c3   : > { %v6853_v6 = vpop.eup %6852  ;;  %v3118_v20 = vmul.f32 1.6732632, %v5390_v45  ;;  %v8359_v58 = vpop.f32.mrb[98].mxu1  ;;  %v3759_v18 = vmul.f32 1.050701, %v3545_v5  ;;  %v3653_v51 = vsel %vm3439_vm4, %v8165_v23, %v3225_v34  ;;  %v5498_v1 = vadd.f32 -1.0, %v6851_v28 }
 0x1c4   : > { %v6213_v59 = vpop.f32.mrb[99].mxu0  ;;  %v5391_v50 = vadd.f32 -1.0, %v6853_v6  ;;  %v6429_v38 = vpop.f32.mrb[99].mxu1  ;;  %4829 = vst.msk [vmem:[%s7488_s23 + $0x98] sm:$0xf] %vm4790_vm2, %v5819_v3  ;;  %v5927_v8 = vpack.c.bf16 %v3866_v49, %v3866_v49  ;;  %6862 = vpow2.f32 %v2738_v40  ;;  %v2266_v4 = vmin.f32 %v8268_v62, 0.0  ;;  %6539 = vmatmul.mubr.msk.bf16.gmra.mrb[208].mxu1 %vm1011_vm1, %v6686_v26 }
 0x1c5   : > { %v3867_v13 = vmul.f32 1.050701, %v3653_v51  ;;  %v3546_v31 = vsel %vm3332_vm5, %v8186_v42, %v3118_v20  ;;  %v6855_v60 = vpop.eup %6854  ;;  %v5820_v23 = vpack.c.bf16 %v3759_v18, %v3759_v18  ;;  %v3226_v2 = vmul.f32 1.6732632, %v5498_v1  ;;  %v8386_v16 = vpop.f32.mrb[100].mxu0  ;;  %v6685_v48 = vld [vmem:[%s7195_s20 + $0x1a0] sm:$0xff]  }
 0x1c6   : > { %v3760_v35 = vmul.f32 1.050701, %v3546_v31  ;;  %v3119_v24 = vmul.f32 1.6732632, %v5391_v50  ;;  %4937 = vst.msk [vmem:[%s7488_s23 + $0x248] sm:$0xf] %vm4790_vm2, %v5927_v8  ;;  %6323 = vmatmul.mubr.msk.bf16.gmra.mrb[208].mxu0 %vm1011_vm1, %v6685_v48 }
 0x1c7   : > { %v5928_v42 = vpack.c.bf16 %v3867_v13, %v3867_v13  ;;  %v5499_v30 = vadd.f32 -1.0, %v6855_v60  ;;  %4830 = vst.msk [vmem:[%s7488_s23 + $0x9c] sm:$0xf] %vm4790_vm2, %v5820_v23  ;;  %v3654_v46 = vsel %vm3440_vm6, %v8188_v36, %v3226_v2  ;;  %vm3441_vm8 = vcmp.gt.f32.partialorder %v8202_v61, 0.0  ;;  %v8388_v21 = vpop.f32.mrb[100].mxu1  ;;  %v6216_v43 = vpop.f32.mrb[101].mxu0  ;;  %6326 = vmatprep.mubr.msk.bf16.mxu0 %vm7141_vm0, %v7140_v0 }
 0x1c8   : > { %v5821_v12 = vpack.c.bf16 %v3760_v35, %v3760_v35  ;;  %v3547_v56 = vsel %vm3333_vm7, %v8197_v32, %v3119_v24  ;;  %v6857_v15 = vpop.eup %6856  ;;  %v3868_v27 = vmul.f32 1.050701, %v3654_v46  ;;  %vm3334_vm9 = vcmp.gt.f32.partialorder %v8230_v11, 0.0  ;;  %v6432_v57 = vpop.f32.mrb[101].mxu1  ;;  %v6687_v46 = vld [vmem:[%s7195_s20 + $0x1a8] sm:$0xff]  }
 0x1c9   : > { %4938 = vst.msk [vmem:[%s7488_s23 + $0x24c] sm:$0xf] %vm4790_vm2, %v5928_v42  ;;  %v3761_v29 = vmul.f32 1.050701, %v3547_v56  ;;  %v3227_v33 = vmul.f32 1.6732632, %v5499_v30 }
 0x1ca   : > { %4831 = vst.msk [vmem:[%s7488_s23 + $0xa0] sm:$0xf] %vm4790_vm2, %v5821_v12  ;;  %v5392_v53 = vadd.f32 -1.0, %v6857_v15  ;;  %v2524_v36 = vmul.f32 1.442695, %v2266_v4  ;;  %v2374_v32 = vmin.f32 %v8270_v41, 0.0  ;;  %v6859_v9 = vpop.eup %6858  ;;  %v5929_v52 = vpack.c.bf16 %v3868_v27, %v3868_v27 }
 0x1cb   : > { %v5822_v45 = vpack.c.bf16 %v3761_v29, %v3761_v29  ;;  %v3655_v10 = vsel %vm3441_vm8, %v8202_v61, %v3227_v33  ;;  %v2267_v28 = vmin.f32 %v8279_v63, 0.0  ;;  %v8402_v34 = vpop.f32.mrb[102].mxu0  ;;  %v6861_v40 = vpop.eup %6860  ;;  %v5500_v3 = vadd.f32 -1.0, %v6859_v9 }
 0x1cc   : > { %v3869_v14 = vmul.f32 1.050701, %v3655_v10  ;;  %v3120_v6 = vmul.f32 1.6732632, %v5392_v53  ;;  %6864 = vpow2.f32 %v2524_v36  ;;  %v8404_v49 = vpop.f32.mrb[102].mxu1  ;;  %vm3442_vm10 = vcmp.gt.f32.partialorder %v8235_v19, 0.0 }
 0x1cd   : > { %4939 = vst.msk [vmem:[%s7488_s23 + $0x250] sm:$0xf] %vm4790_vm2, %v5929_v52  ;;  %4832 = vst.msk [vmem:[%s7488_s23 + $0xa4] sm:$0xf] %vm4790_vm2, %v5822_v45  ;;  %v5393_v5 = vadd.f32 -1.0, %v6861_v40  ;;  %v2375_v1 = vmin.f32 %v8282_v7, 0.0 }
 0x1ce   : > { %v2740_v61 = vmul.f32 1.442695, %v2374_v32  ;;  %v2526_v20 = vmul.f32 1.442695, %v2267_v28  ;;  %v5930_v59 = vpack.c.bf16 %v3869_v14, %v3869_v14  ;;  %v3548_v18 = vsel %vm3334_vm9, %v8230_v11, %v3120_v6  ;;  %v6217_v50 = vpop.f32.mrb[103].mxu0  ;;  %v6433_v38 = vpop.f32.mrb[103].mxu1  ;;  %6327 = vmatmul.mubr.msk.bf16.gmra.mrb[212].mxu0 %vm1011_vm1, %v6687_v46 }
 0x1cf   : > { %v3228_v51 = vmul.f32 1.6732632, %v5500_v3  ;;  %v6863_v8 = vpop.eup %6862  ;;  %v3762_v13 = vmul.f32 1.050701, %v3548_v18  ;;  %v3121_v31 = vmul.f32 1.6732632, %v5393_v5 }
 0x1d0   : > { %vm3335_vm11 = vcmp.gt.f32.partialorder %v8243_v17, 0.0  ;;  %6866 = vpow2.f32 %v2740_v61  ;;  %4940 = vst.msk [vmem:[%s7488_s23 + $0x254] sm:$0xf] %vm4790_vm2, %v5930_v59  ;;  %v5501_v60 = vadd.f32 -1.0, %v6863_v8  ;;  %v2742_v23 = vmul.f32 1.442695, %v2375_v1 }
 0x1d1   : > { %v3656_v11 = vsel %vm3442_vm10, %v8235_v19, %v3228_v51  ;;  %6868 = vpow2.f32 %v2526_v20  ;;  %v8425_v35 = vpop.f32.mrb[104].mxu0  ;;  %v8427_v0 = vpop.f32.mrb[104].mxu1  ;;  %v5823_v2 = vpack.c.bf16 %v3762_v13, %v3762_v13  ;;  %v3549_v42 = vsel %vm3335_vm11, %v8243_v17, %v3121_v31 }
 0x1d2   : > { %v3870_v24 = vmul.f32 1.050701, %v3656_v11  ;;  %v2268_v30 = vmin.f32 %v8303_v39, 0.0  ;;  %v6220_v4 = vpop.f32.mrb[105].mxu0  ;;  %v6436_v12 = vpop.f32.mrb[105].mxu1  ;;  %6870 = vpow2.f32 %v2742_v23  ;;  %vm3443_vm0 = vcmp.gt.f32.partialorder %v8247_v47, 0.0 }
 0x1d3   : > { %v3763_v56 = vmul.f32 1.050701, %v3549_v42  ;;  %v3229_v19 = vmul.f32 1.6732632, %v5501_v60  ;;  %v8432_v48 = vpop.f32.mrb[106].mxu0  ;;  %v2376_v17 = vmin.f32 %v8305_v44, 0.0 }
 0x1d4   : > { %4833 = vst.msk [vmem:[%s7488_s23 + $0xa8] sm:$0xf] %vm4790_vm2, %v5823_v2  ;;  %v5931_v26 = vpack.c.bf16 %v3870_v24, %v3870_v24  ;;  %v2528_v15 = vmul.f32 1.442695, %v2268_v30  ;;  %v8438_v27 = vpop.f32.mrb[106].mxu1  ;;  %v6221_v29 = vpop.f32.mrb[107].mxu0 }
 0x1d5   : > { %v5824_v33 = vpack.c.bf16 %v3763_v56, %v3763_v56  ;;  %v3657_v53 = vsel %vm3443_vm0, %v8247_v47, %v3229_v19  ;;  %v2269_v36 = vmin.f32 %v8319_v22, 0.0  ;;  %v6437_v32 = vpop.f32.mrb[107].mxu1  ;;  %v2744_v9 = vmul.f32 1.442695, %v2376_v17  ;;  %v8453_v3 = vpop.f32.mrb[108].mxu0 }
 0x1d6   : > { %4941 = vst.msk [vmem:[%s7488_s23 + $0x258] sm:$0xf] %vm4790_vm2, %v5931_v26  ;;  %v3871_v43 = vmul.f32 1.050701, %v3657_v53  ;;  %6872 = vpow2.f32 %v2528_v15  ;;  %v2377_v52 = vmin.f32 %v8321_v25, 0.0  ;;  %v6865_v45 = vpop.eup %6864  ;;  %vm3336_vm12 = vcmp.gt.f32.partialorder %v8268_v62, 0.0 }
 0x1d7   : > { %4834 = vst.msk [vmem:[%s7488_s23 + $0xac] sm:$0xf] %vm4790_vm2, %v5824_v33  ;;  %vm3444_vm13 = vcmp.gt.f32.partialorder %v8270_v41, 0.0  ;;  %v2530_v47 = vmul.f32 1.442695, %v2269_v36  ;;  %v2270_v10 = vmin.f32 %v8344_v55, 0.0  ;;  %6874 = vpow2.f32 %v2744_v9 }
 0x1d8   : > { %v5932_v28 = vpack.c.bf16 %v3871_v43, %v3871_v43  ;;  %v5394_v57 = vadd.f32 -1.0, %v6865_v45  ;;  %v2746_v40 = vmul.f32 1.442695, %v2377_v52  ;;  %vm3337_vm14 = vcmp.gt.f32.partialorder %v8279_v63, 0.0  ;;  %v8455_v5 = vpop.f32.mrb[108].mxu1  ;;  %v6224_v18 = vpop.f32.mrb[109].mxu0 }
 0x1d9   : > { %6876 = vpow2.f32 %v2530_v47  ;;  %v2532_v14 = vmul.f32 1.442695, %v2270_v10  ;;  %v2378_v6 = vmin.f32 %v8346_v37, 0.0  ;;  %vm3445_vm1 = vcmp.gt.f32.partialorder %v8282_v7, 0.0  ;;  %v6440_v51 = vpop.f32.mrb[109].mxu1  ;;  %v8462_v13 = vpop.f32.mrb[110].mxu0 }
 0x1da   : > { %v6867_v61 = vpop.eup %6866  ;;  %4942 = vst.msk [vmem:[%s7488_s23 + $0x25c] sm:$0xf] %vm4790_vm2, %v5932_v28  ;;  %v3122_v20 = vmul.f32 1.6732632, %v5394_v57  ;;  %6878 = vpow2.f32 %v2746_v40  ;;  %v2271_v59 = vmin.f32 %v8354_v54, 0.0  ;;  %v2379_v8 = vmin.f32 %v8359_v58, 0.0 }
 0x1db   : > { %v6869_v1 = vpop.eup %6868  ;;  %v5502_v50 = vadd.f32 -1.0, %v6867_v61  ;;  %6880 = vpow2.f32 %v2532_v14  ;;  %v2748_v38 = vmul.f32 1.442695, %v2378_v6  ;;  %v8464_v31 = vpop.f32.mrb[110].mxu1  ;;  %vm3338_vm15 = vcmp.gt.f32.partialorder %v8303_v39, 0.0 }
 0x1dc   : > { %v3550_v11 = vsel %vm3336_vm12, %v8268_v62, %v3122_v20  ;;  %v5395_v60 = vadd.f32 -1.0, %v6869_v1  ;;  %v2534_v23 = vmul.f32 1.442695, %v2271_v59  ;;  %v6225_v2 = vpop.f32.mrb[111].mxu0  ;;  %v6441_v24 = vpop.f32.mrb[111].mxu1  ;;  %vm3446_vm3 = vcmp.gt.f32.partialorder %v8305_v44, 0.0 }
 0x1dd   : > { %v6871_v42 = vpop.eup %6870  ;;  %v3764_v30 = vmul.f32 1.050701, %v3550_v11  ;;  %v3230_v4 = vmul.f32 1.6732632, %v5502_v50  ;;  %6882 = vpow2.f32 %v2748_v38  ;;  %v2750_v12 = vmul.f32 1.442695, %v2379_v8 }
 0x1de   : > { %v3123_v46 = vmul.f32 1.6732632, %v5395_v60  ;;  %v5503_v56 = vadd.f32 -1.0, %v6871_v42  ;;  %6884 = vpow2.f32 %v2534_v23  ;;  %v2272_v19 = vmin.f32 %v8386_v16, 0.0  ;;  %v8484_v43 = vpop.f32.mrb[112].mxu0  ;;  %v8490_v47 = vpop.f32.mrb[112].mxu1 }
 0x1df   : > { %v5825_v62 = vpack.c.bf16 %v3764_v30, %v3764_v30  ;;  %v3658_v26 = vsel %vm3444_vm13, %v8270_v41, %v3230_v4  ;;  %vm3339_vm4 = vcmp.gt.f32.partialorder %v8319_v22, 0.0  ;;  %6886 = vpow2.f32 %v2750_v12  ;;  %v6228_v10 = vpop.f32.mrb[113].mxu0  ;;  %v6444_v61 = vpop.f32.mrb[113].mxu1 }
 0x1e0   : > { %v6873_v15 = vpop.eup %6872  ;;  %v3872_v17 = vmul.f32 1.050701, %v3658_v26  ;;  %v3551_v29 = vsel %vm3337_vm14, %v8279_v63, %v3123_v46  ;;  %v3231_v33 = vmul.f32 1.6732632, %v5503_v56  ;;  %vm3447_vm5 = vcmp.gt.f32.partialorder %v8321_v25, 0.0  ;;  %v8501_v11 = vpop.f32.mrb[114].mxu0 }
 0x1e1   : > { %v2536_v53 = vmul.f32 1.442695, %v2272_v19  ;;  %4835 = vst.msk [vmem:[%s7488_s23 + $0xb0] sm:$0xf] %vm4790_vm2, %v5825_v62  ;;  %v3765_v36 = vmul.f32 1.050701, %v3551_v29  ;;  %v6875_v9 = vpop.eup %6874 }
 0x1e2   : > { %v5396_v32 = vadd.f32 -1.0, %v6873_v15  ;;  %vm3340_vm6 = vcmp.gt.f32.partialorder %v8344_v55, 0.0  ;;  %v2380_v41 = vmin.f32 %v8388_v21, 0.0  ;;  %v5933_v52 = vpack.c.bf16 %v3872_v17, %v3872_v17  ;;  %v8503_v60 = vpop.f32.mrb[114].mxu1  ;;  %v6229_v42 = vpop.f32.mrb[115].mxu0 }
 0x1e3   : > { %v3659_v63 = vsel %vm3445_vm1, %v8282_v7, %v3231_v33  ;;  %6888 = vpow2.f32 %v2536_v53  ;;  %v2273_v45 = vmin.f32 %v8402_v34, 0.0  ;;  %v6877_v28 = vpop.eup %6876  ;;  %v5826_v57 = vpack.c.bf16 %v3765_v36, %v3765_v36  ;;  %v6445_v46 = vpop.f32.mrb[115].mxu1 }
 0x1e4   : > { %v3873_v40 = vmul.f32 1.050701, %v3659_v63  ;;  %v3124_v14 = vmul.f32 1.6732632, %v5396_v32  ;;  %v5504_v6 = vadd.f32 -1.0, %v6875_v9  ;;  %v6879_v20 = vpop.eup %6878  ;;  %v5397_v59 = vadd.f32 -1.0, %v6877_v28 }
 0x1e5   : > { %4943 = vst.msk [vmem:[%s7488_s23 + $0x260] sm:$0xf] %vm4790_vm2, %v5933_v52  ;;  %vm3448_vm7 = vcmp.gt.f32.partialorder %v8346_v37, 0.0  ;;  %vm3341_vm8 = vcmp.gt.f32.partialorder %v8354_v54, 0.0  ;;  %v2752_v7 = vmul.f32 1.442695, %v2380_v41  ;;  %v6881_v51 = vpop.eup %6880 }
 0x1e6   : > { %v2538_v18 = vmul.f32 1.442695, %v2273_v45  ;;  %4836 = vst.msk [vmem:[%s7488_s23 + $0xb4] sm:$0xf] %vm4790_vm2, %v5826_v57  ;;  %v5934_v1 = vpack.c.bf16 %v3873_v40, %v3873_v40  ;;  %v3552_v50 = vsel %vm3338_vm15, %v8303_v39, %v3124_v14  ;;  %v3232_v38 = vmul.f32 1.6732632, %v5504_v6 }
 0x1e7   : > { %v5505_v8 = vadd.f32 -1.0, %v6879_v20  ;;  %v3766_v23 = vmul.f32 1.050701, %v3552_v50  ;;  %v3125_v2 = vmul.f32 1.6732632, %v5397_v59  ;;  %v5398_v24 = vadd.f32 -1.0, %v6881_v51  ;;  %v6883_v30 = vpop.eup %6882 }
 0x1e8   : > { %6890 = vpow2.f32 %v2752_v7  ;;  %4944 = vst.msk [vmem:[%s7488_s23 + $0x264] sm:$0xf] %vm4790_vm2, %v5934_v1  ;;  %v3660_v4 = vsel %vm3446_vm3, %v8305_v44, %v3232_v38  ;;  %v2381_v39 = vmin.f32 %v8404_v49, 0.0  ;;  %v6885_v56 = vpop.eup %6884  ;;  %v5506_v33 = vadd.f32 -1.0, %v6883_v30  ;;  %v8517_v36 = vpop.f32.mrb[116].mxu0 }
 0x1e9   : > { %v3233_v12 = vmul.f32 1.6732632, %v5505_v8  ;;  %6892 = vpow2.f32 %v2538_v18  ;;  %v5827_v19 = vpack.c.bf16 %v3766_v23, %v3766_v23  ;;  %v3874_v62 = vmul.f32 1.050701, %v3660_v4  ;;  %v6887_v17 = vpop.eup %6886  ;;  %v8519_v32 = vpop.f32.mrb[116].mxu1 }
 0x1ea   : > { %v3553_v26 = vsel %vm3339_vm4, %v8319_v22, %v3125_v2  ;;  %v3126_v15 = vmul.f32 1.6732632, %v5398_v24  ;;  %v5399_v53 = vadd.f32 -1.0, %v6885_v56  ;;  %v5507_v52 = vadd.f32 -1.0, %v6887_v17  ;;  %v6232_v63 = vpop.f32.mrb[117].mxu0  ;;  %v6448_v45 = vpop.f32.mrb[117].mxu1 }
 0x1eb   : > { %v3767_v29 = vmul.f32 1.050701, %v3553_v26  ;;  %v3661_v44 = vsel %vm3447_vm5, %v8321_v25, %v3233_v12  ;;  %4837 = vst.msk [vmem:[%s7488_s23 + $0xb8] sm:$0xf] %vm4790_vm2, %v5827_v19  ;;  %v5935_v41 = vpack.c.bf16 %v3874_v62, %v3874_v62  ;;  %v3234_v28 = vmul.f32 1.6732632, %v5506_v33 }
 0x1ec   : > { %v3875_v9 = vmul.f32 1.050701, %v3661_v44  ;;  %v3554_v22 = vsel %vm3340_vm6, %v8344_v55, %v3126_v15  ;;  %v3127_v57 = vmul.f32 1.6732632, %v5399_v53  ;;  %v3235_v6 = vmul.f32 1.6732632, %v5507_v52 }
 0x1ed   : > { %v5828_v25 = vpack.c.bf16 %v3767_v29, %v3767_v29  ;;  %v3768_v10 = vmul.f32 1.050701, %v3554_v22  ;;  %v6889_v40 = vpop.eup %6888  ;;  %4945 = vst.msk [vmem:[%s7488_s23 + $0x268] sm:$0xf] %vm4790_vm2, %v5935_v41  ;;  %vm3449_vm9 = vcmp.gt.f32.partialorder %v8359_v58, 0.0  ;;  %v8529_v20 = vpop.f32.mrb[118].mxu0  ;;  %v3662_v59 = vsel %vm3448_vm7, %v8346_v37, %v3234_v28 }
 0x1ee   : > { %v5936_v14 = vpack.c.bf16 %v3875_v9, %v3875_v9  ;;  %v2754_v61 = vmul.f32 1.442695, %v2381_v39  ;;  %v3555_v7 = vsel %vm3341_vm8, %v8354_v54, %v3127_v57  ;;  %v5400_v18 = vadd.f32 -1.0, %v6889_v40  ;;  %v8539_v51 = vpop.f32.mrb[118].mxu1  ;;  %v6233_v1 = vpop.f32.mrb[119].mxu0 }
 0x1ef   : > { %4838 = vst.msk [vmem:[%s7488_s23 + $0xbc] sm:$0xf] %vm4790_vm2, %v5828_v25  ;;  %v5829_v55 = vpack.c.bf16 %v3768_v10, %v3768_v10  ;;  %v3876_v50 = vmul.f32 1.050701, %v3662_v59  ;;  %v3769_v38 = vmul.f32 1.050701, %v3555_v7  ;;  %v3663_v8 = vsel %vm3449_vm9, %v8359_v58, %v3235_v6 }
 0x1f0   : > { %4946 = vst.msk [vmem:[%s7488_s23 + $0x26c] sm:$0xf] %vm4790_vm2, %v5936_v14  ;;  %6894 = vpow2.f32 %v2754_v61  ;;  %v6449_v23 = vpop.f32.mrb[119].mxu1  ;;  %v3877_v37 = vmul.f32 1.050701, %v3663_v8  ;;  %v2274_v54 = vmin.f32 %v8425_v35, 0.0 }
 0x1f1   : > { %4839 = vst.msk [vmem:[%s7488_s23 + $0xc0] sm:$0xf] %vm4790_vm2, %v5829_v55  ;;  %v3128_v2 = vmul.f32 1.6732632, %v5400_v18  ;;  %v5937_v42 = vpack.c.bf16 %v3876_v50, %v3876_v50  ;;  %v5830_v30 = vpack.c.bf16 %v3769_v38, %v3769_v38  ;;  %vm3342_vm10 = vcmp.gt.f32.partialorder %v8386_v16, 0.0  ;;  %v8550_v19 = vpop.f32.mrb[120].mxu0 }
 0x1f2   : > { %v6891_v24 = vpop.eup %6890  ;;  %v2382_v4 = vmin.f32 %v8427_v0, 0.0  ;;  %v5938_v58 = vpack.c.bf16 %v3877_v37, %v3877_v37  ;;  %v2540_v56 = vmul.f32 1.442695, %v2274_v54  ;;  %v8552_v62 = vpop.f32.mrb[120].mxu1  ;;  %v2275_v29 = vmin.f32 %v8432_v48, 0.0 }
 0x1f3   : > { %v6893_v12 = vpop.eup %6892  ;;  %v3556_v39 = vsel %vm3342_vm10, %v8386_v16, %v3128_v2  ;;  %v5508_v46 = vadd.f32 -1.0, %v6891_v24  ;;  %4947 = vst.msk [vmem:[%s7488_s23 + $0x270] sm:$0xf] %vm4790_vm2, %v5937_v42  ;;  %4840 = vst.msk [vmem:[%s7488_s23 + $0xc4] sm:$0xf] %vm4790_vm2, %v5830_v30  ;;  %vm3450_vm11 = vcmp.gt.f32.partialorder %v8388_v21, 0.0 }
 0x1f4   : > { %v3770_v26 = vmul.f32 1.050701, %v3556_v39  ;;  %v5401_v15 = vadd.f32 -1.0, %v6893_v12  ;;  %v2756_v17 = vmul.f32 1.442695, %v2382_v4  ;;  %6896 = vpow2.f32 %v2540_v56  ;;  %v6236_v33 = vpop.f32.mrb[121].mxu0 }
 0x1f5   : > { %4948 = vst.msk [vmem:[%s7488_s23 + $0x274] sm:$0xf] %vm4790_vm2, %v5938_v58  ;;  %v3236_v44 = vmul.f32 1.6732632, %v5508_v46  ;;  %v2383_v16 = vmin.f32 %v8438_v27, 0.0  ;;  %v6452_v53 = vpop.f32.mrb[121].mxu1 }
 0x1f6   : > { %v5831_v41 = vpack.c.bf16 %v3770_v26, %v3770_v26  ;;  %v3129_v9 = vmul.f32 1.6732632, %v5401_v15  ;;  %6898 = vpow2.f32 %v2756_v17  ;;  %v2542_v22 = vmul.f32 1.442695, %v2275_v29  ;;  %v8563_v52 = vpop.f32.mrb[122].mxu0  ;;  %v8565_v63 = vpop.f32.mrb[122].mxu1 }
 0x1f7   : > { %v3664_v45 = vsel %vm3450_vm11, %v8388_v21, %v3236_v44  ;;  %vm3343_vm0 = vcmp.gt.f32.partialorder %v8402_v34, 0.0  ;;  %v2758_v25 = vmul.f32 1.442695, %v2383_v16  ;;  %v2276_v10 = vmin.f32 %v8453_v3, 0.0  ;;  %v6237_v28 = vpop.f32.mrb[123].mxu0  ;;  %v6453_v57 = vpop.f32.mrb[123].mxu1 }
 0x1f8   : > { %4841 = vst.msk [vmem:[%s7488_s23 + $0xc8] sm:$0xf] %vm4790_vm2, %v5831_v41  ;;  %v3878_v40 = vmul.f32 1.050701, %v3664_v45  ;;  %v3557_v14 = vsel %vm3343_vm0, %v8402_v34, %v3129_v9  ;;  %6900 = vpow2.f32 %v2542_v22  ;;  %v2384_v55 = vmin.f32 %v8455_v5, 0.0  ;;  %v8576_v38 = vpop.f32.mrb[124].mxu0 }
 0x1f9   : > { %v3771_v6 = vmul.f32 1.050701, %v3557_v14  ;;  %6902 = vpow2.f32 %v2758_v25  ;;  %v2544_v61 = vmul.f32 1.442695, %v2276_v10  ;;  %vm3451_vm12 = vcmp.gt.f32.partialorder %v8404_v49, 0.0  ;;  %v8578_v34 = vpop.f32.mrb[124].mxu1 }
 0x1fa   : > { %v6895_v21 = vpop.eup %6894  ;;  %v5939_v59 = vpack.c.bf16 %v3878_v40, %v3878_v40  ;;  %v2277_v7 = vmin.f32 %v8462_v13, 0.0  ;;  %v2760_v50 = vmul.f32 1.442695, %v2384_v55  ;;  %vm3344_vm13 = vcmp.gt.f32.partialorder %v8425_v35, 0.0  ;;  %v6240_v2 = vpop.f32.mrb[125].mxu0 }
 0x1fb   : > { %v5832_v18 = vpack.c.bf16 %v3771_v6, %v3771_v6  ;;  %v5509_v1 = vadd.f32 -1.0, %v6895_v21  ;;  %6904 = vpow2.f32 %v2544_v61  ;;  %v2385_v23 = vmin.f32 %v8464_v31, 0.0  ;;  %v6456_v42 = vpop.f32.mrb[125].mxu1  ;;  %v8589_v30 = vpop.f32.mrb[126].mxu0 }
 0x1fc   : > { %4949 = vst.msk [vmem:[%s7488_s23 + $0x278] sm:$0xf] %vm4790_vm2, %v5939_v59  ;;  %v2546_v8 = vmul.f32 1.442695, %v2277_v7  ;;  %v2278_v37 = vmin.f32 %v8484_v43, 0.0  ;;  %vm3452_vm14 = vcmp.gt.f32.partialorder %v8427_v0, 0.0  ;;  %6906 = vpow2.f32 %v2760_v50 }
 0x1fd   : > { %4842 = vst.msk [vmem:[%s7488_s23 + $0xcc] sm:$0xf] %vm4790_vm2, %v5832_v18  ;;  %v3237_v54 = vmul.f32 1.6732632, %v5509_v1  ;;  %v2386_v24 = vmin.f32 %v8490_v47, 0.0  ;;  %vm3345_vm1 = vcmp.gt.f32.partialorder %v8432_v48, 0.0 }
 0x1fe   : > { %6908 = vpow2.f32 %v2546_v8  ;;  %v2762_v4 = vmul.f32 1.442695, %v2385_v23  ;;  %v2548_v12 = vmul.f32 1.442695, %v2278_v37  ;;  %v8592_v58 = vpop.f32.mrb[126].mxu1  ;;  %v6897_v39 = vpop.eup %6896  ;;  %vm3453_vm15 = vcmp.gt.f32.partialorder %v8438_v27, 0.0 }
 0x1ff   : > { %v3665_v46 = vsel %vm3451_vm12, %v8404_v49, %v3237_v54  ;;  %v2764_v56 = vmul.f32 1.442695, %v2386_v24  ;;  %v2279_v26 = vmin.f32 %v8501_v11, 0.0  ;;  %v6241_v15 = vpop.f32.mrb[127].mxu0  ;;  %v6457_v17 = vpop.f32.mrb[127].mxu1  ;;  %v5402_v16 = vadd.f32 -1.0, %v6897_v39 }
 0x200   : > { %v6899_v29 = vpop.eup %6898  ;;  %v3879_v44 = vmul.f32 1.050701, %v3665_v46  ;;  %6910 = vpow2.f32 %v2762_v4  ;;  %v2387_v33 = vmin.f32 %v8503_v60, 0.0  ;;  %vm3346_vm3 = vcmp.gt.f32.partialorder %v8453_v3, 0.0  ;;  %v8602_v40 = vpop.f32.mrb[128].mxu0 }
 0x201   : > { %v5510_v53 = vadd.f32 -1.0, %v6899_v29  ;;  %6912 = vpow2.f32 %v2548_v12  ;;  %v2550_v41 = vmul.f32 1.442695, %v2279_v26  ;;  %v3130_v22 = vmul.f32 1.6732632, %v5402_v16  ;;  %v8604_v14 = vpop.f32.mrb[128].mxu1 }
 0x202   : > { %v6901_v49 = vpop.eup %6900  ;;  %v5940_v9 = vpack.c.bf16 %v3879_v44, %v3879_v44  ;;  %6914 = vpow2.f32 %v2764_v56  ;;  %v2766_v45 = vmul.f32 1.442695, %v2387_v33  ;;  %v2280_v57 = vmin.f32 %v8517_v36, 0.0  ;;  %v6244_v55 = vpop.f32.mrb[129].mxu0 }
 0x203   : > { %v6903_v25 = vpop.eup %6902  ;;  %v3238_v10 = vmul.f32 1.6732632, %v5510_v53  ;;  %v5403_v28 = vadd.f32 -1.0, %v6901_v49  ;;  %6916 = vpow2.f32 %v2550_v41  ;;  %v3558_v6 = vsel %vm3344_vm13, %v8425_v35, %v3130_v22  ;;  %v6460_v21 = vpop.f32.mrb[129].mxu1 }
 0x204   : > { %4950 = vst.msk [vmem:[%s7488_s23 + $0x27c] sm:$0xf] %vm4790_vm2, %v5940_v9  ;;  %v5511_v61 = vadd.f32 -1.0, %v6903_v25  ;;  %vm3454_vm4 = vcmp.gt.f32.partialorder %v8455_v5, 0.0  ;;  %vm3347_vm5 = vcmp.gt.f32.partialorder %v8462_v13, 0.0  ;;  %6918 = vpow2.f32 %v2766_v45  ;;  %v8621_v42 = vpop.f32.mrb[130].mxu0 }
 0x205   : > { %v6905_v59 = vpop.eup %6904  ;;  %v3772_v7 = vmul.f32 1.050701, %v3558_v6  ;;  %v3666_v18 = vsel %vm3452_vm14, %v8427_v0, %v3238_v10  ;;  %v3131_v1 = vmul.f32 1.6732632, %v5403_v28  ;;  %v2552_v50 = vmul.f32 1.442695, %v2280_v57 }
 0x206   : > { %v3880_v8 = vmul.f32 1.050701, %v3666_v18  ;;  %v3239_v23 = vmul.f32 1.6732632, %v5511_v61  ;;  %v5404_v37 = vadd.f32 -1.0, %v6905_v59  ;;  %v2388_v35 = vmin.f32 %v8519_v32, 0.0  ;;  %v6907_v2 = vpop.eup %6906 }
 0x207   : > { %v5833_v54 = vpack.c.bf16 %v3772_v7, %v3772_v7  ;;  %v3559_v24 = vsel %vm3345_vm1, %v8432_v48, %v3131_v1  ;;  %vm3455_vm6 = vcmp.gt.f32.partialorder %v8464_v31, 0.0  ;;  %6920 = vpow2.f32 %v2552_v50  ;;  %v8623_v0 = vpop.f32.mrb[130].mxu1  ;;  %v6245_v48 = vpop.f32.mrb[131].mxu0 }
 0x208   : > { %v6909_v4 = vpop.eup %6908  ;;  %v5941_v12 = vpack.c.bf16 %v3880_v8, %v3880_v8  ;;  %v3773_v39 = vmul.f32 1.050701, %v3559_v24  ;;  %v3667_v46 = vsel %vm3453_vm15, %v8438_v27, %v3239_v23  ;;  %v3132_v56 = vmul.f32 1.6732632, %v5404_v37  ;;  %v6461_v26 = vpop.f32.mrb[131].mxu1 }
 0x209   : > { %vm3348_vm7 = vcmp.gt.f32.partialorder %v8484_v43, 0.0  ;;  %vm3456_vm8 = vcmp.gt.f32.partialorder %v8490_v47, 0.0  ;;  %4843 = vst.msk [vmem:[%s7488_s23 + $0xd0] sm:$0xf] %vm4790_vm2, %v5833_v54  ;;  %v3881_v15 = vmul.f32 1.050701, %v3667_v46 }
 0x20a   : > { %v5512_v17 = vadd.f32 -1.0, %v6907_v2  ;;  %v5405_v29 = vadd.f32 -1.0, %v6909_v4  ;;  %v2768_v44 = vmul.f32 1.442695, %v2388_v35  ;;  %v6911_v16 = vpop.eup %6910  ;;  %4951 = vst.msk [vmem:[%s7488_s23 + $0x280] sm:$0xf] %vm4790_vm2, %v5941_v12  ;;  %v5834_v33 = vpack.c.bf16 %v3773_v39, %v3773_v39 }
 0x20b   : > { %v3560_v27 = vsel %vm3346_vm3, %v8453_v3, %v3132_v56  ;;  %vm3349_vm9 = vcmp.gt.f32.partialorder %v8501_v11, 0.0  ;;  %v2281_v53 = vmin.f32 %v8529_v20, 0.0  ;;  %v6913_v41 = vpop.eup %6912  ;;  %v5942_v49 = vpack.c.bf16 %v3881_v15, %v3881_v15  ;;  %v8642_v3 = vpop.f32.mrb[132].mxu0 }
 0x20c   : > { %v3774_v9 = vmul.f32 1.050701, %v3560_v27  ;;  %v3240_v22 = vmul.f32 1.6732632, %v5512_v17  ;;  %v3133_v45 = vmul.f32 1.6732632, %v5405_v29  ;;  %v6915_v25 = vpop.eup %6914  ;;  %6922 = vpow2.f32 %v2768_v44 }
 0x20d   : > { %vm3457_vm10 = vcmp.gt.f32.partialorder %v8503_v60, 0.0  ;;  %4844 = vst.msk [vmem:[%s7488_s23 + $0xd4] sm:$0xf] %vm4790_vm2, %v5834_v33  ;;  %v5513_v10 = vadd.f32 -1.0, %v6911_v16  ;;  %v5406_v28 = vadd.f32 -1.0, %v6913_v41  ;;  %v8644_v6 = vpop.f32.mrb[132].mxu1  ;;  %v6917_v61 = vpop.eup %6916 }
 0x20e   : > { %v2554_v57 = vmul.f32 1.442695, %v2281_v53  ;;  %4952 = vst.msk [vmem:[%s7488_s23 + $0x284] sm:$0xf] %vm4790_vm2, %v5942_v49  ;;  %v5835_v55 = vpack.c.bf16 %v3774_v9, %v3774_v9  ;;  %v3668_v21 = vsel %vm3454_vm4, %v8455_v5, %v3240_v22  ;;  %v3561_v59 = vsel %vm3347_vm5, %v8462_v13, %v3133_v45  ;;  %v6248_v18 = vpop.f32.mrb[133].mxu0  ;;  %v6464_v1 = vpop.f32.mrb[133].mxu1 }
 0x20f   : > { %v5514_v7 = vadd.f32 -1.0, %v6915_v25  ;;  %v6919_v50 = vpop.eup %6918  ;;  %v3882_v8 = vmul.f32 1.050701, %v3668_v21  ;;  %v3775_v23 = vmul.f32 1.050701, %v3561_v59  ;;  %v5407_v54 = vadd.f32 -1.0, %v6917_v61 }
 0x210   : > { %v3241_v37 = vmul.f32 1.6732632, %v5513_v10  ;;  %6924 = vpow2.f32 %v2554_v57  ;;  %4845 = vst.msk [vmem:[%s7488_s23 + $0xd8] sm:$0xf] %vm4790_vm2, %v5835_v55  ;;  %v3134_v35 = vmul.f32 1.6732632, %v5406_v28 }
 0x211   : > { %v3242_v2 = vmul.f32 1.6732632, %v5514_v7  ;;  %v5515_v5 = vadd.f32 -1.0, %v6919_v50  ;;  %v5943_v24 = vpack.c.bf16 %v3882_v8, %v3882_v8  ;;  %v5836_v4 = vpack.c.bf16 %v3775_v23, %v3775_v23  ;;  %v8660_v39 = vpop.f32.mrb[134].mxu0  ;;  %v8662_v46 = vpop.f32.mrb[134].mxu1 }
 0x212   : > { %v3669_v13 = vsel %vm3455_vm6, %v8464_v31, %v3241_v37  ;;  %v2389_v12 = vmin.f32 %v8539_v51, 0.0  ;;  %v6921_v56 = vpop.eup %6920  ;;  %v3562_v26 = vsel %vm3348_vm7, %v8484_v43, %v3134_v35  ;;  %v3135_v17 = vmul.f32 1.6732632, %v5407_v54  ;;  %v6249_v29 = vpop.f32.mrb[135].mxu0 }
 0x213   : > { %v3883_v48 = vmul.f32 1.050701, %v3669_v13  ;;  %v3670_v15 = vsel %vm3456_vm8, %v8490_v47, %v3242_v2  ;;  %v6465_v44 = vpop.f32.mrb[135].mxu1  ;;  %4953 = vst.msk [vmem:[%s7488_s23 + $0x288] sm:$0xf] %vm4790_vm2, %v5943_v24  ;;  %v5408_v53 = vadd.f32 -1.0, %v6921_v56 }
 0x214   : > { %4846 = vst.msk [vmem:[%s7488_s23 + $0xdc] sm:$0xf] %vm4790_vm2, %v5836_v4  ;;  %v3776_v31 = vmul.f32 1.050701, %v3562_v26  ;;  %v3884_v16 = vmul.f32 1.050701, %v3670_v15  ;;  %v3563_v43 = vsel %vm3349_vm9, %v8501_v11, %v3135_v17 }
 0x215   : > { %v3243_v33 = vmul.f32 1.6732632, %v5515_v5  ;;  %v5944_v27 = vpack.c.bf16 %v3883_v48, %v3883_v48  ;;  %v2770_v41 = vmul.f32 1.442695, %v2389_v12  ;;  %v8677_v47 = vpop.f32.mrb[136].mxu0  ;;  %v8679_v49 = vpop.f32.mrb[136].mxu1 }
 0x216   : > { %v5837_v9 = vpack.c.bf16 %v3776_v31, %v3776_v31  ;;  %v5945_v22 = vpack.c.bf16 %v3884_v16, %v3884_v16  ;;  %v3777_v45 = vmul.f32 1.050701, %v3563_v43  ;;  %v6252_v10 = vpop.f32.mrb[137].mxu0  ;;  %v6468_v28 = vpop.f32.mrb[137].mxu1  ;;  %v3136_v57 = vmul.f32 1.6732632, %v5408_v53 }
 0x217   : > { %v3671_v25 = vsel %vm3457_vm10, %v8503_v60, %v3243_v33  ;;  %4954 = vst.msk [vmem:[%s7488_s23 + $0x28c] sm:$0xf] %vm4790_vm2, %v5944_v27  ;;  %6926 = vpow2.f32 %v2770_v41  ;;  %v8686_v61 = vpop.f32.mrb[138].mxu0  ;;  %v6923_v55 = vpop.eup %6922  ;;  %vm3350_vm11 = vcmp.gt.f32.partialorder %v8517_v36, 0.0  ;;  %v2282_v60 = vmin.f32 %v8550_v19, 0.0 }
 0x218   : > { %v3885_v11 = vmul.f32 1.050701, %v3671_v25  ;;  %4847 = vst.msk [vmem:[%s7488_s23 + $0xe0] sm:$0xf] %vm4790_vm2, %v5837_v9  ;;  %4955 = vst.msk [vmem:[%s7488_s23 + $0x290] sm:$0xf] %vm4790_vm2, %v5945_v22  ;;  %v5838_v21 = vpack.c.bf16 %v3777_v45, %v3777_v45  ;;  %v3564_v50 = vsel %vm3350_vm11, %v8517_v36, %v3136_v57 }
 0x219   : > { %v2390_v59 = vmin.f32 %v8552_v62, 0.0  ;;  %v8695_v7 = vpop.f32.mrb[138].mxu1  ;;  %v6253_v18 = vpop.f32.mrb[139].mxu0  ;;  %v5516_v8 = vadd.f32 -1.0, %v6923_v55  ;;  %v3778_v35 = vmul.f32 1.050701, %v3564_v50 }
 0x21a   : > { %v5946_v1 = vpack.c.bf16 %v3885_v11, %v3885_v11  ;;  %v6469_v23 = vpop.f32.mrb[139].mxu1  ;;  %v6925_v37 = vpop.eup %6924  ;;  %4848 = vst.msk [vmem:[%s7488_s23 + $0xe4] sm:$0xf] %vm4790_vm2, %v5838_v21  ;;  %v2556_v2 = vmul.f32 1.442695, %v2282_v60  ;;  %v2283_v4 = vmin.f32 %v8563_v52, 0.0 }
 0x21b   : > { %v2772_v54 = vmul.f32 1.442695, %v2390_v59  ;;  %v3244_v5 = vmul.f32 1.6732632, %v5516_v8  ;;  %v5409_v24 = vadd.f32 -1.0, %v6925_v37  ;;  %v5839_v13 = vpack.c.bf16 %v3778_v35, %v3778_v35  ;;  %v8706_v26 = vpop.f32.mrb[140].mxu0 }
 0x21c   : > { %4956 = vst.msk [vmem:[%s7488_s23 + $0x294] sm:$0xf] %vm4790_vm2, %v5946_v1  ;;  %vm3458_vm0 = vcmp.gt.f32.partialorder %v8519_v32, 0.0  ;;  %6928 = vpow2.f32 %v2556_v2  ;;  %v2391_v36 = vmin.f32 %v8565_v63, 0.0  ;;  %v2558_v48 = vmul.f32 1.442695, %v2283_v4 }
 0x21d   : > { %v3672_v12 = vsel %vm3458_vm0, %v8519_v32, %v3244_v5  ;;  %v3137_v56 = vmul.f32 1.6732632, %v5409_v24  ;;  %6930 = vpow2.f32 %v2772_v54  ;;  %v8708_v15 = vpop.f32.mrb[140].mxu1  ;;  %4849 = vst.msk [vmem:[%s7488_s23 + $0xe8] sm:$0xf] %vm4790_vm2, %v5839_v13  ;;  %vm3351_vm12 = vcmp.gt.f32.partialorder %v8529_v20, 0.0 }
 0x21e   : > { %v3886_v17 = vmul.f32 1.050701, %v3672_v12  ;;  %v2774_v29 = vmul.f32 1.442695, %v2391_v36  ;;  %v2284_v44 = vmin.f32 %v8576_v38, 0.0  ;;  %6932 = vpow2.f32 %v2558_v48  ;;  %v6256_v16 = vpop.f32.mrb[141].mxu0 }
 0x21f   : > { %v3565_v31 = vsel %vm3351_vm12, %v8529_v20, %v3137_v56  ;;  %v2392_v32 = vmin.f32 %v8578_v34, 0.0  ;;  %v6472_v33 = vpop.f32.mrb[141].mxu1  ;;  %v8716_v41 = vpop.f32.mrb[142].mxu0  ;;  %v2285_v25 = vmin.f32 %v8589_v30, 0.0  ;;  %v2393_v20 = vmin.f32 %v8592_v58, 0.0 }
 0x220   : > { %v5947_v27 = vpack.c.bf16 %v3886_v17, %v3886_v17  ;;  %v3779_v43 = vmul.f32 1.050701, %v3565_v31  ;;  %6934 = vpow2.f32 %v2774_v29  ;;  %v2560_v53 = vmul.f32 1.442695, %v2284_v44  ;;  %v8718_v9 = vpop.f32.mrb[142].mxu1  ;;  %v6257_v10 = vpop.f32.mrb[143].mxu0 }
 0x221   : > { %v6927_v22 = vpop.eup %6926  ;;  %v2776_v45 = vmul.f32 1.442695, %v2392_v32  ;;  %vm3459_vm13 = vcmp.gt.f32.partialorder %v8539_v51, 0.0  ;;  %v6473_v57 = vpop.f32.mrb[143].mxu1  ;;  %v2562_v55 = vmul.f32 1.442695, %v2285_v25 }
 0x222   : > { %4957 = vst.msk [vmem:[%s7488_s23 + $0x298] sm:$0xf] %vm4790_vm2, %v5947_v27  ;;  %v5840_v28 = vpack.c.bf16 %v3779_v43, %v3779_v43  ;;  %v5517_v11 = vadd.f32 -1.0, %v6927_v22  ;;  %6936 = vpow2.f32 %v2560_v53  ;;  %v2778_v21 = vmul.f32 1.442695, %v2393_v20  ;;  %v8733_v8 = vpop.f32.mrb[144].mxu0 }
 0x223   : > { %6938 = vpow2.f32 %v2776_v45  ;;  %v2286_v60 = vmin.f32 %v8602_v40, 0.0  ;;  %vm3352_vm14 = vcmp.gt.f32.partialorder %v8550_v19, 0.0  ;;  %vm3460_vm1 = vcmp.gt.f32.partialorder %v8552_v62, 0.0  ;;  %v8735_v23 = vpop.f32.mrb[144].mxu1  ;;  %v6260_v5 = vpop.f32.mrb[145].mxu0 }
 0x224   : > { %4850 = vst.msk [vmem:[%s7488_s23 + $0xec] sm:$0xf] %vm4790_vm2, %v5840_v28  ;;  %v3245_v59 = vmul.f32 1.6732632, %v5517_v11  ;;  %v2394_v18 = vmin.f32 %v8604_v14, 0.0  ;;  %vm3353_vm15 = vcmp.gt.f32.partialorder %v8563_v52, 0.0  ;;  %6940 = vpow2.f32 %v2562_v55 }
 0x225   : > { %v2564_v1 = vmul.f32 1.442695, %v2286_v60  ;;  %v2287_v50 = vmin.f32 %v8621_v42, 0.0  ;;  %vm3461_vm3 = vcmp.gt.f32.partialorder %v8565_v63, 0.0  ;;  %6942 = vpow2.f32 %v2778_v21  ;;  %v6476_v24 = vpop.f32.mrb[145].mxu1  ;;  %v8742_v56 = vpop.f32.mrb[146].mxu0 }
 0x226   : > { %v6929_v37 = vpop.eup %6928  ;;  %v3673_v35 = vsel %vm3459_vm13, %v8539_v51, %v3245_v59  ;;  %v2780_v2 = vmul.f32 1.442695, %v2394_v18  ;;  %v2395_v54 = vmin.f32 %v8623_v0, 0.0  ;;  %vm3354_vm4 = vcmp.gt.f32.partialorder %v8576_v38, 0.0  ;;  %v8745_v17 = vpop.f32.mrb[146].mxu1 }
 0x227   : > { %v6931_v4 = vpop.eup %6930  ;;  %v3887_v13 = vmul.f32 1.050701, %v3673_v35  ;;  %v5410_v36 = vadd.f32 -1.0, %v6929_v37  ;;  %6944 = vpow2.f32 %v2564_v1  ;;  %v2566_v12 = vmul.f32 1.442695, %v2287_v50  ;;  %v6261_v29 = vpop.f32.mrb[147].mxu0 }
 0x228   : > { %v5518_v48 = vadd.f32 -1.0, %v6931_v4  ;;  %6946 = vpow2.f32 %v2780_v2  ;;  %v2782_v51 = vmul.f32 1.442695, %v2395_v54  ;;  %v6933_v44 = vpop.eup %6932  ;;  %v2288_v16 = vmin.f32 %v8642_v3, 0.0  ;;  %v6477_v33 = vpop.f32.mrb[147].mxu1 }
 0x229   : > { %v5948_v31 = vpack.c.bf16 %v3887_v13, %v3887_v13  ;;  %v3138_v32 = vmul.f32 1.6732632, %v5410_v36  ;;  %6948 = vpow2.f32 %v2566_v12  ;;  %v5411_v53 = vadd.f32 -1.0, %v6933_v44  ;;  %v8766_v37 = vpop.f32.mrb[148].mxu1 }
 0x22a   : > { %v6935_v27 = vpop.eup %6934  ;;  %v3246_v43 = vmul.f32 1.6732632, %v5518_v48  ;;  %vm3462_vm5 = vcmp.gt.f32.partialorder %v8578_v34, 0.0  ;;  %6950 = vpow2.f32 %v2782_v51  ;;  %vm3355_vm6 = vcmp.gt.f32.partialorder %v8589_v30, 0.0  ;;  %v6480_v13 = vpop.f32.mrb[149].mxu1 }
 0x22b   : > { %4958 = vst.msk [vmem:[%s7488_s23 + $0x29c] sm:$0xf] %vm4790_vm2, %v5948_v31  ;;  %v3566_v22 = vsel %vm3352_vm14, %v8550_v19, %v3138_v32  ;;  %v5519_v45 = vadd.f32 -1.0, %v6935_v27  ;;  %v2568_v25 = vmul.f32 1.442695, %v2288_v16  ;;  %v2396_v20 = vmin.f32 %v8644_v6, 0.0 }
 0x22c   : > { %v6937_v10 = vpop.eup %6936  ;;  %v3780_v28 = vmul.f32 1.050701, %v3566_v22  ;;  %v3674_v11 = vsel %vm3460_vm1, %v8552_v62, %v3246_v43  ;;  %v3139_v57 = vmul.f32 1.6732632, %v5411_v53  ;;  %vm3463_vm7 = vcmp.gt.f32.partialorder %v8592_v58, 0.0  ;;  %v8760_v19 = vpop.f32.mrb[148].mxu0 }
 0x22d   : > { %v6939_v55 = vpop.eup %6938  ;;  %v3888_v21 = vmul.f32 1.050701, %v3674_v11  ;;  %v3247_v60 = vmul.f32 1.6732632, %v5519_v45  ;;  %v5412_v59 = vadd.f32 -1.0, %v6937_v10  ;;  %6952 = vpow2.f32 %v2568_v25  ;;  %v6264_v35 = vpop.f32.mrb[149].mxu0 }
 0x22e   : > { %v5841_v18 = vpack.c.bf16 %v3780_v28, %v3780_v28  ;;  %v3567_v1 = vsel %vm3353_vm15, %v8563_v52, %v3139_v57  ;;  %v5520_v50 = vadd.f32 -1.0, %v6939_v55  ;;  %vm3356_vm8 = vcmp.gt.f32.partialorder %v8602_v40, 0.0  ;;  %v6941_v2 = vpop.eup %6940  ;;  %v8772_v52 = vpop.f32.mrb[150].mxu0 }
 0x22f   : > { %v2784_v62 = vmul.f32 1.442695, %v2396_v20  ;;  %v5949_v54 = vpack.c.bf16 %v3888_v21, %v3888_v21  ;;  %v3781_v5 = vmul.f32 1.050701, %v3567_v1  ;;  %v3675_v24 = vsel %vm3461_vm3, %v8565_v63, %v3247_v60  ;;  %v6943_v36 = vpop.eup %6942  ;;  %v8776_v29 = vpop.f32.mrb[150].mxu1 }
 0x230   : > { %v3140_v4 = vmul.f32 1.6732632, %v5412_v59  ;;  %vm3464_vm9 = vcmp.gt.f32.partialorder %v8604_v14, 0.0  ;;  %4851 = vst.msk [vmem:[%s7488_s23 + $0xf0] sm:$0xf] %vm4790_vm2, %v5841_v18  ;;  %v5413_v51 = vadd.f32 -1.0, %v6941_v2 }
 0x231   : > { %v3889_v12 = vmul.f32 1.050701, %v3675_v24  ;;  %v3248_v48 = vmul.f32 1.6732632, %v5520_v50  ;;  %6954 = vpow2.f32 %v2784_v62  ;;  %v6945_v44 = vpop.eup %6944  ;;  %4959 = vst.msk [vmem:[%s7488_s23 + $0x2a0] sm:$0xf] %vm4790_vm2, %v5949_v54  ;;  %v5842_v63 = vpack.c.bf16 %v3781_v5, %v3781_v5 }
 0x232   : > { %v3568_v31 = vsel %vm3354_vm4, %v8576_v38, %v3140_v4  ;;  %v5521_v32 = vadd.f32 -1.0, %v6943_v36  ;;  %v2289_v16 = vmin.f32 %v8660_v39, 0.0  ;;  %v6265_v33 = vpop.f32.mrb[151].mxu0  ;;  %v6481_v27 = vpop.f32.mrb[151].mxu1  ;;  %v3141_v25 = vmul.f32 1.6732632, %v5413_v51 }
 0x233   : > { %v6947_v43 = vpop.eup %6946  ;;  %v5950_v53 = vpack.c.bf16 %v3889_v12, %v3889_v12  ;;  %v3782_v22 = vmul.f32 1.050701, %v3568_v31  ;;  %v3676_v45 = vsel %vm3462_vm5, %v8578_v34, %v3248_v48  ;;  %4852 = vst.msk [vmem:[%s7488_s23 + $0xf4] sm:$0xf] %vm4790_vm2, %v5842_v63  ;;  %v5414_v28 = vadd.f32 -1.0, %v6945_v44  ;;  %v8797_v62 = vpop.f32.mrb[152].mxu0 }
 0x234   : > { %v6949_v20 = vpop.eup %6948  ;;  %v3890_v10 = vmul.f32 1.050701, %v3676_v45  ;;  %v3249_v38 = vmul.f32 1.6732632, %v5521_v32  ;;  %v5522_v11 = vadd.f32 -1.0, %v6947_v43  ;;  %v3569_v21 = vsel %vm3355_vm6, %v8589_v30, %v3141_v25  ;;  %v8799_v35 = vpop.f32.mrb[152].mxu1 }
 0x235   : > { %v6951_v57 = vpop.eup %6950  ;;  %4960 = vst.msk [vmem:[%s7488_s23 + $0x2a4] sm:$0xf] %vm4790_vm2, %v5950_v53  ;;  %v5843_v55 = vpack.c.bf16 %v3782_v22, %v3782_v22  ;;  %v5415_v60 = vadd.f32 -1.0, %v6949_v20  ;;  %v2570_v34 = vmul.f32 1.442695, %v2289_v16  ;;  %vm3357_vm10 = vcmp.gt.f32.partialorder %v8621_v42, 0.0 }
 0x236   : > { %v5951_v59 = vpack.c.bf16 %v3890_v10, %v3890_v10  ;;  %v3783_v18 = vmul.f32 1.050701, %v3569_v21  ;;  %v3677_v1 = vsel %vm3463_vm7, %v8592_v58, %v3249_v38  ;;  %v3142_v50 = vmul.f32 1.6732632, %v5414_v28  ;;  %v6268_v13 = vpop.f32.mrb[153].mxu0  ;;  %v6484_v36 = vpop.f32.mrb[153].mxu1 }
 0x237   : > { %4853 = vst.msk [vmem:[%s7488_s23 + $0xf8] sm:$0xf] %vm4790_vm2, %v5843_v55  ;;  %v3891_v2 = vmul.f32 1.050701, %v3677_v1  ;;  %v3250_v54 = vmul.f32 1.6732632, %v5522_v11  ;;  %6956 = vpow2.f32 %v2570_v34  ;;  %v6953_v30 = vpop.eup %6952 }
 0x238   : > { %v3143_v5 = vmul.f32 1.6732632, %v5415_v60  ;;  %4961 = vst.msk [vmem:[%s7488_s23 + $0x2a8] sm:$0xf] %vm4790_vm2, %v5951_v59  ;;  %v5844_v24 = vpack.c.bf16 %v3783_v18, %v3783_v18  ;;  %v3570_v58 = vsel %vm3356_vm8, %v8602_v40, %v3142_v50  ;;  %v5523_v4 = vadd.f32 -1.0, %v6951_v57  ;;  %v8813_v63 = vpop.f32.mrb[154].mxu0 }
 0x239   : > { %v5952_v12 = vpack.c.bf16 %v3891_v2, %v3891_v2  ;;  %v3784_v48 = vmul.f32 1.050701, %v3570_v58  ;;  %v3678_v51 = vsel %vm3464_vm9, %v8604_v14, %v3250_v54  ;;  %v8815_v31 = vpop.f32.mrb[154].mxu1  ;;  %vm3465_vm11 = vcmp.gt.f32.partialorder %v8623_v0, 0.0  ;;  %v6269_v43 = vpop.f32.mrb[155].mxu0 }
 0x23a   : > { %v3571_v44 = vsel %vm3357_vm10, %v8621_v42, %v3143_v5  ;;  %4854 = vst.msk [vmem:[%s7488_s23 + $0xfc] sm:$0xf] %vm4790_vm2, %v5844_v24  ;;  %v3892_v40 = vmul.f32 1.050701, %v3678_v51  ;;  %v3251_v16 = vmul.f32 1.6732632, %v5523_v4 }
 0x23b   : > { %v3785_v32 = vmul.f32 1.050701, %v3571_v44  ;;  %v6955_v33 = vpop.eup %6954  ;;  %4962 = vst.msk [vmem:[%s7488_s23 + $0x2ac] sm:$0xf] %vm4790_vm2, %v5952_v12  ;;  %v5845_v27 = vpack.c.bf16 %v3784_v48, %v3784_v48  ;;  %v5416_v14 = vadd.f32 -1.0, %v6953_v30  ;;  %v2397_v42 = vmin.f32 %v8662_v46, 0.0 }
 0x23c   : > { %v6485_v53 = vpop.f32.mrb[155].mxu1  ;;  %v5953_v22 = vpack.c.bf16 %v3892_v40, %v3892_v40  ;;  %v3679_v25 = vsel %vm3465_vm11, %v8623_v0, %v3251_v16  ;;  %v5524_v20 = vadd.f32 -1.0, %v6955_v33  ;;  %vm3358_vm0 = vcmp.gt.f32.partialorder %v8642_v3, 0.0  ;;  %v8833_v21 = vpop.f32.mrb[156].mxu0 }
 0x23d   : > { %v5846_v45 = vpack.c.bf16 %v3785_v32, %v3785_v32  ;;  %4855 = vst.msk [vmem:[%s7488_s23 + $0x100] sm:$0xf] %vm4790_vm2, %v5845_v27  ;;  %v3893_v10 = vmul.f32 1.050701, %v3679_v25  ;;  %v3144_v38 = vmul.f32 1.6732632, %v5416_v14 }
 0x23e   : > { %v2786_v28 = vmul.f32 1.442695, %v2397_v42  ;;  %4963 = vst.msk [vmem:[%s7488_s23 + $0x2b0] sm:$0xf] %vm4790_vm2, %v5953_v22  ;;  %v3252_v11 = vmul.f32 1.6732632, %v5524_v20 }
 0x23f   : > { %4856 = vst.msk [vmem:[%s7488_s23 + $0x104] sm:$0xf] %vm4790_vm2, %v5846_v45  ;;  %v2290_v57 = vmin.f32 %v8677_v47, 0.0  ;;  %v2398_v55 = vmin.f32 %v8679_v49, 0.0  ;;  %v5954_v0 = vpack.c.bf16 %v3893_v10, %v3893_v10  ;;  %v3572_v60 = vsel %vm3358_vm0, %v8642_v3, %v3144_v38  ;;  %v8837_v34 = vpop.f32.mrb[156].mxu1  ;;  %v6272_v59 = vpop.f32.mrb[157].mxu0 }
 0x240   : > { %vm3466_vm12 = vcmp.gt.f32.partialorder %v8644_v6, 0.0  ;;  %6958 = vpow2.f32 %v2786_v28  ;;  %v3786_v18 = vmul.f32 1.050701, %v3572_v60  ;;  %v2291_v30 = vmin.f32 %v8686_v61, 0.0  ;;  %v6488_v24 = vpop.f32.mrb[157].mxu1  ;;  %v8844_v13 = vpop.f32.mrb[158].mxu0 }
 0x241   : > { %v3680_v1 = vsel %vm3466_vm12, %v8644_v6, %v3252_v11  ;;  %v2572_v50 = vmul.f32 1.442695, %v2290_v57  ;;  %v2788_v2 = vmul.f32 1.442695, %v2398_v55  ;;  %v6957_v54 = vpop.eup %6956  ;;  %4964 = vst.msk [vmem:[%s7488_s23 + $0x2b4] sm:$0xf] %vm4790_vm2, %v5954_v0 }
 0x242   : > { %v3894_v5 = vmul.f32 1.050701, %v3680_v1  ;;  %v2399_v3 = vmin.f32 %v8695_v7, 0.0  ;;  %v5847_v58 = vpack.c.bf16 %v3786_v18, %v3786_v18  ;;  %v5417_v4 = vadd.f32 -1.0, %v6957_v54  ;;  %v8846_v36 = vpop.f32.mrb[158].mxu1  ;;  %v6273_v51 = vpop.f32.mrb[159].mxu0 }
 0x243   : > { %6960 = vpow2.f32 %v2572_v50  ;;  %v2574_v12 = vmul.f32 1.442695, %v2291_v30  ;;  %v6489_v44 = vpop.f32.mrb[159].mxu1  ;;  %v2292_v32 = vmin.f32 %v8706_v26, 0.0  ;;  %v2400_v16 = vmin.f32 %v8708_v15, 0.0  ;;  %v8857_v43 = vpop.f32.mrb[160].mxu0 }
 0x244   : > { %v5955_v6 = vpack.c.bf16 %v3894_v5, %v3894_v5  ;;  %6962 = vpow2.f32 %v2788_v2  ;;  %v2790_v48 = vmul.f32 1.442695, %v2399_v3  ;;  %4857 = vst.msk [vmem:[%s7488_s23 + $0x108] sm:$0xf] %vm4790_vm2, %v5847_v58  ;;  %v3145_v40 = vmul.f32 1.6732632, %v5417_v4 }
 0x245   : > { %vm3359_vm13 = vcmp.gt.f32.partialorder %v8660_v39, 0.0  ;;  %6964 = vpow2.f32 %v2574_v12  ;;  %v2293_v33 = vmin.f32 %v8716_v41, 0.0  ;;  %v2576_v14 = vmul.f32 1.442695, %v2292_v32  ;;  %v8859_v53 = vpop.f32.mrb[160].mxu1  ;;  %v6276_v10 = vpop.f32.mrb[161].mxu0 }
 0x246   : > { %4965 = vst.msk [vmem:[%s7488_s23 + $0x2b8] sm:$0xf] %vm4790_vm2, %v5955_v6  ;;  %v3573_v27 = vsel %vm3359_vm13, %v8660_v39, %v3145_v40  ;;  %6966 = vpow2.f32 %v2790_v48  ;;  %v2792_v42 = vmul.f32 1.442695, %v2400_v16  ;;  %vm3467_vm14 = vcmp.gt.f32.partialorder %v8662_v46, 0.0  ;;  %v6492_v38 = vpop.f32.mrb[161].mxu1 }
 0x247   : > { %v3787_v22 = vmul.f32 1.050701, %v3573_v27  ;;  %v2578_v45 = vmul.f32 1.442695, %v2293_v33  ;;  %v2401_v25 = vmin.f32 %v8718_v9, 0.0  ;;  %vm3360_vm1 = vcmp.gt.f32.partialorder %v8677_v47, 0.0 }
 0x248   : > { %6968 = vpow2.f32 %v2576_v14  ;;  %v2294_v20 = vmin.f32 %v8733_v8, 0.0  ;;  %v2402_v39 = vmin.f32 %v8735_v23, 0.0  ;;  %vm3468_vm15 = vcmp.gt.f32.partialorder %v8679_v49, 0.0  ;;  %v8867_v55 = vpop.f32.mrb[162].mxu0  ;;  %v8869_v0 = vpop.f32.mrb[162].mxu1 }
 0x249   : > { %v5848_v11 = vpack.c.bf16 %v3787_v22, %v3787_v22  ;;  %6970 = vpow2.f32 %v2792_v42  ;;  %v2794_v57 = vmul.f32 1.442695, %v2401_v25  ;;  %v6277_v1 = vpop.f32.mrb[163].mxu0  ;;  %vm3361_vm3 = vcmp.gt.f32.partialorder %v8686_v61, 0.0  ;;  %v6493_v54 = vpop.f32.mrb[163].mxu1 }
 0x24a   : > { %v6959_v28 = vpop.eup %6958  ;;  %6972 = vpow2.f32 %v2578_v45  ;;  %v2580_v59 = vmul.f32 1.442695, %v2294_v20  ;;  %v2796_v18 = vmul.f32 1.442695, %v2402_v39  ;;  %v2295_v50 = vmin.f32 %v8742_v56, 0.0  ;;  %v8882_v44 = vpop.f32.mrb[164].mxu0 }
 0x24b   : > { %v5525_v60 = vadd.f32 -1.0, %v6959_v28  ;;  %4858 = vst.msk [vmem:[%s7488_s23 + $0x10c] sm:$0xf] %vm4790_vm2, %v5848_v11  ;;  %6974 = vpow2.f32 %v2794_v57  ;;  %v2403_v2 = vmin.f32 %v8745_v17, 0.0  ;;  %vm3469_vm4 = vcmp.gt.f32.partialorder %v8695_v7, 0.0  ;;  %v8884_v40 = vpop.f32.mrb[164].mxu1 }
 0x24c   : > { %6976 = vpow2.f32 %v2580_v59  ;;  %v2296_v3 = vmin.f32 %v8760_v19, 0.0  ;;  %v2582_v4 = vmul.f32 1.442695, %v2295_v50  ;;  %vm3362_vm5 = vcmp.gt.f32.partialorder %v8706_v26, 0.0  ;;  %v6280_v14 = vpop.f32.mrb[165].mxu0 }
 0x24d   : > { %v6961_v5 = vpop.eup %6960  ;;  %v3253_v30 = vmul.f32 1.6732632, %v5525_v60  ;;  %6978 = vpow2.f32 %v2796_v18  ;;  %v2798_v6 = vmul.f32 1.442695, %v2403_v2  ;;  %v2404_v27 = vmin.f32 %v8766_v37, 0.0  ;;  %v8888_v25 = vpop.f32.mrb[166].mxu0 }
 0x24e   : > { %v6963_v24 = vpop.eup %6962  ;;  %v5418_v58 = vadd.f32 -1.0, %v6961_v5  ;;  %v2584_v51 = vmul.f32 1.442695, %v2296_v3  ;;  %6980 = vpow2.f32 %v2582_v4  ;;  %vm3470_vm6 = vcmp.gt.f32.partialorder %v8708_v15, 0.0  ;;  %v6281_v28 = vpop.f32.mrb[167].mxu0 }
 0x24f   : > { %v3681_v12 = vsel %vm3467_vm14, %v8662_v46, %v3253_v30  ;;  %v5526_v48 = vadd.f32 -1.0, %v6963_v24  ;;  %v6965_v32 = vpop.eup %6964  ;;  %6982 = vpow2.f32 %v2798_v6  ;;  %v6496_v46 = vpop.f32.mrb[165].mxu1  ;;  %vm3363_vm7 = vcmp.gt.f32.partialorder %v8716_v41, 0.0 }
 0x250   : > { %v3895_v16 = vmul.f32 1.050701, %v3681_v12  ;;  %v3146_v33 = vmul.f32 1.6732632, %v5418_v58  ;;  %v6967_v42 = vpop.eup %6966  ;;  %v5419_v45 = vadd.f32 -1.0, %v6965_v32  ;;  %6984 = vpow2.f32 %v2584_v51  ;;  %v8894_v38 = vpop.f32.mrb[166].mxu1 }
 0x251   : > { %v3254_v22 = vmul.f32 1.6732632, %v5526_v48  ;;  %v5527_v10 = vadd.f32 -1.0, %v6967_v42  ;;  %vm3471_vm8 = vcmp.gt.f32.partialorder %v8718_v9, 0.0  ;;  %vm3364_vm9 = vcmp.gt.f32.partialorder %v8733_v8, 0.0  ;;  %v6497_v24 = vpop.f32.mrb[167].mxu1 }
 0x252   : > { %v5956_v20 = vpack.c.bf16 %v3895_v16, %v3895_v16  ;;  %v3574_v39 = vsel %vm3360_vm1, %v8677_v47, %v3146_v33  ;;  %v6969_v11 = vpop.eup %6968  ;;  %v3147_v59 = vmul.f32 1.6732632, %v5419_v45  ;;  %v2800_v18 = vmul.f32 1.442695, %v2404_v27  ;;  %v8919_v45 = vpop.f32.mrb[168].mxu0 }
 0x253   : > { %v3788_v57 = vmul.f32 1.050701, %v3574_v39  ;;  %v3682_v60 = vsel %vm3468_vm15, %v8679_v49, %v3254_v22  ;;  %v6971_v47 = vpop.eup %6970  ;;  %v3255_v50 = vmul.f32 1.6732632, %v5527_v10  ;;  %v5420_v2 = vadd.f32 -1.0, %v6969_v11  ;;  %v8921_v46 = vpop.f32.mrb[168].mxu1 }
 0x254   : > { %4966 = vst.msk [vmem:[%s7488_s23 + $0x2bc] sm:$0xf] %vm4790_vm2, %v5956_v20  ;;  %v3896_v1 = vmul.f32 1.050701, %v3682_v60  ;;  %v2297_v54 = vmin.f32 %v8772_v52, 0.0  ;;  %v6973_v5 = vpop.eup %6972  ;;  %v3575_v49 = vsel %vm3361_vm3, %v8686_v61, %v3147_v59  ;;  %v5528_v3 = vadd.f32 -1.0, %v6971_v47 }
 0x255   : > { %v5849_v30 = vpack.c.bf16 %v3788_v57, %v3788_v57  ;;  %6986 = vpow2.f32 %v2800_v18  ;;  %v6975_v58 = vpop.eup %6974  ;;  %v3789_v6 = vmul.f32 1.050701, %v3575_v49  ;;  %v3683_v12 = vsel %vm3469_vm4, %v8695_v7, %v3255_v50  ;;  %v6284_v11 = vpop.f32.mrb[169].mxu0 }
 0x256   : > { %v5957_v4 = vpack.c.bf16 %v3896_v1, %v3896_v1  ;;  %v3148_v48 = vmul.f32 1.6732632, %v5420_v2  ;;  %vm3472_vm10 = vcmp.gt.f32.partialorder %v8735_v23, 0.0  ;;  %v6977_v51 = vpop.eup %6976  ;;  %v3897_v32 = vmul.f32 1.050701, %v3683_v12  ;;  %v6500_v57 = vpop.f32.mrb[169].mxu1 }
 0x257   : > { %4859 = vst.msk [vmem:[%s7488_s23 + $0x110] sm:$0xf] %vm4790_vm2, %v5849_v30  ;;  %v3256_v16 = vmul.f32 1.6732632, %v5528_v3  ;;  %v5421_v61 = vadd.f32 -1.0, %v6973_v5  ;;  %v5529_v33 = vadd.f32 -1.0, %v6975_v58  ;;  %v6979_v27 = vpop.eup %6978  ;;  %v5850_v14 = vpack.c.bf16 %v3789_v6, %v3789_v6 }
 0x258   : > { %vm3365_vm11 = vcmp.gt.f32.partialorder %v8742_v56, 0.0  ;;  %4967 = vst.msk [vmem:[%s7488_s23 + $0x2c0] sm:$0xf] %vm4790_vm2, %v5957_v4  ;;  %v3576_v7 = vsel %vm3362_vm5, %v8706_v26, %v3148_v48  ;;  %v5422_v42 = vadd.f32 -1.0, %v6977_v51  ;;  %v2586_v22 = vmul.f32 1.442695, %v2297_v54  ;;  %v6981_v60 = vpop.eup %6980 }
 0x259   : > { %v5958_v20 = vpack.c.bf16 %v3897_v32, %v3897_v32  ;;  %v3790_v39 = vmul.f32 1.050701, %v3576_v7  ;;  %v3684_v10 = vsel %vm3470_vm6, %v8708_v15, %v3256_v16  ;;  %v3149_v28 = vmul.f32 1.6732632, %v5421_v61  ;;  %4860 = vst.msk [vmem:[%s7488_s23 + $0x114] sm:$0xf] %vm4790_vm2, %v5850_v14  ;;  %v6983_v47 = vpop.eup %6982 }
 0x25a   : > { %v3898_v26 = vmul.f32 1.050701, %v3684_v10  ;;  %v3257_v59 = vmul.f32 1.6732632, %v5529_v33  ;;  %v3150_v18 = vmul.f32 1.6732632, %v5422_v42  ;;  %6988 = vpow2.f32 %v2586_v22  ;;  %v6985_v30 = vpop.eup %6984 }
 0x25b   : > { %4968 = vst.msk [vmem:[%s7488_s23 + $0x2c4] sm:$0xf] %vm4790_vm2, %v5958_v20  ;;  %v5851_v1 = vpack.c.bf16 %v3790_v39, %v3790_v39  ;;  %v3577_v50 = vsel %vm3363_vm7, %v8716_v41, %v3149_v28  ;;  %v5530_v15 = vadd.f32 -1.0, %v6979_v27  ;;  %v5423_v2 = vadd.f32 -1.0, %v6981_v60  ;;  %v8933_v54 = vpop.f32.mrb[170].mxu0  ;;  %v8935_v5 = vpop.f32.mrb[170].mxu1 }
 0x25c   : > { %v5959_v49 = vpack.c.bf16 %v3898_v26, %v3898_v26  ;;  %v3791_v3 = vmul.f32 1.050701, %v3577_v50  ;;  %v3685_v24 = vsel %vm3471_vm8, %v8718_v9, %v3257_v59  ;;  %v3578_v58 = vsel %vm3364_vm9, %v8733_v8, %v3150_v18  ;;  %v6285_v4 = vpop.f32.mrb[171].mxu0  ;;  %v6501_v41 = vpop.f32.mrb[171].mxu1 }
 0x25d   : > { %4861 = vst.msk [vmem:[%s7488_s23 + $0x118] sm:$0xf] %vm4790_vm2, %v5851_v1  ;;  %v3899_v6 = vmul.f32 1.050701, %v3685_v24  ;;  %v3792_v12 = vmul.f32 1.050701, %v3578_v58 }
 0x25e   : > { %v3258_v48 = vmul.f32 1.6732632, %v5530_v15  ;;  %4969 = vst.msk [vmem:[%s7488_s23 + $0x2c8] sm:$0xf] %vm4790_vm2, %v5959_v49  ;;  %v5852_v51 = vpack.c.bf16 %v3791_v3, %v3791_v3  ;;  %v3151_v32 = vmul.f32 1.6732632, %v5423_v2 }
 0x25f   : > { %v5531_v16 = vadd.f32 -1.0, %v6983_v47  ;;  %v5424_v9 = vadd.f32 -1.0, %v6985_v30  ;;  %v6987_v61 = vpop.eup %6986  ;;  %v5960_v33 = vpack.c.bf16 %v3899_v6, %v3899_v6  ;;  %v5853_v27 = vpack.c.bf16 %v3792_v12, %v3792_v12  ;;  %v8951_v14 = vpop.f32.mrb[172].mxu0 }
 0x260   : > { %v3686_v8 = vsel %vm3472_vm10, %v8735_v23, %v3258_v48  ;;  %vm3473_vm0 = vcmp.gt.f32.partialorder %v8745_v17, 0.0  ;;  %v8953_v7 = vpop.f32.mrb[172].mxu1  ;;  %4862 = vst.msk [vmem:[%s7488_s23 + $0x11c] sm:$0xf] %vm4790_vm2, %v5852_v51  ;;  %v3579_v22 = vsel %vm3365_vm11, %v8742_v56, %v3151_v32  ;;  %vm3366_vm12 = vcmp.gt.f32.partialorder %v8760_v19, 0.0  ;;  %v6288_v11 = vpop.f32.mrb[173].mxu0 }
 0x261   : > { %v3900_v42 = vmul.f32 1.050701, %v3686_v8  ;;  %v3259_v20 = vmul.f32 1.6732632, %v5531_v16  ;;  %v3152_v39 = vmul.f32 1.6732632, %v5424_v9 }
 0x262   : > { %4970 = vst.msk [vmem:[%s7488_s23 + $0x2cc] sm:$0xf] %vm4790_vm2, %v5960_v33  ;;  %4863 = vst.msk [vmem:[%s7488_s23 + $0x120] sm:$0xf] %vm4790_vm2, %v5853_v27  ;;  %v3793_v23 = vmul.f32 1.050701, %v3579_v22 }
 0x263   : > { %v5532_v10 = vadd.f32 -1.0, %v6987_v61  ;;  %v2405_v28 = vmin.f32 %v8776_v29, 0.0  ;;  %v5961_v57 = vpack.c.bf16 %v3900_v42, %v3900_v42  ;;  %v3687_v56 = vsel %vm3473_vm0, %v8745_v17, %v3259_v20  ;;  %v6504_v59 = vpop.f32.mrb[173].mxu1  ;;  %v8971_v18 = vpop.f32.mrb[174].mxu0 }
 0x264   : > { %v3580_v60 = vsel %vm3366_vm12, %v8760_v19, %v3152_v39  ;;  %v2298_v26 = vmin.f32 %v8797_v62, 0.0  ;;  %v5854_v47 = vpack.c.bf16 %v3793_v23, %v3793_v23  ;;  %v3901_v1 = vmul.f32 1.050701, %v3687_v56  ;;  %v6989_v2 = vpop.eup %6988  ;;  %v8980_v4 = vpop.f32.mrb[174].mxu1 }
 0x265   : > { %v3794_v50 = vmul.f32 1.050701, %v3580_v60  ;;  %v3260_v15 = vmul.f32 1.6732632, %v5532_v10  ;;  %4971 = vst.msk [vmem:[%s7488_s23 + $0x2d0] sm:$0xf] %vm4790_vm2, %v5961_v57 }
 0x266   : > { %vm3474_vm13 = vcmp.gt.f32.partialorder %v8766_v37, 0.0  ;;  %v2802_v30 = vmul.f32 1.442695, %v2405_v28  ;;  %v2588_v17 = vmul.f32 1.442695, %v2298_v26  ;;  %v2406_v19 = vmin.f32 %v8799_v35, 0.0 }
 0x267   : > { %4864 = vst.msk [vmem:[%s7488_s23 + $0x124] sm:$0xf] %vm4790_vm2, %v5854_v47  ;;  %v5962_v49 = vpack.c.bf16 %v3901_v1, %v3901_v1  ;;  %v5855_v3 = vpack.c.bf16 %v3794_v50, %v3794_v50  ;;  %v3688_v24 = vsel %vm3474_vm13, %v8766_v37, %v3260_v15  ;;  %v5425_v58 = vadd.f32 -1.0, %v6989_v2  ;;  %v6289_v41 = vpop.f32.mrb[175].mxu0  ;;  %v6505_v48 = vpop.f32.mrb[175].mxu1 }
 0x268   : > { %v3902_v6 = vmul.f32 1.050701, %v3688_v24  ;;  %6990 = vpow2.f32 %v2802_v30  ;;  %v2804_v12 = vmul.f32 1.442695, %v2406_v19  ;;  %v2299_v32 = vmin.f32 %v8813_v63, 0.0  ;;  %v8987_v16 = vpop.f32.mrb[176].mxu0 }
 0x269   : > { %4972 = vst.msk [vmem:[%s7488_s23 + $0x2d4] sm:$0xf] %vm4790_vm2, %v5962_v49  ;;  %4865 = vst.msk [vmem:[%s7488_s23 + $0x128] sm:$0xf] %vm4790_vm2, %v5855_v3  ;;  %v3153_v51 = vmul.f32 1.6732632, %v5425_v58  ;;  %6992 = vpow2.f32 %v2588_v17 }
 0x26a   : > { %v8989_v37 = vpop.f32.mrb[176].mxu1  ;;  %v5963_v9 = vpack.c.bf16 %v3902_v6, %v3902_v6  ;;  %vm3367_vm14 = vcmp.gt.f32.partialorder %v8772_v52, 0.0  ;;  %6994 = vpow2.f32 %v2804_v12  ;;  %v2407_v61 = vmin.f32 %v8815_v31, 0.0  ;;  %v6292_v33 = vpop.f32.mrb[177].mxu0 }
 0x26b   : > { %v6508_v27 = vpop.f32.mrb[177].mxu1  ;;  %v3581_v8 = vsel %vm3367_vm14, %v8772_v52, %v3153_v51  ;;  %v2590_v42 = vmul.f32 1.442695, %v2299_v32  ;;  %v2300_v22 = vmin.f32 %v8833_v21, 0.0  ;;  %v8995_v20 = vpop.f32.mrb[178].mxu0  ;;  %v2408_v28 = vmin.f32 %v8837_v34, 0.0 }
 0x26c   : > { %v8997_v39 = vpop.f32.mrb[178].mxu1  ;;  %4973 = vst.msk [vmem:[%s7488_s23 + $0x2d8] sm:$0xf] %vm4790_vm2, %v5963_v9  ;;  %v3795_v23 = vmul.f32 1.050701, %v3581_v8  ;;  %v2301_v57 = vmin.f32 %v8844_v13, 0.0 }
 0x26d   : > { %v2806_v10 = vmul.f32 1.442695, %v2407_v61  ;;  %6996 = vpow2.f32 %v2590_v42  ;;  %v2592_v11 = vmul.f32 1.442695, %v2300_v22  ;;  %v6293_v56 = vpop.f32.mrb[179].mxu0  ;;  %v6509_v52 = vpop.f32.mrb[179].mxu1 }
 0x26e   : > { %v5856_v60 = vpack.c.bf16 %v3795_v23, %v3795_v23  ;;  %v2808_v26 = vmul.f32 1.442695, %v2408_v28  ;;  %v2409_v59 = vmin.f32 %v8846_v36, 0.0  ;;  %v2594_v47 = vmul.f32 1.442695, %v2301_v57  ;;  %v9011_v17 = vpop.f32.mrb[180].mxu0 }
 0x26f   : > { %6998 = vpow2.f32 %v2806_v10  ;;  %v2302_v1 = vmin.f32 %v8857_v43, 0.0  ;;  %vm3475_vm1 = vcmp.gt.f32.partialorder %v8776_v29, 0.0  ;;  %v2410_v15 = vmin.f32 %v8859_v53, 0.0  ;;  %v9013_v19 = vpop.f32.mrb[180].mxu1  ;;  %v6296_v58 = vpop.f32.mrb[181].mxu0 }
 0x270   : > { %7000 = vpow2.f32 %v2592_v11  ;;  %4866 = vst.msk [vmem:[%s7488_s23 + $0x12c] sm:$0xf] %vm4790_vm2, %v5856_v60  ;;  %v2810_v50 = vmul.f32 1.442695, %v2409_v59  ;;  %vm3368_vm15 = vcmp.gt.f32.partialorder %v8797_v62, 0.0  ;;  %v2303_v30 = vmin.f32 %v8867_v55, 0.0 }
 0x271   : > { %7002 = vpow2.f32 %v2808_v26  ;;  %v2596_v2 = vmul.f32 1.442695, %v2302_v1  ;;  %vm3476_vm3 = vcmp.gt.f32.partialorder %v8799_v35, 0.0  ;;  %v2812_v3 = vmul.f32 1.442695, %v2410_v15  ;;  %v6512_v41 = vpop.f32.mrb[181].mxu1 }
 0x272   : > { %7004 = vpow2.f32 %v2594_v47  ;;  %v6991_v49 = vpop.eup %6990  ;;  %v2411_v24 = vmin.f32 %v8869_v0, 0.0  ;;  %vm3369_vm4 = vcmp.gt.f32.partialorder %v8813_v63, 0.0  ;;  %v2598_v48 = vmul.f32 1.442695, %v2303_v30  ;;  %v9018_v51 = vpop.f32.mrb[182].mxu0 }
 0x273   : > { %7006 = vpow2.f32 %v2810_v50  ;;  %v6993_v6 = vpop.eup %6992  ;;  %v5533_v12 = vadd.f32 -1.0, %v6991_v49  ;;  %v9020_v32 = vpop.f32.mrb[182].mxu1  ;;  %vm3477_vm5 = vcmp.gt.f32.partialorder %v8815_v31, 0.0  ;;  %v2304_v27 = vmin.f32 %v8882_v44, 0.0 }
 0x274   : > { %7008 = vpow2.f32 %v2596_v2  ;;  %v6995_v9 = vpop.eup %6994  ;;  %v5426_v61 = vadd.f32 -1.0, %v6993_v6  ;;  %v2814_v33 = vmul.f32 1.442695, %v2411_v24  ;;  %v6297_v8 = vpop.f32.mrb[183].mxu0  ;;  %vm3370_vm6 = vcmp.gt.f32.partialorder %v8833_v21, 0.0 }
 0x275   : > { %7010 = vpow2.f32 %v2812_v3  ;;  %v6513_v42 = vpop.f32.mrb[183].mxu1  ;;  %v3261_v22 = vmul.f32 1.6732632, %v5533_v12  ;;  %v5534_v23 = vadd.f32 -1.0, %v6995_v9  ;;  %vm3478_vm7 = vcmp.gt.f32.partialorder %v8837_v34, 0.0  ;;  %v9040_v49 = vpop.f32.mrb[184].mxu0 }
 0x276   : > { %7012 = vpow2.f32 %v2598_v48  ;;  %v3154_v10 = vmul.f32 1.6732632, %v5426_v61  ;;  %v2600_v28 = vmul.f32 1.442695, %v2304_v27  ;;  %v2412_v11 = vmin.f32 %v8884_v40, 0.0  ;;  %v9042_v6 = vpop.f32.mrb[184].mxu1 }
 0x277   : > { %7014 = vpow2.f32 %v2814_v33  ;;  %v6997_v57 = vpop.eup %6996  ;;  %v3689_v56 = vsel %vm3475_vm1, %v8776_v29, %v3261_v22  ;;  %v3262_v52 = vmul.f32 1.6732632, %v5534_v23  ;;  %vm3371_vm8 = vcmp.gt.f32.partialorder %v8844_v13, 0.0  ;;  %v6516_v33 = vpop.f32.mrb[185].mxu1 }
 0x278   : > { %v2305_v60 = vmin.f32 %v8888_v25, 0.0  ;;  %v3903_v59 = vmul.f32 1.050701, %v3689_v56  ;;  %v3582_v47 = vsel %vm3368_vm15, %v8797_v62, %v3154_v10  ;;  %v5427_v1 = vadd.f32 -1.0, %v6997_v57 }
 0x279   : > { %v6999_v26 = vpop.eup %6998  ;;  %vm3479_vm9 = vcmp.gt.f32.partialorder %v8846_v36, 0.0  ;;  %7016 = vpow2.f32 %v2600_v28  ;;  %v3796_v15 = vmul.f32 1.050701, %v3582_v47  ;;  %v3690_v29 = vsel %vm3476_vm3, %v8799_v35, %v3262_v52  ;;  %v6300_v35 = vpop.f32.mrb[185].mxu0 }
 0x27a   : > { %v7001_v50 = vpop.eup %7000  ;;  %v5535_v2 = vadd.f32 -1.0, %v6999_v26  ;;  %vm3372_vm10 = vcmp.gt.f32.partialorder %v8857_v43, 0.0  ;;  %v2816_v30 = vmul.f32 1.442695, %v2412_v11  ;;  %v5964_v24 = vpack.c.bf16 %v3903_v59, %v3903_v59  ;;  %v9050_v10 = vpop.f32.mrb[186].mxu0 }
 0x27b   : > { %v7003_v3 = vpop.eup %7002  ;;  %v3904_v62 = vmul.f32 1.050701, %v3690_v29  ;;  %v3155_v58 = vmul.f32 1.6732632, %v5427_v1  ;;  %v5428_v41 = vadd.f32 -1.0, %v7001_v50  ;;  %v5857_v48 = vpack.c.bf16 %v3796_v15, %v3796_v15  ;;  %v9052_v28 = vpop.f32.mrb[186].mxu1 }
 0x27c   : > { %v7005_v12 = vpop.eup %7004  ;;  %v3263_v9 = vmul.f32 1.6732632, %v5535_v2  ;;  %v5536_v61 = vadd.f32 -1.0, %v7003_v3  ;;  %7018 = vpow2.f32 %v2816_v30  ;;  %4974 = vst.msk [vmem:[%s7488_s23 + $0x2dc] sm:$0xf] %vm4790_vm2, %v5964_v24  ;;  %vm3480_vm11 = vcmp.gt.f32.partialorder %v8859_v53, 0.0 }
 0x27d   : > { %v7007_v27 = vpop.eup %7006  ;;  %v5965_v8 = vpack.c.bf16 %v3904_v62, %v3904_v62  ;;  %v3583_v42 = vsel %vm3369_vm4, %v8813_v63, %v3155_v58  ;;  %v3156_v22 = vmul.f32 1.6732632, %v5428_v41  ;;  %v5429_v23 = vadd.f32 -1.0, %v7005_v12  ;;  %4867 = vst.msk [vmem:[%s7488_s23 + $0x130] sm:$0xf] %vm4790_vm2, %v5857_v48  ;;  %v6301_v63 = vpop.f32.mrb[187].mxu0 }
 0x27e   : > { %v7009_v11 = vpop.eup %7008  ;;  %v3797_v57 = vmul.f32 1.050701, %v3583_v42  ;;  %v3691_v56 = vsel %vm3477_vm5, %v8815_v31, %v3263_v9  ;;  %v3264_v52 = vmul.f32 1.6732632, %v5536_v61  ;;  %v5537_v26 = vadd.f32 -1.0, %v7007_v27  ;;  %v6517_v29 = vpop.f32.mrb[187].mxu1 }
 0x27f   : > { %vm3373_vm0 = vcmp.gt.f32.partialorder %v8867_v55, 0.0  ;;  %v7011_v59 = vpop.eup %7010  ;;  %4975 = vst.msk [vmem:[%s7488_s23 + $0x2e0] sm:$0xf] %vm4790_vm2, %v5965_v8  ;;  %v3905_v47 = vmul.f32 1.050701, %v3691_v56  ;;  %v3584_v1 = vsel %vm3370_vm6, %v8833_v21, %v3156_v22  ;;  %v5430_v15 = vadd.f32 -1.0, %v7009_v11 }
 0x280   : > { %v3157_v50 = vmul.f32 1.6732632, %v5429_v23  ;;  %vm3481_vm12 = vcmp.gt.f32.partialorder %v8869_v0, 0.0  ;;  %v7013_v31 = vpop.eup %7012  ;;  %v5858_v2 = vpack.c.bf16 %v3797_v57, %v3797_v57  ;;  %v3798_v30 = vmul.f32 1.050701, %v3584_v1  ;;  %v9079_v33 = vpop.f32.mrb[188].mxu1 }
 0x281   : > { %v3692_v3 = vsel %vm3478_vm7, %v8837_v34, %v3264_v52  ;;  %v3265_v24 = vmul.f32 1.6732632, %v5537_v26  ;;  %v7015_v62 = vpop.eup %7014  ;;  %v5966_v58 = vpack.c.bf16 %v3905_v47, %v3905_v47  ;;  %v3158_v12 = vmul.f32 1.6732632, %v5430_v15  ;;  %v9077_v34 = vpop.f32.mrb[188].mxu0 }
 0x282   : > { %v3906_v41 = vmul.f32 1.050701, %v3692_v3  ;;  %v3585_v21 = vsel %vm3371_vm8, %v8844_v13, %v3157_v50  ;;  %4868 = vst.msk [vmem:[%s7488_s23 + $0x134] sm:$0xf] %vm4790_vm2, %v5858_v2  ;;  %v5859_v48 = vpack.c.bf16 %v3798_v30, %v3798_v30  ;;  %v5538_v35 = vadd.f32 -1.0, %v7011_v59  ;;  %v6304_v23 = vpop.f32.mrb[189].mxu0 }
 0x283   : > { %v3799_v9 = vmul.f32 1.050701, %v3585_v21  ;;  %v3693_v61 = vsel %vm3479_vm9, %v8846_v36, %v3265_v24  ;;  %v7017_v27 = vpop.eup %7016  ;;  %4976 = vst.msk [vmem:[%s7488_s23 + $0x2e4] sm:$0xf] %vm4790_vm2, %v5966_v58  ;;  %v3586_v42 = vsel %vm3372_vm10, %v8857_v43, %v3158_v12  ;;  %v5431_v22 = vadd.f32 -1.0, %v7013_v31  ;;  %v6520_v11 = vpop.f32.mrb[189].mxu1 }
 0x284   : > { %v5967_v13 = vpack.c.bf16 %v3906_v41, %v3906_v41  ;;  %v3907_v8 = vmul.f32 1.050701, %v3693_v61  ;;  %4869 = vst.msk [vmem:[%s7488_s23 + $0x138] sm:$0xf] %vm4790_vm2, %v5859_v48  ;;  %v3800_v57 = vmul.f32 1.050701, %v3586_v42 }
 0x285   : > { %v5860_v36 = vpack.c.bf16 %v3799_v9, %v3799_v9  ;;  %v3266_v56 = vmul.f32 1.6732632, %v5538_v35  ;;  %v5539_v52 = vadd.f32 -1.0, %v7015_v62  ;;  %v9088_v26 = vpop.f32.mrb[190].mxu0  ;;  %v3159_v59 = vmul.f32 1.6732632, %v5431_v22 }
 0x286   : > { %4977 = vst.msk [vmem:[%s7488_s23 + $0x2e8] sm:$0xf] %vm4790_vm2, %v5967_v13  ;;  %v5968_v63 = vpack.c.bf16 %v3907_v8, %v3907_v8  ;;  %v5432_v47 = vadd.f32 -1.0, %v7017_v27  ;;  %v2602_v43 = vmul.f32 1.442695, %v2305_v60  ;;  %v9094_v1 = vpop.f32.mrb[190].mxu1  ;;  %v7019_v50 = vpop.eup %7018  ;;  %v5861_v15 = vpack.c.bf16 %v3800_v57, %v3800_v57 }
 0x287   : > { %4870 = vst.msk [vmem:[%s7488_s23 + $0x13c] sm:$0xf] %vm4790_vm2, %v5860_v36  ;;  %v3694_v29 = vsel %vm3480_vm11, %v8859_v53, %v3266_v56  ;;  %v3267_v31 = vmul.f32 1.6732632, %v5539_v52  ;;  %vm3374_vm13 = vcmp.gt.f32.partialorder %v8882_v44, 0.0  ;;  %v6305_v2 = vpop.f32.mrb[191].mxu0  ;;  %v3587_v60 = vsel %vm3373_vm0, %v8867_v55, %v3159_v59 }
 0x288   : > { %v6521_v30 = vpop.f32.mrb[191].mxu1  ;;  %4978 = vst.msk [vmem:[%s7488_s23 + $0x2ec] sm:$0xf] %vm4790_vm2, %v5968_v63  ;;  %v3908_v3 = vmul.f32 1.050701, %v3694_v29  ;;  %v5540_v62 = vadd.f32 -1.0, %v7019_v50  ;;  %7020 = vpow2.f32 %v2602_v43 }
 0x289   : > { %v3160_v24 = vmul.f32 1.6732632, %v5432_v47  ;;  %4871 = vst.msk [vmem:[%s7488_s23 + $0x140] sm:$0xf] %vm4790_vm2, %v5861_v15  ;;  %v3801_v58 = vmul.f32 1.050701, %v3587_v60  ;;  %v3695_v53 = vsel %vm3481_vm12, %v8869_v0, %v3267_v31 }
 0x28a   : > { %v2413_v41 = vmin.f32 %v8894_v38, 0.0  ;;  %v5969_v21 = vpack.c.bf16 %v3908_v3, %v3908_v3  ;;  %v3909_v12 = vmul.f32 1.050701, %v3695_v53  ;;  %v3268_v9 = vmul.f32 1.6732632, %v5540_v62  ;;  %v9115_v27 = vpop.f32.mrb[192].mxu0 }
 0x28b   : > { %v3588_v48 = vsel %vm3374_vm13, %v8882_v44, %v3160_v24  ;;  %v5862_v55 = vpack.c.bf16 %v3801_v58, %v3801_v58  ;;  %vm3482_vm14 = vcmp.gt.f32.partialorder %v8884_v40, 0.0  ;;  %v2306_v8 = vmin.f32 %v8919_v45, 0.0  ;;  %v9121_v42 = vpop.f32.mrb[192].mxu1  ;;  %v6308_v44 = vpop.f32.mrb[193].mxu0 }
 0x28c   : > { %v3802_v61 = vmul.f32 1.050701, %v3588_v48  ;;  %v2818_v35 = vmul.f32 1.442695, %v2413_v41  ;;  %4979 = vst.msk [vmem:[%s7488_s23 + $0x2f0] sm:$0xf] %vm4790_vm2, %v5969_v21  ;;  %v5970_v0 = vpack.c.bf16 %v3909_v12, %v3909_v12  ;;  %v3696_v13 = vsel %vm3482_vm14, %v8884_v40, %v3268_v9 }
 0x28d   : > { %4872 = vst.msk [vmem:[%s7488_s23 + $0x144] sm:$0xf] %vm4790_vm2, %v5862_v55  ;;  %v3910_v23 = vmul.f32 1.050701, %v3696_v13  ;;  %v2414_v11 = vmin.f32 %v8921_v46, 0.0  ;;  %v6524_v36 = vpop.f32.mrb[193].mxu1 }
 0x28e   : > { %v5863_v22 = vpack.c.bf16 %v3802_v61, %v3802_v61  ;;  %7022 = vpow2.f32 %v2818_v35  ;;  %v9126_v57 = vpop.f32.mrb[194].mxu0  ;;  %4980 = vst.msk [vmem:[%s7488_s23 + $0x2f4] sm:$0xf] %vm4790_vm2, %v5970_v0  ;;  %v2604_v56 = vmul.f32 1.442695, %v2306_v8  ;;  %v2307_v40 = vmin.f32 %v8933_v54, 0.0 }
 0x28f   : > { %v9131_v52 = vpop.f32.mrb[194].mxu1  ;;  %v5971_v63 = vpack.c.bf16 %v3910_v23, %v3910_v23  ;;  %v2820_v59 = vmul.f32 1.442695, %v2414_v11  ;;  %v2415_v47 = vmin.f32 %v8935_v5, 0.0  ;;  %v6309_v43 = vpop.f32.mrb[195].mxu0  ;;  %v2308_v29 = vmin.f32 %v8951_v14, 0.0 }
 0x290   : > { %4873 = vst.msk [vmem:[%s7488_s23 + $0x148] sm:$0xf] %vm4790_vm2, %v5863_v22  ;;  %v6525_v50 = vpop.f32.mrb[195].mxu1  ;;  %7024 = vpow2.f32 %v2604_v56  ;;  %v2606_v15 = vmul.f32 1.442695, %v2307_v40  ;;  %v2416_v2 = vmin.f32 %v8953_v7, 0.0 }
 0x291   : > { %4981 = vst.msk [vmem:[%s7488_s23 + $0x2f8] sm:$0xf] %vm4790_vm2, %v5971_v63  ;;  %7026 = vpow2.f32 %v2820_v59  ;;  %v2822_v31 = vmul.f32 1.442695, %v2415_v47  ;;  %v2608_v30 = vmul.f32 1.442695, %v2308_v29 }
 0x292   : > { %7028 = vpow2.f32 %v2606_v15  ;;  %v2309_v3 = vmin.f32 %v8971_v18, 0.0  ;;  %v7021_v60 = vpop.eup %7020  ;;  %vm3375_vm1 = vcmp.gt.f32.partialorder %v8888_v25, 0.0  ;;  %v2824_v24 = vmul.f32 1.442695, %v2416_v2  ;;  %v9143_v58 = vpop.f32.mrb[196].mxu0 }
 0x293   : > { %7030 = vpow2.f32 %v2822_v31  ;;  %v2417_v62 = vmin.f32 %v8980_v4, 0.0  ;;  %v9145_v53 = vpop.f32.mrb[196].mxu1  ;;  %v5433_v41 = vadd.f32 -1.0, %v7021_v60  ;;  %v2310_v12 = vmin.f32 %v8987_v16, 0.0  ;;  %v6312_v48 = vpop.f32.mrb[197].mxu0 }
 0x294   : > { %7032 = vpow2.f32 %v2608_v30  ;;  %v2610_v21 = vmul.f32 1.442695, %v2309_v3  ;;  %v6528_v9 = vpop.f32.mrb[197].mxu1  ;;  %vm3483_vm15 = vcmp.gt.f32.partialorder %v8894_v38, 0.0  ;;  %v2418_v61 = vmin.f32 %v8989_v37, 0.0  ;;  %v9150_v35 = vpop.f32.mrb[198].mxu0 }
 0x295   : > { %7034 = vpow2.f32 %v2824_v24  ;;  %v2826_v55 = vmul.f32 1.442695, %v2417_v62  ;;  %v9152_v0 = vpop.f32.mrb[198].mxu1  ;;  %v3161_v13 = vmul.f32 1.6732632, %v5433_v41  ;;  %vm3376_vm3 = vcmp.gt.f32.partialorder %v8919_v45, 0.0 }
 0x296   : > { %7036 = vpow2.f32 %v2610_v21  ;;  %v2612_v8 = vmul.f32 1.442695, %v2310_v12  ;;  %v6313_v44 = vpop.f32.mrb[199].mxu0  ;;  %vm3484_vm4 = vcmp.gt.f32.partialorder %v8921_v46, 0.0  ;;  %v2828_v23 = vmul.f32 1.442695, %v2418_v61 }
 0x297   : > { %7038 = vpow2.f32 %v2826_v55  ;;  %v2311_v11 = vmin.f32 %v8995_v20, 0.0  ;;  %v6529_v36 = vpop.f32.mrb[199].mxu1  ;;  %v3589_v56 = vsel %vm3375_vm1, %v8888_v25, %v3161_v13  ;;  %vm3377_vm5 = vcmp.gt.f32.partialorder %v8933_v54, 0.0  ;;  %v9167_v3 = vpop.f32.mrb[200].mxu0 }
 0x298   : > { %v7023_v22 = vpop.eup %7022  ;;  %7040 = vpow2.f32 %v2612_v8  ;;  %v2419_v63 = vmin.f32 %v8997_v39, 0.0  ;;  %v3803_v59 = vmul.f32 1.050701, %v3589_v56  ;;  %vm3485_vm6 = vcmp.gt.f32.partialorder %v8935_v5, 0.0  ;;  %v9169_v60 = vpop.f32.mrb[200].mxu1 }
 0x299   : > { %v5541_v40 = vadd.f32 -1.0, %v7023_v22  ;;  %7042 = vpow2.f32 %v2828_v23  ;;  %v2614_v47 = vmul.f32 1.442695, %v2311_v11  ;;  %vm3378_vm7 = vcmp.gt.f32.partialorder %v8951_v14, 0.0  ;;  %v6316_v12 = vpop.f32.mrb[201].mxu0  ;;  %v6532_v48 = vpop.f32.mrb[201].mxu1 }
 0x29a   : > { %v7025_v43 = vpop.eup %7024  ;;  %v2830_v15 = vmul.f32 1.442695, %v2419_v63  ;;  %v2312_v29 = vmin.f32 %v9011_v17, 0.0  ;;  %v5864_v25 = vpack.c.bf16 %v3803_v59, %v3803_v59  ;;  %vm3486_vm8 = vcmp.gt.f32.partialorder %v8953_v7, 0.0  ;;  %v9185_v59 = vpop.f32.mrb[202].mxu1 }
 0x29b   : > { %v3269_v50 = vmul.f32 1.6732632, %v5541_v40  ;;  %v7027_v31 = vpop.eup %7026  ;;  %v5434_v2 = vadd.f32 -1.0, %v7025_v43  ;;  %7044 = vpow2.f32 %v2614_v47  ;;  %v2420_v30 = vmin.f32 %v9013_v19, 0.0 }
 0x29c   : > { %v7029_v24 = vpop.eup %7028  ;;  %v5542_v41 = vadd.f32 -1.0, %v7027_v31  ;;  %7046 = vpow2.f32 %v2830_v15  ;;  %v2616_v21 = vmul.f32 1.442695, %v2312_v29  ;;  %4874 = vst.msk [vmem:[%s7488_s23 + $0x14c] sm:$0xf] %vm4790_vm2, %v5864_v25  ;;  %vm3379_vm9 = vcmp.gt.f32.partialorder %v8971_v18, 0.0 }
 0x29d   : > { %v3697_v62 = vsel %vm3483_vm15, %v8894_v38, %v3269_v50  ;;  %v7031_v9 = vpop.eup %7030  ;;  %v3162_v61 = vmul.f32 1.6732632, %v5434_v2  ;;  %v5435_v13 = vadd.f32 -1.0, %v7029_v24  ;;  %v9177_v23 = vmul.f32 1.442695, %v2420_v30  ;;  %v9179_v38 = vpop.f32.mrb[202].mxu0 }
 0x29e   : > { %v3911_v55 = vmul.f32 1.050701, %v3697_v62  ;;  %v7033_v8 = vpop.eup %7032  ;;  %v3270_v44 = vmul.f32 1.6732632, %v5542_v41  ;;  %v5543_v22 = vadd.f32 -1.0, %v7031_v9  ;;  %7048 = vpow2.f32 %v2616_v21  ;;  %v6317_v47 = vpop.f32.mrb[203].mxu0 }
 0x29f   : > { %v7035_v11 = vpop.eup %7034  ;;  %v3590_v56 = vsel %vm3376_vm3, %v8919_v45, %v3162_v61  ;;  %v3163_v40 = vmul.f32 1.6732632, %v5435_v13  ;;  %v5436_v63 = vadd.f32 -1.0, %v7033_v8  ;;  %vm3487_vm10 = vcmp.gt.f32.partialorder %v8980_v4, 0.0  ;;  %v6533_v25 = vpop.f32.mrb[203].mxu1 }
 0x2a0   : > { %v5972_v36 = vpack.c.bf16 %v3911_v55, %v3911_v55  ;;  %v7037_v43 = vpop.eup %7036  ;;  %v3804_v50 = vmul.f32 1.050701, %v3590_v56  ;;  %v3698_v15 = vsel %vm3484_vm4, %v8921_v46, %v3270_v44  ;;  %v3271_v29 = vmul.f32 1.6732632, %v5543_v22  ;;  %v9205_v8 = vpop.f32.mrb[204].mxu0 }
 0x2a1   : > { %v5544_v31 = vadd.f32 -1.0, %v7035_v11  ;;  %vm3380_vm11 = vcmp.gt.f32.partialorder %v8987_v16, 0.0  ;;  %v7039_v2 = vpop.eup %7038  ;;  %v3912_v45 = vmul.f32 1.050701, %v3698_v15  ;;  %v3591_v30 = vsel %vm3377_vm5, %v8933_v54, %v3163_v40  ;;  %v9207_v44 = vpop.f32.mrb[204].mxu1 }
 0x2a2   : > { %4982 = vst.msk [vmem:[%s7488_s23 + $0x2fc] sm:$0xf] %vm4790_vm2, %v5972_v36  ;;  %v3164_v24 = vmul.f32 1.6732632, %v5436_v63  ;;  %v5437_v62 = vadd.f32 -1.0, %v7037_v43  ;;  %vm3488_vm0 = vcmp.gt.f32.partialorder %v8989_v37, 0.0  ;;  %v7041_v41 = vpop.eup %7040  ;;  %v5865_v46 = vpack.c.bf16 %v3804_v50, %v3804_v50 }
 0x2a3   : > { %v3805_v21 = vmul.f32 1.050701, %v3591_v30  ;;  %v3699_v12 = vsel %vm3485_vm6, %v8935_v5, %v3271_v29  ;;  %v3272_v48 = vmul.f32 1.6732632, %v5544_v31  ;;  %vm3381_vm12 = vcmp.gt.f32.partialorder %v8995_v20, 0.0  ;;  %v7043_v9 = vpop.eup %7042  ;;  %v6320_v56 = vpop.f32.mrb[205].mxu0 }
 0x2a4   : > { %vm3489_vm13 = vcmp.gt.f32.partialorder %v8997_v39, 0.0  ;;  %v5973_v54 = vpack.c.bf16 %v3912_v45, %v3912_v45  ;;  %v3913_v55 = vmul.f32 1.050701, %v3699_v12  ;;  %v3592_v61 = vsel %vm3378_vm7, %v8951_v14, %v3164_v24  ;;  %4875 = vst.msk [vmem:[%s7488_s23 + $0x150] sm:$0xf] %vm4790_vm2, %v5865_v46  ;;  %v6536_v40 = vpop.f32.mrb[205].mxu1 }
 0x2a5   : > { %v3165_v13 = vmul.f32 1.6732632, %v5437_v62  ;;  %v5866_v5 = vpack.c.bf16 %v3805_v21, %v3805_v21  ;;  %v3806_v22 = vmul.f32 1.050701, %v3592_v61  ;;  %v3700_v11 = vsel %vm3486_vm8, %v8953_v7, %v3272_v48  ;;  %v7045_v63 = vpop.eup %7044  ;;  %v9219_v15 = vpop.f32.mrb[206].mxu0 }
 0x2a6   : > { %v5545_v36 = vadd.f32 -1.0, %v7039_v2  ;;  %4983 = vst.msk [vmem:[%s7488_s23 + $0x300] sm:$0xf] %vm4790_vm2, %v5973_v54  ;;  %v5974_v14 = vpack.c.bf16 %v3913_v55, %v3913_v55  ;;  %v3914_v47 = vmul.f32 1.050701, %v3700_v11  ;;  %v5438_v50 = vadd.f32 -1.0, %v7041_v41  ;;  %v7047_v7 = vpop.eup %7046 }
 0x2a7   : > { %v3593_v43 = vsel %vm3379_vm9, %v8971_v18, %v3165_v13  ;;  %v9221_v29 = vpop.f32.mrb[206].mxu1  ;;  %4876 = vst.msk [vmem:[%s7488_s23 + $0x154] sm:$0xf] %vm4790_vm2, %v5866_v5  ;;  %v5867_v31 = vpack.c.bf16 %v3806_v22, %v3806_v22  ;;  %v5546_v45 = vadd.f32 -1.0, %v7043_v9  ;;  %v6321_v30 = vpop.f32.mrb[207].mxu0  ;;  %v5439_v62 = vadd.f32 -1.0, %v7045_v63 }
 0x2a8   : > { %v3807_v25 = vmul.f32 1.050701, %v3593_v43  ;;  %v3273_v2 = vmul.f32 1.6732632, %v5545_v36  ;;  %4984 = vst.msk [vmem:[%s7488_s23 + $0x304] sm:$0xf] %vm4790_vm2, %v5974_v14  ;;  %v5975_v24 = vpack.c.bf16 %v3914_v47, %v3914_v47  ;;  %v7049_v21 = vpop.eup %7048  ;;  %7050 = vpow2.f32 %v9177_v23 }
 0x2a9   : > { %v3166_v18 = vmul.f32 1.6732632, %v5438_v50  ;;  %v5547_v41 = vadd.f32 -1.0, %v7047_v7  ;;  %v6537_v46 = vpop.f32.mrb[207].mxu1  ;;  %4877 = vst.msk [vmem:[%s7488_s23 + $0x158] sm:$0xf] %vm4790_vm2, %v5867_v31 }
 0x2aa   : > { %v5868_v12 = vpack.c.bf16 %v3807_v25, %v3807_v25  ;;  %v3701_v48 = vsel %vm3487_vm10, %v8980_v4, %v3273_v2  ;;  %v3274_v54 = vmul.f32 1.6732632, %v5546_v45  ;;  %4985 = vst.msk [vmem:[%s7488_s23 + $0x308] sm:$0xf] %vm4790_vm2, %v5975_v24  ;;  %v3167_v61 = vmul.f32 1.6732632, %v5439_v62 }
 0x2ab   : > { %v3915_v9 = vmul.f32 1.050701, %v3701_v48  ;;  %v3594_v55 = vsel %vm3380_vm11, %v8987_v16, %v3166_v18  ;;  %v3275_v13 = vmul.f32 1.6732632, %v5547_v41  ;;  %v5440_v22 = vadd.f32 -1.0, %v7049_v21  ;;  %v9250_v40 = vpop.f32.mrb[208].mxu0 }
 0x2ac   : > { %4878 = vst.msk [vmem:[%s7488_s23 + $0x15c] sm:$0xf] %vm4790_vm2, %v5868_v12  ;;  %v3808_v5 = vmul.f32 1.050701, %v3594_v55  ;;  %v3702_v4 = vsel %vm3488_vm0, %v8989_v37, %v3274_v54  ;;  %v2313_v23 = vmin.f32 %v9018_v51, 0.0  ;;  %v3595_v16 = vsel %vm3381_vm12, %v8995_v20, %v3167_v61  ;;  %v9252_v63 = vpop.f32.mrb[208].mxu1 }
 0x2ad   : > { %v5976_v11 = vpack.c.bf16 %v3915_v9, %v3915_v9  ;;  %v3916_v36 = vmul.f32 1.050701, %v3702_v4  ;;  %v3703_v56 = vsel %vm3489_vm13, %v8997_v39, %v3275_v13  ;;  %v3809_v37 = vmul.f32 1.050701, %v3595_v16  ;;  %v6324_v39 = vpop.f32.mrb[209].mxu0  ;;  %v6540_v31 = vpop.f32.mrb[209].mxu1 }
 0x2ae   : > { %v5869_v14 = vpack.c.bf16 %v3808_v5, %v3808_v5  ;;  %v3917_v47 = vmul.f32 1.050701, %v3703_v56  ;;  %v3168_v43 = vmul.f32 1.6732632, %v5440_v22  ;;  %vm3382_vm14 = vcmp.gt.f32.partialorder %v9011_v17, 0.0  ;;  %v9261_v30 = vpop.f32.mrb[210].mxu0 }
 0x2af   : > { %4986 = vst.msk [vmem:[%s7488_s23 + $0x30c] sm:$0xf] %vm4790_vm2, %v5976_v11  ;;  %v5977_v50 = vpack.c.bf16 %v3916_v36, %v3916_v36  ;;  %v2618_v7 = vmul.f32 1.442695, %v2313_v23  ;;  %v2421_v20 = vmin.f32 %v9020_v32, 0.0  ;;  %v5870_v25 = vpack.c.bf16 %v3809_v37, %v3809_v37  ;;  %v9263_v24 = vpop.f32.mrb[210].mxu1 }
 0x2b0   : > { %4879 = vst.msk [vmem:[%s7488_s23 + $0x160] sm:$0xf] %vm4790_vm2, %v5869_v14  ;;  %v5978_v2 = vpack.c.bf16 %v3917_v47, %v3917_v47  ;;  %v3596_v45 = vsel %vm3382_vm14, %v9011_v17, %v3168_v43  ;;  %v2314_v41 = vmin.f32 %v9040_v49, 0.0  ;;  %v6325_v46 = vpop.f32.mrb[211].mxu0  ;;  %v2422_v21 = vmin.f32 %v9042_v6, 0.0  ;;  %v6541_v12 = vpop.f32.mrb[211].mxu1 }
 0x2b1   : > { %4987 = vst.msk [vmem:[%s7488_s23 + $0x310] sm:$0xf] %vm4790_vm2, %v5977_v50  ;;  %v3810_v18 = vmul.f32 1.050701, %v3596_v45  ;;  %7052 = vpow2.f32 %v2618_v7  ;;  %v2834_v62 = vmul.f32 1.442695, %v2421_v20 }
 0x2b2   : > { %4880 = vst.msk [vmem:[%s7488_s23 + $0x164] sm:$0xf] %vm4790_vm2, %v5870_v25  ;;  %4988 = vst.msk [vmem:[%s7488_s23 + $0x314] sm:$0xf] %vm4790_vm2, %v5978_v2  ;;  %v2315_v17 = vmin.f32 %v9050_v10, 0.0  ;;  %v7051_v9 = vpop.eup %7050  ;;  %v2423_v13 = vmin.f32 %v9052_v28, 0.0 }
 0x2b3   : > { %v5871_v48 = vpack.c.bf16 %v3810_v18, %v3810_v18  ;;  %7054 = vpow2.f32 %v2834_v62  ;;  %v2620_v54 = vmul.f32 1.442695, %v2314_v41  ;;  %v2836_v55 = vmul.f32 1.442695, %v2422_v21  ;;  %v9278_v22 = vpop.f32.mrb[212].mxu0 }
 0x2b4   : > { %v2622_v61 = vmul.f32 1.442695, %v2315_v17  ;;  %v5548_v5 = vadd.f32 -1.0, %v7051_v9  ;;  %v2316_v4 = vmin.f32 %v9077_v34, 0.0  ;;  %v2838_v23 = vmul.f32 1.442695, %v2423_v13 }
 0x2b5   : > { %4881 = vst.msk [vmem:[%s7488_s23 + $0x168] sm:$0xf] %vm4790_vm2, %v5871_v48  ;;  %7056 = vpow2.f32 %v2620_v54  ;;  %v2424_v11 = vmin.f32 %v9079_v33, 0.0  ;;  %v6328_v36 = vpop.f32.mrb[213].mxu0  ;;  %v2317_v14 = vmin.f32 %v9088_v26, 0.0  ;;  %vm3490_vm1 = vcmp.gt.f32.partialorder %v9013_v19, 0.0 }
 0x2b6   : > { %7058 = vpow2.f32 %v2836_v55  ;;  %v3276_v16 = vmul.f32 1.6732632, %v5548_v5  ;;  %v2624_v56 = vmul.f32 1.442695, %v2316_v4  ;;  %v9282_v37 = vpop.f32.mrb[214].mxu0  ;;  %v2425_v43 = vmin.f32 %v9094_v1, 0.0 }
 0x2b7   : > { %7060 = vpow2.f32 %v2622_v61  ;;  %v2840_v47 = vmul.f32 1.442695, %v2424_v11  ;;  %v6329_v50 = vpop.f32.mrb[215].mxu0  ;;  %vm3383_vm15 = vcmp.gt.f32.partialorder %v9018_v51, 0.0  ;;  %v2626_v20 = vmul.f32 1.442695, %v2317_v14 }
 0x2b8   : > { %7062 = vpow2.f32 %v2838_v23  ;;  %v3704_v7 = vsel %vm3490_vm1, %v9013_v19, %v3276_v16  ;;  %v2842_v31 = vmul.f32 1.442695, %v2425_v43  ;;  %v2318_v25 = vmin.f32 %v9115_v27, 0.0 }
 0x2b9   : > { %7064 = vpow2.f32 %v2624_v56  ;;  %v3918_v39 = vmul.f32 1.050701, %v3704_v7  ;;  %vm3491_vm3 = vcmp.gt.f32.partialorder %v9020_v32, 0.0  ;;  %vm3384_vm4 = vcmp.gt.f32.partialorder %v9040_v49, 0.0 }
 0x2ba   : > { %7066 = vpow2.f32 %v2840_v47  ;;  %v2426_v45 = vmin.f32 %v9121_v42, 0.0  ;;  %vm3492_vm5 = vcmp.gt.f32.partialorder %v9042_v6, 0.0  ;;  %v2628_v62 = vmul.f32 1.442695, %v2318_v25 }
 0x2bb   : > { %v7053_v2 = vpop.eup %7052  ;;  %7068 = vpow2.f32 %v2626_v20  ;;  %v5979_v18 = vpack.c.bf16 %v3918_v39, %v3918_v39  ;;  %vm3385_vm6 = vcmp.gt.f32.partialorder %v9050_v10, 0.0  ;;  %v2319_v21 = vmin.f32 %v9126_v57, 0.0 }
 0x2bc   : > { %v5441_v19 = vadd.f32 -1.0, %v7053_v2  ;;  %7070 = vpow2.f32 %v2842_v31  ;;  %v2844_v46 = vmul.f32 1.442695, %v2426_v45  ;;  %v2427_v17 = vmin.f32 %v9131_v52, 0.0 }
 0x2bd   : > { %v7055_v41 = vpop.eup %7054  ;;  %4989 = vst.msk [vmem:[%s7488_s23 + $0x318] sm:$0xf] %vm4790_vm2, %v5979_v18  ;;  %vm3493_vm7 = vcmp.gt.f32.partialorder %v9052_v28, 0.0  ;;  %7072 = vpow2.f32 %v2628_v62  ;;  %v2630_v9 = vmul.f32 1.442695, %v2319_v21  ;;  %v2320_v61 = vmin.f32 %v9143_v58, 0.0 }
 0x2be   : > { %v3169_v12 = vmul.f32 1.6732632, %v5441_v19  ;;  %v5549_v48 = vadd.f32 -1.0, %v7055_v41  ;;  %7074 = vpow2.f32 %v2844_v46  ;;  %v2846_v55 = vmul.f32 1.442695, %v2427_v17 }
 0x2bf   : > { %v7057_v54 = vpop.eup %7056  ;;  %vm3386_vm8 = vcmp.gt.f32.partialorder %v9077_v34, 0.0  ;;  %vm3494_vm9 = vcmp.gt.f32.partialorder %v9079_v33, 0.0  ;;  %7076 = vpow2.f32 %v2630_v9  ;;  %v2632_v56 = vmul.f32 1.442695, %v2320_v61 }
 0x2c0   : > { %v7059_v13 = vpop.eup %7058  ;;  %v3597_v5 = vsel %vm3383_vm15, %v9018_v51, %v3169_v12  ;;  %v3277_v4 = vmul.f32 1.6732632, %v5549_v48  ;;  %v5442_v23 = vadd.f32 -1.0, %v7057_v54  ;;  %vm3387_vm10 = vcmp.gt.f32.partialorder %v9088_v26, 0.0 }
 0x2c1   : > { %v7061_v11 = vpop.eup %7060  ;;  %v3811_v36 = vmul.f32 1.050701, %v3597_v5  ;;  %v5550_v16 = vadd.f32 -1.0, %v7059_v13  ;;  %7078 = vpow2.f32 %v2846_v55  ;;  %vm3495_vm11 = vcmp.gt.f32.partialorder %v9094_v1, 0.0 }
 0x2c2   : > { %v7063_v14 = vpop.eup %7062  ;;  %v3705_v47 = vsel %vm3491_vm3, %v9020_v32, %v3277_v4  ;;  %v3170_v43 = vmul.f32 1.6732632, %v5442_v23  ;;  %v5443_v50 = vadd.f32 -1.0, %v7061_v11  ;;  %7080 = vpow2.f32 %v2632_v56 }
 0x2c3   : > { %v7065_v51 = vpop.eup %7064  ;;  %v5872_v7 = vpack.c.bf16 %v3811_v36, %v3811_v36  ;;  %v3919_v20 = vmul.f32 1.050701, %v3705_v47  ;;  %v3278_v39 = vmul.f32 1.6732632, %v5550_v16  ;;  %v5551_v31 = vadd.f32 -1.0, %v7063_v14 }
 0x2c4   : > { %v7067_v25 = vpop.eup %7066  ;;  %v3598_v2 = vsel %vm3384_vm4, %v9040_v49, %v3170_v43  ;;  %v3171_v45 = vmul.f32 1.6732632, %v5443_v50  ;;  %v5444_v18 = vadd.f32 -1.0, %v7065_v51  ;;  %vm3388_vm0 = vcmp.gt.f32.partialorder %v9115_v27, 0.0 }
 0x2c5   : > { %v7069_v32 = vpop.eup %7068  ;;  %4882 = vst.msk [vmem:[%s7488_s23 + $0x16c] sm:$0xf] %vm4790_vm2, %v5872_v7  ;;  %v5980_v19 = vpack.c.bf16 %v3919_v20, %v3919_v20  ;;  %v3812_v62 = vmul.f32 1.050701, %v3598_v2  ;;  %v3706_v41 = vsel %vm3492_vm5, %v9042_v6, %v3278_v39  ;;  %v3279_v46 = vmul.f32 1.6732632, %v5551_v31 }
 0x2c6   : > { %vm3496_vm12 = vcmp.gt.f32.partialorder %v9121_v42, 0.0  ;;  %v7071_v49 = vpop.eup %7070  ;;  %v3920_v21 = vmul.f32 1.050701, %v3706_v41  ;;  %v3599_v17 = vsel %vm3385_vm6, %v9050_v10, %v3171_v45  ;;  %v3172_v12 = vmul.f32 1.6732632, %v5444_v18 }
 0x2c7   : > { %v5552_v48 = vadd.f32 -1.0, %v7067_v25  ;;  %4990 = vst.msk [vmem:[%s7488_s23 + $0x31c] sm:$0xf] %vm4790_vm2, %v5980_v19  ;;  %v5873_v54 = vpack.c.bf16 %v3812_v62, %v3812_v62  ;;  %v3813_v9 = vmul.f32 1.050701, %v3599_v17  ;;  %v3707_v6 = vsel %vm3493_vm7, %v9052_v28, %v3279_v46  ;;  %v7073_v61 = vpop.eup %7072 }
 0x2c8   : > { %v5445_v55 = vadd.f32 -1.0, %v7069_v32  ;;  %v5981_v13 = vpack.c.bf16 %v3920_v21, %v3920_v21  ;;  %v3921_v5 = vmul.f32 1.050701, %v3707_v6  ;;  %v3600_v10 = vsel %vm3386_vm8, %v9077_v34, %v3172_v12  ;;  %v7075_v23 = vpop.eup %7074 }
 0x2c9   : > { %v3280_v4 = vmul.f32 1.6732632, %v5552_v48  ;;  %vm3389_vm13 = vcmp.gt.f32.partialorder %v9126_v57, 0.0  ;;  %4883 = vst.msk [vmem:[%s7488_s23 + $0x170] sm:$0xf] %vm4790_vm2, %v5873_v54  ;;  %v5874_v11 = vpack.c.bf16 %v3813_v9, %v3813_v9  ;;  %v5553_v28 = vadd.f32 -1.0, %v7071_v49  ;;  %v7077_v43 = vpop.eup %7076 }
 0x2ca   : > { %v3814_v36 = vmul.f32 1.050701, %v3600_v10  ;;  %v3173_v16 = vmul.f32 1.6732632, %v5445_v55  ;;  %4991 = vst.msk [vmem:[%s7488_s23 + $0x320] sm:$0xf] %vm4790_vm2, %v5981_v13  ;;  %v5982_v56 = vpack.c.bf16 %v3921_v5, %v3921_v5 }
 0x2cb   : > { %v3708_v14 = vsel %vm3494_vm9, %v9079_v33, %v3280_v4  ;;  %v5446_v34 = vadd.f32 -1.0, %v7073_v61  ;;  %v5554_v47 = vadd.f32 -1.0, %v7075_v23  ;;  %4884 = vst.msk [vmem:[%s7488_s23 + $0x174] sm:$0xf] %vm4790_vm2, %v5874_v11  ;;  %v3281_v20 = vmul.f32 1.6732632, %v5553_v28  ;;  %v7079_v39 = vpop.eup %7078 }
 0x2cc   : > { %v5875_v50 = vpack.c.bf16 %v3814_v36, %v3814_v36  ;;  %v3922_v51 = vmul.f32 1.050701, %v3708_v14  ;;  %v3601_v7 = vsel %vm3387_vm10, %v9088_v26, %v3173_v16  ;;  %4992 = vst.msk [vmem:[%s7488_s23 + $0x324] sm:$0xf] %vm4790_vm2, %v5982_v56  ;;  %v5447_v18 = vadd.f32 -1.0, %v7077_v43  ;;  %v7081_v19 = vpop.eup %7080 }
 0x2cd   : > { %v3815_v31 = vmul.f32 1.050701, %v3601_v7  ;;  %v3174_v25 = vmul.f32 1.6732632, %v5446_v34  ;;  %v3282_v33 = vmul.f32 1.6732632, %v5554_v47  ;;  %v3709_v45 = vsel %vm3495_vm11, %v9094_v1, %v3281_v20 }
 0x2ce   : > { %4885 = vst.msk [vmem:[%s7488_s23 + $0x178] sm:$0xf] %vm4790_vm2, %v5875_v50  ;;  %v5983_v2 = vpack.c.bf16 %v3922_v51, %v3922_v51  ;;  %v5555_v32 = vadd.f32 -1.0, %v7079_v39  ;;  %v3923_v62 = vmul.f32 1.050701, %v3709_v45  ;;  %v5448_v48 = vadd.f32 -1.0, %v7081_v19 }
 0x2cf   : > { %v5876_v26 = vpack.c.bf16 %v3815_v31, %v3815_v31  ;;  %v3602_v41 = vsel %vm3388_vm0, %v9115_v27, %v3174_v25  ;;  %v3710_v46 = vsel %vm3496_vm12, %v9121_v42, %v3282_v33  ;;  %v3175_v1 = vmul.f32 1.6732632, %v5447_v18 }
 0x2d0   : > { %4993 = vst.msk [vmem:[%s7488_s23 + $0x328] sm:$0xf] %vm4790_vm2, %v5983_v2  ;;  %v3816_v49 = vmul.f32 1.050701, %v3602_v41  ;;  %v3924_v21 = vmul.f32 1.050701, %v3710_v46  ;;  %v5984_v17 = vpack.c.bf16 %v3923_v62, %v3923_v62 }
 0x2d1   : > { %4886 = vst.msk [vmem:[%s7488_s23 + $0x17c] sm:$0xf] %vm4790_vm2, %v5876_v26  ;;  %v3283_v12 = vmul.f32 1.6732632, %v5555_v32  ;;  %v2428_v54 = vmin.f32 %v9145_v53, 0.0  ;;  %v3603_v42 = vsel %vm3389_vm13, %v9126_v57, %v3175_v1  ;;  %vm3497_vm14 = vcmp.gt.f32.partialorder %v9131_v52, 0.0 }
 0x2d2   : > { %v5877_v9 = vpack.c.bf16 %v3816_v49, %v3816_v49  ;;  %v5985_v27 = vpack.c.bf16 %v3924_v21, %v3924_v21  ;;  %4994 = vst.msk [vmem:[%s7488_s23 + $0x32c] sm:$0xf] %vm4790_vm2, %v5984_v17  ;;  %v3817_v6 = vmul.f32 1.050701, %v3603_v42  ;;  %v3176_v61 = vmul.f32 1.6732632, %v5448_v48 }
 0x2d3   : > { %v3711_v55 = vsel %vm3497_vm14, %v9131_v52, %v3283_v12  ;;  %v2848_v13 = vmul.f32 1.442695, %v2428_v54  ;;  %vm3390_vm1 = vcmp.gt.f32.partialorder %v9143_v58, 0.0  ;;  %v2321_v57 = vmin.f32 %v9150_v35, 0.0 }
 0x2d4   : > { %4887 = vst.msk [vmem:[%s7488_s23 + $0x180] sm:$0xf] %vm4790_vm2, %v5877_v9  ;;  %4995 = vst.msk [vmem:[%s7488_s23 + $0x330] sm:$0xf] %vm4790_vm2, %v5985_v27  ;;  %v3925_v5 = vmul.f32 1.050701, %v3711_v55  ;;  %v5878_v4 = vpack.c.bf16 %v3817_v6, %v3817_v6  ;;  %v3604_v23 = vsel %vm3390_vm1, %v9143_v58, %v3176_v61 }
 0x2d5   : > { %v2429_v10 = vmin.f32 %v9152_v0, 0.0  ;;  %7082 = vpow2.f32 %v2848_v13  ;;  %v3818_v11 = vmul.f32 1.050701, %v3604_v23  ;;  %v2634_v36 = vmul.f32 1.442695, %v2321_v57 }
 0x2d6   : > { %v5986_v52 = vpack.c.bf16 %v3925_v5, %v3925_v5  ;;  %4888 = vst.msk [vmem:[%s7488_s23 + $0x184] sm:$0xf] %vm4790_vm2, %v5878_v4  ;;  %v2322_v28 = vmin.f32 %v9167_v3, 0.0  ;;  %v2430_v56 = vmin.f32 %v9169_v60, 0.0  ;;  %v2323_v34 = vmin.f32 %v9179_v38, 0.0 }
 0x2d7   : > { %v2850_v16 = vmul.f32 1.442695, %v2429_v10  ;;  %v5879_v14 = vpack.c.bf16 %v3818_v11, %v3818_v11  ;;  %7084 = vpow2.f32 %v2634_v36  ;;  %v2431_v43 = vmin.f32 %v9185_v59, 0.0 }
 0x2d8   : > { %4996 = vst.msk [vmem:[%s7488_s23 + $0x334] sm:$0xf] %vm4790_vm2, %v5986_v52  ;;  %v2636_v58 = vmul.f32 1.442695, %v2322_v28  ;;  %v2852_v47 = vmul.f32 1.442695, %v2430_v56 }
 0x2d9   : > { %7086 = vpow2.f32 %v2850_v16  ;;  %4889 = vst.msk [vmem:[%s7488_s23 + $0x188] sm:$0xf] %vm4790_vm2, %v5879_v14  ;;  %v2638_v50 = vmul.f32 1.442695, %v2323_v34  ;;  %v2324_v51 = vmin.f32 %v9205_v8, 0.0  ;;  %v2432_v20 = vmin.f32 %v9207_v44, 0.0 }
 0x2da   : > { %7088 = vpow2.f32 %v2636_v58  ;;  %v2854_v7 = vmul.f32 1.442695, %v2431_v43  ;;  %v2325_v31 = vmin.f32 %v9219_v15, 0.0  ;;  %vm3498_vm15 = vcmp.gt.f32.partialorder %v9145_v53, 0.0 }
 0x2db   : > { %7090 = vpow2.f32 %v2852_v47  ;;  %v2640_v39 = vmul.f32 1.442695, %v2324_v51  ;;  %v2856_v25 = vmul.f32 1.442695, %v2432_v20  ;;  %v2433_v33 = vmin.f32 %v9221_v29, 0.0 }
 0x2dc   : > { %7092 = vpow2.f32 %v2638_v50  ;;  %vm3391_vm3 = vcmp.gt.f32.partialorder %v9150_v35, 0.0  ;;  %v2642_v2 = vmul.f32 1.442695, %v2325_v31  ;;  %v2326_v45 = vmin.f32 %v9250_v40, 0.0 }
 0x2dd   : > { %7094 = vpow2.f32 %v2854_v7  ;;  %vm3499_vm4 = vcmp.gt.f32.partialorder %v9152_v0, 0.0  ;;  %v2858_v32 = vmul.f32 1.442695, %v2433_v33  ;;  %v2434_v19 = vmin.f32 %v9252_v63, 0.0 }
 0x2de   : > { %7096 = vpow2.f32 %v2640_v39  ;;  %v2644_v62 = vmul.f32 1.442695, %v2326_v45  ;;  %v2327_v41 = vmin.f32 %v9261_v30, 0.0  ;;  %vm3392_vm5 = vcmp.gt.f32.partialorder %v9167_v3, 0.0 }
 0x2df   : > { %v7083_v18 = vpop.eup %7082  ;;  %7098 = vpow2.f32 %v2856_v25  ;;  %v2860_v46 = vmul.f32 1.442695, %v2434_v19  ;;  %v2435_v49 = vmin.f32 %v9263_v24, 0.0  ;;  %vm3500_vm6 = vcmp.gt.f32.partialorder %v9169_v60, 0.0 }
 0x2e0   : > { %v5556_v26 = vadd.f32 -1.0, %v7083_v18  ;;  %7100 = vpow2.f32 %v2642_v2  ;;  %v2646_v17 = vmul.f32 1.442695, %v2327_v41  ;;  %vm3393_vm7 = vcmp.gt.f32.partialorder %v9179_v38, 0.0 }
 0x2e1   : > { %v7085_v21 = vpop.eup %7084  ;;  %7102 = vpow2.f32 %v2858_v32  ;;  %v2862_v54 = vmul.f32 1.442695, %v2435_v49  ;;  %v2328_v9 = vmin.f32 %v9278_v22, 0.0  ;;  %vm3501_vm8 = vcmp.gt.f32.partialorder %v9185_v59, 0.0 }
 0x2e2   : > { %v3284_v1 = vmul.f32 1.6732632, %v5556_v26  ;;  %v5449_v48 = vadd.f32 -1.0, %v7085_v21  ;;  %7104 = vpow2.f32 %v2644_v62  ;;  %vm3394_vm9 = vcmp.gt.f32.partialorder %v9205_v8, 0.0 }
 0x2e3   : > { %v7087_v12 = vpop.eup %7086  ;;  %7106 = vpow2.f32 %v2860_v46  ;;  %v2648_v13 = vmul.f32 1.442695, %v2328_v9  ;;  %vm3502_vm10 = vcmp.gt.f32.partialorder %v9207_v44, 0.0  ;;  %v2329_v11 = vmin.f32 %v9282_v37, 0.0 }
 0x2e4   : > { %v3712_v27 = vsel %vm3498_vm15, %v9145_v53, %v3284_v1  ;;  %v5557_v42 = vadd.f32 -1.0, %v7087_v12  ;;  %v7089_v6 = vpop.eup %7088  ;;  %v3177_v61 = vmul.f32 1.6732632, %v5449_v48  ;;  %7108 = vpow2.f32 %v2646_v17 }
 0x2e5   : > { %v3926_v55 = vmul.f32 1.050701, %v3712_v27  ;;  %v7091_v5 = vpop.eup %7090  ;;  %v5450_v10 = vadd.f32 -1.0, %v7089_v6  ;;  %7110 = vpow2.f32 %v2862_v54  ;;  %vm3395_vm11 = vcmp.gt.f32.partialorder %v9219_v15, 0.0 }
 0x2e6   : > { %v3285_v57 = vmul.f32 1.6732632, %v5557_v42  ;;  %v7093_v4 = vpop.eup %7092  ;;  %v3605_v53 = vsel %vm3391_vm3, %v9150_v35, %v3177_v61  ;;  %v5558_v52 = vadd.f32 -1.0, %v7091_v5  ;;  %7112 = vpow2.f32 %v2648_v13 }
 0x2e7   : > { %v5987_v23 = vpack.c.bf16 %v3926_v55, %v3926_v55  ;;  %v7095_v36 = vpop.eup %7094  ;;  %v3819_v16 = vmul.f32 1.050701, %v3605_v53  ;;  %v3178_v56 = vmul.f32 1.6732632, %v5450_v10  ;;  %v5451_v14 = vadd.f32 -1.0, %v7093_v4 }
 0x2e8   : > { %v3713_v28 = vsel %vm3499_vm4, %v9152_v0, %v3285_v57  ;;  %v7097_v34 = vpop.eup %7096  ;;  %v3286_v35 = vmul.f32 1.6732632, %v5558_v52  ;;  %v5559_v47 = vadd.f32 -1.0, %v7095_v36  ;;  %vm3503_vm0 = vcmp.gt.f32.partialorder %v9221_v29, 0.0 }
 0x2e9   : > { %4997 = vst.msk [vmem:[%s7488_s23 + $0x338] sm:$0xf] %vm4790_vm2, %v5987_v23  ;;  %v3927_v58 = vmul.f32 1.050701, %v3713_v28  ;;  %v7099_v43 = vpop.eup %7098  ;;  %v5880_v50 = vpack.c.bf16 %v3819_v16, %v3819_v16  ;;  %v3606_v51 = vsel %vm3392_vm5, %v9167_v3, %v3178_v56  ;;  %v3179_v7 = vmul.f32 1.6732632, %v5451_v14 }
 0x2ea   : > { %v5452_v0 = vadd.f32 -1.0, %v7097_v34  ;;  %v7101_v20 = vpop.eup %7100  ;;  %v3820_v31 = vmul.f32 1.050701, %v3606_v51  ;;  %v3714_v25 = vsel %vm3500_vm6, %v9169_v60, %v3286_v35  ;;  %v3287_v33 = vmul.f32 1.6732632, %v5559_v47 }
 0x2eb   : > { %v5988_v39 = vpack.c.bf16 %v3927_v58, %v3927_v58  ;;  %vm3396_vm12 = vcmp.gt.f32.partialorder %v9250_v40, 0.0  ;;  %vm3504_vm13 = vcmp.gt.f32.partialorder %v9252_v63, 0.0  ;;  %v7103_v2 = vpop.eup %7102  ;;  %4890 = vst.msk [vmem:[%s7488_s23 + $0x18c] sm:$0xf] %vm4790_vm2, %v5880_v50  ;;  %v3928_v3 = vmul.f32 1.050701, %v3714_v25 }
 0x2ec   : > { %v3607_v45 = vsel %vm3393_vm7, %v9179_v38, %v3179_v7  ;;  %v3180_v18 = vmul.f32 1.6732632, %v5452_v0  ;;  %v5560_v32 = vadd.f32 -1.0, %v7099_v43  ;;  %v7105_v19 = vpop.eup %7104  ;;  %v5881_v60 = vpack.c.bf16 %v3820_v31, %v3820_v31 }
 0x2ed   : > { %4998 = vst.msk [vmem:[%s7488_s23 + $0x33c] sm:$0xf] %vm4790_vm2, %v5988_v39  ;;  %v3821_v26 = vmul.f32 1.050701, %v3607_v45  ;;  %v3715_v62 = vsel %vm3501_vm8, %v9185_v59, %v3287_v33  ;;  %v5453_v41 = vadd.f32 -1.0, %v7101_v20  ;;  %v7107_v46 = vpop.eup %7106  ;;  %v5989_v49 = vpack.c.bf16 %v3928_v3, %v3928_v3 }
 0x2ee   : > { %v3929_v21 = vmul.f32 1.050701, %v3715_v62  ;;  %v3608_v38 = vsel %vm3394_vm9, %v9205_v8, %v3180_v18  ;;  %v3288_v1 = vmul.f32 1.6732632, %v5560_v32  ;;  %vm3397_vm14 = vcmp.gt.f32.partialorder %v9261_v30, 0.0  ;;  %v7109_v17 = vpop.eup %7108 }
 0x2ef   : > { %4891 = vst.msk [vmem:[%s7488_s23 + $0x190] sm:$0xf] %vm4790_vm2, %v5881_v60  ;;  %v5882_v12 = vpack.c.bf16 %v3821_v26, %v3821_v26  ;;  %v3822_v48 = vmul.f32 1.050701, %v3608_v38  ;;  %v3181_v54 = vmul.f32 1.6732632, %v5453_v41  ;;  %v7111_v9 = vpop.eup %7110 }
 0x2f0   : > { %v5561_v59 = vadd.f32 -1.0, %v7103_v2  ;;  %4999 = vst.msk [vmem:[%s7488_s23 + $0x340] sm:$0xf] %vm4790_vm2, %v5989_v49  ;;  %v5990_v27 = vpack.c.bf16 %v3929_v21, %v3929_v21  ;;  %v3716_v8 = vsel %vm3502_vm10, %v9207_v44, %v3288_v1  ;;  %v5454_v42 = vadd.f32 -1.0, %v7105_v19  ;;  %v7113_v23 = vpop.eup %7112 }
 0x2f1   : > { %v5562_v6 = vadd.f32 -1.0, %v7107_v46  ;;  %4892 = vst.msk [vmem:[%s7488_s23 + $0x194] sm:$0xf] %vm4790_vm2, %v5882_v12  ;;  %v5883_v55 = vpack.c.bf16 %v3822_v48, %v3822_v48  ;;  %v3930_v61 = vmul.f32 1.050701, %v3716_v8  ;;  %v3609_v13 = vsel %vm3395_vm11, %v9219_v15, %v3181_v54 }
 0x2f2   : > { %v3289_v5 = vmul.f32 1.6732632, %v5561_v59  ;;  %5000 = vst.msk [vmem:[%s7488_s23 + $0x344] sm:$0xf] %vm4790_vm2, %v5990_v27  ;;  %v3823_v57 = vmul.f32 1.050701, %v3609_v13 }
 0x2f3   : > { %v3182_v10 = vmul.f32 1.6732632, %v5454_v42  ;;  %v3290_v4 = vmul.f32 1.6732632, %v5562_v6  ;;  %4893 = vst.msk [vmem:[%s7488_s23 + $0x198] sm:$0xf] %vm4790_vm2, %v5883_v55  ;;  %v5991_v44 = vpack.c.bf16 %v3930_v61, %v3930_v61 }
 0x2f4   : > { %v3717_v53 = vsel %vm3503_vm0, %v9221_v29, %v3289_v5  ;;  %v5455_v52 = vadd.f32 -1.0, %v7109_v17  ;;  %v5563_v36 = vadd.f32 -1.0, %v7111_v9  ;;  %v5884_v16 = vpack.c.bf16 %v3823_v57, %v3823_v57 }
 0x2f5   : > { %v3931_v15 = vmul.f32 1.050701, %v3717_v53  ;;  %v3610_v28 = vsel %vm3396_vm12, %v9250_v40, %v3182_v10  ;;  %v3718_v56 = vsel %vm3504_vm13, %v9252_v63, %v3290_v4  ;;  %5001 = vst.msk [vmem:[%s7488_s23 + $0x348] sm:$0xf] %vm4790_vm2, %v5991_v44  ;;  %v5456_v47 = vadd.f32 -1.0, %v7113_v23 }
 0x2f6   : > { %v3824_v14 = vmul.f32 1.050701, %v3610_v28  ;;  %v3932_v34 = vmul.f32 1.050701, %v3718_v56  ;;  %v3183_v58 = vmul.f32 1.6732632, %v5455_v52 }
 0x2f7   : > { %4894 = vst.msk [vmem:[%s7488_s23 + $0x19c] sm:$0xf] %vm4790_vm2, %v5884_v16  ;;  %v5992_v29 = vpack.c.bf16 %v3931_v15, %v3931_v15  ;;  %v3291_v35 = vmul.f32 1.6732632, %v5563_v36  ;;  %v2650_v43 = vmul.f32 1.442695, %v2329_v11 }
 0x2f8   : > { %v5885_v40 = vpack.c.bf16 %v3824_v14, %v3824_v14  ;;  %v5993_v50 = vpack.c.bf16 %v3932_v34, %v3932_v34  ;;  %v3611_v63 = vsel %vm3397_vm14, %v9261_v30, %v3183_v58  ;;  %vm3505_vm1 = vcmp.gt.f32.partialorder %v9263_v24, 0.0 }
 0x2f9   : > { %5002 = vst.msk [vmem:[%s7488_s23 + $0x34c] sm:$0xf] %vm4790_vm2, %v5992_v29  ;;  %v3825_v51 = vmul.f32 1.050701, %v3611_v63  ;;  %v3719_v7 = vsel %vm3505_vm1, %v9263_v24, %v3291_v35  ;;  %v3184_v0 = vmul.f32 1.6732632, %v5456_v47  ;;  %7114 = vpow2.f32 %v2650_v43 }
 0x2fa   : > { %4895 = vst.msk [vmem:[%s7488_s23 + $0x1a0] sm:$0xf] %vm4790_vm2, %v5885_v40  ;;  %5003 = vst.msk [vmem:[%s7488_s23 + $0x350] sm:$0xf] %vm4790_vm2, %v5993_v50  ;;  %v3933_v11 = vmul.f32 1.050701, %v3719_v7 }
 0x2fb   : > { %vm3398_vm15 = vcmp.gt.f32.partialorder %v9278_v22, 0.0  ;;  %v5886_v30 = vpack.c.bf16 %v3825_v51, %v3825_v51  ;;  %vm3399_vm3 = vcmp.gt.f32.partialorder %v9282_v37, 0.0 }
 0x2fc   : > { %v3612_v20 = vsel %vm3398_vm15, %v9278_v22, %v3184_v0  ;;  %v5994_v39 = vpack.c.bf16 %v3933_v11, %v3933_v11 }
 0x2fd   : > { %v3826_v31 = vmul.f32 1.050701, %v3612_v20  ;;  %4896 = vst.msk [vmem:[%s7488_s23 + $0x1a4] sm:$0xf] %vm4790_vm2, %v5886_v30 }
 0x2fe   : > { %5004 = vst.msk [vmem:[%s7488_s23 + $0x354] sm:$0xf] %vm4790_vm2, %v5994_v39 }
 0x2ff   : > { %v5887_v24 = vpack.c.bf16 %v3826_v31, %v3826_v31 }
 0x301   : > { %4897 = vst.msk [vmem:[%s7488_s23 + $0x1a8] sm:$0xf] %vm4790_vm2, %v5887_v24 }
 0x303   : > { %v7115_v25 = vpop.eup %7114 }
 0x304   : > { %v5457_v33 = vadd.f32 -1.0, %v7115_v25 }
 0x306   : > { %v3185_v2 = vmul.f32 1.6732632, %v5457_v33 }
 0x308   : > { %v3613_v3 = vsel %vm3399_vm3, %v9282_v37, %v3185_v2 }
 0x309   : > { %v3827_v45 = vmul.f32 1.050701, %v3613_v3 }
 0x30b   : > { %v5888_v18 = vpack.c.bf16 %v3827_v45, %v3827_v45 }
 0x30d   : > { %4898 = vst.msk [vmem:[%s7488_s23 + $0x1ac] sm:$0xf] %vm4790_vm2, %v5888_v18 }
 0x30e PF: > { %s12_s11 = sadd.s32 1, %s7138_s11   ;;  %s9507_s9 = smov %s7134_s10 }
 0x30f   : > { %p9_p5 = scmp.ge.s32.totalorder %s12_s11, 6   ;;  %s9508_s10 = smov %s9510_s12 }
 0x311   :  { %11 = sbr.rel (!%p9_p5) target bundleno = 2 (0x2), region = 61 }

// kernel: netG_forward.15
= control target key start
LH: loop header
LB: loop body
LE: loop exit
PB: predicated region body
PF: predicated region fallthrough
CT: control target
= control target key end

     0   :  { %7 = vsyncpa [#allocation3], 0  ;;  %s5881_s0 = inlined_call_operand.hbm [shape: bf16[4,8192,32], index: 0, kind: input, shape index: {}]   ;;  %s5882_s1 = inlined_call_operand.hbm [shape: bf16[4,32,8], index: 1, kind: input, shape index: {}]   ;;  %s5883_s2 = inlined_call_operand.vmem [shape: f32[4,8192,8], index: 2, kind: output, shape index: {}]  }
   0x1   :  { %9 = vsyncpa [#allocation3 + $0x1], 0 }
   0x2   :  { %10 = vsyncpa [#allocation5], 0 }
   0x3   :  { %12 = vsyncpa [#allocation5 + $0x1], 0  ;;  %s4845_s9 = smov 0   ;;  %s4847_s10 = smov 0  }
   0x4   :  { %s4849_s11 = smov 0   ;;  %s4851_s12 = smov 0  }
   0x5   :  { %s4853_s13 = smov 0   ;;  %s4855_s14 = smov 0  }
   0x6   :  { %s4857_s15 = smov 0   ;;  %s4859_s16 = smov 0  }
   0x7   :  { %s4861_s17 = smov 0   ;;  %s4863_s18 = smov 0  }
   0x8   :  { %s4865_s19 = smov 0  }
   0x9 LB: > { %s3254_s20 = sadd.s32 4294967295, %s4824_s19   ;;  %s33_s21 = sadd.s32 1, %s4816_s17  ;;  %s4824_s19 = sphi %s4865_s19, %s18_s19   ;;  %s4820_s18 = sphi %s4863_s18, %s5912_s18   ;;  %s4816_s17 = sphi %s4861_s17, %s5911_s17   ;;  %s4812_s16 = sphi %s4859_s16, %s5910_s16   ;;  %s4808_s15 = sphi %s4857_s15, %s5909_s15   ;;  %s4804_s14 = sphi %s4855_s14, %s5908_s14   ;;  %s4800_s13 = sphi %s4853_s13, %s5907_s13   ;;  %s4796_s12 = sphi %s4851_s12, %s5906_s12   ;;  %s4792_s11 = sphi %s4849_s11, %s5905_s11   ;;  %s4788_s10 = sphi %s4847_s10, %s5904_s10   ;;  %s4784_s9 = sphi %s4845_s9, %s5903_s9  }
   0xa   : > { %p35_p0 = scmp.ge.s32.totalorder %s33_s21, 4  ;;  %s37_s22 = sadd.s32 1, %s4820_s18 }
   0xb   : > { %s46_s23 = sadd.s32 1, %s4804_s14  ;;  %p53_p1 = scmp.ne.s32.totalorder %s4804_s14, %s4800_s13 }
   0xc   : > { %s5914_s21 = smov (%p35_p0, %s33_s21), 0  ;;  %s5916_s22 = smov (!%p35_p0, %s37_s22), %s4820_s18 }
   0xd   : > { %s42_s24 = ssub.s32 %s4816_s17, %s5914_s21  ;;  %p5886_p2 = scmp.eq.s32.totalorder %s4824_s19, 0 }
   0xe   : > { %p39_p3 = scmp.ge.s32.totalorder %s5916_s22, 4  ;;  %p59_p4 = scmp.ne.s32.totalorder %s4800_s13, %s4796_s12 }
   0xf   : > { %p4913_p5 = por %p5886_p2, %p53_p1  ;;  %p4917_p6 = scmp.eq.s32.totalorder %s3254_s20, 0 }
  0x10   : > { %s5918_s22 = smov (%p39_p3, %s5916_s22), 0  ;;  %p5885_p8 = scmp.lt.s32.totalorder %s4824_s19, 16 }
  0x11   : > { %5891 = sst [smem:[#allocation8_spill]] %s5918_s22  ;;  %p4925_p7 = por %p4917_p6, %p59_p4 }
  0x12   : > { %s4931_s28 = ssub.s32 %s4820_s18, %s5918_s22  ;;  %s141_s30 = sand.u32 1, %s4804_s14  }
  0x13   : > { %s5892_s27 = scalar_select %p4925_p7, 1, 0 }
  0x14   : > { %s43_s29 = sor.u32 %s42_s24, %s4931_s28  ;;  %s3258_s3 = sshll.u32 %s141_s30, 10 }
  0x15   : > { %p44_p10 = scmp.eq.s32.totalorder %s43_s29, 0  ;;  %s3259_s5 = sshll.u32 %s4816_s17, 8 }
  0x16   : > { %s3260_s6 = sshll.u32 %s4820_s18, 10  ;;  %s145_s7 = scalar_lea.vmem [#allocation2], %s3258_s3 }
  0x17   : > { %s4938_s4 = scalar_select %p44_p10, %s4804_s14, %s46_s23  }
  0x18   : > { %s154_s8 = sshll.u32 %s145_s7, 4  ;;  %s151_s12 = sadd.s32 %s3260_s6, %s3259_s5  ;;  %s4942_s8 = int_to_ptr.vmem [resolvable:$true] %s154_s8 }
  0x19   : > { %s3261_s20 = sshll.u32 %s151_s12, 6  ;;  %p4948_p11 = pnand %p5885_p8, %p4913_p5 }
  0x1a   : > { %s4955_s23 = scalar_lea.hbm %s5881_s0, %s3261_s20  ;;  %s4957_s3 = scalar_lea.sflag [#allocation3], %s141_s30 }
  0x1b   : > { %s4670_s5 = scalar_lea.hbm %s4955_s23, 16384  ;;  %p4672_p13 = pneg %p4948_p11 }
  0x1c   : > { %p4671_p12 = scmp.ne.s32.totalorder %s4955_s23, %s4670_s5  ;;  %s4675_s7 = scalar_lea.hbm %s5881_s0, 262144 }
  0x1d   : > { %p4676_p3 = scmp.lt.u32.totalorder %s4955_s23, %s5881_s0  ;;  %p4677_p4 = scmp.lt.u32.totalorder %s4675_s7, %s4670_s5 }
  0x1e   : > { %p4673_p0 = pnand %p4672_p13, %p4671_p12  ;;  %p4679_p10 = scmp.lt.u32.totalorder %s4670_s5, %s4955_s23 }
  0x1f   : > { %p4678_p5 = por %p4677_p4, %p4676_p3 }
  0x20   : > { %p4674_p1 = pneg %p4673_p0 }
  0x21   : > { %p4680_p8 = por %p4679_p10, %p4678_p5 }
  0x23   : > { %p4681_p2 = pnand %p4680_p8, %p4674_p1 }
  0x25   : > { %4684 = shalt.err (!%p4681_p2)
}
  0x26   : > { %s4685_s30 = scalar_lea.vmem %s4942_s8, 16384  ;;  %s4826_s24 = smov [#allocation2]  }
  0x27   : > { %p4686_p12 = scmp.ne.s32.totalorder %s4942_s8, %s4685_s30  ;;  %s4690_s29 = sshll.u32 %s4826_s24, 4  ;;  %s4691_s29 = int_to_ptr.vmem [resolvable:$false] %s4690_s29 }
  0x28   : > { %s4692_s25 = scalar_lea.vmem %s4691_s29, 32768  ;;  %p4693_p7 = scmp.lt.s32.totalorder %s4942_s8, %s4691_s29 }
  0x29   : > { %p4688_p0 = pnand %p4686_p12, %p4672_p13  ;;  %p4694_p3 = scmp.lt.s32.totalorder %s4692_s25, %s4685_s30 }
  0x2b   : > { %p4689_p9 = pneg %p4688_p0  ;;  %p4695_p4 = por %p4694_p3, %p4693_p7 }
  0x2d   : > { %p4696_p5 = pnand %p4695_p4, %p4689_p9 }
  0x2f   : > { %4699 = shalt.err (!%p4696_p5)
}
  0x30   : > { %s4827_s5 = smov 64   ;;  %s4828_s6 = smov 4  }
  0x31   : > { %3933 = dma.hbm_to_vmem [thread:$0]  (!%p4948_p11), %s4955_s23, 16384, %s4942_s8, %s4957_s3, %s4827_s5, %s4827_s5, %s4828_s6  }
  0x32   : > { %p3265_p2 = scmp.ge.s32.totalorder %s4824_s19, 1  ;;  %p184_p7 = scmp.lt.s32.totalorder %s4824_s19, 17 }
  0x33   : > { %s74_s12 = sadd.s32 1, %s4792_s11  ;;  %p5895_p9 = scmp.eq.s32.totalorder %s4931_s28, 0 }
  0x34   : > { %p4990_p8 = pnand %p3265_p2, %p184_p7  ;;  %p81_p13 = scmp.ne.s32.totalorder %s4792_s11, %s4788_s10 }
  0x35   : > { %s4998_s20 = scalar_select %p5895_p9, %s4792_s11, %s74_s12  }
  0x36   : > { %p87_p1 = scmp.ne.s32.totalorder %s4788_s10, %s4784_s9  ;;  %s164_s30 = sand.u32 1, %s4792_s11  }
  0x37   : > { %s3531_s24 = sshll.u32 %s4820_s18, 8  ;;  %p5896_p10 = scmp.eq.s32.totalorder %s4824_s19, 0 }
  0x38   : > { %p5010_p0 = por %p87_p1, %p4917_p6  ;;  %s3262_s8 = sshll.u32 %s164_s30, 4 }
  0x39   : > { %p83_p12 = por %p81_p13, %p5896_p10  ;;  %s5017_s29 = scalar_lea.hbm %s5882_s1, %s3531_s24 }
  0x3a   : > { %s5897_s22 = scalar_select %p5010_p0, 1, 0 }
  0x3b   : > { %s168_s9 = scalar_lea.vmem [#allocation4], %s3262_s8  ;;  %p5898_p11 = scmp.lt.s32.totalorder %s4824_s19, 16 }
  0x3c   : > { %s176_s28 = sshll.u32 %s168_s9, 4  ;;  %s5027_s26 = scalar_lea.sflag [#allocation5], %s164_s30  ;;  %s5025_s28 = int_to_ptr.vmem [resolvable:$true] %s176_s28 }
  0x3d   : > { %p5021_p3 = pnand %p5898_p11, %p83_p12  ;;  %s4700_s12 = scalar_lea.hbm %s5017_s29, 256 }
  0x3e   : > { %p4701_p6 = scmp.ne.s32.totalorder %s5017_s29, %s4700_s12  ;;  %s4705_s23 = scalar_lea.hbm %s5882_s1, 1024 }
  0x3f   : > { %p4702_p4 = pneg %p5021_p3  ;;  %p4706_p7 = scmp.lt.u32.totalorder %s5017_s29, %s5882_s1 }
  0x40   : > { %p4707_p9 = scmp.lt.u32.totalorder %s4705_s23, %s4700_s12  ;;  %p4709_p1 = scmp.lt.u32.totalorder %s4700_s12, %s5017_s29 }
  0x41   : > { %p4703_p5 = pnand %p4702_p4, %p4701_p6 }
  0x42   : > { %p4708_p13 = por %p4707_p9, %p4706_p7 }
  0x43   : > { %p4704_p2 = pneg %p4703_p5 }
  0x44   : > { %p4710_p10 = por %p4709_p1, %p4708_p13 }
  0x46   : > { %p4711_p12 = pnand %p4710_p10, %p4704_p2 }
  0x48   : > { %4714 = shalt.err (!%p4711_p12)
}
  0x49   : > { %s4715_s30 = scalar_lea.vmem %s5025_s28, 256  ;;  %s4829_s24 = smov [#allocation4]  }
  0x4a   : > { %p4716_p11 = scmp.ne.s32.totalorder %s5025_s28, %s4715_s30  ;;  %s4720_s8 = sshll.u32 %s4829_s24, 4  ;;  %s4721_s8 = int_to_ptr.vmem [resolvable:$false] %s4720_s8 }
  0x4b   : > { %s4722_s3 = scalar_lea.vmem %s4721_s8, 512  ;;  %p4723_p0 = scmp.lt.s32.totalorder %s5025_s28, %s4721_s8 }
  0x4c   : > { %p4718_p6 = pnand %p4716_p11, %p4702_p4  ;;  %p4724_p7 = scmp.lt.s32.totalorder %s4722_s3, %s4715_s30 }
  0x4e   : > { %p4719_p5 = pneg %p4718_p6  ;;  %p4725_p9 = por %p4724_p7, %p4723_p0 }
  0x50   : > { %p4726_p13 = pnand %p4725_p9, %p4719_p5 }
  0x52   : > { %4729 = shalt.err (!%p4726_p13)
}
  0x53   : > { %3936 = dma.hbm_to_vmem [thread:$0]  (!%p5021_p3), %s5017_s29, 256, %s5025_s28, %s5027_s26, %s4827_s5, %s4827_s5, %s4828_s6  }
  0x54   : > { %188 = sbr.rel (%p4990_p8) target bundleno = 587 (0x24b), region = 28  ;;  %s190_s12 = sand.u32 (!%p4990_p8), 1, %s4800_s13  }
  0x55   : > { %s3266_s23 = sshll.u32 (!%p4990_p8), %s190_s12, 10  ;;  %s191_s9 = scalar_lea.sflag (!%p4990_p8), [#allocation3], %s190_s12 }
  0x56   : > { %s5061_s30 = scalar_lea.vmem (!%p4990_p8), [#allocation2], %s3266_s23  ;;  %p5900_p0 = scmp.ne.s32.totalorder (!%p4990_p8), %s5892_s27, 0 }
  0x5b   : > { %4775 = dma.done.wait (%p5900_p0), %s191_s9, 16384  }
  0x5c   : > { %4777 = vsyncadd (%p5900_p0), %s191_s9, 4294950912  ;;  %s199_s25 = sand.u32 1, %s4788_s10   ;;  %p5901_p3 = scmp.ne.s32.totalorder %s5897_s22, 0 }
  0x5d   : > { %s3267_s24 = sshll.u32 %s199_s25, 4  ;;  %s200_s5 = scalar_lea.sflag [#allocation5], %s199_s25 }
  0x5e   : > { %s203_s6 = scalar_lea.vmem [#allocation4], %s3267_s24 }
  0x5f   : > { %4779 = dma.done.wait (%p5901_p3), %s200_s5, 256  }
  0x60   : > { %4781 = vsyncadd (%p5901_p3), %s200_s5, 4294967040  ;;  %v4028_v0 = vld [vmem:[%s203_s6] sm:$0xff]   ;;  %v4029_v1 = vld [vmem:[%s203_s6 + $0x8] sm:$0xff]   ;;  %vm1163_vm0 = vcmask 261120   ;;  %s3268_s27 = sshll.u32 %s4808_s15, 8  ;;  %p238_p8 = scmp.lt.s32.totalorder %s4812_s16, 3 }
  0x61   : > { %3662 = vmatprep.subr.bf16.mxu0 %v4028_v0  ;;  %3922 = vmatprep.subr.bf16.mxu1 %v4028_v0  ;;  %v4030_v2 = vld [vmem:[%s5061_s30] sm:$0xff]   ;;  %v4032_v4 = vld [vmem:[%s5061_s30 + $0x8] sm:$0xff]   ;;  %v4034_v6 = vld [vmem:[%s5061_s30 + $0x10] sm:$0xff]   ;;  %p240_p4 = scmp.lt.s32.totalorder %s3268_s27, 1023  ;;  %vm2861_vm1 = vcmask 64512  }
  0x62   : > { %3663 = vmatpush3.bf16.msra.mxu0 %v4028_v0  ;;  %3924 = vmatpush3.bf16.msra.mxu1 %v4028_v0  ;;  %v4031_v3 = vld [vmem:[%s5061_s30 + $0x200] sm:$0xff]   ;;  %v4033_v5 = vld [vmem:[%s5061_s30 + $0x208] sm:$0xff]   ;;  %v4035_v7 = vld [vmem:[%s5061_s30 + $0x210] sm:$0xff]   ;;  %s5920_s16 = smov (!%p238_p8, %s4812_s16), 3 }
  0x63   : > { %3664 = vmatprep.subr.bf16.mxu0 %v4029_v1  ;;  %3923 = vmatprep.subr.bf16.mxu1 %v4029_v1  ;;  %v4036_v8 = vld [vmem:[%s5061_s30 + $0x18] sm:$0xff]   ;;  %v4038_v10 = vld [vmem:[%s5061_s30 + $0x20] sm:$0xff]   ;;  %v4040_v12 = vld [vmem:[%s5061_s30 + $0x28] sm:$0xff]   ;;  %s5922_s27 = smov (!%p240_p4, %s3268_s27), 1023  ;;  %s3269_s15 = sshll.u32 %s5920_s16, 10 }
  0x64   : > { %3666 = vmatprep.mubr.msk.bf16.mxu0 %vm1163_vm0, %v4030_v2  ;;  %3794 = vmatprep.mubr.msk.bf16.mxu1 %vm1163_vm0, %v4031_v3  ;;  %v4037_v9 = vld [vmem:[%s5061_s30 + $0x218] sm:$0xff]   ;;  %v4039_v11 = vld [vmem:[%s5061_s30 + $0x220] sm:$0xff]   ;;  %v4041_v13 = vld [vmem:[%s5061_s30 + $0x228] sm:$0xff]   ;;  %s246_s7 = sadd.s32 %s3269_s15, %s5922_s27 }
  0x65   : > { %v4042_v14 = vld [vmem:[%s5061_s30 + $0x30] sm:$0xff]   ;;  %v4044_v16 = vld [vmem:[%s5061_s30 + $0x38] sm:$0xff]   ;;  %v4046_v18 = vld [vmem:[%s5061_s30 + $0x40] sm:$0xff]   ;;  %s3270_s16 = sshll.u32 %s246_s7, 3 }
  0x66   : > { %3665 = vmatpush3.bf16.msra.mxu0 %v4029_v1  ;;  %3925 = vmatpush3.bf16.msra.mxu1 %v4029_v1  ;;  %v4043_v15 = vld [vmem:[%s5061_s30 + $0x230] sm:$0xff]   ;;  %v4045_v17 = vld [vmem:[%s5061_s30 + $0x238] sm:$0xff]   ;;  %v4047_v19 = vld [vmem:[%s5061_s30 + $0x240] sm:$0xff]   ;;  %s5306_s28 = scalar_lea.vmem %s5883_s2, %s3270_s16 }
  0x67   : > { %v4048_v20 = vld [vmem:[%s5061_s30 + $0x48] sm:$0xff]   ;;  %v4050_v22 = vld [vmem:[%s5061_s30 + $0x50] sm:$0xff]   ;;  %v4052_v24 = vld [vmem:[%s5061_s30 + $0x58] sm:$0xff]  }
  0x68   : > { %v4049_v21 = vld [vmem:[%s5061_s30 + $0x248] sm:$0xff]   ;;  %v4051_v23 = vld [vmem:[%s5061_s30 + $0x250] sm:$0xff]   ;;  %v4053_v25 = vld [vmem:[%s5061_s30 + $0x258] sm:$0xff]  }
  0x69   : > { %3667 = vmatmul.mubr.msk.bf16.vlgmr.msra.gmra.mrb[0].mxu0 %vm1163_vm0, %v4032_v4  ;;  %3795 = vmatmul.mubr.msk.bf16.vlgmr.msra.gmra.mrb[0].mxu1 %vm1163_vm0, %v4033_v5  ;;  %v4054_v26 = vld [vmem:[%s5061_s30 + $0x60] sm:$0xff]   ;;  %v4056_v28 = vld [vmem:[%s5061_s30 + $0x68] sm:$0xff]   ;;  %v4058_v30 = vld [vmem:[%s5061_s30 + $0x70] sm:$0xff]  }
  0x6a   : > { %3670 = vmatprep.mubr.msk.bf16.mxu0 %vm1163_vm0, %v4034_v6  ;;  %3798 = vmatprep.mubr.msk.bf16.mxu1 %vm1163_vm0, %v4035_v7  ;;  %v4055_v27 = vld [vmem:[%s5061_s30 + $0x260] sm:$0xff]   ;;  %v4057_v29 = vld [vmem:[%s5061_s30 + $0x268] sm:$0xff]   ;;  %v4059_v31 = vld [vmem:[%s5061_s30 + $0x270] sm:$0xff]  }
  0x6b   : > { %v4060_v32 = vld [vmem:[%s5061_s30 + $0x78] sm:$0xff]   ;;  %v4062_v34 = vld [vmem:[%s5061_s30 + $0x80] sm:$0xff]   ;;  %v4064_v36 = vld [vmem:[%s5061_s30 + $0x88] sm:$0xff]  }
  0x6c   : > { %v4061_v33 = vld [vmem:[%s5061_s30 + $0x278] sm:$0xff]   ;;  %v4063_v35 = vld [vmem:[%s5061_s30 + $0x280] sm:$0xff]   ;;  %v4065_v37 = vld [vmem:[%s5061_s30 + $0x288] sm:$0xff]  }
  0x6d   : > { %v4066_v38 = vld [vmem:[%s5061_s30 + $0x90] sm:$0xff]   ;;  %v4068_v40 = vld [vmem:[%s5061_s30 + $0x98] sm:$0xff]   ;;  %v4070_v42 = vld [vmem:[%s5061_s30 + $0xa0] sm:$0xff]  }
  0x6e   : > { %v4067_v39 = vld [vmem:[%s5061_s30 + $0x290] sm:$0xff]   ;;  %v4069_v41 = vld [vmem:[%s5061_s30 + $0x298] sm:$0xff]   ;;  %v4071_v43 = vld [vmem:[%s5061_s30 + $0x2a0] sm:$0xff]  }
  0x6f   : > { %v4072_v44 = vld [vmem:[%s5061_s30 + $0xa8] sm:$0xff]   ;;  %v4074_v46 = vld [vmem:[%s5061_s30 + $0xb0] sm:$0xff]   ;;  %v4076_v48 = vld [vmem:[%s5061_s30 + $0xb8] sm:$0xff]  }
  0x70   : > { %v4073_v45 = vld [vmem:[%s5061_s30 + $0x2a8] sm:$0xff]   ;;  %v4075_v47 = vld [vmem:[%s5061_s30 + $0x2b0] sm:$0xff]   ;;  %v4077_v49 = vld [vmem:[%s5061_s30 + $0x2b8] sm:$0xff]  }
  0x71   : > { %3671 = vmatmul.mubr.msk.bf16.gmra.mrb[4].mxu0 %vm1163_vm0, %v4036_v8  ;;  %3799 = vmatmul.mubr.msk.bf16.gmra.mrb[4].mxu1 %vm1163_vm0, %v4037_v9  ;;  %v4078_v50 = vld [vmem:[%s5061_s30 + $0xc0] sm:$0xff]   ;;  %v4080_v52 = vld [vmem:[%s5061_s30 + $0xc8] sm:$0xff]   ;;  %v4082_v54 = vld [vmem:[%s5061_s30 + $0xd0] sm:$0xff]  }
  0x72   : > { %3674 = vmatprep.mubr.msk.bf16.mxu0 %vm1163_vm0, %v4038_v10  ;;  %3802 = vmatprep.mubr.msk.bf16.mxu1 %vm1163_vm0, %v4039_v11  ;;  %v4079_v51 = vld [vmem:[%s5061_s30 + $0x2c0] sm:$0xff]   ;;  %v4081_v53 = vld [vmem:[%s5061_s30 + $0x2c8] sm:$0xff]   ;;  %v4083_v55 = vld [vmem:[%s5061_s30 + $0x2d0] sm:$0xff]  }
  0x73   : > { %v4084_v56 = vld [vmem:[%s5061_s30 + $0xd8] sm:$0xff]   ;;  %v4086_v58 = vld [vmem:[%s5061_s30 + $0xe0] sm:$0xff]   ;;  %v4088_v60 = vld [vmem:[%s5061_s30 + $0xe8] sm:$0xff]  }
  0x74   : > { %v4085_v57 = vld [vmem:[%s5061_s30 + $0x2d8] sm:$0xff]   ;;  %v4087_v59 = vld [vmem:[%s5061_s30 + $0x2e0] sm:$0xff]   ;;  %v4089_v61 = vld [vmem:[%s5061_s30 + $0x2e8] sm:$0xff]  }
  0x75   : > { %v4090_v62 = vld [vmem:[%s5061_s30 + $0xf0] sm:$0xff]   ;;  %v4092_v0 = vld [vmem:[%s5061_s30 + $0xf8] sm:$0xff]   ;;  %v4094_v2 = vld [vmem:[%s5061_s30 + $0x100] sm:$0xff]  }
  0x76   : > { %v4091_v63 = vld [vmem:[%s5061_s30 + $0x2f0] sm:$0xff]   ;;  %v4093_v1 = vld [vmem:[%s5061_s30 + $0x2f8] sm:$0xff]   ;;  %v4095_v3 = vld [vmem:[%s5061_s30 + $0x300] sm:$0xff]  }
  0x77   : > { %v4096_v4 = vld [vmem:[%s5061_s30 + $0x108] sm:$0xff]   ;;  %v4098_v6 = vld [vmem:[%s5061_s30 + $0x110] sm:$0xff]   ;;  %v4100_v8 = vld [vmem:[%s5061_s30 + $0x118] sm:$0xff]  }
  0x78   : > { %v4097_v5 = vld [vmem:[%s5061_s30 + $0x308] sm:$0xff]   ;;  %v4099_v7 = vld [vmem:[%s5061_s30 + $0x310] sm:$0xff]   ;;  %v4101_v9 = vld [vmem:[%s5061_s30 + $0x318] sm:$0xff]  }
  0x79   : > { %3675 = vmatmul.mubr.msk.bf16.gmra.mrb[8].mxu0 %vm1163_vm0, %v4040_v12  ;;  %3803 = vmatmul.mubr.msk.bf16.gmra.mrb[8].mxu1 %vm1163_vm0, %v4041_v13  ;;  %v4102_v10 = vld [vmem:[%s5061_s30 + $0x120] sm:$0xff]   ;;  %v4104_v12 = vld [vmem:[%s5061_s30 + $0x128] sm:$0xff]  }
  0x7a   : > { %3678 = vmatprep.mubr.msk.bf16.mxu0 %vm1163_vm0, %v4042_v14  ;;  %3806 = vmatprep.mubr.msk.bf16.mxu1 %vm1163_vm0, %v4043_v15  ;;  %v4103_v11 = vld [vmem:[%s5061_s30 + $0x320] sm:$0xff]   ;;  %v4105_v13 = vld [vmem:[%s5061_s30 + $0x328] sm:$0xff]   ;;  %v4106_v14 = vld [vmem:[%s5061_s30 + $0x130] sm:$0xff]  }
  0x7b   : > { %v4107_v15 = vld [vmem:[%s5061_s30 + $0x330] sm:$0xff]  }
  0x81   : > { %3679 = vmatmul.mubr.msk.bf16.gmra.mrb[12].mxu0 %vm1163_vm0, %v4044_v16  ;;  %3807 = vmatmul.mubr.msk.bf16.gmra.mrb[12].mxu1 %vm1163_vm0, %v4045_v17  ;;  %v4108_v16 = vld [vmem:[%s5061_s30 + $0x138] sm:$0xff]  }
  0x82   : > { %3682 = vmatprep.mubr.msk.bf16.mxu0 %vm1163_vm0, %v4046_v18  ;;  %3810 = vmatprep.mubr.msk.bf16.mxu1 %vm1163_vm0, %v4047_v19  ;;  %v4109_v17 = vld [vmem:[%s5061_s30 + $0x338] sm:$0xff]   ;;  %v4110_v18 = vld [vmem:[%s5061_s30 + $0x140] sm:$0xff]  }
  0x83   : > { %v4111_v19 = vld [vmem:[%s5061_s30 + $0x340] sm:$0xff]  }
  0x89   : > { %3683 = vmatmul.mubr.msk.bf16.gmra.mrb[16].mxu0 %vm1163_vm0, %v4048_v20  ;;  %3811 = vmatmul.mubr.msk.bf16.gmra.mrb[16].mxu1 %vm1163_vm0, %v4049_v21  ;;  %v4112_v20 = vld [vmem:[%s5061_s30 + $0x148] sm:$0xff]  }
  0x8a   : > { %3686 = vmatprep.mubr.msk.bf16.mxu0 %vm1163_vm0, %v4050_v22  ;;  %3814 = vmatprep.mubr.msk.bf16.mxu1 %vm1163_vm0, %v4051_v23  ;;  %v4113_v21 = vld [vmem:[%s5061_s30 + $0x348] sm:$0xff]   ;;  %v4114_v22 = vld [vmem:[%s5061_s30 + $0x150] sm:$0xff]  }
  0x8b   : > { %v4115_v23 = vld [vmem:[%s5061_s30 + $0x350] sm:$0xff]  }
  0x91   : > { %3687 = vmatmul.mubr.msk.bf16.gmra.mrb[20].mxu0 %vm1163_vm0, %v4052_v24  ;;  %3815 = vmatmul.mubr.msk.bf16.gmra.mrb[20].mxu1 %vm1163_vm0, %v4053_v25  ;;  %v4116_v24 = vld [vmem:[%s5061_s30 + $0x158] sm:$0xff]  }
  0x92   : > { %3690 = vmatprep.mubr.msk.bf16.mxu0 %vm1163_vm0, %v4054_v26  ;;  %3818 = vmatprep.mubr.msk.bf16.mxu1 %vm1163_vm0, %v4055_v27  ;;  %v4117_v25 = vld [vmem:[%s5061_s30 + $0x358] sm:$0xff]   ;;  %v4118_v26 = vld [vmem:[%s5061_s30 + $0x160] sm:$0xff]  }
  0x93   : > { %v4119_v27 = vld [vmem:[%s5061_s30 + $0x360] sm:$0xff]  }
  0x99   : > { %3691 = vmatmul.mubr.msk.bf16.gmra.mrb[24].mxu0 %vm1163_vm0, %v4056_v28  ;;  %3819 = vmatmul.mubr.msk.bf16.gmra.mrb[24].mxu1 %vm1163_vm0, %v4057_v29  ;;  %v4120_v28 = vld [vmem:[%s5061_s30 + $0x168] sm:$0xff]  }
  0x9a   : > { %3694 = vmatprep.mubr.msk.bf16.mxu0 %vm1163_vm0, %v4058_v30  ;;  %3822 = vmatprep.mubr.msk.bf16.mxu1 %vm1163_vm0, %v4059_v31  ;;  %v4121_v29 = vld [vmem:[%s5061_s30 + $0x368] sm:$0xff]   ;;  %v4122_v30 = vld [vmem:[%s5061_s30 + $0x170] sm:$0xff]  }
  0x9b   : > { %v4123_v31 = vld [vmem:[%s5061_s30 + $0x370] sm:$0xff]  }
  0xa1   : > { %3695 = vmatmul.mubr.msk.bf16.gmra.mrb[28].mxu0 %vm1163_vm0, %v4060_v32  ;;  %3823 = vmatmul.mubr.msk.bf16.gmra.mrb[28].mxu1 %vm1163_vm0, %v4061_v33  ;;  %v4124_v32 = vld [vmem:[%s5061_s30 + $0x178] sm:$0xff]  }
  0xa2   : > { %3698 = vmatprep.mubr.msk.bf16.mxu0 %vm1163_vm0, %v4062_v34  ;;  %3826 = vmatprep.mubr.msk.bf16.mxu1 %vm1163_vm0, %v4063_v35  ;;  %v4125_v33 = vld [vmem:[%s5061_s30 + $0x378] sm:$0xff]   ;;  %v4126_v34 = vld [vmem:[%s5061_s30 + $0x180] sm:$0xff]  }
  0xa3   : > { %v4127_v35 = vld [vmem:[%s5061_s30 + $0x380] sm:$0xff]  }
  0xa9   : > { %3699 = vmatmul.mubr.msk.bf16.gmra.mrb[32].mxu0 %vm1163_vm0, %v4064_v36  ;;  %3827 = vmatmul.mubr.msk.bf16.gmra.mrb[32].mxu1 %vm1163_vm0, %v4065_v37  ;;  %v4128_v36 = vld [vmem:[%s5061_s30 + $0x188] sm:$0xff]  }
  0xaa   : > { %3702 = vmatprep.mubr.msk.bf16.mxu0 %vm1163_vm0, %v4066_v38  ;;  %3830 = vmatprep.mubr.msk.bf16.mxu1 %vm1163_vm0, %v4067_v39  ;;  %v4129_v37 = vld [vmem:[%s5061_s30 + $0x388] sm:$0xff]   ;;  %v4130_v38 = vld [vmem:[%s5061_s30 + $0x190] sm:$0xff]  }
  0xab   : > { %v4131_v39 = vld [vmem:[%s5061_s30 + $0x390] sm:$0xff]  }
  0xb1   : > { %3703 = vmatmul.mubr.msk.bf16.gmra.mrb[36].mxu0 %vm1163_vm0, %v4068_v40  ;;  %3831 = vmatmul.mubr.msk.bf16.gmra.mrb[36].mxu1 %vm1163_vm0, %v4069_v41  ;;  %v4132_v40 = vld [vmem:[%s5061_s30 + $0x198] sm:$0xff]  }
  0xb2   : > { %3706 = vmatprep.mubr.msk.bf16.mxu0 %vm1163_vm0, %v4070_v42  ;;  %3834 = vmatprep.mubr.msk.bf16.mxu1 %vm1163_vm0, %v4071_v43  ;;  %v4133_v41 = vld [vmem:[%s5061_s30 + $0x398] sm:$0xff]   ;;  %v4134_v42 = vld [vmem:[%s5061_s30 + $0x1a0] sm:$0xff]  }
  0xb3   : > { %v4135_v43 = vld [vmem:[%s5061_s30 + $0x3a0] sm:$0xff]  }
  0xb9   : > { %3707 = vmatmul.mubr.msk.bf16.gmra.mrb[40].mxu0 %vm1163_vm0, %v4072_v44  ;;  %3835 = vmatmul.mubr.msk.bf16.gmra.mrb[40].mxu1 %vm1163_vm0, %v4073_v45  ;;  %v4136_v44 = vld [vmem:[%s5061_s30 + $0x1a8] sm:$0xff]  }
  0xba   : > { %3710 = vmatprep.mubr.msk.bf16.mxu0 %vm1163_vm0, %v4074_v46  ;;  %3838 = vmatprep.mubr.msk.bf16.mxu1 %vm1163_vm0, %v4075_v47  ;;  %v4137_v45 = vld [vmem:[%s5061_s30 + $0x3a8] sm:$0xff]   ;;  %v4138_v46 = vld [vmem:[%s5061_s30 + $0x1b0] sm:$0xff]  }
  0xbb   : > { %v4139_v47 = vld [vmem:[%s5061_s30 + $0x3b0] sm:$0xff]  }
  0xc1   : > { %3711 = vmatmul.mubr.msk.bf16.gmra.mrb[44].mxu0 %vm1163_vm0, %v4076_v48  ;;  %3839 = vmatmul.mubr.msk.bf16.gmra.mrb[44].mxu1 %vm1163_vm0, %v4077_v49 }
  0xc2   : > { %3714 = vmatprep.mubr.msk.bf16.mxu0 %vm1163_vm0, %v4078_v50  ;;  %3842 = vmatprep.mubr.msk.bf16.mxu1 %vm1163_vm0, %v4079_v51 }
  0xc9   : > { %3715 = vmatmul.mubr.msk.bf16.gmra.mrb[48].mxu0 %vm1163_vm0, %v4080_v52  ;;  %3843 = vmatmul.mubr.msk.bf16.gmra.mrb[48].mxu1 %vm1163_vm0, %v4081_v53  ;;  %v4140_v52 = vld [vmem:[%s5061_s30 + $0x1b8] sm:$0xff]  }
  0xca   : > { %3718 = vmatprep.mubr.msk.bf16.mxu0 %vm1163_vm0, %v4082_v54  ;;  %3846 = vmatprep.mubr.msk.bf16.mxu1 %vm1163_vm0, %v4083_v55  ;;  %v4141_v53 = vld [vmem:[%s5061_s30 + $0x3b8] sm:$0xff]  }
  0xd1   : > { %3719 = vmatmul.mubr.msk.bf16.gmra.mrb[52].mxu0 %vm1163_vm0, %v4084_v56  ;;  %3847 = vmatmul.mubr.msk.bf16.gmra.mrb[52].mxu1 %vm1163_vm0, %v4085_v57  ;;  %v4142_v56 = vld [vmem:[%s5061_s30 + $0x1c0] sm:$0xff]  }
  0xd2   : > { %3722 = vmatprep.mubr.msk.bf16.mxu0 %vm1163_vm0, %v4086_v58  ;;  %3850 = vmatprep.mubr.msk.bf16.mxu1 %vm1163_vm0, %v4087_v59  ;;  %v4143_v57 = vld [vmem:[%s5061_s30 + $0x3c0] sm:$0xff]  }
  0xd9   : > { %3723 = vmatmul.mubr.msk.bf16.gmra.mrb[56].mxu0 %vm1163_vm0, %v4088_v60  ;;  %3851 = vmatmul.mubr.msk.bf16.gmra.mrb[56].mxu1 %vm1163_vm0, %v4089_v61 }
  0xda   : > { %3726 = vmatprep.mubr.msk.bf16.mxu0 %vm1163_vm0, %v4090_v62  ;;  %3854 = vmatprep.mubr.msk.bf16.mxu1 %vm1163_vm0, %v4091_v63 }
  0xe1   : > { %3727 = vmatmul.mubr.msk.bf16.gmra.mrb[60].mxu0 %vm1163_vm0, %v4092_v0  ;;  %3855 = vmatmul.mubr.msk.bf16.gmra.mrb[60].mxu1 %vm1163_vm0, %v4093_v1  ;;  %v4144_v0 = vld [vmem:[%s5061_s30 + $0x1c8] sm:$0xff]  }
  0xe2   : > { %3730 = vmatprep.mubr.msk.bf16.mxu0 %vm1163_vm0, %v4094_v2  ;;  %3858 = vmatprep.mubr.msk.bf16.mxu1 %vm1163_vm0, %v4095_v3  ;;  %v4145_v1 = vld [vmem:[%s5061_s30 + $0x3c8] sm:$0xff]  }
  0xe9   : > { %3731 = vmatmul.mubr.msk.bf16.gmra.mrb[64].mxu0 %vm1163_vm0, %v4096_v4  ;;  %3859 = vmatmul.mubr.msk.bf16.gmra.mrb[64].mxu1 %vm1163_vm0, %v4097_v5  ;;  %v4146_v4 = vld [vmem:[%s5061_s30 + $0x1d0] sm:$0xff]  }
  0xea   : > { %3734 = vmatprep.mubr.msk.bf16.mxu0 %vm1163_vm0, %v4098_v6  ;;  %3862 = vmatprep.mubr.msk.bf16.mxu1 %vm1163_vm0, %v4099_v7  ;;  %v4147_v5 = vld [vmem:[%s5061_s30 + $0x3d0] sm:$0xff]  }
  0xf1   : > { %3735 = vmatmul.mubr.msk.bf16.gmra.mrb[68].mxu0 %vm1163_vm0, %v4100_v8  ;;  %3863 = vmatmul.mubr.msk.bf16.gmra.mrb[68].mxu1 %vm1163_vm0, %v4101_v9 }
  0xf2   : > { %3738 = vmatprep.mubr.msk.bf16.mxu0 %vm1163_vm0, %v4102_v10  ;;  %3866 = vmatprep.mubr.msk.bf16.mxu1 %vm1163_vm0, %v4103_v11 }
  0xf9   : > { %3739 = vmatmul.mubr.msk.bf16.gmra.mrb[72].mxu0 %vm1163_vm0, %v4104_v12  ;;  %3867 = vmatmul.mubr.msk.bf16.gmra.mrb[72].mxu1 %vm1163_vm0, %v4105_v13 }
  0xfa   : > { %3742 = vmatprep.mubr.msk.bf16.mxu0 %vm1163_vm0, %v4106_v14  ;;  %3870 = vmatprep.mubr.msk.bf16.mxu1 %vm1163_vm0, %v4107_v15 }
 0x101   : > { %3743 = vmatmul.mubr.msk.bf16.gmra.mrb[76].mxu0 %vm1163_vm0, %v4108_v16  ;;  %3871 = vmatmul.mubr.msk.bf16.gmra.mrb[76].mxu1 %vm1163_vm0, %v4109_v17 }
 0x102   : > { %3746 = vmatprep.mubr.msk.bf16.mxu0 %vm1163_vm0, %v4110_v18  ;;  %3874 = vmatprep.mubr.msk.bf16.mxu1 %vm1163_vm0, %v4111_v19  ;;  %v4148_v19 = vld [vmem:[%s5061_s30 + $0x1d8] sm:$0xff]  }
 0x109   : > { %3747 = vmatmul.mubr.msk.bf16.gmra.mrb[80].mxu0 %vm1163_vm0, %v4112_v20  ;;  %3875 = vmatmul.mubr.msk.bf16.gmra.mrb[80].mxu1 %vm1163_vm0, %v4113_v21  ;;  %v4149_v20 = vld [vmem:[%s5061_s30 + $0x3d8] sm:$0xff]  }
 0x10a   : > { %3750 = vmatprep.mubr.msk.bf16.mxu0 %vm1163_vm0, %v4114_v22  ;;  %3878 = vmatprep.mubr.msk.bf16.mxu1 %vm1163_vm0, %v4115_v23 }
 0x111   : > { %3751 = vmatmul.mubr.msk.bf16.gmra.mrb[84].mxu0 %vm1163_vm0, %v4116_v24  ;;  %3879 = vmatmul.mubr.msk.bf16.gmra.mrb[84].mxu1 %vm1163_vm0, %v4117_v25  ;;  %v4150_v24 = vld [vmem:[%s5061_s30 + $0x1e0] sm:$0xff]  }
 0x112   : > { %3754 = vmatprep.mubr.msk.bf16.mxu0 %vm1163_vm0, %v4118_v26  ;;  %3882 = vmatprep.mubr.msk.bf16.mxu1 %vm1163_vm0, %v4119_v27  ;;  %v4151_v25 = vld [vmem:[%s5061_s30 + $0x3e0] sm:$0xff]  }
 0x119   : > { %3755 = vmatmul.mubr.msk.bf16.gmra.mrb[88].mxu0 %vm1163_vm0, %v4120_v28  ;;  %3883 = vmatmul.mubr.msk.bf16.gmra.mrb[88].mxu1 %vm1163_vm0, %v4121_v29 }
 0x11a   : > { %3758 = vmatprep.mubr.msk.bf16.mxu0 %vm1163_vm0, %v4122_v30  ;;  %3886 = vmatprep.mubr.msk.bf16.mxu1 %vm1163_vm0, %v4123_v31 }
 0x121   : > { %3759 = vmatmul.mubr.msk.bf16.gmra.mrb[92].mxu0 %vm1163_vm0, %v4124_v32  ;;  %3887 = vmatmul.mubr.msk.bf16.gmra.mrb[92].mxu1 %vm1163_vm0, %v4125_v33 }
 0x122   : > { %3762 = vmatprep.mubr.msk.bf16.mxu0 %vm1163_vm0, %v4126_v34  ;;  %3890 = vmatprep.mubr.msk.bf16.mxu1 %vm1163_vm0, %v4127_v35 }
 0x129   : > { %3763 = vmatmul.mubr.msk.bf16.gmra.mrb[96].mxu0 %vm1163_vm0, %v4128_v36  ;;  %3891 = vmatmul.mubr.msk.bf16.gmra.mrb[96].mxu1 %vm1163_vm0, %v4129_v37 }
 0x12a   : > { %3766 = vmatprep.mubr.msk.bf16.mxu0 %vm1163_vm0, %v4130_v38  ;;  %3894 = vmatprep.mubr.msk.bf16.mxu1 %vm1163_vm0, %v4131_v39  ;;  %v4152_v39 = vld [vmem:[%s5061_s30 + $0x1e8] sm:$0xff]  }
 0x131   : > { %3767 = vmatmul.mubr.msk.bf16.gmra.mrb[100].mxu0 %vm1163_vm0, %v4132_v40  ;;  %3895 = vmatmul.mubr.msk.bf16.gmra.mrb[100].mxu1 %vm1163_vm0, %v4133_v41  ;;  %v4153_v40 = vld [vmem:[%s5061_s30 + $0x3e8] sm:$0xff]  }
 0x132   : > { %3770 = vmatprep.mubr.msk.bf16.mxu0 %vm1163_vm0, %v4134_v42  ;;  %3898 = vmatprep.mubr.msk.bf16.mxu1 %vm1163_vm0, %v4135_v43 }
 0x139   : > { %3771 = vmatmul.mubr.msk.bf16.gmra.mrb[104].mxu0 %vm1163_vm0, %v4136_v44  ;;  %3899 = vmatmul.mubr.msk.bf16.gmra.mrb[104].mxu1 %vm1163_vm0, %v4137_v45  ;;  %v4154_v44 = vld [vmem:[%s5061_s30 + $0x1f0] sm:$0xff]  }
 0x13a   : > { %3774 = vmatprep.mubr.msk.bf16.mxu0 %vm1163_vm0, %v4138_v46  ;;  %3902 = vmatprep.mubr.msk.bf16.mxu1 %vm1163_vm0, %v4139_v47  ;;  %v4155_v45 = vld [vmem:[%s5061_s30 + $0x3f0] sm:$0xff]  }
 0x13c   : > { %v3668_v48 = vpop.f32.mrb[0].mxu0  ;;  %v3796_v49 = vpop.f32.mrb[0].mxu1 }
 0x13d   : > { %4158 = vtanh.f32 %v3668_v48  ;;  %v1582_v50 = vpop.f32.mrb[1].mxu0  ;;  %v2094_v51 = vpop.f32.mrb[1].mxu1 }
 0x13e   : > { %4160 = vtanh.f32 %v3796_v49  ;;  %v3669_v54 = vpop.f32.mrb[2].mxu0  ;;  %v3797_v55 = vpop.f32.mrb[2].mxu1 }
 0x13f   : > { %4162 = vtanh.f32 %v1582_v50  ;;  %v1585_v58 = vpop.f32.mrb[3].mxu0  ;;  %v2097_v59 = vpop.f32.mrb[3].mxu1 }
 0x140   : > { %4164 = vtanh.f32 %v2094_v51 }
 0x141   : > { %4166 = vtanh.f32 %v3669_v54  ;;  %3775 = vmatmul.mubr.msk.bf16.gmra.mrb[108].mxu0 %vm1163_vm0, %v4140_v52  ;;  %3903 = vmatmul.mubr.msk.bf16.gmra.mrb[108].mxu1 %vm1163_vm0, %v4141_v53 }
 0x142   : > { %4168 = vtanh.f32 %v3797_v55  ;;  %3778 = vmatprep.mubr.msk.bf16.mxu0 %vm1163_vm0, %v4142_v56  ;;  %3906 = vmatprep.mubr.msk.bf16.mxu1 %vm1163_vm0, %v4143_v57 }
 0x143   : > { %4170 = vtanh.f32 %v1585_v58 }
 0x144   : > { %4172 = vtanh.f32 %v2097_v59  ;;  %v3672_v60 = vpop.f32.mrb[4].mxu0  ;;  %v3800_v61 = vpop.f32.mrb[4].mxu1  ;;  %v4156_v59 = vld [vmem:[%s5061_s30 + $0x1f8] sm:$0xff]  }
 0x145   : > { %4174 = vtanh.f32 %v3672_v60  ;;  %v1598_v62 = vpop.f32.mrb[5].mxu0  ;;  %v2110_v63 = vpop.f32.mrb[5].mxu1  ;;  %v4157_v60 = vld [vmem:[%s5061_s30 + $0x3f8] sm:$0xff]  }
 0x146   : > { %4176 = vtanh.f32 %v3800_v61  ;;  %v3673_v2 = vpop.f32.mrb[6].mxu0  ;;  %v3801_v3 = vpop.f32.mrb[6].mxu1 }
 0x147   : > { %v4159_v6 = vpop.eup %4158  ;;  %4178 = vtanh.f32 %v1598_v62  ;;  %v1601_v7 = vpop.f32.mrb[7].mxu0 }
 0x148   : > { %v2113_v8 = vpop.f32.mrb[7].mxu1  ;;  %v4161_v9 = vpop.eup %4160  ;;  %2864 = vst.msk [vmem:[%s5306_s28 + $0x10] sm:$0xff] %vm2861_vm1, %v4159_v6  ;;  %4180 = vtanh.f32 %v2110_v63 }
 0x149   : > { %v4163_v10 = vpop.eup %4162  ;;  %2992 = vst.msk [vmem:[%s5306_s28 + $0x410] sm:$0xff] %vm2861_vm1, %v4161_v9  ;;  %4182 = vtanh.f32 %v3673_v2  ;;  %3779 = vmatmul.mubr.msk.bf16.gmra.mrb[112].mxu0 %vm1163_vm0, %v4144_v0  ;;  %3907 = vmatmul.mubr.msk.bf16.gmra.mrb[112].mxu1 %vm1163_vm0, %v4145_v1 }
 0x14a   : > { %v4165_v11 = vpop.eup %4164  ;;  %2862 = vst.msk [vmem:[%s5306_s28] sm:$0xff] %vm2861_vm1, %v4163_v10  ;;  %4184 = vtanh.f32 %v3801_v3  ;;  %3782 = vmatprep.mubr.msk.bf16.mxu0 %vm1163_vm0, %v4146_v4  ;;  %3910 = vmatprep.mubr.msk.bf16.mxu1 %vm1163_vm0, %v4147_v5 }
 0x14b   : > { %v4167_v12 = vpop.eup %4166  ;;  %2990 = vst.msk [vmem:[%s5306_s28 + $0x400] sm:$0xff] %vm2861_vm1, %v4165_v11  ;;  %4186 = vtanh.f32 %v1601_v7 }
 0x14c   : > { %v4169_v13 = vpop.eup %4168  ;;  %2865 = vst.msk [vmem:[%s5306_s28 + $0x18] sm:$0xff] %vm2861_vm1, %v4167_v12  ;;  %4188 = vtanh.f32 %v2113_v8  ;;  %v3676_v14 = vpop.f32.mrb[8].mxu0 }
 0x14d   : > { %v3804_v15 = vpop.f32.mrb[8].mxu1  ;;  %v4171_v16 = vpop.eup %4170  ;;  %2993 = vst.msk [vmem:[%s5306_s28 + $0x418] sm:$0xff] %vm2861_vm1, %v4169_v13  ;;  %4190 = vtanh.f32 %v3676_v14 }
 0x14e   : > { %v1614_v17 = vpop.f32.mrb[9].mxu0  ;;  %v2126_v18 = vpop.f32.mrb[9].mxu1  ;;  %2863 = vst.msk [vmem:[%s5306_s28 + $0x8] sm:$0xff] %vm2861_vm1, %v4171_v16  ;;  %4192 = vtanh.f32 %v3804_v15 }
 0x14f   : > { %v4173_v21 = vpop.eup %4172  ;;  %v3677_v22 = vpop.f32.mrb[10].mxu0  ;;  %4194 = vtanh.f32 %v1614_v17 }
 0x150   : > { %v3805_v23 = vpop.f32.mrb[10].mxu1  ;;  %v4175_v26 = vpop.eup %4174  ;;  %2991 = vst.msk [vmem:[%s5306_s28 + $0x408] sm:$0xff] %vm2861_vm1, %v4173_v21  ;;  %4196 = vtanh.f32 %v2126_v18 }
 0x151   : > { %v1617_v27 = vpop.f32.mrb[11].mxu0  ;;  %v2129_v28 = vpop.f32.mrb[11].mxu1  ;;  %2868 = vst.msk [vmem:[%s5306_s28 + $0x30] sm:$0xff] %vm2861_vm1, %v4175_v26  ;;  %4198 = vtanh.f32 %v3677_v22  ;;  %3783 = vmatmul.mubr.msk.bf16.gmra.mrb[116].mxu0 %vm1163_vm0, %v4148_v19  ;;  %3911 = vmatmul.mubr.msk.bf16.gmra.mrb[116].mxu1 %vm1163_vm0, %v4149_v20 }
 0x152   : > { %v4177_v29 = vpop.eup %4176  ;;  %4200 = vtanh.f32 %v3805_v23  ;;  %3786 = vmatprep.mubr.msk.bf16.mxu0 %vm1163_vm0, %v4150_v24  ;;  %3914 = vmatprep.mubr.msk.bf16.mxu1 %vm1163_vm0, %v4151_v25 }
 0x153   : > { %v4179_v30 = vpop.eup %4178  ;;  %2996 = vst.msk [vmem:[%s5306_s28 + $0x430] sm:$0xff] %vm2861_vm1, %v4177_v29  ;;  %4202 = vtanh.f32 %v1617_v27 }
 0x154   : > { %v4181_v31 = vpop.eup %4180  ;;  %2866 = vst.msk [vmem:[%s5306_s28 + $0x20] sm:$0xff] %vm2861_vm1, %v4179_v30  ;;  %4204 = vtanh.f32 %v2129_v28  ;;  %v3680_v34 = vpop.f32.mrb[12].mxu0 }
 0x155   : > { %v4183_v32 = vpop.eup %4182  ;;  %2994 = vst.msk [vmem:[%s5306_s28 + $0x420] sm:$0xff] %vm2861_vm1, %v4181_v31  ;;  %v3808_v35 = vpop.f32.mrb[12].mxu1  ;;  %4206 = vtanh.f32 %v3680_v34 }
 0x156   : > { %v4185_v33 = vpop.eup %4184  ;;  %2869 = vst.msk [vmem:[%s5306_s28 + $0x38] sm:$0xff] %vm2861_vm1, %v4183_v32  ;;  %v1630_v37 = vpop.f32.mrb[13].mxu0  ;;  %4208 = vtanh.f32 %v3808_v35 }
 0x157   : > { %v4187_v36 = vpop.eup %4186  ;;  %2997 = vst.msk [vmem:[%s5306_s28 + $0x438] sm:$0xff] %vm2861_vm1, %v4185_v33  ;;  %v2142_v38 = vpop.f32.mrb[13].mxu1  ;;  %4210 = vtanh.f32 %v1630_v37 }
 0x158   : > { %v4189_v41 = vpop.eup %4188  ;;  %2867 = vst.msk [vmem:[%s5306_s28 + $0x28] sm:$0xff] %vm2861_vm1, %v4187_v36  ;;  %v3681_v42 = vpop.f32.mrb[14].mxu0  ;;  %4212 = vtanh.f32 %v2142_v38 }
 0x159   : > { %v3809_v43 = vpop.f32.mrb[14].mxu1  ;;  %v4191_v46 = vpop.eup %4190  ;;  %2995 = vst.msk [vmem:[%s5306_s28 + $0x428] sm:$0xff] %vm2861_vm1, %v4189_v41  ;;  %4214 = vtanh.f32 %v3681_v42  ;;  %3787 = vmatmul.mubr.msk.bf16.gmra.mrb[120].mxu0 %vm1163_vm0, %v4152_v39  ;;  %3915 = vmatmul.mubr.msk.bf16.gmra.mrb[120].mxu1 %vm1163_vm0, %v4153_v40 }
 0x15a   : > { %v1633_v47 = vpop.f32.mrb[15].mxu0  ;;  %v2145_v48 = vpop.f32.mrb[15].mxu1  ;;  %2872 = vst.msk [vmem:[%s5306_s28 + $0x50] sm:$0xff] %vm2861_vm1, %v4191_v46  ;;  %4216 = vtanh.f32 %v3809_v43  ;;  %3790 = vmatprep.mubr.msk.bf16.mxu0 %vm1163_vm0, %v4154_v44  ;;  %3918 = vmatprep.mubr.msk.bf16.mxu1 %vm1163_vm0, %v4155_v45 }
 0x15b   : > { %v4193_v49 = vpop.eup %4192  ;;  %4218 = vtanh.f32 %v1633_v47 }
 0x15c   : > { %v4195_v50 = vpop.eup %4194  ;;  %3000 = vst.msk [vmem:[%s5306_s28 + $0x450] sm:$0xff] %vm2861_vm1, %v4193_v49  ;;  %4220 = vtanh.f32 %v2145_v48  ;;  %v3684_v54 = vpop.f32.mrb[16].mxu0 }
 0x15d   : > { %v4197_v51 = vpop.eup %4196  ;;  %2870 = vst.msk [vmem:[%s5306_s28 + $0x40] sm:$0xff] %vm2861_vm1, %v4195_v50  ;;  %v3812_v55 = vpop.f32.mrb[16].mxu1  ;;  %4222 = vtanh.f32 %v3684_v54 }
 0x15e   : > { %v4199_v52 = vpop.eup %4198  ;;  %2998 = vst.msk [vmem:[%s5306_s28 + $0x440] sm:$0xff] %vm2861_vm1, %v4197_v51  ;;  %v1646_v57 = vpop.f32.mrb[17].mxu0  ;;  %4224 = vtanh.f32 %v3812_v55 }
 0x15f   : > { %v4201_v53 = vpop.eup %4200  ;;  %2873 = vst.msk [vmem:[%s5306_s28 + $0x58] sm:$0xff] %vm2861_vm1, %v4199_v52  ;;  %v2158_v58 = vpop.f32.mrb[17].mxu1  ;;  %4226 = vtanh.f32 %v1646_v57 }
 0x160   : > { %v4203_v56 = vpop.eup %4202  ;;  %3001 = vst.msk [vmem:[%s5306_s28 + $0x458] sm:$0xff] %vm2861_vm1, %v4201_v53  ;;  %v3685_v62 = vpop.f32.mrb[18].mxu0  ;;  %4228 = vtanh.f32 %v2158_v58 }
 0x161   : > { %v4205_v61 = vpop.eup %4204  ;;  %2871 = vst.msk [vmem:[%s5306_s28 + $0x48] sm:$0xff] %vm2861_vm1, %v4203_v56  ;;  %v3813_v63 = vpop.f32.mrb[18].mxu1  ;;  %4230 = vtanh.f32 %v3685_v62  ;;  %3791 = vmatmul.mubr.msk.bf16.gmra.mrb[124].mxu0 %vm1163_vm0, %v4156_v59  ;;  %3919 = vmatmul.mubr.msk.bf16.gmra.mrb[124].mxu1 %vm1163_vm0, %v4157_v60 }
 0x162   : > { %v4207_v0 = vpop.eup %4206  ;;  %2999 = vst.msk [vmem:[%s5306_s28 + $0x448] sm:$0xff] %vm2861_vm1, %v4205_v61  ;;  %v1649_v1 = vpop.f32.mrb[19].mxu0  ;;  %4232 = vtanh.f32 %v3813_v63 }
 0x163   : > { %v2161_v2 = vpop.f32.mrb[19].mxu1  ;;  %v4209_v3 = vpop.eup %4208  ;;  %2876 = vst.msk [vmem:[%s5306_s28 + $0x70] sm:$0xff] %vm2861_vm1, %v4207_v0  ;;  %4234 = vtanh.f32 %v1649_v1 }
 0x164   : > { %v4211_v4 = vpop.eup %4210  ;;  %3004 = vst.msk [vmem:[%s5306_s28 + $0x470] sm:$0xff] %vm2861_vm1, %v4209_v3  ;;  %4236 = vtanh.f32 %v2161_v2  ;;  %v3688_v8 = vpop.f32.mrb[20].mxu0 }
 0x165   : > { %v4213_v5 = vpop.eup %4212  ;;  %2874 = vst.msk [vmem:[%s5306_s28 + $0x60] sm:$0xff] %vm2861_vm1, %v4211_v4  ;;  %v3816_v9 = vpop.f32.mrb[20].mxu1  ;;  %4238 = vtanh.f32 %v3688_v8 }
 0x166   : > { %v4215_v6 = vpop.eup %4214  ;;  %3002 = vst.msk [vmem:[%s5306_s28 + $0x460] sm:$0xff] %vm2861_vm1, %v4213_v5  ;;  %v1662_v11 = vpop.f32.mrb[21].mxu0  ;;  %4240 = vtanh.f32 %v3816_v9 }
 0x167   : > { %v4217_v7 = vpop.eup %4216  ;;  %2877 = vst.msk [vmem:[%s5306_s28 + $0x78] sm:$0xff] %vm2861_vm1, %v4215_v6  ;;  %v2174_v12 = vpop.f32.mrb[21].mxu1  ;;  %4242 = vtanh.f32 %v1662_v11 }
 0x168   : > { %v4219_v10 = vpop.eup %4218  ;;  %3005 = vst.msk [vmem:[%s5306_s28 + $0x478] sm:$0xff] %vm2861_vm1, %v4217_v7  ;;  %v3689_v14 = vpop.f32.mrb[22].mxu0  ;;  %4244 = vtanh.f32 %v2174_v12 }
 0x169   : > { %v4221_v13 = vpop.eup %4220  ;;  %2875 = vst.msk [vmem:[%s5306_s28 + $0x68] sm:$0xff] %vm2861_vm1, %v4219_v10  ;;  %v3817_v15 = vpop.f32.mrb[22].mxu1  ;;  %4246 = vtanh.f32 %v3689_v14 }
 0x16a   : > { %v4223_v16 = vpop.eup %4222  ;;  %3003 = vst.msk [vmem:[%s5306_s28 + $0x468] sm:$0xff] %vm2861_vm1, %v4221_v13  ;;  %v1665_v17 = vpop.f32.mrb[23].mxu0  ;;  %4248 = vtanh.f32 %v3817_v15 }
 0x16b   : > { %v2177_v18 = vpop.f32.mrb[23].mxu1  ;;  %v4225_v19 = vpop.eup %4224  ;;  %2880 = vst.msk [vmem:[%s5306_s28 + $0x90] sm:$0xff] %vm2861_vm1, %v4223_v16  ;;  %4250 = vtanh.f32 %v1665_v17 }
 0x16c   : > { %v4227_v20 = vpop.eup %4226  ;;  %3008 = vst.msk [vmem:[%s5306_s28 + $0x490] sm:$0xff] %vm2861_vm1, %v4225_v19  ;;  %4252 = vtanh.f32 %v2177_v18  ;;  %v3692_v24 = vpop.f32.mrb[24].mxu0 }
 0x16d   : > { %v4229_v21 = vpop.eup %4228  ;;  %2878 = vst.msk [vmem:[%s5306_s28 + $0x80] sm:$0xff] %vm2861_vm1, %v4227_v20  ;;  %v3820_v25 = vpop.f32.mrb[24].mxu1  ;;  %4254 = vtanh.f32 %v3692_v24 }
 0x16e   : > { %v4231_v22 = vpop.eup %4230  ;;  %3006 = vst.msk [vmem:[%s5306_s28 + $0x480] sm:$0xff] %vm2861_vm1, %v4229_v21  ;;  %v1678_v27 = vpop.f32.mrb[25].mxu0  ;;  %4256 = vtanh.f32 %v3820_v25 }
 0x16f   : > { %v4233_v23 = vpop.eup %4232  ;;  %2881 = vst.msk [vmem:[%s5306_s28 + $0x98] sm:$0xff] %vm2861_vm1, %v4231_v22  ;;  %v2190_v28 = vpop.f32.mrb[25].mxu1  ;;  %4258 = vtanh.f32 %v1678_v27 }
 0x170   : > { %v4235_v26 = vpop.eup %4234  ;;  %3009 = vst.msk [vmem:[%s5306_s28 + $0x498] sm:$0xff] %vm2861_vm1, %v4233_v23  ;;  %v3693_v30 = vpop.f32.mrb[26].mxu0  ;;  %4260 = vtanh.f32 %v2190_v28 }
 0x171   : > { %v4237_v29 = vpop.eup %4236  ;;  %2879 = vst.msk [vmem:[%s5306_s28 + $0x88] sm:$0xff] %vm2861_vm1, %v4235_v26  ;;  %v3821_v31 = vpop.f32.mrb[26].mxu1  ;;  %4262 = vtanh.f32 %v3693_v30 }
 0x172   : > { %v4239_v32 = vpop.eup %4238  ;;  %3007 = vst.msk [vmem:[%s5306_s28 + $0x488] sm:$0xff] %vm2861_vm1, %v4237_v29  ;;  %v1681_v33 = vpop.f32.mrb[27].mxu0  ;;  %4264 = vtanh.f32 %v3821_v31 }
 0x173   : > { %v2193_v34 = vpop.f32.mrb[27].mxu1  ;;  %v4241_v35 = vpop.eup %4240  ;;  %2884 = vst.msk [vmem:[%s5306_s28 + $0xb0] sm:$0xff] %vm2861_vm1, %v4239_v32  ;;  %4266 = vtanh.f32 %v1681_v33 }
 0x174   : > { %v4243_v36 = vpop.eup %4242  ;;  %3012 = vst.msk [vmem:[%s5306_s28 + $0x4b0] sm:$0xff] %vm2861_vm1, %v4241_v35  ;;  %4268 = vtanh.f32 %v2193_v34  ;;  %v3696_v40 = vpop.f32.mrb[28].mxu0 }
 0x175   : > { %v4245_v37 = vpop.eup %4244  ;;  %2882 = vst.msk [vmem:[%s5306_s28 + $0xa0] sm:$0xff] %vm2861_vm1, %v4243_v36  ;;  %v3824_v41 = vpop.f32.mrb[28].mxu1  ;;  %4270 = vtanh.f32 %v3696_v40 }
 0x176   : > { %v4247_v38 = vpop.eup %4246  ;;  %3010 = vst.msk [vmem:[%s5306_s28 + $0x4a0] sm:$0xff] %vm2861_vm1, %v4245_v37  ;;  %v1694_v43 = vpop.f32.mrb[29].mxu0  ;;  %4272 = vtanh.f32 %v3824_v41 }
 0x177   : > { %v4249_v39 = vpop.eup %4248  ;;  %2885 = vst.msk [vmem:[%s5306_s28 + $0xb8] sm:$0xff] %vm2861_vm1, %v4247_v38  ;;  %v2206_v44 = vpop.f32.mrb[29].mxu1  ;;  %4274 = vtanh.f32 %v1694_v43 }
 0x178   : > { %v4251_v42 = vpop.eup %4250  ;;  %3013 = vst.msk [vmem:[%s5306_s28 + $0x4b8] sm:$0xff] %vm2861_vm1, %v4249_v39  ;;  %v3697_v46 = vpop.f32.mrb[30].mxu0  ;;  %4276 = vtanh.f32 %v2206_v44 }
 0x179   : > { %v4253_v45 = vpop.eup %4252  ;;  %2883 = vst.msk [vmem:[%s5306_s28 + $0xa8] sm:$0xff] %vm2861_vm1, %v4251_v42  ;;  %v3825_v47 = vpop.f32.mrb[30].mxu1  ;;  %4278 = vtanh.f32 %v3697_v46 }
 0x17a   : > { %v4255_v48 = vpop.eup %4254  ;;  %3011 = vst.msk [vmem:[%s5306_s28 + $0x4a8] sm:$0xff] %vm2861_vm1, %v4253_v45  ;;  %v1697_v49 = vpop.f32.mrb[31].mxu0  ;;  %4280 = vtanh.f32 %v3825_v47 }
 0x17b   : > { %v2209_v50 = vpop.f32.mrb[31].mxu1  ;;  %v4257_v51 = vpop.eup %4256  ;;  %2888 = vst.msk [vmem:[%s5306_s28 + $0xd0] sm:$0xff] %vm2861_vm1, %v4255_v48  ;;  %4282 = vtanh.f32 %v1697_v49 }
 0x17c   : > { %v4259_v52 = vpop.eup %4258  ;;  %3016 = vst.msk [vmem:[%s5306_s28 + $0x4d0] sm:$0xff] %vm2861_vm1, %v4257_v51  ;;  %4284 = vtanh.f32 %v2209_v50  ;;  %v3700_v56 = vpop.f32.mrb[32].mxu0 }
 0x17d   : > { %v4261_v53 = vpop.eup %4260  ;;  %2886 = vst.msk [vmem:[%s5306_s28 + $0xc0] sm:$0xff] %vm2861_vm1, %v4259_v52  ;;  %v3828_v57 = vpop.f32.mrb[32].mxu1  ;;  %4286 = vtanh.f32 %v3700_v56 }
 0x17e   : > { %v4263_v54 = vpop.eup %4262  ;;  %3014 = vst.msk [vmem:[%s5306_s28 + $0x4c0] sm:$0xff] %vm2861_vm1, %v4261_v53  ;;  %v1710_v59 = vpop.f32.mrb[33].mxu0  ;;  %4288 = vtanh.f32 %v3828_v57 }
 0x17f   : > { %v4265_v55 = vpop.eup %4264  ;;  %2889 = vst.msk [vmem:[%s5306_s28 + $0xd8] sm:$0xff] %vm2861_vm1, %v4263_v54  ;;  %v2222_v60 = vpop.f32.mrb[33].mxu1  ;;  %4290 = vtanh.f32 %v1710_v59 }
 0x180   : > { %v4267_v58 = vpop.eup %4266  ;;  %3017 = vst.msk [vmem:[%s5306_s28 + $0x4d8] sm:$0xff] %vm2861_vm1, %v4265_v55  ;;  %v3701_v62 = vpop.f32.mrb[34].mxu0  ;;  %4292 = vtanh.f32 %v2222_v60 }
 0x181   : > { %v4269_v61 = vpop.eup %4268  ;;  %2887 = vst.msk [vmem:[%s5306_s28 + $0xc8] sm:$0xff] %vm2861_vm1, %v4267_v58  ;;  %v3829_v63 = vpop.f32.mrb[34].mxu1  ;;  %4294 = vtanh.f32 %v3701_v62 }
 0x182   : > { %v4271_v0 = vpop.eup %4270  ;;  %3015 = vst.msk [vmem:[%s5306_s28 + $0x4c8] sm:$0xff] %vm2861_vm1, %v4269_v61  ;;  %v1713_v1 = vpop.f32.mrb[35].mxu0  ;;  %4296 = vtanh.f32 %v3829_v63 }
 0x183   : > { %v2225_v2 = vpop.f32.mrb[35].mxu1  ;;  %v4273_v3 = vpop.eup %4272  ;;  %2892 = vst.msk [vmem:[%s5306_s28 + $0xf0] sm:$0xff] %vm2861_vm1, %v4271_v0  ;;  %4298 = vtanh.f32 %v1713_v1 }
 0x184   : > { %v4275_v4 = vpop.eup %4274  ;;  %3020 = vst.msk [vmem:[%s5306_s28 + $0x4f0] sm:$0xff] %vm2861_vm1, %v4273_v3  ;;  %4300 = vtanh.f32 %v2225_v2  ;;  %v3704_v8 = vpop.f32.mrb[36].mxu0 }
 0x185   : > { %v4277_v5 = vpop.eup %4276  ;;  %2890 = vst.msk [vmem:[%s5306_s28 + $0xe0] sm:$0xff] %vm2861_vm1, %v4275_v4  ;;  %v3832_v9 = vpop.f32.mrb[36].mxu1  ;;  %4302 = vtanh.f32 %v3704_v8 }
 0x186   : > { %v4279_v6 = vpop.eup %4278  ;;  %3018 = vst.msk [vmem:[%s5306_s28 + $0x4e0] sm:$0xff] %vm2861_vm1, %v4277_v5  ;;  %v1726_v11 = vpop.f32.mrb[37].mxu0  ;;  %4304 = vtanh.f32 %v3832_v9 }
 0x187   : > { %v4281_v7 = vpop.eup %4280  ;;  %2893 = vst.msk [vmem:[%s5306_s28 + $0xf8] sm:$0xff] %vm2861_vm1, %v4279_v6  ;;  %v2238_v12 = vpop.f32.mrb[37].mxu1  ;;  %4306 = vtanh.f32 %v1726_v11 }
 0x188   : > { %v4283_v10 = vpop.eup %4282  ;;  %3021 = vst.msk [vmem:[%s5306_s28 + $0x4f8] sm:$0xff] %vm2861_vm1, %v4281_v7  ;;  %v3705_v14 = vpop.f32.mrb[38].mxu0  ;;  %4308 = vtanh.f32 %v2238_v12 }
 0x189   : > { %v4285_v13 = vpop.eup %4284  ;;  %2891 = vst.msk [vmem:[%s5306_s28 + $0xe8] sm:$0xff] %vm2861_vm1, %v4283_v10  ;;  %v3833_v15 = vpop.f32.mrb[38].mxu1  ;;  %4310 = vtanh.f32 %v3705_v14 }
 0x18a   : > { %v4287_v16 = vpop.eup %4286  ;;  %3019 = vst.msk [vmem:[%s5306_s28 + $0x4e8] sm:$0xff] %vm2861_vm1, %v4285_v13  ;;  %v1729_v17 = vpop.f32.mrb[39].mxu0  ;;  %4312 = vtanh.f32 %v3833_v15 }
 0x18b   : > { %v2241_v18 = vpop.f32.mrb[39].mxu1  ;;  %v4289_v19 = vpop.eup %4288  ;;  %2896 = vst.msk [vmem:[%s5306_s28 + $0x110] sm:$0xff] %vm2861_vm1, %v4287_v16  ;;  %4314 = vtanh.f32 %v1729_v17 }
 0x18c   : > { %v4291_v20 = vpop.eup %4290  ;;  %3024 = vst.msk [vmem:[%s5306_s28 + $0x510] sm:$0xff] %vm2861_vm1, %v4289_v19  ;;  %4316 = vtanh.f32 %v2241_v18  ;;  %v3708_v24 = vpop.f32.mrb[40].mxu0 }
 0x18d   : > { %v4293_v21 = vpop.eup %4292  ;;  %2894 = vst.msk [vmem:[%s5306_s28 + $0x100] sm:$0xff] %vm2861_vm1, %v4291_v20  ;;  %v3836_v25 = vpop.f32.mrb[40].mxu1  ;;  %4318 = vtanh.f32 %v3708_v24 }
 0x18e   : > { %v4295_v22 = vpop.eup %4294  ;;  %3022 = vst.msk [vmem:[%s5306_s28 + $0x500] sm:$0xff] %vm2861_vm1, %v4293_v21  ;;  %v1742_v27 = vpop.f32.mrb[41].mxu0  ;;  %4320 = vtanh.f32 %v3836_v25 }
 0x18f   : > { %v4297_v23 = vpop.eup %4296  ;;  %2897 = vst.msk [vmem:[%s5306_s28 + $0x118] sm:$0xff] %vm2861_vm1, %v4295_v22  ;;  %v2254_v28 = vpop.f32.mrb[41].mxu1  ;;  %4322 = vtanh.f32 %v1742_v27 }
 0x190   : > { %v4299_v26 = vpop.eup %4298  ;;  %3025 = vst.msk [vmem:[%s5306_s28 + $0x518] sm:$0xff] %vm2861_vm1, %v4297_v23  ;;  %v3709_v30 = vpop.f32.mrb[42].mxu0  ;;  %4324 = vtanh.f32 %v2254_v28 }
 0x191   : > { %v4301_v29 = vpop.eup %4300  ;;  %2895 = vst.msk [vmem:[%s5306_s28 + $0x108] sm:$0xff] %vm2861_vm1, %v4299_v26  ;;  %v3837_v31 = vpop.f32.mrb[42].mxu1  ;;  %4326 = vtanh.f32 %v3709_v30 }
 0x192   : > { %v4303_v32 = vpop.eup %4302  ;;  %3023 = vst.msk [vmem:[%s5306_s28 + $0x508] sm:$0xff] %vm2861_vm1, %v4301_v29  ;;  %v1745_v33 = vpop.f32.mrb[43].mxu0  ;;  %4328 = vtanh.f32 %v3837_v31 }
 0x193   : > { %v2257_v34 = vpop.f32.mrb[43].mxu1  ;;  %v4305_v35 = vpop.eup %4304  ;;  %2900 = vst.msk [vmem:[%s5306_s28 + $0x130] sm:$0xff] %vm2861_vm1, %v4303_v32  ;;  %4330 = vtanh.f32 %v1745_v33 }
 0x194   : > { %v4307_v36 = vpop.eup %4306  ;;  %3028 = vst.msk [vmem:[%s5306_s28 + $0x530] sm:$0xff] %vm2861_vm1, %v4305_v35  ;;  %4332 = vtanh.f32 %v2257_v34  ;;  %v3712_v40 = vpop.f32.mrb[44].mxu0 }
 0x195   : > { %v4309_v37 = vpop.eup %4308  ;;  %2898 = vst.msk [vmem:[%s5306_s28 + $0x120] sm:$0xff] %vm2861_vm1, %v4307_v36  ;;  %v3840_v41 = vpop.f32.mrb[44].mxu1  ;;  %4334 = vtanh.f32 %v3712_v40 }
 0x196   : > { %v4311_v38 = vpop.eup %4310  ;;  %3026 = vst.msk [vmem:[%s5306_s28 + $0x520] sm:$0xff] %vm2861_vm1, %v4309_v37  ;;  %v1758_v43 = vpop.f32.mrb[45].mxu0  ;;  %4336 = vtanh.f32 %v3840_v41 }
 0x197   : > { %v4313_v39 = vpop.eup %4312  ;;  %2901 = vst.msk [vmem:[%s5306_s28 + $0x138] sm:$0xff] %vm2861_vm1, %v4311_v38  ;;  %v2270_v44 = vpop.f32.mrb[45].mxu1  ;;  %4338 = vtanh.f32 %v1758_v43 }
 0x198   : > { %v4315_v42 = vpop.eup %4314  ;;  %3029 = vst.msk [vmem:[%s5306_s28 + $0x538] sm:$0xff] %vm2861_vm1, %v4313_v39  ;;  %v3713_v46 = vpop.f32.mrb[46].mxu0  ;;  %4340 = vtanh.f32 %v2270_v44 }
 0x199   : > { %v4317_v45 = vpop.eup %4316  ;;  %2899 = vst.msk [vmem:[%s5306_s28 + $0x128] sm:$0xff] %vm2861_vm1, %v4315_v42  ;;  %v3841_v47 = vpop.f32.mrb[46].mxu1  ;;  %4342 = vtanh.f32 %v3713_v46 }
 0x19a   : > { %v4319_v48 = vpop.eup %4318  ;;  %3027 = vst.msk [vmem:[%s5306_s28 + $0x528] sm:$0xff] %vm2861_vm1, %v4317_v45  ;;  %v1761_v49 = vpop.f32.mrb[47].mxu0  ;;  %4344 = vtanh.f32 %v3841_v47 }
 0x19b   : > { %v2273_v50 = vpop.f32.mrb[47].mxu1  ;;  %v4321_v51 = vpop.eup %4320  ;;  %2904 = vst.msk [vmem:[%s5306_s28 + $0x150] sm:$0xff] %vm2861_vm1, %v4319_v48  ;;  %4346 = vtanh.f32 %v1761_v49 }
 0x19c   : > { %v4323_v52 = vpop.eup %4322  ;;  %3032 = vst.msk [vmem:[%s5306_s28 + $0x550] sm:$0xff] %vm2861_vm1, %v4321_v51  ;;  %4348 = vtanh.f32 %v2273_v50  ;;  %v3716_v56 = vpop.f32.mrb[48].mxu0 }
 0x19d   : > { %v4325_v53 = vpop.eup %4324  ;;  %2902 = vst.msk [vmem:[%s5306_s28 + $0x140] sm:$0xff] %vm2861_vm1, %v4323_v52  ;;  %v3844_v57 = vpop.f32.mrb[48].mxu1  ;;  %4350 = vtanh.f32 %v3716_v56 }
 0x19e   : > { %v4327_v54 = vpop.eup %4326  ;;  %3030 = vst.msk [vmem:[%s5306_s28 + $0x540] sm:$0xff] %vm2861_vm1, %v4325_v53  ;;  %v1774_v59 = vpop.f32.mrb[49].mxu0  ;;  %4352 = vtanh.f32 %v3844_v57 }
 0x19f   : > { %v4329_v55 = vpop.eup %4328  ;;  %2905 = vst.msk [vmem:[%s5306_s28 + $0x158] sm:$0xff] %vm2861_vm1, %v4327_v54  ;;  %v2286_v60 = vpop.f32.mrb[49].mxu1  ;;  %4354 = vtanh.f32 %v1774_v59 }
 0x1a0   : > { %v4331_v58 = vpop.eup %4330  ;;  %3033 = vst.msk [vmem:[%s5306_s28 + $0x558] sm:$0xff] %vm2861_vm1, %v4329_v55  ;;  %v3717_v62 = vpop.f32.mrb[50].mxu0  ;;  %4356 = vtanh.f32 %v2286_v60 }
 0x1a1   : > { %v4333_v61 = vpop.eup %4332  ;;  %2903 = vst.msk [vmem:[%s5306_s28 + $0x148] sm:$0xff] %vm2861_vm1, %v4331_v58  ;;  %v3845_v63 = vpop.f32.mrb[50].mxu1  ;;  %4358 = vtanh.f32 %v3717_v62 }
 0x1a2   : > { %v4335_v0 = vpop.eup %4334  ;;  %3031 = vst.msk [vmem:[%s5306_s28 + $0x548] sm:$0xff] %vm2861_vm1, %v4333_v61  ;;  %v1777_v1 = vpop.f32.mrb[51].mxu0  ;;  %4360 = vtanh.f32 %v3845_v63 }
 0x1a3   : > { %v2289_v2 = vpop.f32.mrb[51].mxu1  ;;  %v4337_v3 = vpop.eup %4336  ;;  %2908 = vst.msk [vmem:[%s5306_s28 + $0x170] sm:$0xff] %vm2861_vm1, %v4335_v0  ;;  %4362 = vtanh.f32 %v1777_v1 }
 0x1a4   : > { %v4339_v4 = vpop.eup %4338  ;;  %3036 = vst.msk [vmem:[%s5306_s28 + $0x570] sm:$0xff] %vm2861_vm1, %v4337_v3  ;;  %4364 = vtanh.f32 %v2289_v2  ;;  %v3720_v8 = vpop.f32.mrb[52].mxu0 }
 0x1a5   : > { %v4341_v5 = vpop.eup %4340  ;;  %2906 = vst.msk [vmem:[%s5306_s28 + $0x160] sm:$0xff] %vm2861_vm1, %v4339_v4  ;;  %v3848_v9 = vpop.f32.mrb[52].mxu1  ;;  %4366 = vtanh.f32 %v3720_v8 }
 0x1a6   : > { %v4343_v6 = vpop.eup %4342  ;;  %3034 = vst.msk [vmem:[%s5306_s28 + $0x560] sm:$0xff] %vm2861_vm1, %v4341_v5  ;;  %v1790_v11 = vpop.f32.mrb[53].mxu0  ;;  %4368 = vtanh.f32 %v3848_v9 }
 0x1a7   : > { %v4345_v7 = vpop.eup %4344  ;;  %2909 = vst.msk [vmem:[%s5306_s28 + $0x178] sm:$0xff] %vm2861_vm1, %v4343_v6  ;;  %v2302_v12 = vpop.f32.mrb[53].mxu1  ;;  %4370 = vtanh.f32 %v1790_v11 }
 0x1a8   : > { %v4347_v10 = vpop.eup %4346  ;;  %3037 = vst.msk [vmem:[%s5306_s28 + $0x578] sm:$0xff] %vm2861_vm1, %v4345_v7  ;;  %v3721_v14 = vpop.f32.mrb[54].mxu0  ;;  %4372 = vtanh.f32 %v2302_v12 }
 0x1a9   : > { %v4349_v13 = vpop.eup %4348  ;;  %2907 = vst.msk [vmem:[%s5306_s28 + $0x168] sm:$0xff] %vm2861_vm1, %v4347_v10  ;;  %v3849_v15 = vpop.f32.mrb[54].mxu1  ;;  %4374 = vtanh.f32 %v3721_v14 }
 0x1aa   : > { %v4351_v16 = vpop.eup %4350  ;;  %3035 = vst.msk [vmem:[%s5306_s28 + $0x568] sm:$0xff] %vm2861_vm1, %v4349_v13  ;;  %v1793_v17 = vpop.f32.mrb[55].mxu0  ;;  %4376 = vtanh.f32 %v3849_v15 }
 0x1ab   : > { %v2305_v18 = vpop.f32.mrb[55].mxu1  ;;  %v4353_v19 = vpop.eup %4352  ;;  %2912 = vst.msk [vmem:[%s5306_s28 + $0x190] sm:$0xff] %vm2861_vm1, %v4351_v16  ;;  %4378 = vtanh.f32 %v1793_v17 }
 0x1ac   : > { %v4355_v20 = vpop.eup %4354  ;;  %3040 = vst.msk [vmem:[%s5306_s28 + $0x590] sm:$0xff] %vm2861_vm1, %v4353_v19  ;;  %4380 = vtanh.f32 %v2305_v18  ;;  %v3724_v24 = vpop.f32.mrb[56].mxu0 }
 0x1ad   : > { %v4357_v21 = vpop.eup %4356  ;;  %2910 = vst.msk [vmem:[%s5306_s28 + $0x180] sm:$0xff] %vm2861_vm1, %v4355_v20  ;;  %v3852_v25 = vpop.f32.mrb[56].mxu1  ;;  %4382 = vtanh.f32 %v3724_v24 }
 0x1ae   : > { %v4359_v22 = vpop.eup %4358  ;;  %3038 = vst.msk [vmem:[%s5306_s28 + $0x580] sm:$0xff] %vm2861_vm1, %v4357_v21  ;;  %v1806_v27 = vpop.f32.mrb[57].mxu0  ;;  %4384 = vtanh.f32 %v3852_v25 }
 0x1af   : > { %v4361_v23 = vpop.eup %4360  ;;  %2913 = vst.msk [vmem:[%s5306_s28 + $0x198] sm:$0xff] %vm2861_vm1, %v4359_v22  ;;  %v2318_v28 = vpop.f32.mrb[57].mxu1  ;;  %4386 = vtanh.f32 %v1806_v27 }
 0x1b0   : > { %v4363_v26 = vpop.eup %4362  ;;  %3041 = vst.msk [vmem:[%s5306_s28 + $0x598] sm:$0xff] %vm2861_vm1, %v4361_v23  ;;  %v3725_v30 = vpop.f32.mrb[58].mxu0  ;;  %4388 = vtanh.f32 %v2318_v28 }
 0x1b1   : > { %v4365_v29 = vpop.eup %4364  ;;  %2911 = vst.msk [vmem:[%s5306_s28 + $0x188] sm:$0xff] %vm2861_vm1, %v4363_v26  ;;  %v3853_v31 = vpop.f32.mrb[58].mxu1  ;;  %4390 = vtanh.f32 %v3725_v30 }
 0x1b2   : > { %v4367_v32 = vpop.eup %4366  ;;  %3039 = vst.msk [vmem:[%s5306_s28 + $0x588] sm:$0xff] %vm2861_vm1, %v4365_v29  ;;  %v1809_v33 = vpop.f32.mrb[59].mxu0  ;;  %4392 = vtanh.f32 %v3853_v31 }
 0x1b3   : > { %v2321_v34 = vpop.f32.mrb[59].mxu1  ;;  %v4369_v35 = vpop.eup %4368  ;;  %2916 = vst.msk [vmem:[%s5306_s28 + $0x1b0] sm:$0xff] %vm2861_vm1, %v4367_v32  ;;  %4394 = vtanh.f32 %v1809_v33 }
 0x1b4   : > { %v4371_v36 = vpop.eup %4370  ;;  %3044 = vst.msk [vmem:[%s5306_s28 + $0x5b0] sm:$0xff] %vm2861_vm1, %v4369_v35  ;;  %4396 = vtanh.f32 %v2321_v34  ;;  %v3728_v40 = vpop.f32.mrb[60].mxu0 }
 0x1b5   : > { %v4373_v37 = vpop.eup %4372  ;;  %2914 = vst.msk [vmem:[%s5306_s28 + $0x1a0] sm:$0xff] %vm2861_vm1, %v4371_v36  ;;  %v3856_v41 = vpop.f32.mrb[60].mxu1  ;;  %4398 = vtanh.f32 %v3728_v40 }
 0x1b6   : > { %v4375_v38 = vpop.eup %4374  ;;  %3042 = vst.msk [vmem:[%s5306_s28 + $0x5a0] sm:$0xff] %vm2861_vm1, %v4373_v37  ;;  %v1822_v43 = vpop.f32.mrb[61].mxu0  ;;  %4400 = vtanh.f32 %v3856_v41 }
 0x1b7   : > { %v4377_v39 = vpop.eup %4376  ;;  %2917 = vst.msk [vmem:[%s5306_s28 + $0x1b8] sm:$0xff] %vm2861_vm1, %v4375_v38  ;;  %v2334_v44 = vpop.f32.mrb[61].mxu1  ;;  %4402 = vtanh.f32 %v1822_v43 }
 0x1b8   : > { %v4379_v42 = vpop.eup %4378  ;;  %3045 = vst.msk [vmem:[%s5306_s28 + $0x5b8] sm:$0xff] %vm2861_vm1, %v4377_v39  ;;  %v3729_v46 = vpop.f32.mrb[62].mxu0  ;;  %4404 = vtanh.f32 %v2334_v44 }
 0x1b9   : > { %v4381_v45 = vpop.eup %4380  ;;  %2915 = vst.msk [vmem:[%s5306_s28 + $0x1a8] sm:$0xff] %vm2861_vm1, %v4379_v42  ;;  %v3857_v47 = vpop.f32.mrb[62].mxu1  ;;  %4406 = vtanh.f32 %v3729_v46 }
 0x1ba   : > { %v4383_v48 = vpop.eup %4382  ;;  %3043 = vst.msk [vmem:[%s5306_s28 + $0x5a8] sm:$0xff] %vm2861_vm1, %v4381_v45  ;;  %v1825_v49 = vpop.f32.mrb[63].mxu0  ;;  %4408 = vtanh.f32 %v3857_v47 }
 0x1bb   : > { %v2337_v50 = vpop.f32.mrb[63].mxu1  ;;  %v4385_v51 = vpop.eup %4384  ;;  %2920 = vst.msk [vmem:[%s5306_s28 + $0x1d0] sm:$0xff] %vm2861_vm1, %v4383_v48  ;;  %4410 = vtanh.f32 %v1825_v49 }
 0x1bc   : > { %v4387_v52 = vpop.eup %4386  ;;  %3048 = vst.msk [vmem:[%s5306_s28 + $0x5d0] sm:$0xff] %vm2861_vm1, %v4385_v51  ;;  %4412 = vtanh.f32 %v2337_v50  ;;  %v3732_v56 = vpop.f32.mrb[64].mxu0 }
 0x1bd   : > { %v4389_v53 = vpop.eup %4388  ;;  %2918 = vst.msk [vmem:[%s5306_s28 + $0x1c0] sm:$0xff] %vm2861_vm1, %v4387_v52  ;;  %v3860_v57 = vpop.f32.mrb[64].mxu1  ;;  %4414 = vtanh.f32 %v3732_v56 }
 0x1be   : > { %v4391_v54 = vpop.eup %4390  ;;  %3046 = vst.msk [vmem:[%s5306_s28 + $0x5c0] sm:$0xff] %vm2861_vm1, %v4389_v53  ;;  %v1838_v59 = vpop.f32.mrb[65].mxu0  ;;  %4416 = vtanh.f32 %v3860_v57 }
 0x1bf   : > { %v4393_v55 = vpop.eup %4392  ;;  %2921 = vst.msk [vmem:[%s5306_s28 + $0x1d8] sm:$0xff] %vm2861_vm1, %v4391_v54  ;;  %v2350_v60 = vpop.f32.mrb[65].mxu1  ;;  %4418 = vtanh.f32 %v1838_v59 }
 0x1c0   : > { %v4395_v58 = vpop.eup %4394  ;;  %3049 = vst.msk [vmem:[%s5306_s28 + $0x5d8] sm:$0xff] %vm2861_vm1, %v4393_v55  ;;  %v3733_v62 = vpop.f32.mrb[66].mxu0  ;;  %4420 = vtanh.f32 %v2350_v60 }
 0x1c1   : > { %v4397_v61 = vpop.eup %4396  ;;  %2919 = vst.msk [vmem:[%s5306_s28 + $0x1c8] sm:$0xff] %vm2861_vm1, %v4395_v58  ;;  %v3861_v63 = vpop.f32.mrb[66].mxu1  ;;  %4422 = vtanh.f32 %v3733_v62 }
 0x1c2   : > { %v4399_v0 = vpop.eup %4398  ;;  %3047 = vst.msk [vmem:[%s5306_s28 + $0x5c8] sm:$0xff] %vm2861_vm1, %v4397_v61  ;;  %v1841_v1 = vpop.f32.mrb[67].mxu0  ;;  %4424 = vtanh.f32 %v3861_v63 }
 0x1c3   : > { %v2353_v2 = vpop.f32.mrb[67].mxu1  ;;  %v4401_v3 = vpop.eup %4400  ;;  %2924 = vst.msk [vmem:[%s5306_s28 + $0x1f0] sm:$0xff] %vm2861_vm1, %v4399_v0  ;;  %4426 = vtanh.f32 %v1841_v1 }
 0x1c4   : > { %v4403_v4 = vpop.eup %4402  ;;  %3052 = vst.msk [vmem:[%s5306_s28 + $0x5f0] sm:$0xff] %vm2861_vm1, %v4401_v3  ;;  %4428 = vtanh.f32 %v2353_v2  ;;  %v3736_v8 = vpop.f32.mrb[68].mxu0 }
 0x1c5   : > { %v4405_v5 = vpop.eup %4404  ;;  %2922 = vst.msk [vmem:[%s5306_s28 + $0x1e0] sm:$0xff] %vm2861_vm1, %v4403_v4  ;;  %v3864_v9 = vpop.f32.mrb[68].mxu1  ;;  %4430 = vtanh.f32 %v3736_v8 }
 0x1c6   : > { %v4407_v6 = vpop.eup %4406  ;;  %3050 = vst.msk [vmem:[%s5306_s28 + $0x5e0] sm:$0xff] %vm2861_vm1, %v4405_v5  ;;  %v1854_v11 = vpop.f32.mrb[69].mxu0  ;;  %4432 = vtanh.f32 %v3864_v9 }
 0x1c7   : > { %v4409_v7 = vpop.eup %4408  ;;  %2925 = vst.msk [vmem:[%s5306_s28 + $0x1f8] sm:$0xff] %vm2861_vm1, %v4407_v6  ;;  %v2366_v12 = vpop.f32.mrb[69].mxu1  ;;  %4434 = vtanh.f32 %v1854_v11 }
 0x1c8   : > { %v4411_v10 = vpop.eup %4410  ;;  %3053 = vst.msk [vmem:[%s5306_s28 + $0x5f8] sm:$0xff] %vm2861_vm1, %v4409_v7  ;;  %v3737_v14 = vpop.f32.mrb[70].mxu0  ;;  %4436 = vtanh.f32 %v2366_v12 }
 0x1c9   : > { %v4413_v13 = vpop.eup %4412  ;;  %2923 = vst.msk [vmem:[%s5306_s28 + $0x1e8] sm:$0xff] %vm2861_vm1, %v4411_v10  ;;  %v3865_v15 = vpop.f32.mrb[70].mxu1  ;;  %4438 = vtanh.f32 %v3737_v14 }
 0x1ca   : > { %v4415_v16 = vpop.eup %4414  ;;  %3051 = vst.msk [vmem:[%s5306_s28 + $0x5e8] sm:$0xff] %vm2861_vm1, %v4413_v13  ;;  %v1857_v17 = vpop.f32.mrb[71].mxu0  ;;  %4440 = vtanh.f32 %v3865_v15 }
 0x1cb   : > { %v2369_v18 = vpop.f32.mrb[71].mxu1  ;;  %v4417_v19 = vpop.eup %4416  ;;  %2928 = vst.msk [vmem:[%s5306_s28 + $0x210] sm:$0xff] %vm2861_vm1, %v4415_v16  ;;  %4442 = vtanh.f32 %v1857_v17 }
 0x1cc   : > { %v4419_v20 = vpop.eup %4418  ;;  %3056 = vst.msk [vmem:[%s5306_s28 + $0x610] sm:$0xff] %vm2861_vm1, %v4417_v19  ;;  %4444 = vtanh.f32 %v2369_v18  ;;  %v3740_v24 = vpop.f32.mrb[72].mxu0 }
 0x1cd   : > { %v4421_v21 = vpop.eup %4420  ;;  %2926 = vst.msk [vmem:[%s5306_s28 + $0x200] sm:$0xff] %vm2861_vm1, %v4419_v20  ;;  %v3868_v25 = vpop.f32.mrb[72].mxu1  ;;  %4446 = vtanh.f32 %v3740_v24 }
 0x1ce   : > { %v4423_v22 = vpop.eup %4422  ;;  %3054 = vst.msk [vmem:[%s5306_s28 + $0x600] sm:$0xff] %vm2861_vm1, %v4421_v21  ;;  %v1870_v27 = vpop.f32.mrb[73].mxu0  ;;  %4448 = vtanh.f32 %v3868_v25 }
 0x1cf   : > { %v4425_v23 = vpop.eup %4424  ;;  %2929 = vst.msk [vmem:[%s5306_s28 + $0x218] sm:$0xff] %vm2861_vm1, %v4423_v22  ;;  %v2382_v28 = vpop.f32.mrb[73].mxu1  ;;  %4450 = vtanh.f32 %v1870_v27 }
 0x1d0   : > { %v4427_v26 = vpop.eup %4426  ;;  %3057 = vst.msk [vmem:[%s5306_s28 + $0x618] sm:$0xff] %vm2861_vm1, %v4425_v23  ;;  %v3741_v30 = vpop.f32.mrb[74].mxu0  ;;  %4452 = vtanh.f32 %v2382_v28 }
 0x1d1   : > { %v4429_v29 = vpop.eup %4428  ;;  %2927 = vst.msk [vmem:[%s5306_s28 + $0x208] sm:$0xff] %vm2861_vm1, %v4427_v26  ;;  %v3869_v31 = vpop.f32.mrb[74].mxu1  ;;  %4454 = vtanh.f32 %v3741_v30 }
 0x1d2   : > { %v4431_v32 = vpop.eup %4430  ;;  %3055 = vst.msk [vmem:[%s5306_s28 + $0x608] sm:$0xff] %vm2861_vm1, %v4429_v29  ;;  %v1873_v33 = vpop.f32.mrb[75].mxu0  ;;  %4456 = vtanh.f32 %v3869_v31 }
 0x1d3   : > { %v2385_v34 = vpop.f32.mrb[75].mxu1  ;;  %v4433_v35 = vpop.eup %4432  ;;  %2932 = vst.msk [vmem:[%s5306_s28 + $0x230] sm:$0xff] %vm2861_vm1, %v4431_v32  ;;  %4458 = vtanh.f32 %v1873_v33 }
 0x1d4   : > { %v4435_v36 = vpop.eup %4434  ;;  %3060 = vst.msk [vmem:[%s5306_s28 + $0x630] sm:$0xff] %vm2861_vm1, %v4433_v35  ;;  %4460 = vtanh.f32 %v2385_v34  ;;  %v3744_v40 = vpop.f32.mrb[76].mxu0 }
 0x1d5   : > { %v4437_v37 = vpop.eup %4436  ;;  %2930 = vst.msk [vmem:[%s5306_s28 + $0x220] sm:$0xff] %vm2861_vm1, %v4435_v36  ;;  %v3872_v41 = vpop.f32.mrb[76].mxu1  ;;  %4462 = vtanh.f32 %v3744_v40 }
 0x1d6   : > { %v4439_v38 = vpop.eup %4438  ;;  %3058 = vst.msk [vmem:[%s5306_s28 + $0x620] sm:$0xff] %vm2861_vm1, %v4437_v37  ;;  %v1886_v43 = vpop.f32.mrb[77].mxu0  ;;  %4464 = vtanh.f32 %v3872_v41 }
 0x1d7   : > { %v4441_v39 = vpop.eup %4440  ;;  %2933 = vst.msk [vmem:[%s5306_s28 + $0x238] sm:$0xff] %vm2861_vm1, %v4439_v38  ;;  %v2398_v44 = vpop.f32.mrb[77].mxu1  ;;  %4466 = vtanh.f32 %v1886_v43 }
 0x1d8   : > { %v4443_v42 = vpop.eup %4442  ;;  %3061 = vst.msk [vmem:[%s5306_s28 + $0x638] sm:$0xff] %vm2861_vm1, %v4441_v39  ;;  %v3745_v46 = vpop.f32.mrb[78].mxu0  ;;  %4468 = vtanh.f32 %v2398_v44 }
 0x1d9   : > { %v4445_v45 = vpop.eup %4444  ;;  %2931 = vst.msk [vmem:[%s5306_s28 + $0x228] sm:$0xff] %vm2861_vm1, %v4443_v42  ;;  %v3873_v47 = vpop.f32.mrb[78].mxu1  ;;  %4470 = vtanh.f32 %v3745_v46 }
 0x1da   : > { %v4447_v48 = vpop.eup %4446  ;;  %3059 = vst.msk [vmem:[%s5306_s28 + $0x628] sm:$0xff] %vm2861_vm1, %v4445_v45  ;;  %v1889_v49 = vpop.f32.mrb[79].mxu0  ;;  %4472 = vtanh.f32 %v3873_v47 }
 0x1db   : > { %v2401_v50 = vpop.f32.mrb[79].mxu1  ;;  %v4449_v51 = vpop.eup %4448  ;;  %2936 = vst.msk [vmem:[%s5306_s28 + $0x250] sm:$0xff] %vm2861_vm1, %v4447_v48  ;;  %4474 = vtanh.f32 %v1889_v49 }
 0x1dc   : > { %v4451_v52 = vpop.eup %4450  ;;  %3064 = vst.msk [vmem:[%s5306_s28 + $0x650] sm:$0xff] %vm2861_vm1, %v4449_v51  ;;  %4476 = vtanh.f32 %v2401_v50  ;;  %v3748_v56 = vpop.f32.mrb[80].mxu0 }
 0x1dd   : > { %v4453_v53 = vpop.eup %4452  ;;  %2934 = vst.msk [vmem:[%s5306_s28 + $0x240] sm:$0xff] %vm2861_vm1, %v4451_v52  ;;  %v3876_v57 = vpop.f32.mrb[80].mxu1  ;;  %4478 = vtanh.f32 %v3748_v56 }
 0x1de   : > { %v4455_v54 = vpop.eup %4454  ;;  %3062 = vst.msk [vmem:[%s5306_s28 + $0x640] sm:$0xff] %vm2861_vm1, %v4453_v53  ;;  %v1902_v59 = vpop.f32.mrb[81].mxu0  ;;  %4480 = vtanh.f32 %v3876_v57 }
 0x1df   : > { %v4457_v55 = vpop.eup %4456  ;;  %2937 = vst.msk [vmem:[%s5306_s28 + $0x258] sm:$0xff] %vm2861_vm1, %v4455_v54  ;;  %v2414_v60 = vpop.f32.mrb[81].mxu1  ;;  %4482 = vtanh.f32 %v1902_v59 }
 0x1e0   : > { %v4459_v58 = vpop.eup %4458  ;;  %3065 = vst.msk [vmem:[%s5306_s28 + $0x658] sm:$0xff] %vm2861_vm1, %v4457_v55  ;;  %v3749_v62 = vpop.f32.mrb[82].mxu0  ;;  %4484 = vtanh.f32 %v2414_v60 }
 0x1e1   : > { %v4461_v61 = vpop.eup %4460  ;;  %2935 = vst.msk [vmem:[%s5306_s28 + $0x248] sm:$0xff] %vm2861_vm1, %v4459_v58  ;;  %v3877_v63 = vpop.f32.mrb[82].mxu1  ;;  %4486 = vtanh.f32 %v3749_v62 }
 0x1e2   : > { %v4463_v0 = vpop.eup %4462  ;;  %3063 = vst.msk [vmem:[%s5306_s28 + $0x648] sm:$0xff] %vm2861_vm1, %v4461_v61  ;;  %v1905_v1 = vpop.f32.mrb[83].mxu0  ;;  %4488 = vtanh.f32 %v3877_v63 }
 0x1e3   : > { %v2417_v2 = vpop.f32.mrb[83].mxu1  ;;  %v4465_v3 = vpop.eup %4464  ;;  %2940 = vst.msk [vmem:[%s5306_s28 + $0x270] sm:$0xff] %vm2861_vm1, %v4463_v0  ;;  %4490 = vtanh.f32 %v1905_v1 }
 0x1e4   : > { %v4467_v4 = vpop.eup %4466  ;;  %3068 = vst.msk [vmem:[%s5306_s28 + $0x670] sm:$0xff] %vm2861_vm1, %v4465_v3  ;;  %4492 = vtanh.f32 %v2417_v2  ;;  %v3752_v8 = vpop.f32.mrb[84].mxu0 }
 0x1e5   : > { %v4469_v5 = vpop.eup %4468  ;;  %2938 = vst.msk [vmem:[%s5306_s28 + $0x260] sm:$0xff] %vm2861_vm1, %v4467_v4  ;;  %v3880_v9 = vpop.f32.mrb[84].mxu1  ;;  %4494 = vtanh.f32 %v3752_v8 }
 0x1e6   : > { %v4471_v6 = vpop.eup %4470  ;;  %3066 = vst.msk [vmem:[%s5306_s28 + $0x660] sm:$0xff] %vm2861_vm1, %v4469_v5  ;;  %v1918_v11 = vpop.f32.mrb[85].mxu0  ;;  %4496 = vtanh.f32 %v3880_v9 }
 0x1e7   : > { %v4473_v7 = vpop.eup %4472  ;;  %2941 = vst.msk [vmem:[%s5306_s28 + $0x278] sm:$0xff] %vm2861_vm1, %v4471_v6  ;;  %v2430_v12 = vpop.f32.mrb[85].mxu1  ;;  %4498 = vtanh.f32 %v1918_v11 }
 0x1e8   : > { %v4475_v10 = vpop.eup %4474  ;;  %3069 = vst.msk [vmem:[%s5306_s28 + $0x678] sm:$0xff] %vm2861_vm1, %v4473_v7  ;;  %v3753_v14 = vpop.f32.mrb[86].mxu0  ;;  %4500 = vtanh.f32 %v2430_v12 }
 0x1e9   : > { %v4477_v13 = vpop.eup %4476  ;;  %2939 = vst.msk [vmem:[%s5306_s28 + $0x268] sm:$0xff] %vm2861_vm1, %v4475_v10  ;;  %v3881_v15 = vpop.f32.mrb[86].mxu1  ;;  %4502 = vtanh.f32 %v3753_v14 }
 0x1ea   : > { %v4479_v16 = vpop.eup %4478  ;;  %3067 = vst.msk [vmem:[%s5306_s28 + $0x668] sm:$0xff] %vm2861_vm1, %v4477_v13  ;;  %v1921_v17 = vpop.f32.mrb[87].mxu0  ;;  %4504 = vtanh.f32 %v3881_v15 }
 0x1eb   : > { %v2433_v18 = vpop.f32.mrb[87].mxu1  ;;  %v4481_v19 = vpop.eup %4480  ;;  %2944 = vst.msk [vmem:[%s5306_s28 + $0x290] sm:$0xff] %vm2861_vm1, %v4479_v16  ;;  %4506 = vtanh.f32 %v1921_v17 }
 0x1ec   : > { %v4483_v20 = vpop.eup %4482  ;;  %3072 = vst.msk [vmem:[%s5306_s28 + $0x690] sm:$0xff] %vm2861_vm1, %v4481_v19  ;;  %4508 = vtanh.f32 %v2433_v18  ;;  %v3756_v24 = vpop.f32.mrb[88].mxu0 }
 0x1ed   : > { %v4485_v21 = vpop.eup %4484  ;;  %2942 = vst.msk [vmem:[%s5306_s28 + $0x280] sm:$0xff] %vm2861_vm1, %v4483_v20  ;;  %v3884_v25 = vpop.f32.mrb[88].mxu1  ;;  %4510 = vtanh.f32 %v3756_v24 }
 0x1ee   : > { %v4487_v22 = vpop.eup %4486  ;;  %3070 = vst.msk [vmem:[%s5306_s28 + $0x680] sm:$0xff] %vm2861_vm1, %v4485_v21  ;;  %v1934_v27 = vpop.f32.mrb[89].mxu0  ;;  %4512 = vtanh.f32 %v3884_v25 }
 0x1ef   : > { %v4489_v23 = vpop.eup %4488  ;;  %2945 = vst.msk [vmem:[%s5306_s28 + $0x298] sm:$0xff] %vm2861_vm1, %v4487_v22  ;;  %v2446_v28 = vpop.f32.mrb[89].mxu1  ;;  %4514 = vtanh.f32 %v1934_v27 }
 0x1f0   : > { %v4491_v26 = vpop.eup %4490  ;;  %3073 = vst.msk [vmem:[%s5306_s28 + $0x698] sm:$0xff] %vm2861_vm1, %v4489_v23  ;;  %v3757_v30 = vpop.f32.mrb[90].mxu0  ;;  %4516 = vtanh.f32 %v2446_v28 }
 0x1f1   : > { %v4493_v29 = vpop.eup %4492  ;;  %2943 = vst.msk [vmem:[%s5306_s28 + $0x288] sm:$0xff] %vm2861_vm1, %v4491_v26  ;;  %v3885_v31 = vpop.f32.mrb[90].mxu1  ;;  %4518 = vtanh.f32 %v3757_v30 }
 0x1f2   : > { %v4495_v32 = vpop.eup %4494  ;;  %3071 = vst.msk [vmem:[%s5306_s28 + $0x688] sm:$0xff] %vm2861_vm1, %v4493_v29  ;;  %v1937_v33 = vpop.f32.mrb[91].mxu0  ;;  %4520 = vtanh.f32 %v3885_v31 }
 0x1f3   : > { %v2449_v34 = vpop.f32.mrb[91].mxu1  ;;  %v4497_v35 = vpop.eup %4496  ;;  %2948 = vst.msk [vmem:[%s5306_s28 + $0x2b0] sm:$0xff] %vm2861_vm1, %v4495_v32  ;;  %4522 = vtanh.f32 %v1937_v33 }
 0x1f4   : > { %v4499_v36 = vpop.eup %4498  ;;  %3076 = vst.msk [vmem:[%s5306_s28 + $0x6b0] sm:$0xff] %vm2861_vm1, %v4497_v35  ;;  %4524 = vtanh.f32 %v2449_v34  ;;  %v3760_v40 = vpop.f32.mrb[92].mxu0 }
 0x1f5   : > { %v4501_v37 = vpop.eup %4500  ;;  %2946 = vst.msk [vmem:[%s5306_s28 + $0x2a0] sm:$0xff] %vm2861_vm1, %v4499_v36  ;;  %v3888_v41 = vpop.f32.mrb[92].mxu1  ;;  %4526 = vtanh.f32 %v3760_v40 }
 0x1f6   : > { %v4503_v38 = vpop.eup %4502  ;;  %3074 = vst.msk [vmem:[%s5306_s28 + $0x6a0] sm:$0xff] %vm2861_vm1, %v4501_v37  ;;  %v1950_v43 = vpop.f32.mrb[93].mxu0  ;;  %4528 = vtanh.f32 %v3888_v41 }
 0x1f7   : > { %v4505_v39 = vpop.eup %4504  ;;  %2949 = vst.msk [vmem:[%s5306_s28 + $0x2b8] sm:$0xff] %vm2861_vm1, %v4503_v38  ;;  %v2462_v44 = vpop.f32.mrb[93].mxu1  ;;  %4530 = vtanh.f32 %v1950_v43 }
 0x1f8   : > { %v4507_v42 = vpop.eup %4506  ;;  %3077 = vst.msk [vmem:[%s5306_s28 + $0x6b8] sm:$0xff] %vm2861_vm1, %v4505_v39  ;;  %v3761_v46 = vpop.f32.mrb[94].mxu0  ;;  %4532 = vtanh.f32 %v2462_v44 }
 0x1f9   : > { %v4509_v45 = vpop.eup %4508  ;;  %2947 = vst.msk [vmem:[%s5306_s28 + $0x2a8] sm:$0xff] %vm2861_vm1, %v4507_v42  ;;  %v3889_v47 = vpop.f32.mrb[94].mxu1  ;;  %4534 = vtanh.f32 %v3761_v46 }
 0x1fa   : > { %v4511_v48 = vpop.eup %4510  ;;  %3075 = vst.msk [vmem:[%s5306_s28 + $0x6a8] sm:$0xff] %vm2861_vm1, %v4509_v45  ;;  %v1953_v49 = vpop.f32.mrb[95].mxu0  ;;  %4536 = vtanh.f32 %v3889_v47 }
 0x1fb   : > { %v2465_v50 = vpop.f32.mrb[95].mxu1  ;;  %v4513_v51 = vpop.eup %4512  ;;  %2952 = vst.msk [vmem:[%s5306_s28 + $0x2d0] sm:$0xff] %vm2861_vm1, %v4511_v48  ;;  %4538 = vtanh.f32 %v1953_v49 }
 0x1fc   : > { %v4515_v52 = vpop.eup %4514  ;;  %3080 = vst.msk [vmem:[%s5306_s28 + $0x6d0] sm:$0xff] %vm2861_vm1, %v4513_v51  ;;  %4540 = vtanh.f32 %v2465_v50  ;;  %v3764_v56 = vpop.f32.mrb[96].mxu0 }
 0x1fd   : > { %v4517_v53 = vpop.eup %4516  ;;  %2950 = vst.msk [vmem:[%s5306_s28 + $0x2c0] sm:$0xff] %vm2861_vm1, %v4515_v52  ;;  %v3892_v57 = vpop.f32.mrb[96].mxu1  ;;  %4542 = vtanh.f32 %v3764_v56 }
 0x1fe   : > { %v4519_v54 = vpop.eup %4518  ;;  %3078 = vst.msk [vmem:[%s5306_s28 + $0x6c0] sm:$0xff] %vm2861_vm1, %v4517_v53  ;;  %v1966_v59 = vpop.f32.mrb[97].mxu0  ;;  %4544 = vtanh.f32 %v3892_v57 }
 0x1ff   : > { %v4521_v55 = vpop.eup %4520  ;;  %2953 = vst.msk [vmem:[%s5306_s28 + $0x2d8] sm:$0xff] %vm2861_vm1, %v4519_v54  ;;  %v2478_v60 = vpop.f32.mrb[97].mxu1  ;;  %4546 = vtanh.f32 %v1966_v59 }
 0x200   : > { %v4523_v58 = vpop.eup %4522  ;;  %3081 = vst.msk [vmem:[%s5306_s28 + $0x6d8] sm:$0xff] %vm2861_vm1, %v4521_v55  ;;  %v3765_v62 = vpop.f32.mrb[98].mxu0  ;;  %4548 = vtanh.f32 %v2478_v60 }
 0x201   : > { %v4525_v61 = vpop.eup %4524  ;;  %2951 = vst.msk [vmem:[%s5306_s28 + $0x2c8] sm:$0xff] %vm2861_vm1, %v4523_v58  ;;  %v3893_v63 = vpop.f32.mrb[98].mxu1  ;;  %4550 = vtanh.f32 %v3765_v62 }
 0x202   : > { %v4527_v0 = vpop.eup %4526  ;;  %3079 = vst.msk [vmem:[%s5306_s28 + $0x6c8] sm:$0xff] %vm2861_vm1, %v4525_v61  ;;  %v1969_v1 = vpop.f32.mrb[99].mxu0  ;;  %4552 = vtanh.f32 %v3893_v63 }
 0x203   : > { %v2481_v2 = vpop.f32.mrb[99].mxu1  ;;  %v4529_v3 = vpop.eup %4528  ;;  %2956 = vst.msk [vmem:[%s5306_s28 + $0x2f0] sm:$0xff] %vm2861_vm1, %v4527_v0  ;;  %4554 = vtanh.f32 %v1969_v1 }
 0x204   : > { %v4531_v4 = vpop.eup %4530  ;;  %3084 = vst.msk [vmem:[%s5306_s28 + $0x6f0] sm:$0xff] %vm2861_vm1, %v4529_v3  ;;  %4556 = vtanh.f32 %v2481_v2  ;;  %v3768_v8 = vpop.f32.mrb[100].mxu0 }
 0x205   : > { %v4533_v5 = vpop.eup %4532  ;;  %2954 = vst.msk [vmem:[%s5306_s28 + $0x2e0] sm:$0xff] %vm2861_vm1, %v4531_v4  ;;  %v3896_v9 = vpop.f32.mrb[100].mxu1  ;;  %4558 = vtanh.f32 %v3768_v8 }
 0x206   : > { %v4535_v6 = vpop.eup %4534  ;;  %3082 = vst.msk [vmem:[%s5306_s28 + $0x6e0] sm:$0xff] %vm2861_vm1, %v4533_v5  ;;  %v1982_v11 = vpop.f32.mrb[101].mxu0  ;;  %4560 = vtanh.f32 %v3896_v9 }
 0x207   : > { %v4537_v7 = vpop.eup %4536  ;;  %2957 = vst.msk [vmem:[%s5306_s28 + $0x2f8] sm:$0xff] %vm2861_vm1, %v4535_v6  ;;  %v2494_v12 = vpop.f32.mrb[101].mxu1  ;;  %4562 = vtanh.f32 %v1982_v11 }
 0x208   : > { %v4539_v10 = vpop.eup %4538  ;;  %3085 = vst.msk [vmem:[%s5306_s28 + $0x6f8] sm:$0xff] %vm2861_vm1, %v4537_v7  ;;  %v3769_v14 = vpop.f32.mrb[102].mxu0  ;;  %4564 = vtanh.f32 %v2494_v12 }
 0x209   : > { %v4541_v13 = vpop.eup %4540  ;;  %2955 = vst.msk [vmem:[%s5306_s28 + $0x2e8] sm:$0xff] %vm2861_vm1, %v4539_v10  ;;  %v3897_v15 = vpop.f32.mrb[102].mxu1  ;;  %4566 = vtanh.f32 %v3769_v14 }
 0x20a   : > { %v4543_v16 = vpop.eup %4542  ;;  %3083 = vst.msk [vmem:[%s5306_s28 + $0x6e8] sm:$0xff] %vm2861_vm1, %v4541_v13  ;;  %v1985_v17 = vpop.f32.mrb[103].mxu0  ;;  %4568 = vtanh.f32 %v3897_v15 }
 0x20b   : > { %v2497_v18 = vpop.f32.mrb[103].mxu1  ;;  %v4545_v19 = vpop.eup %4544  ;;  %2960 = vst.msk [vmem:[%s5306_s28 + $0x310] sm:$0xff] %vm2861_vm1, %v4543_v16  ;;  %4570 = vtanh.f32 %v1985_v17 }
 0x20c   : > { %v4547_v20 = vpop.eup %4546  ;;  %3088 = vst.msk [vmem:[%s5306_s28 + $0x710] sm:$0xff] %vm2861_vm1, %v4545_v19  ;;  %4572 = vtanh.f32 %v2497_v18  ;;  %v3772_v24 = vpop.f32.mrb[104].mxu0 }
 0x20d   : > { %v4549_v21 = vpop.eup %4548  ;;  %2958 = vst.msk [vmem:[%s5306_s28 + $0x300] sm:$0xff] %vm2861_vm1, %v4547_v20  ;;  %v3900_v25 = vpop.f32.mrb[104].mxu1  ;;  %4574 = vtanh.f32 %v3772_v24 }
 0x20e   : > { %v4551_v22 = vpop.eup %4550  ;;  %3086 = vst.msk [vmem:[%s5306_s28 + $0x700] sm:$0xff] %vm2861_vm1, %v4549_v21  ;;  %v1998_v27 = vpop.f32.mrb[105].mxu0  ;;  %4576 = vtanh.f32 %v3900_v25 }
 0x20f   : > { %v4553_v23 = vpop.eup %4552  ;;  %2961 = vst.msk [vmem:[%s5306_s28 + $0x318] sm:$0xff] %vm2861_vm1, %v4551_v22  ;;  %v2510_v28 = vpop.f32.mrb[105].mxu1  ;;  %4578 = vtanh.f32 %v1998_v27 }
 0x210   : > { %v4555_v26 = vpop.eup %4554  ;;  %3089 = vst.msk [vmem:[%s5306_s28 + $0x718] sm:$0xff] %vm2861_vm1, %v4553_v23  ;;  %v3773_v30 = vpop.f32.mrb[106].mxu0  ;;  %4580 = vtanh.f32 %v2510_v28 }
 0x211   : > { %v4557_v29 = vpop.eup %4556  ;;  %2959 = vst.msk [vmem:[%s5306_s28 + $0x308] sm:$0xff] %vm2861_vm1, %v4555_v26  ;;  %v3901_v31 = vpop.f32.mrb[106].mxu1  ;;  %4582 = vtanh.f32 %v3773_v30 }
 0x212   : > { %v4559_v32 = vpop.eup %4558  ;;  %3087 = vst.msk [vmem:[%s5306_s28 + $0x708] sm:$0xff] %vm2861_vm1, %v4557_v29  ;;  %v2001_v33 = vpop.f32.mrb[107].mxu0  ;;  %4584 = vtanh.f32 %v3901_v31 }
 0x213   : > { %v2513_v34 = vpop.f32.mrb[107].mxu1  ;;  %v4561_v35 = vpop.eup %4560  ;;  %2964 = vst.msk [vmem:[%s5306_s28 + $0x330] sm:$0xff] %vm2861_vm1, %v4559_v32  ;;  %4586 = vtanh.f32 %v2001_v33 }
 0x214   : > { %v4563_v36 = vpop.eup %4562  ;;  %3092 = vst.msk [vmem:[%s5306_s28 + $0x730] sm:$0xff] %vm2861_vm1, %v4561_v35  ;;  %4588 = vtanh.f32 %v2513_v34  ;;  %v3776_v40 = vpop.f32.mrb[108].mxu0 }
 0x215   : > { %v4565_v37 = vpop.eup %4564  ;;  %2962 = vst.msk [vmem:[%s5306_s28 + $0x320] sm:$0xff] %vm2861_vm1, %v4563_v36  ;;  %v3904_v41 = vpop.f32.mrb[108].mxu1  ;;  %4590 = vtanh.f32 %v3776_v40 }
 0x216   : > { %v4567_v38 = vpop.eup %4566  ;;  %3090 = vst.msk [vmem:[%s5306_s28 + $0x720] sm:$0xff] %vm2861_vm1, %v4565_v37  ;;  %v2014_v43 = vpop.f32.mrb[109].mxu0  ;;  %4592 = vtanh.f32 %v3904_v41 }
 0x217   : > { %v4569_v39 = vpop.eup %4568  ;;  %2965 = vst.msk [vmem:[%s5306_s28 + $0x338] sm:$0xff] %vm2861_vm1, %v4567_v38  ;;  %v2526_v44 = vpop.f32.mrb[109].mxu1  ;;  %4594 = vtanh.f32 %v2014_v43 }
 0x218   : > { %v4571_v42 = vpop.eup %4570  ;;  %3093 = vst.msk [vmem:[%s5306_s28 + $0x738] sm:$0xff] %vm2861_vm1, %v4569_v39  ;;  %v3777_v46 = vpop.f32.mrb[110].mxu0  ;;  %4596 = vtanh.f32 %v2526_v44 }
 0x219   : > { %v4573_v45 = vpop.eup %4572  ;;  %2963 = vst.msk [vmem:[%s5306_s28 + $0x328] sm:$0xff] %vm2861_vm1, %v4571_v42  ;;  %v3905_v47 = vpop.f32.mrb[110].mxu1  ;;  %4598 = vtanh.f32 %v3777_v46 }
 0x21a   : > { %v4575_v48 = vpop.eup %4574  ;;  %3091 = vst.msk [vmem:[%s5306_s28 + $0x728] sm:$0xff] %vm2861_vm1, %v4573_v45  ;;  %v2017_v49 = vpop.f32.mrb[111].mxu0  ;;  %4600 = vtanh.f32 %v3905_v47 }
 0x21b   : > { %v2529_v50 = vpop.f32.mrb[111].mxu1  ;;  %v4577_v51 = vpop.eup %4576  ;;  %2968 = vst.msk [vmem:[%s5306_s28 + $0x350] sm:$0xff] %vm2861_vm1, %v4575_v48  ;;  %4602 = vtanh.f32 %v2017_v49 }
 0x21c   : > { %v4579_v52 = vpop.eup %4578  ;;  %3096 = vst.msk [vmem:[%s5306_s28 + $0x750] sm:$0xff] %vm2861_vm1, %v4577_v51  ;;  %4604 = vtanh.f32 %v2529_v50  ;;  %v3780_v56 = vpop.f32.mrb[112].mxu0 }
 0x21d   : > { %v4581_v53 = vpop.eup %4580  ;;  %2966 = vst.msk [vmem:[%s5306_s28 + $0x340] sm:$0xff] %vm2861_vm1, %v4579_v52  ;;  %v3908_v57 = vpop.f32.mrb[112].mxu1  ;;  %4606 = vtanh.f32 %v3780_v56 }
 0x21e   : > { %v4583_v54 = vpop.eup %4582  ;;  %3094 = vst.msk [vmem:[%s5306_s28 + $0x740] sm:$0xff] %vm2861_vm1, %v4581_v53  ;;  %v2030_v59 = vpop.f32.mrb[113].mxu0  ;;  %4608 = vtanh.f32 %v3908_v57 }
 0x21f   : > { %v4585_v55 = vpop.eup %4584  ;;  %2969 = vst.msk [vmem:[%s5306_s28 + $0x358] sm:$0xff] %vm2861_vm1, %v4583_v54  ;;  %v2542_v60 = vpop.f32.mrb[113].mxu1  ;;  %4610 = vtanh.f32 %v2030_v59 }
 0x220   : > { %v4587_v58 = vpop.eup %4586  ;;  %3097 = vst.msk [vmem:[%s5306_s28 + $0x758] sm:$0xff] %vm2861_vm1, %v4585_v55  ;;  %v3781_v62 = vpop.f32.mrb[114].mxu0  ;;  %4612 = vtanh.f32 %v2542_v60 }
 0x221   : > { %v4589_v61 = vpop.eup %4588  ;;  %2967 = vst.msk [vmem:[%s5306_s28 + $0x348] sm:$0xff] %vm2861_vm1, %v4587_v58  ;;  %v3909_v63 = vpop.f32.mrb[114].mxu1  ;;  %4614 = vtanh.f32 %v3781_v62 }
 0x222   : > { %v4591_v0 = vpop.eup %4590  ;;  %3095 = vst.msk [vmem:[%s5306_s28 + $0x748] sm:$0xff] %vm2861_vm1, %v4589_v61  ;;  %v2033_v1 = vpop.f32.mrb[115].mxu0  ;;  %4616 = vtanh.f32 %v3909_v63 }
 0x223   : > { %v2545_v2 = vpop.f32.mrb[115].mxu1  ;;  %v4593_v3 = vpop.eup %4592  ;;  %2972 = vst.msk [vmem:[%s5306_s28 + $0x370] sm:$0xff] %vm2861_vm1, %v4591_v0  ;;  %4618 = vtanh.f32 %v2033_v1 }
 0x224   : > { %v4595_v4 = vpop.eup %4594  ;;  %3100 = vst.msk [vmem:[%s5306_s28 + $0x770] sm:$0xff] %vm2861_vm1, %v4593_v3  ;;  %4620 = vtanh.f32 %v2545_v2  ;;  %v3784_v8 = vpop.f32.mrb[116].mxu0 }
 0x225   : > { %v4597_v5 = vpop.eup %4596  ;;  %2970 = vst.msk [vmem:[%s5306_s28 + $0x360] sm:$0xff] %vm2861_vm1, %v4595_v4  ;;  %v3912_v9 = vpop.f32.mrb[116].mxu1  ;;  %4622 = vtanh.f32 %v3784_v8 }
 0x226   : > { %v4599_v6 = vpop.eup %4598  ;;  %3098 = vst.msk [vmem:[%s5306_s28 + $0x760] sm:$0xff] %vm2861_vm1, %v4597_v5  ;;  %v2046_v11 = vpop.f32.mrb[117].mxu0  ;;  %4624 = vtanh.f32 %v3912_v9 }
 0x227   : > { %v4601_v7 = vpop.eup %4600  ;;  %2973 = vst.msk [vmem:[%s5306_s28 + $0x378] sm:$0xff] %vm2861_vm1, %v4599_v6  ;;  %v2558_v12 = vpop.f32.mrb[117].mxu1  ;;  %4626 = vtanh.f32 %v2046_v11 }
 0x228   : > { %v4603_v10 = vpop.eup %4602  ;;  %3101 = vst.msk [vmem:[%s5306_s28 + $0x778] sm:$0xff] %vm2861_vm1, %v4601_v7  ;;  %v3785_v14 = vpop.f32.mrb[118].mxu0  ;;  %4628 = vtanh.f32 %v2558_v12 }
 0x229   : > { %v4605_v13 = vpop.eup %4604  ;;  %2971 = vst.msk [vmem:[%s5306_s28 + $0x368] sm:$0xff] %vm2861_vm1, %v4603_v10  ;;  %v3913_v15 = vpop.f32.mrb[118].mxu1  ;;  %4630 = vtanh.f32 %v3785_v14 }
 0x22a   : > { %v4607_v16 = vpop.eup %4606  ;;  %3099 = vst.msk [vmem:[%s5306_s28 + $0x768] sm:$0xff] %vm2861_vm1, %v4605_v13  ;;  %v2049_v17 = vpop.f32.mrb[119].mxu0  ;;  %4632 = vtanh.f32 %v3913_v15 }
 0x22b   : > { %v2561_v18 = vpop.f32.mrb[119].mxu1  ;;  %v4609_v19 = vpop.eup %4608  ;;  %2976 = vst.msk [vmem:[%s5306_s28 + $0x390] sm:$0xff] %vm2861_vm1, %v4607_v16  ;;  %4634 = vtanh.f32 %v2049_v17 }
 0x22c   : > { %v4611_v20 = vpop.eup %4610  ;;  %3104 = vst.msk [vmem:[%s5306_s28 + $0x790] sm:$0xff] %vm2861_vm1, %v4609_v19  ;;  %4636 = vtanh.f32 %v2561_v18  ;;  %v3788_v24 = vpop.f32.mrb[120].mxu0 }
 0x22d   : > { %v4613_v21 = vpop.eup %4612  ;;  %2974 = vst.msk [vmem:[%s5306_s28 + $0x380] sm:$0xff] %vm2861_vm1, %v4611_v20  ;;  %v3916_v25 = vpop.f32.mrb[120].mxu1  ;;  %4638 = vtanh.f32 %v3788_v24 }
 0x22e   : > { %v4615_v22 = vpop.eup %4614  ;;  %3102 = vst.msk [vmem:[%s5306_s28 + $0x780] sm:$0xff] %vm2861_vm1, %v4613_v21  ;;  %v2062_v27 = vpop.f32.mrb[121].mxu0  ;;  %4640 = vtanh.f32 %v3916_v25 }
 0x22f   : > { %v4617_v23 = vpop.eup %4616  ;;  %2977 = vst.msk [vmem:[%s5306_s28 + $0x398] sm:$0xff] %vm2861_vm1, %v4615_v22  ;;  %v2574_v28 = vpop.f32.mrb[121].mxu1  ;;  %4642 = vtanh.f32 %v2062_v27 }
 0x230   : > { %v4619_v26 = vpop.eup %4618  ;;  %3105 = vst.msk [vmem:[%s5306_s28 + $0x798] sm:$0xff] %vm2861_vm1, %v4617_v23  ;;  %v3789_v30 = vpop.f32.mrb[122].mxu0  ;;  %4644 = vtanh.f32 %v2574_v28 }
 0x231   : > { %v4621_v29 = vpop.eup %4620  ;;  %2975 = vst.msk [vmem:[%s5306_s28 + $0x388] sm:$0xff] %vm2861_vm1, %v4619_v26  ;;  %v3917_v31 = vpop.f32.mrb[122].mxu1  ;;  %4646 = vtanh.f32 %v3789_v30 }
 0x232   : > { %v4623_v32 = vpop.eup %4622  ;;  %3103 = vst.msk [vmem:[%s5306_s28 + $0x788] sm:$0xff] %vm2861_vm1, %v4621_v29  ;;  %v2065_v33 = vpop.f32.mrb[123].mxu0  ;;  %4648 = vtanh.f32 %v3917_v31 }
 0x233   : > { %v2577_v34 = vpop.f32.mrb[123].mxu1  ;;  %v4625_v35 = vpop.eup %4624  ;;  %2980 = vst.msk [vmem:[%s5306_s28 + $0x3b0] sm:$0xff] %vm2861_vm1, %v4623_v32  ;;  %4650 = vtanh.f32 %v2065_v33 }
 0x234   : > { %v4627_v36 = vpop.eup %4626  ;;  %3108 = vst.msk [vmem:[%s5306_s28 + $0x7b0] sm:$0xff] %vm2861_vm1, %v4625_v35  ;;  %4652 = vtanh.f32 %v2577_v34  ;;  %v3792_v40 = vpop.f32.mrb[124].mxu0 }
 0x235   : > { %v4629_v37 = vpop.eup %4628  ;;  %2978 = vst.msk [vmem:[%s5306_s28 + $0x3a0] sm:$0xff] %vm2861_vm1, %v4627_v36  ;;  %v3920_v41 = vpop.f32.mrb[124].mxu1  ;;  %4654 = vtanh.f32 %v3792_v40 }
 0x236   : > { %v4631_v38 = vpop.eup %4630  ;;  %3106 = vst.msk [vmem:[%s5306_s28 + $0x7a0] sm:$0xff] %vm2861_vm1, %v4629_v37  ;;  %v2078_v43 = vpop.f32.mrb[125].mxu0  ;;  %4656 = vtanh.f32 %v3920_v41 }
 0x237   : > { %v4633_v39 = vpop.eup %4632  ;;  %2981 = vst.msk [vmem:[%s5306_s28 + $0x3b8] sm:$0xff] %vm2861_vm1, %v4631_v38  ;;  %v2590_v44 = vpop.f32.mrb[125].mxu1  ;;  %4658 = vtanh.f32 %v2078_v43 }
 0x238   : > { %v4635_v42 = vpop.eup %4634  ;;  %3109 = vst.msk [vmem:[%s5306_s28 + $0x7b8] sm:$0xff] %vm2861_vm1, %v4633_v39  ;;  %v3793_v46 = vpop.f32.mrb[126].mxu0  ;;  %4660 = vtanh.f32 %v2590_v44 }
 0x239   : > { %v4637_v45 = vpop.eup %4636  ;;  %2979 = vst.msk [vmem:[%s5306_s28 + $0x3a8] sm:$0xff] %vm2861_vm1, %v4635_v42  ;;  %v3921_v47 = vpop.f32.mrb[126].mxu1  ;;  %4662 = vtanh.f32 %v3793_v46 }
 0x23a   : > { %v4639_v48 = vpop.eup %4638  ;;  %3107 = vst.msk [vmem:[%s5306_s28 + $0x7a8] sm:$0xff] %vm2861_vm1, %v4637_v45  ;;  %v2081_v49 = vpop.f32.mrb[127].mxu0  ;;  %4664 = vtanh.f32 %v3921_v47 }
 0x23b   : > { %v2593_v50 = vpop.f32.mrb[127].mxu1  ;;  %v4641_v51 = vpop.eup %4640  ;;  %2984 = vst.msk [vmem:[%s5306_s28 + $0x3d0] sm:$0xff] %vm2861_vm1, %v4639_v48  ;;  %4666 = vtanh.f32 %v2081_v49 }
 0x23c   : > { %v4643_v52 = vpop.eup %4642  ;;  %3112 = vst.msk [vmem:[%s5306_s28 + $0x7d0] sm:$0xff] %vm2861_vm1, %v4641_v51  ;;  %4668 = vtanh.f32 %v2593_v50 }
 0x23d   : > { %v4645_v53 = vpop.eup %4644  ;;  %2982 = vst.msk [vmem:[%s5306_s28 + $0x3c0] sm:$0xff] %vm2861_vm1, %v4643_v52 }
 0x23e   : > { %v4647_v54 = vpop.eup %4646  ;;  %3110 = vst.msk [vmem:[%s5306_s28 + $0x7c0] sm:$0xff] %vm2861_vm1, %v4645_v53 }
 0x23f   : > { %v4649_v55 = vpop.eup %4648  ;;  %2985 = vst.msk [vmem:[%s5306_s28 + $0x3d8] sm:$0xff] %vm2861_vm1, %v4647_v54 }
 0x240   : > { %v4651_v56 = vpop.eup %4650  ;;  %3113 = vst.msk [vmem:[%s5306_s28 + $0x7d8] sm:$0xff] %vm2861_vm1, %v4649_v55 }
 0x241   : > { %v4653_v57 = vpop.eup %4652  ;;  %2983 = vst.msk [vmem:[%s5306_s28 + $0x3c8] sm:$0xff] %vm2861_vm1, %v4651_v56 }
 0x242   : > { %v4655_v58 = vpop.eup %4654  ;;  %3111 = vst.msk [vmem:[%s5306_s28 + $0x7c8] sm:$0xff] %vm2861_vm1, %v4653_v57 }
 0x243   : > { %v4657_v59 = vpop.eup %4656  ;;  %2988 = vst.msk [vmem:[%s5306_s28 + $0x3f0] sm:$0xff] %vm2861_vm1, %v4655_v58 }
 0x244   : > { %v4659_v60 = vpop.eup %4658  ;;  %3116 = vst.msk [vmem:[%s5306_s28 + $0x7f0] sm:$0xff] %vm2861_vm1, %v4657_v59 }
 0x245   : > { %v4661_v61 = vpop.eup %4660  ;;  %2986 = vst.msk [vmem:[%s5306_s28 + $0x3e0] sm:$0xff] %vm2861_vm1, %v4659_v60 }
 0x246   : > { %v4663_v62 = vpop.eup %4662  ;;  %3114 = vst.msk [vmem:[%s5306_s28 + $0x7e0] sm:$0xff] %vm2861_vm1, %v4661_v61 }
 0x247   : > { %v4665_v63 = vpop.eup %4664  ;;  %2989 = vst.msk [vmem:[%s5306_s28 + $0x3f8] sm:$0xff] %vm2861_vm1, %v4663_v62 }
 0x248   : > { %v4667_v0 = vpop.eup %4666  ;;  %3117 = vst.msk [vmem:[%s5306_s28 + $0x7f8] sm:$0xff] %vm2861_vm1, %v4665_v63 }
 0x249   : > { %v4669_v1 = vpop.eup %4668  ;;  %2987 = vst.msk [vmem:[%s5306_s28 + $0x3e8] sm:$0xff] %vm2861_vm1, %v4667_v0 }
 0x24a   : > { %3115 = vst.msk [vmem:[%s5306_s28 + $0x7e8] sm:$0xff] %vm2861_vm1, %v4669_v1 }
 0x24b PF: > { %s18_s19 = sadd.s32 1, %s4824_s19   ;;  %s5902_s26 = sld [smem:[#allocation8_spill]] }
 0x24c   : > { %p15_p2 = scmp.ge.s32.totalorder %s18_s19, 18   ;;  %s5903_s9 = smov %s4788_s10 }
 0x24d   : > { %s5904_s10 = smov %s4792_s11  ;;  %s5905_s11 = smov %s4998_s20 }
 0x24e   : > { %s5906_s12 = smov %s4800_s13  ;;  %s5907_s13 = smov %s4804_s14 }
 0x24f   : > { %s5908_s14 = smov %s4938_s4  ;;  %s5909_s15 = smov %s4816_s17 }
 0x250   : > { %s5910_s16 = smov %s4820_s18  ;;  %s5911_s17 = smov %s5914_s21 }
 0x251   : > { %s5912_s18 = smov %s5902_s26  ;;  %17 = sbr.rel (!%p15_p2) target bundleno = 9 (0x9), region = 81 }
 0x258   :  { %3154 = vsyncpa [#allocation3], 1 }
 0x259   :  { %3156 = vsyncpa [#allocation3 + $0x1], 1 }
 0x25a   :  { %3157 = vsyncpa [#allocation5], 1 }
 0x25b   :  { %3159 = vsyncpa [#allocation5 + $0x1], 1 }

</bundles_post_ra>
